<compile_context>
chip_gen: v7x
topology: tpu7x:2x2x1
jax: 0.10.0
libtpu: 0.0.40
codegen_flags: <defaults>
</compile_context>

<pallas_src>
import functools

import jax
import jax.numpy as jnp
from jax.experimental import pallas as pl
from jax.experimental.pallas import tpu as pltpu


# ----------------------------- in-kernel helpers (operate on VMEM values) -----------------------------

def _gn_cn(x, gamma, beta, mgrp, eps, silu):
    """GroupNorm (+ optional SiLU) on a (C, N) tile.

    mgrp is a (C, C) group-averaging matrix with entries 1/(cg*N) for same-group channel pairs,
    so `sum_lanes(mgrp @ x)` gives the per-channel (broadcast) group mean directly - no reshapes.
    All statistics in f32.
    """
    mean = jnp.sum(jnp.dot(mgrp, x, preferred_element_type=jnp.float32),
                   axis=1, keepdims=True)                       # (C, 1)
    ex2 = jnp.sum(jnp.dot(mgrp, x * x, preferred_element_type=jnp.float32),
                  axis=1, keepdims=True)                        # (C, 1)
    inv = jax.lax.rsqrt(ex2 - mean * mean + eps)                # biased variance (matches torch GN)
    y = (x - mean) * (inv * gamma) + beta
    if silu:
        y = y * jax.nn.sigmoid(y)
    return y


def _conv3_cn(h, wcat, bias):
    """Conv1d(k=3, stride=1, pad=1) on a (Cin, N) tile as ONE contraction of width 3*Cin.

    wcat: (Cout, 3*Cin) bf16 with wcat[co, k*Cin+ci] = w[co, ci, k];  bias: (Cout, 1) f32.
    """
    C, N = h.shape
    z = jnp.zeros((C, 1), h.dtype)
    hp = jnp.concatenate([z, h, z], axis=1)                     # (C, N+2) zero-padded (in VMEM)
    xc = jnp.concatenate([hp[:, 0:N], hp[:, 1:N + 1], hp[:, 2:N + 2]], axis=0)   # (3C, N)
    y = jnp.dot(wcat, xc.astype(wcat.dtype), preferred_element_type=jnp.float32)  # (Cout, N) f32
    return y + bias


# ----------------------------- fused ResnetBlock kernel -----------------------------

def _resnet_kernel(x_ref, mgrp_ref,
                   g1_ref, b1_ref, w1_ref, cb1_ref,
                   g2_ref, b2_ref, w2_ref, cb2_ref,
                   *rest, eps, skip_scale, fuse_attn_gn):
    if fuse_attn_gn:
        ga_ref, gb_ref, o_ref, og_ref = rest
    else:
        (o_ref,) = rest

    x = x_ref[0]                                                # (C, N) f32
    mgrp = mgrp_ref[...]

    h = _gn_cn(x, g1_ref[...], b1_ref[...], mgrp, eps, silu=True)
    h = _conv3_cn(h, w1_ref[...], cb1_ref[...])
    h = _gn_cn(h, g2_ref[...], b2_ref[...], mgrp, eps, silu=True)
    h = _conv3_cn(h, w2_ref[...], cb2_ref[...])

    out = (h + x) * skip_scale                                  # shortcut = Identity (Cin == Cout)
    o_ref[0] = out.astype(o_ref.dtype)

    if fuse_attn_gn:
        # GroupNorm of the MVAttention that consumes this block's output (no SiLU).
        og = _gn_cn(out, ga_ref[...], gb_ref[...], mgrp, eps, silu=False)
        og_ref[0] = og.astype(og_ref.dtype)


def _prep_conv_w(w):
    # (Cout, Cin, K) -> (Cout, K*Cin) bf16 ; wcat[co, k*Cin+ci] = w[co, ci, k]
    cout, cin, k = w.shape
    return jnp.transpose(w, (0, 2, 1)).reshape(cout, k * cin).astype(jnp.bfloat16)


def resnet_block(x, p, mgrp, *, skip_scale, eps, attn_norm=None):
    # x: (BV, C, N) f32 ; p: ResnetBlock params ; attn_norm: (gamma, beta) of the following MVAttention
    BV, C, N = x.shape
    fuse = attn_norm is not None

    args = [x, mgrp,
            p["norm1_g"][:, None], p["norm1_b"][:, None], _prep_conv_w(p["conv1_w"]), p["conv1_b"][:, None],
            p["norm2_g"][:, None], p["norm2_b"][:, None], _prep_conv_w(p["conv2_w"]), p["conv2_b"][:, None]]
    vec_spec = pl.BlockSpec((C, 1), lambda i: (0, 0))
    in_specs = [pl.BlockSpec((1, C, N), lambda i: (i, 0, 0)),
                pl.BlockSpec((C, C), lambda i: (0, 0)),
                vec_spec, vec_spec, pl.BlockSpec((C, 3 * C), lambda i: (0, 0)), vec_spec,
                vec_spec, vec_spec, pl.BlockSpec((C, 3 * C), lambda i: (0, 0)), vec_spec]
    if fuse:
        args += [attn_norm[0][:, None], attn_norm[1][:, None]]
        in_specs += [vec_spec, vec_spec]

    out_shape = [jax.ShapeDtypeStruct((BV, C, N), x.dtype)]
    out_specs = [pl.BlockSpec((1, C, N), lambda i: (i, 0, 0))]
    if fuse:
        out_shape.append(jax.ShapeDtypeStruct((BV, C, N), x.dtype))
        out_specs.append(pl.BlockSpec((1, C, N), lambda i: (i, 0, 0)))

    kern = functools.partial(_resnet_kernel, eps=eps, skip_scale=skip_scale, fuse_attn_gn=fuse)
    res = pl.pallas_call(
        kern,
        out_shape=tuple(out_shape),
        grid=(BV,),
        in_specs=in_specs,
        out_specs=tuple(out_specs),
        compiler_params=pltpu.CompilerParams(dimension_semantics=("parallel",)),
    )(*args)

    if fuse:
        return res[0], res[1]
    y = res[0] if isinstance(res, (tuple, list)) else res
    return y, None


# ----------------------------- fused MVAttention kernel -----------------------------

def _attn_kernel(tok_ref, res_ref, wqkv_ref, wproj_ref, bproj_ref, o_ref,
                 *, num_heads, scale, skip_scale):
    h = tok_ref[0]                                              # (T, C) f32  (already GroupNorm'd)
    res = res_ref[0]                                            # (T, C) f32  (residual, raw x view)
    T, C = h.shape
    D = C // num_heads

    qkv = jnp.dot(h.astype(jnp.bfloat16), wqkv_ref[...],
                  preferred_element_type=jnp.float32)           # (T, 3C) f32
    q = qkv[:, 0:C] * scale
    k = qkv[:, C:2 * C]
    v = qkv[:, 2 * C:3 * C]

    heads = []
    for hd in range(num_heads):                                 # all heads inside one kernel (VMEM)
        lo = hd * D
        qh, kh, vh = q[:, lo:lo + D], k[:, lo:lo + D], v[:, lo:lo + D]
        s = jax.lax.dot_general(qh, kh, (((1,), (1,)), ((), ())),
                                preferred_element_type=jnp.float32)   # (T, T)
        s = s - jnp.max(s, axis=-1, keepdims=True)
        p = jnp.exp(s)
        p = p * pl.reciprocal(jnp.sum(p, axis=-1, keepdims=True), approx=True)
        heads.append(jnp.dot(p.astype(jnp.bfloat16), vh.astype(jnp.bfloat16),
                             preferred_element_type=jnp.float32))     # (T, D)
    o = jnp.concatenate(heads, axis=1)                          # (T, C)

    o = jnp.dot(o.astype(jnp.bfloat16), wproj_ref[...],
                preferred_element_type=jnp.float32) + bproj_ref[...]
    o_ref[0] = ((o + res) * skip_scale).astype(o_ref.dtype)


def mv_attention(x, x_norm, p, *, num_heads, num_frames, skip_scale):
    # x, x_norm: (BV, C, N); x_norm is GroupNorm(x) (computed fused in the preceding ResnetBlock).
    BV, C, N = x.shape
    B = BV // num_frames
    T = num_frames * N
    # Torch chain x.reshape(B, F, C, N).reshape(B, -1, C) is a pure row-major reinterpretation -> free.
    tok = x_norm.reshape(B, T, C)
    res = x.reshape(B, T, C)

    wqkv = p["qkv_w"].astype(jnp.bfloat16)                      # (C, 3C)   (qkv_bias=False)
    wproj = p["proj_w"].astype(jnp.bfloat16)                    # (C, C)
    bproj = p["proj_b"][None, :]                                # (1, C)

    D = C // num_heads
    kern = functools.partial(_attn_kernel, num_heads=num_heads,
                             scale=float(D) ** -0.5, skip_scale=skip_scale)
    out = pl.pallas_call(
        kern,
        out_shape=jax.ShapeDtypeStruct((B, T, C), x.dtype),
        grid=(B,),
        in_specs=[pl.BlockSpec((1, T, C), lambda i: (i, 0, 0)),
                  pl.BlockSpec((1, T, C), lambda i: (i, 0, 0)),
                  pl.BlockSpec((C, 3 * C), lambda i: (0, 0)),
                  pl.BlockSpec((C, C), lambda i: (0, 0)),
                  pl.BlockSpec((1, C), lambda i: (0, 0))],
        out_specs=pl.BlockSpec((1, T, C), lambda i: (i, 0, 0)),
        compiler_params=pltpu.CompilerParams(dimension_semantics=("parallel",)),
    )(tok, res, wqkv, wproj, bproj)
    # Inverse torch chain (B,T,C)->(B,F,N,C)->(BV,C,N) is again a raw reinterpretation -> free.
    return out.reshape(BV, C, N)


# ----------------------------- MidBlock forward (glue) -----------------------------

def _group_avg_matrix(C, groups, N):
    cg = C // groups
    gid = jnp.arange(C) // cg
    return (gid[:, None] == gid[None, :]).astype(jnp.float32) / float(cg * N)


def mid_block(x, params, *, num_layers, attention, attention_heads,
              skip_scale=1.0, num_frames=1, groups=32, eps=1e-5):
    BV, C, N = x.shape
    mgrp = _group_avg_matrix(C, groups, N)
    nets, attns = params["nets"], params["attns"]

    def run_net(x, j):
        fuse = attention and j < num_layers        # nets[j] (j < num_layers) is followed by attns[j]
        attn_norm = (attns[j]["norm_g"], attns[j]["norm_b"]) if fuse else None
        return resnet_block(x, nets[j], mgrp, skip_scale=skip_scale, eps=eps, attn_norm=attn_norm)

    x, xg = run_net(x, 0)
    for i in range(num_layers):
        if attention:
            x = mv_attention(x, xg, attns[i], num_heads=attention_heads,
                             num_frames=num_frames, skip_scale=skip_scale)
        x, xg = run_net(x, i + 1)
    return x


# ----------------------------- Deterministic parameter init -----------------------------

def init_params(key, c, *, num_layers, attention):
    keys = iter(jax.random.split(key, 64))

    def rnd(shape, scale=0.05):
        return scale * jax.random.normal(next(keys), shape, jnp.float32)

    def resnet_p():
        return dict(norm1_g=1.0 + rnd((c,)), norm1_b=rnd((c,)),
                    conv1_w=rnd((c, c, 3)), conv1_b=rnd((c,)),
                    norm2_g=1.0 + rnd((c,)), norm2_b=rnd((c,)),
                    conv2_w=rnd((c, c, 3)), conv2_b=rnd((c,)))

    nets = [resnet_p() for _ in range(num_layers + 1)]
    attns = []
    for _ in range(num_layers):
        if attention:
            attns.append(dict(norm_g=1.0 + rnd((c,)), norm_b=rnd((c,)),
                              qkv_w=rnd((c, 3 * c)),          # qkv_bias=False
                              proj_w=rnd((c, c)), proj_b=rnd((c,))))
        else:
            attns.append(None)
    return dict(nets=nets, attns=attns)


# ----------------------------- main -----------------------------

if __name__ == "__main__":
    BV, C, N = 2, 64, 16            # in_channels must be divisible by groups=32
    NUM_LAYERS = 1
    ATTENTION = True
    HEADS = 16                      # MidBlock default attention_heads=16 -> head_dim = 4

    key = jax.random.PRNGKey(0)
    kx, kp = jax.random.split(key)
    x = jax.random.normal(kx, (BV, C, N), jnp.float32)
    params = init_params(kp, C, num_layers=NUM_LAYERS, attention=ATTENTION)

    fwd = jax.jit(functools.partial(mid_block, num_layers=NUM_LAYERS, attention=ATTENTION,
                                    attention_heads=HEADS, skip_scale=1.0))
    out = fwd(x, params)
    jax.block_until_ready(out)

    assert out.shape == (BV, C, N)
    assert bool(jnp.all(jnp.isfinite(out)))
    print("KERNEL_OK")
</pallas_src>

<mosaic_0001>
module attributes {stable_mosaic.version = 11 : i64} {
  func.func @_resnet_kernel(%arg0: i32, %arg1: memref<1x64x16xf32, #tpu.memory_space<vmem>>, %arg2: memref<64x64xf32, #tpu.memory_space<vmem>>, %arg3: memref<64x1xf32, #tpu.memory_space<vmem>>, %arg4: memref<64x1xf32, #tpu.memory_space<vmem>>, %arg5: memref<64x192xbf16, #tpu.memory_space<vmem>>, %arg6: memref<64x1xf32, #tpu.memory_space<vmem>>, %arg7: memref<64x1xf32, #tpu.memory_space<vmem>>, %arg8: memref<64x1xf32, #tpu.memory_space<vmem>>, %arg9: memref<64x192xbf16, #tpu.memory_space<vmem>>, %arg10: memref<64x1xf32, #tpu.memory_space<vmem>>, %arg11: memref<64x1xf32, #tpu.memory_space<vmem>>, %arg12: memref<64x1xf32, #tpu.memory_space<vmem>>, %arg13: memref<1x64x16xf32, #tpu.memory_space<vmem>>, %arg14: memref<1x64x16xf32, #tpu.memory_space<vmem>>) attributes {dimension_semantics = [#tpu.dimension_semantics<parallel>], iteration_bounds = array<i64: 2>, scalar_prefetch = 0 : i64, scratch_operands = 0 : i64, tpu.core_type = #tpu.core_type<tc>, window_params = [{transform_indices = @transform_0, window_bounds = array<i64: 1, 64, 16>}, {pipeline_mode = #tpu.pipeline_mode<synchronous>, transform_indices = @transform_1, window_bounds = array<i64: 64, 64>}, {pipeline_mode = #tpu.pipeline_mode<synchronous>, transform_indices = @transform_2, window_bounds = array<i64: 64, 1>}, {pipeline_mode = #tpu.pipeline_mode<synchronous>, transform_indices = @transform_3, window_bounds = array<i64: 64, 1>}, {pipeline_mode = #tpu.pipeline_mode<synchronous>, transform_indices = @transform_4, window_bounds = array<i64: 64, 192>}, {pipeline_mode = #tpu.pipeline_mode<synchronous>, transform_indices = @transform_5, window_bounds = array<i64: 64, 1>}, {pipeline_mode = #tpu.pipeline_mode<synchronous>, transform_indices = @transform_6, window_bounds = array<i64: 64, 1>}, {pipeline_mode = #tpu.pipeline_mode<synchronous>, transform_indices = @transform_7, window_bounds = array<i64: 64, 1>}, {pipeline_mode = #tpu.pipeline_mode<synchronous>, transform_indices = @transform_8, window_bounds = array<i64: 64, 192>}, {pipeline_mode = #tpu.pipeline_mode<synchronous>, transform_indices = @transform_9, window_bounds = array<i64: 64, 1>}, {pipeline_mode = #tpu.pipeline_mode<synchronous>, transform_indices = @transform_10, window_bounds = array<i64: 64, 1>}, {pipeline_mode = #tpu.pipeline_mode<synchronous>, transform_indices = @transform_11, window_bounds = array<i64: 64, 1>}, {transform_indices = @transform_12, window_bounds = array<i64: 1, 64, 16>}, {transform_indices = @transform_13, window_bounds = array<i64: 1, 64, 16>}]} {
    %c0 = arith.constant 0 : index
    %c0_0 = arith.constant 0 : index
    %c0_1 = arith.constant 0 : index
    %0 = vector.load %arg1[%c0, %c0_0, %c0_1] : memref<1x64x16xf32, #tpu.memory_space<vmem>>, vector<1x64x16xf32>
    %1 = vector.shape_cast %0 : vector<1x64x16xf32> to vector<64x16xf32>
    %c0_2 = arith.constant 0 : index
    %c0_3 = arith.constant 0 : index
    %2 = vector.load %arg2[%c0_2, %c0_3] : memref<64x64xf32, #tpu.memory_space<vmem>>, vector<64x64xf32>
    %c0_4 = arith.constant 0 : index
    %c0_5 = arith.constant 0 : index
    %3 = vector.load %arg3[%c0_4, %c0_5] : memref<64x1xf32, #tpu.memory_space<vmem>>, vector<64x1xf32>
    %c0_6 = arith.constant 0 : index
    %c0_7 = arith.constant 0 : index
    %4 = vector.load %arg4[%c0_6, %c0_7] : memref<64x1xf32, #tpu.memory_space<vmem>>, vector<64x1xf32>
    %cst = arith.constant dense<0.000000e+00> : vector<64x16xf32>
    %5 = tpu.matmul %2, %1, %cst {dimension_numbers = #tpu.dot_dimension_numbers<[1], [0], [0], [1], [0, 0, 1, 1], [], []>} : vector<64x64xf32>, vector<64x16xf32>, vector<64x16xf32> -> vector<64x16xf32>
    %cst_8 = arith.constant dense<0.000000e+00> : vector<64xf32>
    %6 = vector.multi_reduction <add>, %5, %cst_8 [1] : vector<64x16xf32> to vector<64xf32>
    %7 = vector.shape_cast %6 : vector<64xf32> to vector<64x1xf32>
    %8 = arith.mulf %1, %1 : vector<64x16xf32>
    %cst_9 = arith.constant dense<0.000000e+00> : vector<64x16xf32>
    %9 = tpu.matmul %2, %8, %cst_9 {dimension_numbers = #tpu.dot_dimension_numbers<[1], [0], [0], [1], [0, 0, 1, 1], [], []>} : vector<64x64xf32>, vector<64x16xf32>, vector<64x16xf32> -> vector<64x16xf32>
    %cst_10 = arith.constant dense<0.000000e+00> : vector<64xf32>
    %10 = vector.multi_reduction <add>, %9, %cst_10 [1] : vector<64x16xf32> to vector<64xf32>
    %11 = vector.shape_cast %10 : vector<64xf32> to vector<64x1xf32>
    %12 = arith.mulf %7, %7 : vector<64x1xf32>
    %13 = arith.subf %11, %12 : vector<64x1xf32>
    %cst_11 = arith.constant 9.99999974E-6 : f32
    %14 = vector.broadcast %cst_11 : f32 to vector<64x1xf32>
    %15 = arith.addf %13, %14 : vector<64x1xf32>
    %16 = math.rsqrt %15 : vector<64x1xf32>
    %17 = vector.broadcast %7 : vector<64x1xf32> to vector<64x16xf32>
    %18 = arith.subf %1, %17 : vector<64x16xf32>
    %19 = arith.mulf %16, %3 : vector<64x1xf32>
    %20 = vector.broadcast %19 : vector<64x1xf32> to vector<64x16xf32>
    %21 = arith.mulf %18, %20 : vector<64x16xf32>
    %22 = vector.broadcast %4 : vector<64x1xf32> to vector<64x16xf32>
    %23 = arith.addf %21, %22 : vector<64x16xf32>
    %24 = arith.negf %23 : vector<64x16xf32>
    %25 = math.exp %24 : vector<64x16xf32>
    %cst_12 = arith.constant 1.000000e+00 : f32
    %26 = vector.broadcast %cst_12 : f32 to vector<64x16xf32>
    %27 = arith.addf %26, %25 : vector<64x16xf32>
    %28 = arith.divf %26, %27 : vector<64x16xf32>
    %29 = arith.mulf %23, %28 : vector<64x16xf32>
    %c0_13 = arith.constant 0 : index
    %c0_14 = arith.constant 0 : index
    %30 = vector.load %arg5[%c0_13, %c0_14] : memref<64x192xbf16, #tpu.memory_space<vmem>>, vector<64x192xbf16>
    %c0_15 = arith.constant 0 : index
    %c0_16 = arith.constant 0 : index
    %31 = vector.load %arg6[%c0_15, %c0_16] : memref<64x1xf32, #tpu.memory_space<vmem>>, vector<64x1xf32>
    %cst_17 = arith.constant 0.000000e+00 : f32
    %32 = vector.broadcast %cst_17 : f32 to vector<64x1xf32>
    %33 = tpu.concatenate %32, %29, %32 in 1 : vector<64x1xf32>, vector<64x16xf32>, vector<64x1xf32> -> vector<64x18xf32>
    %34 = vector.extract_strided_slice %33 {offsets = [0, 0], sizes = [64, 16], strides = [1, 1]} : vector<64x18xf32> to vector<64x16xf32>
    %35 = vector.extract_strided_slice %33 {offsets = [0, 1], sizes = [64, 16], strides = [1, 1]} : vector<64x18xf32> to vector<64x16xf32>
    %36 = vector.extract_strided_slice %33 {offsets = [0, 2], sizes = [64, 16], strides = [1, 1]} : vector<64x18xf32> to vector<64x16xf32>
    %37 = tpu.concatenate %34, %35, %36 in 0 : vector<64x16xf32>, vector<64x16xf32>, vector<64x16xf32> -> vector<192x16xf32>
    %38 = arith.truncf %37 : vector<192x16xf32> to vector<192x16xbf16>
    %cst_18 = arith.constant dense<0.000000e+00> : vector<64x16xf32>
    %39 = tpu.matmul %30, %38, %cst_18 {dimension_numbers = #tpu.dot_dimension_numbers<[1], [0], [0], [1], [0, 0, 1, 1], [], []>} : vector<64x192xbf16>, vector<192x16xbf16>, vector<64x16xf32> -> vector<64x16xf32>
    %40 = vector.broadcast %31 : vector<64x1xf32> to vector<64x16xf32>
    %41 = arith.addf %39, %40 : vector<64x16xf32>
    %c0_19 = arith.constant 0 : index
    %c0_20 = arith.constant 0 : index
    %42 = vector.load %arg7[%c0_19, %c0_20] : memref<64x1xf32, #tpu.memory_space<vmem>>, vector<64x1xf32>
    %c0_21 = arith.constant 0 : index
    %c0_22 = arith.constant 0 : index
    %43 = vector.load %arg8[%c0_21, %c0_22] : memref<64x1xf32, #tpu.memory_space<vmem>>, vector<64x1xf32>
    %cst_23 = arith.constant dense<0.000000e+00> : vector<64x16xf32>
    %44 = tpu.matmul %2, %41, %cst_23 {dimension_numbers = #tpu.dot_dimension_numbers<[1], [0], [0], [1], [0, 0, 1, 1], [], []>} : vector<64x64xf32>, vector<64x16xf32>, vector<64x16xf32> -> vector<64x16xf32>
    %cst_24 = arith.constant dense<0.000000e+00> : vector<64xf32>
    %45 = vector.multi_reduction <add>, %44, %cst_24 [1] : vector<64x16xf32> to vector<64xf32>
    %46 = vector.shape_cast %45 : vector<64xf32> to vector<64x1xf32>
    %47 = arith.mulf %41, %41 : vector<64x16xf32>
    %cst_25 = arith.constant dense<0.000000e+00> : vector<64x16xf32>
    %48 = tpu.matmul %2, %47, %cst_25 {dimension_numbers = #tpu.dot_dimension_numbers<[1], [0], [0], [1], [0, 0, 1, 1], [], []>} : vector<64x64xf32>, vector<64x16xf32>, vector<64x16xf32> -> vector<64x16xf32>
    %cst_26 = arith.constant dense<0.000000e+00> : vector<64xf32>
    %49 = vector.multi_reduction <add>, %48, %cst_26 [1] : vector<64x16xf32> to vector<64xf32>
    %50 = vector.shape_cast %49 : vector<64xf32> to vector<64x1xf32>
    %51 = arith.mulf %46, %46 : vector<64x1xf32>
    %52 = arith.subf %50, %51 : vector<64x1xf32>
    %cst_27 = arith.constant 9.99999974E-6 : f32
    %53 = vector.broadcast %cst_27 : f32 to vector<64x1xf32>
    %54 = arith.addf %52, %53 : vector<64x1xf32>
    %55 = math.rsqrt %54 : vector<64x1xf32>
    %56 = vector.broadcast %46 : vector<64x1xf32> to vector<64x16xf32>
    %57 = arith.subf %41, %56 : vector<64x16xf32>
    %58 = arith.mulf %55, %42 : vector<64x1xf32>
    %59 = vector.broadcast %58 : vector<64x1xf32> to vector<64x16xf32>
    %60 = arith.mulf %57, %59 : vector<64x16xf32>
    %61 = vector.broadcast %43 : vector<64x1xf32> to vector<64x16xf32>
    %62 = arith.addf %60, %61 : vector<64x16xf32>
    %63 = arith.negf %62 : vector<64x16xf32>
    %64 = math.exp %63 : vector<64x16xf32>
    %cst_28 = arith.constant 1.000000e+00 : f32
    %65 = vector.broadcast %cst_28 : f32 to vector<64x16xf32>
    %66 = arith.addf %65, %64 : vector<64x16xf32>
    %67 = arith.divf %65, %66 : vector<64x16xf32>
    %68 = arith.mulf %62, %67 : vector<64x16xf32>
    %c0_29 = arith.constant 0 : index
    %c0_30 = arith.constant 0 : index
    %69 = vector.load %arg9[%c0_29, %c0_30] : memref<64x192xbf16, #tpu.memory_space<vmem>>, vector<64x192xbf16>
    %c0_31 = arith.constant 0 : index
    %c0_32 = arith.constant 0 : index
    %70 = vector.load %arg10[%c0_31, %c0_32] : memref<64x1xf32, #tpu.memory_space<vmem>>, vector<64x1xf32>
    %cst_33 = arith.constant 0.000000e+00 : f32
    %71 = vector.broadcast %cst_33 : f32 to vector<64x1xf32>
    %72 = tpu.concatenate %71, %68, %71 in 1 : vector<64x1xf32>, vector<64x16xf32>, vector<64x1xf32> -> vector<64x18xf32>
    %73 = vector.extract_strided_slice %72 {offsets = [0, 0], sizes = [64, 16], strides = [1, 1]} : vector<64x18xf32> to vector<64x16xf32>
    %74 = vector.extract_strided_slice %72 {offsets = [0, 1], sizes = [64, 16], strides = [1, 1]} : vector<64x18xf32> to vector<64x16xf32>
    %75 = vector.extract_strided_slice %72 {offsets = [0, 2], sizes = [64, 16], strides = [1, 1]} : vector<64x18xf32> to vector<64x16xf32>
    %76 = tpu.concatenate %73, %74, %75 in 0 : vector<64x16xf32>, vector<64x16xf32>, vector<64x16xf32> -> vector<192x16xf32>
    %77 = arith.truncf %76 : vector<192x16xf32> to vector<192x16xbf16>
    %cst_34 = arith.constant dense<0.000000e+00> : vector<64x16xf32>
    %78 = tpu.matmul %69, %77, %cst_34 {dimension_numbers = #tpu.dot_dimension_numbers<[1], [0], [0], [1], [0, 0, 1, 1], [], []>} : vector<64x192xbf16>, vector<192x16xbf16>, vector<64x16xf32> -> vector<64x16xf32>
    %79 = vector.broadcast %70 : vector<64x1xf32> to vector<64x16xf32>
    %80 = arith.addf %78, %79 : vector<64x16xf32>
    %81 = arith.addf %80, %1 : vector<64x16xf32>
    %cst_35 = arith.constant 1.000000e+00 : f32
    %82 = vector.broadcast %cst_35 : f32 to vector<64x16xf32>
    %83 = arith.mulf %81, %82 : vector<64x16xf32>
    %c0_36 = arith.constant 0 : index
    %c0_37 = arith.constant 0 : index
    %c0_38 = arith.constant 0 : index
    %84 = vector.load %arg13[%c0_36, %c0_37, %c0_38] : memref<1x64x16xf32, #tpu.memory_space<vmem>>, vector<1x64x16xf32>
    %85 = vector.shape_cast %84 : vector<1x64x16xf32> to vector<64x16xf32>
    %86 = vector.shape_cast %83 : vector<64x16xf32> to vector<1x64x16xf32>
    tpu.vector_store %arg13[%c0_36, %c0_37, %c0_38], %86 {strides = array<i32>} : memref<1x64x16xf32, #tpu.memory_space<vmem>>, vector<1x64x16xf32>,
    %c0_39 = arith.constant 0 : index
    %c0_40 = arith.constant 0 : index
    %87 = vector.load %arg11[%c0_39, %c0_40] : memref<64x1xf32, #tpu.memory_space<vmem>>, vector<64x1xf32>
    %c0_41 = arith.constant 0 : index
    %c0_42 = arith.constant 0 : index
    %88 = vector.load %arg12[%c0_41, %c0_42] : memref<64x1xf32, #tpu.memory_space<vmem>>, vector<64x1xf32>
    %cst_43 = arith.constant dense<0.000000e+00> : vector<64x16xf32>
    %89 = tpu.matmul %2, %83, %cst_43 {dimension_numbers = #tpu.dot_dimension_numbers<[1], [0], [0], [1], [0, 0, 1, 1], [], []>} : vector<64x64xf32>, vector<64x16xf32>, vector<64x16xf32> -> vector<64x16xf32>
    %cst_44 = arith.constant dense<0.000000e+00> : vector<64xf32>
    %90 = vector.multi_reduction <add>, %89, %cst_44 [1] : vector<64x16xf32> to vector<64xf32>
    %91 = vector.shape_cast %90 : vector<64xf32> to vector<64x1xf32>
    %92 = arith.mulf %83, %83 : vector<64x16xf32>
    %cst_45 = arith.constant dense<0.000000e+00> : vector<64x16xf32>
    %93 = tpu.matmul %2, %92, %cst_45 {dimension_numbers = #tpu.dot_dimension_numbers<[1], [0], [0], [1], [0, 0, 1, 1], [], []>} : vector<64x64xf32>, vector<64x16xf32>, vector<64x16xf32> -> vector<64x16xf32>
    %cst_46 = arith.constant dense<0.000000e+00> : vector<64xf32>
    %94 = vector.multi_reduction <add>, %93, %cst_46 [1] : vector<64x16xf32> to vector<64xf32>
    %95 = vector.shape_cast %94 : vector<64xf32> to vector<64x1xf32>
    %96 = arith.mulf %91, %91 : vector<64x1xf32>
    %97 = arith.subf %95, %96 : vector<64x1xf32>
    %cst_47 = arith.constant 9.99999974E-6 : f32
    %98 = vector.broadcast %cst_47 : f32 to vector<64x1xf32>
    %99 = arith.addf %97, %98 : vector<64x1xf32>
    %100 = math.rsqrt %99 : vector<64x1xf32>
    %101 = vector.broadcast %91 : vector<64x1xf32> to vector<64x16xf32>
    %102 = arith.subf %83, %101 : vector<64x16xf32>
    %103 = arith.mulf %100, %87 : vector<64x1xf32>
    %104 = vector.broadcast %103 : vector<64x1xf32> to vector<64x16xf32>
    %105 = arith.mulf %102, %104 : vector<64x16xf32>
    %106 = vector.broadcast %88 : vector<64x1xf32> to vector<64x16xf32>
    %107 = arith.addf %105, %106 : vector<64x16xf32>
    %c0_48 = arith.constant 0 : index
    %c0_49 = arith.constant 0 : index
    %c0_50 = arith.constant 0 : index
    %108 = vector.load %arg14[%c0_48, %c0_49, %c0_50] : memref<1x64x16xf32, #tpu.memory_space<vmem>>, vector<1x64x16xf32>
    %109 = vector.shape_cast %108 : vector<1x64x16xf32> to vector<64x16xf32>
    %110 = vector.shape_cast %107 : vector<64x16xf32> to vector<1x64x16xf32>
    tpu.vector_store %arg14[%c0_48, %c0_49, %c0_50], %110 {strides = array<i32>} : memref<1x64x16xf32, #tpu.memory_space<vmem>>, vector<1x64x16xf32>,
    return
  }
  func.func @transform_0(%arg0: i32) -> (i32, i32, i32) {
    %c0_i32 = arith.constant 0 : i32
    %c0_i32_0 = arith.constant 0 : i32
    %c0_i32_1 = arith.constant 0 : i32
    return %arg0, %c0_i32, %c0_i32_0 : i32, i32, i32
  }
  func.func @transform_1(%arg0: i32) -> (i32, i32) {
    %c0_i32 = arith.constant 0 : i32
    %c0_i32_0 = arith.constant 0 : i32
    %c0_i32_1 = arith.constant 0 : i32
    return %c0_i32, %c0_i32_0 : i32, i32
  }
  func.func @transform_2(%arg0: i32) -> (i32, i32) {
    %c0_i32 = arith.constant 0 : i32
    %c0_i32_0 = arith.constant 0 : i32
    %c0_i32_1 = arith.constant 0 : i32
    return %c0_i32, %c0_i32_0 : i32, i32
  }
  func.func @transform_3(%arg0: i32) -> (i32, i32) {
    %c0_i32 = arith.constant 0 : i32
    %c0_i32_0 = arith.constant 0 : i32
    %c0_i32_1 = arith.constant 0 : i32
    return %c0_i32, %c0_i32_0 : i32, i32
  }
  func.func @transform_4(%arg0: i32) -> (i32, i32) {
    %c0_i32 = arith.constant 0 : i32
    %c0_i32_0 = arith.constant 0 : i32
    %c0_i32_1 = arith.constant 0 : i32
    return %c0_i32, %c0_i32_0 : i32, i32
  }
  func.func @transform_5(%arg0: i32) -> (i32, i32) {
    %c0_i32 = arith.constant 0 : i32
    %c0_i32_0 = arith.constant 0 : i32
    %c0_i32_1 = arith.constant 0 : i32
    return %c0_i32, %c0_i32_0 : i32, i32
  }
  func.func @transform_6(%arg0: i32) -> (i32, i32) {
    %c0_i32 = arith.constant 0 : i32
    %c0_i32_0 = arith.constant 0 : i32
    %c0_i32_1 = arith.constant 0 : i32
    return %c0_i32, %c0_i32_0 : i32, i32
  }
  func.func @transform_7(%arg0: i32) -> (i32, i32) {
    %c0_i32 = arith.constant 0 : i32
    %c0_i32_0 = arith.constant 0 : i32
    %c0_i32_1 = arith.constant 0 : i32
    return %c0_i32, %c0_i32_0 : i32, i32
  }
  func.func @transform_8(%arg0: i32) -> (i32, i32) {
    %c0_i32 = arith.constant 0 : i32
    %c0_i32_0 = arith.constant 0 : i32
    %c0_i32_1 = arith.constant 0 : i32
    return %c0_i32, %c0_i32_0 : i32, i32
  }
  func.func @transform_9(%arg0: i32) -> (i32, i32) {
    %c0_i32 = arith.constant 0 : i32
    %c0_i32_0 = arith.constant 0 : i32
    %c0_i32_1 = arith.constant 0 : i32
    return %c0_i32, %c0_i32_0 : i32, i32
  }
  func.func @transform_10(%arg0: i32) -> (i32, i32) {
    %c0_i32 = arith.constant 0 : i32
    %c0_i32_0 = arith.constant 0 : i32
    %c0_i32_1 = arith.constant 0 : i32
    return %c0_i32, %c0_i32_0 : i32, i32
  }
  func.func @transform_11(%arg0: i32) -> (i32, i32) {
    %c0_i32 = arith.constant 0 : i32
    %c0_i32_0 = arith.constant 0 : i32
    %c0_i32_1 = arith.constant 0 : i32
    return %c0_i32, %c0_i32_0 : i32, i32
  }
  func.func @transform_12(%arg0: i32) -> (i32, i32, i32) {
    %c0_i32 = arith.constant 0 : i32
    %c0_i32_0 = arith.constant 0 : i32
    %c0_i32_1 = arith.constant 0 : i32
    return %arg0, %c0_i32, %c0_i32_0 : i32, i32, i32
  }
  func.func @transform_13(%arg0: i32) -> (i32, i32, i32) {
    %c0_i32 = arith.constant 0 : i32
    %c0_i32_0 = arith.constant 0 : i32
    %c0_i32_1 = arith.constant 0 : i32
    return %arg0, %c0_i32, %c0_i32_0 : i32, i32, i32
  }
}

module attributes {stable_mosaic.version = 11 : i64} {
  func.func @_resnet_kernel(%arg0: i32, %arg1: memref<1x64x16xf32, #tpu.memory_space<vmem>>, %arg2: memref<64x64xf32, #tpu.memory_space<vmem>>, %arg3: memref<64x1xf32, #tpu.memory_space<vmem>>, %arg4: memref<64x1xf32, #tpu.memory_space<vmem>>, %arg5: memref<64x192xbf16, #tpu.memory_space<vmem>>, %arg6: memref<64x1xf32, #tpu.memory_space<vmem>>, %arg7: memref<64x1xf32, #tpu.memory_space<vmem>>, %arg8: memref<64x1xf32, #tpu.memory_space<vmem>>, %arg9: memref<64x192xbf16, #tpu.memory_space<vmem>>, %arg10: memref<64x1xf32, #tpu.memory_space<vmem>>, %arg11: memref<1x64x16xf32, #tpu.memory_space<vmem>>) attributes {dimension_semantics = [#tpu.dimension_semantics<parallel>], iteration_bounds = array<i64: 2>, scalar_prefetch = 0 : i64, scratch_operands = 0 : i64, tpu.core_type = #tpu.core_type<tc>, window_params = [{transform_indices = @transform_0, window_bounds = array<i64: 1, 64, 16>}, {pipeline_mode = #tpu.pipeline_mode<synchronous>, transform_indices = @transform_1, window_bounds = array<i64: 64, 64>}, {pipeline_mode = #tpu.pipeline_mode<synchronous>, transform_indices = @transform_2, window_bounds = array<i64: 64, 1>}, {pipeline_mode = #tpu.pipeline_mode<synchronous>, transform_indices = @transform_3, window_bounds = array<i64: 64, 1>}, {pipeline_mode = #tpu.pipeline_mode<synchronous>, transform_indices = @transform_4, window_bounds = array<i64: 64, 192>}, {pipeline_mode = #tpu.pipeline_mode<synchronous>, transform_indices = @transform_5, window_bounds = array<i64: 64, 1>}, {pipeline_mode = #tpu.pipeline_mode<synchronous>, transform_indices = @transform_6, window_bounds = array<i64: 64, 1>}, {pipeline_mode = #tpu.pipeline_mode<synchronous>, transform_indices = @transform_7, window_bounds = array<i64: 64, 1>}, {pipeline_mode = #tpu.pipeline_mode<synchronous>, transform_indices = @transform_8, window_bounds = array<i64: 64, 192>}, {pipeline_mode = #tpu.pipeline_mode<synchronous>, transform_indices = @transform_9, window_bounds = array<i64: 64, 1>}, {transform_indices = @transform_10, window_bounds = array<i64: 1, 64, 16>}]} {
    %c0 = arith.constant 0 : index
    %c0_0 = arith.constant 0 : index
    %c0_1 = arith.constant 0 : index
    %0 = vector.load %arg1[%c0, %c0_0, %c0_1] : memref<1x64x16xf32, #tpu.memory_space<vmem>>, vector<1x64x16xf32>
    %1 = vector.shape_cast %0 : vector<1x64x16xf32> to vector<64x16xf32>
    %c0_2 = arith.constant 0 : index
    %c0_3 = arith.constant 0 : index
    %2 = vector.load %arg2[%c0_2, %c0_3] : memref<64x64xf32, #tpu.memory_space<vmem>>, vector<64x64xf32>
    %c0_4 = arith.constant 0 : index
    %c0_5 = arith.constant 0 : index
    %3 = vector.load %arg3[%c0_4, %c0_5] : memref<64x1xf32, #tpu.memory_space<vmem>>, vector<64x1xf32>
    %c0_6 = arith.constant 0 : index
    %c0_7 = arith.constant 0 : index
    %4 = vector.load %arg4[%c0_6, %c0_7] : memref<64x1xf32, #tpu.memory_space<vmem>>, vector<64x1xf32>
    %cst = arith.constant dense<0.000000e+00> : vector<64x16xf32>
    %5 = tpu.matmul %2, %1, %cst {dimension_numbers = #tpu.dot_dimension_numbers<[1], [0], [0], [1], [0, 0, 1, 1], [], []>} : vector<64x64xf32>, vector<64x16xf32>, vector<64x16xf32> -> vector<64x16xf32>
    %cst_8 = arith.constant dense<0.000000e+00> : vector<64xf32>
    %6 = vector.multi_reduction <add>, %5, %cst_8 [1] : vector<64x16xf32> to vector<64xf32>
    %7 = vector.shape_cast %6 : vector<64xf32> to vector<64x1xf32>
    %8 = arith.mulf %1, %1 : vector<64x16xf32>
    %cst_9 = arith.constant dense<0.000000e+00> : vector<64x16xf32>
    %9 = tpu.matmul %2, %8, %cst_9 {dimension_numbers = #tpu.dot_dimension_numbers<[1], [0], [0], [1], [0, 0, 1, 1], [], []>} : vector<64x64xf32>, vector<64x16xf32>, vector<64x16xf32> -> vector<64x16xf32>
    %cst_10 = arith.constant dense<0.000000e+00> : vector<64xf32>
    %10 = vector.multi_reduction <add>, %9, %cst_10 [1] : vector<64x16xf32> to vector<64xf32>
    %11 = vector.shape_cast %10 : vector<64xf32> to vector<64x1xf32>
    %12 = arith.mulf %7, %7 : vector<64x1xf32>
    %13 = arith.subf %11, %12 : vector<64x1xf32>
    %cst_11 = arith.constant 9.99999974E-6 : f32
    %14 = vector.broadcast %cst_11 : f32 to vector<64x1xf32>
    %15 = arith.addf %13, %14 : vector<64x1xf32>
    %16 = math.rsqrt %15 : vector<64x1xf32>
    %17 = vector.broadcast %7 : vector<64x1xf32> to vector<64x16xf32>
    %18 = arith.subf %1, %17 : vector<64x16xf32>
    %19 = arith.mulf %16, %3 : vector<64x1xf32>
    %20 = vector.broadcast %19 : vector<64x1xf32> to vector<64x16xf32>
    %21 = arith.mulf %18, %20 : vector<64x16xf32>
    %22 = vector.broadcast %4 : vector<64x1xf32> to vector<64x16xf32>
    %23 = arith.addf %21, %22 : vector<64x16xf32>
    %24 = arith.negf %23 : vector<64x16xf32>
    %25 = math.exp %24 : vector<64x16xf32>
    %cst_12 = arith.constant 1.000000e+00 : f32
    %26 = vector.broadcast %cst_12 : f32 to vector<64x16xf32>
    %27 = arith.addf %26, %25 : vector<64x16xf32>
    %28 = arith.divf %26, %27 : vector<64x16xf32>
    %29 = arith.mulf %23, %28 : vector<64x16xf32>
    %c0_13 = arith.constant 0 : index
    %c0_14 = arith.constant 0 : index
    %30 = vector.load %arg5[%c0_13, %c0_14] : memref<64x192xbf16, #tpu.memory_space<vmem>>, vector<64x192xbf16>
    %c0_15 = arith.constant 0 : index
    %c0_16 = arith.constant 0 : index
    %31 = vector.load %arg6[%c0_15, %c0_16] : memref<64x1xf32, #tpu.memory_space<vmem>>, vector<64x1xf32>
    %cst_17 = arith.constant 0.000000e+00 : f32
    %32 = vector.broadcast %cst_17 : f32 to vector<64x1xf32>
    %33 = tpu.concatenate %32, %29, %32 in 1 : vector<64x1xf32>, vector<64x16xf32>, vector<64x1xf32> -> vector<64x18xf32>
    %34 = vector.extract_strided_slice %33 {offsets = [0, 0], sizes = [64, 16], strides = [1, 1]} : vector<64x18xf32> to vector<64x16xf32>
    %35 = vector.extract_strided_slice %33 {offsets = [0, 1], sizes = [64, 16], strides = [1, 1]} : vector<64x18xf32> to vector<64x16xf32>
    %36 = vector.extract_strided_slice %33 {offsets = [0, 2], sizes = [64, 16], strides = [1, 1]} : vector<64x18xf32> to vector<64x16xf32>
    %37 = tpu.concatenate %34, %35, %36 in 0 : vector<64x16xf32>, vector<64x16xf32>, vector<64x16xf32> -> vector<192x16xf32>
    %38 = arith.truncf %37 : vector<192x16xf32> to vector<192x16xbf16>
    %cst_18 = arith.constant dense<0.000000e+00> : vector<64x16xf32>
    %39 = tpu.matmul %30, %38, %cst_18 {dimension_numbers = #tpu.dot_dimension_numbers<[1], [0], [0], [1], [0, 0, 1, 1], [], []>} : vector<64x192xbf16>, vector<192x16xbf16>, vector<64x16xf32> -> vector<64x16xf32>
    %40 = vector.broadcast %31 : vector<64x1xf32> to vector<64x16xf32>
    %41 = arith.addf %39, %40 : vector<64x16xf32>
    %c0_19 = arith.constant 0 : index
    %c0_20 = arith.constant 0 : index
    %42 = vector.load %arg7[%c0_19, %c0_20] : memref<64x1xf32, #tpu.memory_space<vmem>>, vector<64x1xf32>
    %c0_21 = arith.constant 0 : index
    %c0_22 = arith.constant 0 : index
    %43 = vector.load %arg8[%c0_21, %c0_22] : memref<64x1xf32, #tpu.memory_space<vmem>>, vector<64x1xf32>
    %cst_23 = arith.constant dense<0.000000e+00> : vector<64x16xf32>
    %44 = tpu.matmul %2, %41, %cst_23 {dimension_numbers = #tpu.dot_dimension_numbers<[1], [0], [0], [1], [0, 0, 1, 1], [], []>} : vector<64x64xf32>, vector<64x16xf32>, vector<64x16xf32> -> vector<64x16xf32>
    %cst_24 = arith.constant dense<0.000000e+00> : vector<64xf32>
    %45 = vector.multi_reduction <add>, %44, %cst_24 [1] : vector<64x16xf32> to vector<64xf32>
    %46 = vector.shape_cast %45 : vector<64xf32> to vector<64x1xf32>
    %47 = arith.mulf %41, %41 : vector<64x16xf32>
    %cst_25 = arith.constant dense<0.000000e+00> : vector<64x16xf32>
    %48 = tpu.matmul %2, %47, %cst_25 {dimension_numbers = #tpu.dot_dimension_numbers<[1], [0], [0], [1], [0, 0, 1, 1], [], []>} : vector<64x64xf32>, vector<64x16xf32>, vector<64x16xf32> -> vector<64x16xf32>
    %cst_26 = arith.constant dense<0.000000e+00> : vector<64xf32>
    %49 = vector.multi_reduction <add>, %48, %cst_26 [1] : vector<64x16xf32> to vector<64xf32>
    %50 = vector.shape_cast %49 : vector<64xf32> to vector<64x1xf32>
    %51 = arith.mulf %46, %46 : vector<64x1xf32>
    %52 = arith.subf %50, %51 : vector<64x1xf32>
    %cst_27 = arith.constant 9.99999974E-6 : f32
    %53 = vector.broadcast %cst_27 : f32 to vector<64x1xf32>
    %54 = arith.addf %52, %53 : vector<64x1xf32>
    %55 = math.rsqrt %54 : vector<64x1xf32>
    %56 = vector.broadcast %46 : vector<64x1xf32> to vector<64x16xf32>
    %57 = arith.subf %41, %56 : vector<64x16xf32>
    %58 = arith.mulf %55, %42 : vector<64x1xf32>
    %59 = vector.broadcast %58 : vector<64x1xf32> to vector<64x16xf32>
    %60 = arith.mulf %57, %59 : vector<64x16xf32>
    %61 = vector.broadcast %43 : vector<64x1xf32> to vector<64x16xf32>
    %62 = arith.addf %60, %61 : vector<64x16xf32>
    %63 = arith.negf %62 : vector<64x16xf32>
    %64 = math.exp %63 : vector<64x16xf32>
    %cst_28 = arith.constant 1.000000e+00 : f32
    %65 = vector.broadcast %cst_28 : f32 to vector<64x16xf32>
    %66 = arith.addf %65, %64 : vector<64x16xf32>
    %67 = arith.divf %65, %66 : vector<64x16xf32>
    %68 = arith.mulf %62, %67 : vector<64x16xf32>
    %c0_29 = arith.constant 0 : index
    %c0_30 = arith.constant 0 : index
    %69 = vector.load %arg9[%c0_29, %c0_30] : memref<64x192xbf16, #tpu.memory_space<vmem>>, vector<64x192xbf16>
    %c0_31 = arith.constant 0 : index
    %c0_32 = arith.constant 0 : index
    %70 = vector.load %arg10[%c0_31, %c0_32] : memref<64x1xf32, #tpu.memory_space<vmem>>, vector<64x1xf32>
    %cst_33 = arith.constant 0.000000e+00 : f32
    %71 = vector.broadcast %cst_33 : f32 to vector<64x1xf32>
    %72 = tpu.concatenate %71, %68, %71 in 1 : vector<64x1xf32>, vector<64x16xf32>, vector<64x1xf32> -> vector<64x18xf32>
    %73 = vector.extract_strided_slice %72 {offsets = [0, 0], sizes = [64, 16], strides = [1, 1]} : vector<64x18xf32> to vector<64x16xf32>
    %74 = vector.extract_strided_slice %72 {offsets = [0, 1], sizes = [64, 16], strides = [1, 1]} : vector<64x18xf32> to vector<64x16xf32>
    %75 = vector.extract_strided_slice %72 {offsets = [0, 2], sizes = [64, 16], strides = [1, 1]} : vector<64x18xf32> to vector<64x16xf32>
    %76 = tpu.concatenate %73, %74, %75 in 0 : vector<64x16xf32>, vector<64x16xf32>, vector<64x16xf32> -> vector<192x16xf32>
    %77 = arith.truncf %76 : vector<192x16xf32> to vector<192x16xbf16>
    %cst_34 = arith.constant dense<0.000000e+00> : vector<64x16xf32>
    %78 = tpu.matmul %69, %77, %cst_34 {dimension_numbers = #tpu.dot_dimension_numbers<[1], [0], [0], [1], [0, 0, 1, 1], [], []>} : vector<64x192xbf16>, vector<192x16xbf16>, vector<64x16xf32> -> vector<64x16xf32>
    %79 = vector.broadcast %70 : vector<64x1xf32> to vector<64x16xf32>
    %80 = arith.addf %78, %79 : vector<64x16xf32>
    %81 = arith.addf %80, %1 : vector<64x16xf32>
    %cst_35 = arith.constant 1.000000e+00 : f32
    %82 = vector.broadcast %cst_35 : f32 to vector<64x16xf32>
    %83 = arith.mulf %81, %82 : vector<64x16xf32>
    %c0_36 = arith.constant 0 : index
    %c0_37 = arith.constant 0 : index
    %c0_38 = arith.constant 0 : index
    %84 = vector.load %arg11[%c0_36, %c0_37, %c0_38] : memref<1x64x16xf32, #tpu.memory_space<vmem>>, vector<1x64x16xf32>
    %85 = vector.shape_cast %84 : vector<1x64x16xf32> to vector<64x16xf32>
    %86 = vector.shape_cast %83 : vector<64x16xf32> to vector<1x64x16xf32>
    tpu.vector_store %arg11[%c0_36, %c0_37, %c0_38], %86 {strides = array<i32>} : memref<1x64x16xf32, #tpu.memory_space<vmem>>, vector<1x64x16xf32>,
    return
  }
  func.func @transform_0(%arg0: i32) -> (i32, i32, i32) {
    %c0_i32 = arith.constant 0 : i32
    %c0_i32_0 = arith.constant 0 : i32
    %c0_i32_1 = arith.constant 0 : i32
    return %arg0, %c0_i32, %c0_i32_0 : i32, i32, i32
  }
  func.func @transform_1(%arg0: i32) -> (i32, i32) {
    %c0_i32 = arith.constant 0 : i32
    %c0_i32_0 = arith.constant 0 : i32
    %c0_i32_1 = arith.constant 0 : i32
    return %c0_i32, %c0_i32_0 : i32, i32
  }
  func.func @transform_2(%arg0: i32) -> (i32, i32) {
    %c0_i32 = arith.constant 0 : i32
    %c0_i32_0 = arith.constant 0 : i32
    %c0_i32_1 = arith.constant 0 : i32
    return %c0_i32, %c0_i32_0 : i32, i32
  }
  func.func @transform_3(%arg0: i32) -> (i32, i32) {
    %c0_i32 = arith.constant 0 : i32
    %c0_i32_0 = arith.constant 0 : i32
    %c0_i32_1 = arith.constant 0 : i32
    return %c0_i32, %c0_i32_0 : i32, i32
  }
  func.func @transform_4(%arg0: i32) -> (i32, i32) {
    %c0_i32 = arith.constant 0 : i32
    %c0_i32_0 = arith.constant 0 : i32
    %c0_i32_1 = arith.constant 0 : i32
    return %c0_i32, %c0_i32_0 : i32, i32
  }
  func.func @transform_5(%arg0: i32) -> (i32, i32) {
    %c0_i32 = arith.constant 0 : i32
    %c0_i32_0 = arith.constant 0 : i32
    %c0_i32_1 = arith.constant 0 : i32
    return %c0_i32, %c0_i32_0 : i32, i32
  }
  func.func @transform_6(%arg0: i32) -> (i32, i32) {
    %c0_i32 = arith.constant 0 : i32
    %c0_i32_0 = arith.constant 0 : i32
    %c0_i32_1 = arith.constant 0 : i32
    return %c0_i32, %c0_i32_0 : i32, i32
  }
  func.func @transform_7(%arg0: i32) -> (i32, i32) {
    %c0_i32 = arith.constant 0 : i32
    %c0_i32_0 = arith.constant 0 : i32
    %c0_i32_1 = arith.constant 0 : i32
    return %c0_i32, %c0_i32_0 : i32, i32
  }
  func.func @transform_8(%arg0: i32) -> (i32, i32) {
    %c0_i32 = arith.constant 0 : i32
    %c0_i32_0 = arith.constant 0 : i32
    %c0_i32_1 = arith.constant 0 : i32
    return %c0_i32, %c0_i32_0 : i32, i32
  }
  func.func @transform_9(%arg0: i32) -> (i32, i32) {
    %c0_i32 = arith.constant 0 : i32
    %c0_i32_0 = arith.constant 0 : i32
    %c0_i32_1 = arith.constant 0 : i32
    return %c0_i32, %c0_i32_0 : i32, i32
  }
  func.func @transform_10(%arg0: i32) -> (i32, i32, i32) {
    %c0_i32 = arith.constant 0 : i32
    %c0_i32_0 = arith.constant 0 : i32
    %c0_i32_1 = arith.constant 0 : i32
    return %arg0, %c0_i32, %c0_i32_0 : i32, i32, i32
  }
}

module attributes {stable_mosaic.version = 11 : i64} {
  func.func @_attn_kernel(%arg0: i32, %arg1: memref<1x16x64xf32, #tpu.memory_space<vmem>>, %arg2: memref<1x16x64xf32, #tpu.memory_space<vmem>>, %arg3: memref<64x192xbf16, #tpu.memory_space<vmem>>, %arg4: memref<64x64xbf16, #tpu.memory_space<vmem>>, %arg5: memref<1x64xf32, #tpu.memory_space<vmem>>, %arg6: memref<1x16x64xf32, #tpu.memory_space<vmem>>) attributes {dimension_semantics = [#tpu.dimension_semantics<parallel>], iteration_bounds = array<i64: 2>, scalar_prefetch = 0 : i64, scratch_operands = 0 : i64, tpu.core_type = #tpu.core_type<tc>, window_params = [{transform_indices = @transform_0, window_bounds = array<i64: 1, 16, 64>}, {transform_indices = @transform_1, window_bounds = array<i64: 1, 16, 64>}, {pipeline_mode = #tpu.pipeline_mode<synchronous>, transform_indices = @transform_2, window_bounds = array<i64: 64, 192>}, {pipeline_mode = #tpu.pipeline_mode<synchronous>, transform_indices = @transform_3, window_bounds = array<i64: 64, 64>}, {pipeline_mode = #tpu.pipeline_mode<synchronous>, transform_indices = @transform_4, window_bounds = array<i64: 1, 64>}, {transform_indices = @transform_5, window_bounds = array<i64: 1, 16, 64>}]} {
    %c0 = arith.constant 0 : index
    %c0_0 = arith.constant 0 : index
    %c0_1 = arith.constant 0 : index
    %0 = vector.load %arg1[%c0, %c0_0, %c0_1] : memref<1x16x64xf32, #tpu.memory_space<vmem>>, vector<1x16x64xf32>
    %1 = vector.shape_cast %0 : vector<1x16x64xf32> to vector<16x64xf32>
    %c0_2 = arith.constant 0 : index
    %c0_3 = arith.constant 0 : index
    %c0_4 = arith.constant 0 : index
    %2 = vector.load %arg2[%c0_2, %c0_3, %c0_4] : memref<1x16x64xf32, #tpu.memory_space<vmem>>, vector<1x16x64xf32>
    %3 = vector.shape_cast %2 : vector<1x16x64xf32> to vector<16x64xf32>
    %4 = arith.truncf %1 : vector<16x64xf32> to vector<16x64xbf16>
    %c0_5 = arith.constant 0 : index
    %c0_6 = arith.constant 0 : index
    %5 = vector.load %arg3[%c0_5, %c0_6] : memref<64x192xbf16, #tpu.memory_space<vmem>>, vector<64x192xbf16>
    %cst = arith.constant dense<0.000000e+00> : vector<16x192xf32>
    %6 = tpu.matmul %4, %5, %cst {dimension_numbers = #tpu.dot_dimension_numbers<[1], [0], [0], [1], [0, 0, 1, 1], [], []>} : vector<16x64xbf16>, vector<64x192xbf16>, vector<16x192xf32> -> vector<16x192xf32>
    %7 = vector.extract_strided_slice %6 {offsets = [0, 0], sizes = [16, 64], strides = [1, 1]} : vector<16x192xf32> to vector<16x64xf32>
    %cst_7 = arith.constant 5.000000e-01 : f32
    %8 = vector.broadcast %cst_7 : f32 to vector<16x64xf32>
    %9 = arith.mulf %7, %8 : vector<16x64xf32>
    %10 = vector.extract_strided_slice %6 {offsets = [0, 64], sizes = [16, 64], strides = [1, 1]} : vector<16x192xf32> to vector<16x64xf32>
    %11 = vector.extract_strided_slice %6 {offsets = [0, 128], sizes = [16, 64], strides = [1, 1]} : vector<16x192xf32> to vector<16x64xf32>
    %12 = vector.extract_strided_slice %9 {offsets = [0, 0], sizes = [16, 4], strides = [1, 1]} : vector<16x64xf32> to vector<16x4xf32>
    %13 = vector.extract_strided_slice %10 {offsets = [0, 0], sizes = [16, 4], strides = [1, 1]} : vector<16x64xf32> to vector<16x4xf32>
    %14 = vector.extract_strided_slice %11 {offsets = [0, 0], sizes = [16, 4], strides = [1, 1]} : vector<16x64xf32> to vector<16x4xf32>
    %cst_8 = arith.constant dense<0.000000e+00> : vector<16x16xf32>
    %15 = tpu.matmul %12, %13, %cst_8 {dimension_numbers = #tpu.dot_dimension_numbers<[1], [1], [0], [0], [0, 0, 1, 0], [], []>} : vector<16x4xf32>, vector<16x4xf32>, vector<16x16xf32> -> vector<16x16xf32>
    %cst_9 = arith.constant dense<0xFF800000> : vector<16xf32>
    %16 = vector.multi_reduction <maximumf>, %15, %cst_9 [1] : vector<16x16xf32> to vector<16xf32>
    %17 = vector.shape_cast %16 : vector<16xf32> to vector<16x1xf32>
    %18 = vector.broadcast %17 : vector<16x1xf32> to vector<16x16xf32>
    %19 = arith.subf %15, %18 : vector<16x16xf32>
    %20 = math.exp %19 : vector<16x16xf32>
    %cst_10 = arith.constant dense<0.000000e+00> : vector<16xf32>
    %21 = vector.multi_reduction <add>, %20, %cst_10 [1] : vector<16x16xf32> to vector<16xf32>
    %22 = vector.shape_cast %21 : vector<16xf32> to vector<16x1xf32>
    %23 = tpu.reciprocal %22 {approx = true} : vector<16x1xf32> -> vector<16x1xf32>
    %24 = vector.broadcast %23 : vector<16x1xf32> to vector<16x16xf32>
    %25 = arith.mulf %20, %24 : vector<16x16xf32>
    %26 = arith.truncf %25 : vector<16x16xf32> to vector<16x16xbf16>
    %27 = arith.truncf %14 : vector<16x4xf32> to vector<16x4xbf16>
    %cst_11 = arith.constant dense<0.000000e+00> : vector<16x4xf32>
    %28 = tpu.matmul %26, %27, %cst_11 {dimension_numbers = #tpu.dot_dimension_numbers<[1], [0], [0], [1], [0, 0, 1, 1], [], []>} : vector<16x16xbf16>, vector<16x4xbf16>, vector<16x4xf32> -> vector<16x4xf32>
    %29 = vector.extract_strided_slice %9 {offsets = [0, 4], sizes = [16, 4], strides = [1, 1]} : vector<16x64xf32> to vector<16x4xf32>
    %30 = vector.extract_strided_slice %10 {offsets = [0, 4], sizes = [16, 4], strides = [1, 1]} : vector<16x64xf32> to vector<16x4xf32>
    %31 = vector.extract_strided_slice %11 {offsets = [0, 4], sizes = [16, 4], strides = [1, 1]} : vector<16x64xf32> to vector<16x4xf32>
    %cst_12 = arith.constant dense<0.000000e+00> : vector<16x16xf32>
    %32 = tpu.matmul %29, %30, %cst_12 {dimension_numbers = #tpu.dot_dimension_numbers<[1], [1], [0], [0], [0, 0, 1, 0], [], []>} : vector<16x4xf32>, vector<16x4xf32>, vector<16x16xf32> -> vector<16x16xf32>
    %cst_13 = arith.constant dense<0xFF800000> : vector<16xf32>
    %33 = vector.multi_reduction <maximumf>, %32, %cst_13 [1] : vector<16x16xf32> to vector<16xf32>
    %34 = vector.shape_cast %33 : vector<16xf32> to vector<16x1xf32>
    %35 = vector.broadcast %34 : vector<16x1xf32> to vector<16x16xf32>
    %36 = arith.subf %32, %35 : vector<16x16xf32>
    %37 = math.exp %36 : vector<16x16xf32>
    %cst_14 = arith.constant dense<0.000000e+00> : vector<16xf32>
    %38 = vector.multi_reduction <add>, %37, %cst_14 [1] : vector<16x16xf32> to vector<16xf32>
    %39 = vector.shape_cast %38 : vector<16xf32> to vector<16x1xf32>
    %40 = tpu.reciprocal %39 {approx = true} : vector<16x1xf32> -> vector<16x1xf32>
    %41 = vector.broadcast %40 : vector<16x1xf32> to vector<16x16xf32>
    %42 = arith.mulf %37, %41 : vector<16x16xf32>
    %43 = arith.truncf %42 : vector<16x16xf32> to vector<16x16xbf16>
    %44 = arith.truncf %31 : vector<16x4xf32> to vector<16x4xbf16>
    %cst_15 = arith.constant dense<0.000000e+00> : vector<16x4xf32>
    %45 = tpu.matmul %43, %44, %cst_15 {dimension_numbers = #tpu.dot_dimension_numbers<[1], [0], [0], [1], [0, 0, 1, 1], [], []>} : vector<16x16xbf16>, vector<16x4xbf16>, vector<16x4xf32> -> vector<16x4xf32>
    %46 = vector.extract_strided_slice %9 {offsets = [0, 8], sizes = [16, 4], strides = [1, 1]} : vector<16x64xf32> to vector<16x4xf32>
    %47 = vector.extract_strided_slice %10 {offsets = [0, 8], sizes = [16, 4], strides = [1, 1]} : vector<16x64xf32> to vector<16x4xf32>
    %48 = vector.extract_strided_slice %11 {offsets = [0, 8], sizes = [16, 4], strides = [1, 1]} : vector<16x64xf32> to vector<16x4xf32>
    %cst_16 = arith.constant dense<0.000000e+00> : vector<16x16xf32>
    %49 = tpu.matmul %46, %47, %cst_16 {dimension_numbers = #tpu.dot_dimension_numbers<[1], [1], [0], [0], [0, 0, 1, 0], [], []>} : vector<16x4xf32>, vector<16x4xf32>, vector<16x16xf32> -> vector<16x16xf32>
    %cst_17 = arith.constant dense<0xFF800000> : vector<16xf32>
    %50 = vector.multi_reduction <maximumf>, %49, %cst_17 [1] : vector<16x16xf32> to vector<16xf32>
    %51 = vector.shape_cast %50 : vector<16xf32> to vector<16x1xf32>
    %52 = vector.broadcast %51 : vector<16x1xf32> to vector<16x16xf32>
    %53 = arith.subf %49, %52 : vector<16x16xf32>
    %54 = math.exp %53 : vector<16x16xf32>
    %cst_18 = arith.constant dense<0.000000e+00> : vector<16xf32>
    %55 = vector.multi_reduction <add>, %54, %cst_18 [1] : vector<16x16xf32> to vector<16xf32>
    %56 = vector.shape_cast %55 : vector<16xf32> to vector<16x1xf32>
    %57 = tpu.reciprocal %56 {approx = true} : vector<16x1xf32> -> vector<16x1xf32>
    %58 = vector.broadcast %57 : vector<16x1xf32> to vector<16x16xf32>
    %59 = arith.mulf %54, %58 : vector<16x16xf32>
    %60 = arith.truncf %59 : vector<16x16xf32> to vector<16x16xbf16>
    %61 = arith.truncf %48 : vector<16x4xf32> to vector<16x4xbf16>
    %cst_19 = arith.constant dense<0.000000e+00> : vector<16x4xf32>
    %62 = tpu.matmul %60, %61, %cst_19 {dimension_numbers = #tpu.dot_dimension_numbers<[1], [0], [0], [1], [0, 0, 1, 1], [], []>} : vector<16x16xbf16>, vector<16x4xbf16>, vector<16x4xf32> -> vector<16x4xf32>
    %63 = vector.extract_strided_slice %9 {offsets = [0, 12], sizes = [16, 4], strides = [1, 1]} : vector<16x64xf32> to vector<16x4xf32>
    %64 = vector.extract_strided_slice %10 {offsets = [0, 12], sizes = [16, 4], strides = [1, 1]} : vector<16x64xf32> to vector<16x4xf32>
    %65 = vector.extract_strided_slice %11 {offsets = [0, 12], sizes = [16, 4], strides = [1, 1]} : vector<16x64xf32> to vector<16x4xf32>
    %cst_20 = arith.constant dense<0.000000e+00> : vector<16x16xf32>
    %66 = tpu.matmul %63, %64, %cst_20 {dimension_numbers = #tpu.dot_dimension_numbers<[1], [1], [0], [0], [0, 0, 1, 0], [], []>} : vector<16x4xf32>, vector<16x4xf32>, vector<16x16xf32> -> vector<16x16xf32>
    %cst_21 = arith.constant dense<0xFF800000> : vector<16xf32>
    %67 = vector.multi_reduction <maximumf>, %66, %cst_21 [1] : vector<16x16xf32> to vector<16xf32>
    %68 = vector.shape_cast %67 : vector<16xf32> to vector<16x1xf32>
    %69 = vector.broadcast %68 : vector<16x1xf32> to vector<16x16xf32>
    %70 = arith.subf %66, %69 : vector<16x16xf32>
    %71 = math.exp %70 : vector<16x16xf32>
    %cst_22 = arith.constant dense<0.000000e+00> : vector<16xf32>
    %72 = vector.multi_reduction <add>, %71, %cst_22 [1] : vector<16x16xf32> to vector<16xf32>
    %73 = vector.shape_cast %72 : vector<16xf32> to vector<16x1xf32>
    %74 = tpu.reciprocal %73 {approx = true} : vector<16x1xf32> -> vector<16x1xf32>
    %75 = vector.broadcast %74 : vector<16x1xf32> to vector<16x16xf32>
    %76 = arith.mulf %71, %75 : vector<16x16xf32>
    %77 = arith.truncf %76 : vector<16x16xf32> to vector<16x16xbf16>
    %78 = arith.truncf %65 : vector<16x4xf32> to vector<16x4xbf16>
    %cst_23 = arith.constant dense<0.000000e+00> : vector<16x4xf32>
    %79 = tpu.matmul %77, %78, %cst_23 {dimension_numbers = #tpu.dot_dimension_numbers<[1], [0], [0], [1], [0, 0, 1, 1], [], []>} : vector<16x16xbf16>, vector<16x4xbf16>, vector<16x4xf32> -> vector<16x4xf32>
    %80 = vector.extract_strided_slice %9 {offsets = [0, 16], sizes = [16, 4], strides = [1, 1]} : vector<16x64xf32> to vector<16x4xf32>
    %81 = vector.extract_strided_slice %10 {offsets = [0, 16], sizes = [16, 4], strides = [1, 1]} : vector<16x64xf32> to vector<16x4xf32>
    %82 = vector.extract_strided_slice %11 {offsets = [0, 16], sizes = [16, 4], strides = [1, 1]} : vector<16x64xf32> to vector<16x4xf32>
    %cst_24 = arith.constant dense<0.000000e+00> : vector<16x16xf32>
    %83 = tpu.matmul %80, %81, %cst_24 {dimension_numbers = #tpu.dot_dimension_numbers<[1], [1], [0], [0], [0, 0, 1, 0], [], []>} : vector<16x4xf32>, vector<16x4xf32>, vector<16x16xf32> -> vector<16x16xf32>
    %cst_25 = arith.constant dense<0xFF800000> : vector<16xf32>
    %84 = vector.multi_reduction <maximumf>, %83, %cst_25 [1] : vector<16x16xf32> to vector<16xf32>
    %85 = vector.shape_cast %84 : vector<16xf32> to vector<16x1xf32>
    %86 = vector.broadcast %85 : vector<16x1xf32> to vector<16x16xf32>
    %87 = arith.subf %83, %86 : vector<16x16xf32>
    %88 = math.exp %87 : vector<16x16xf32>
    %cst_26 = arith.constant dense<0.000000e+00> : vector<16xf32>
    %89 = vector.multi_reduction <add>, %88, %cst_26 [1] : vector<16x16xf32> to vector<16xf32>
    %90 = vector.shape_cast %89 : vector<16xf32> to vector<16x1xf32>
    %91 = tpu.reciprocal %90 {approx = true} : vector<16x1xf32> -> vector<16x1xf32>
    %92 = vector.broadcast %91 : vector<16x1xf32> to vector<16x16xf32>
    %93 = arith.mulf %88, %92 : vector<16x16xf32>
    %94 = arith.truncf %93 : vector<16x16xf32> to vector<16x16xbf16>
    %95 = arith.truncf %82 : vector<16x4xf32> to vector<16x4xbf16>
    %cst_27 = arith.constant dense<0.000000e+00> : vector<16x4xf32>
    %96 = tpu.matmul %94, %95, %cst_27 {dimension_numbers = #tpu.dot_dimension_numbers<[1], [0], [0], [1], [0, 0, 1, 1], [], []>} : vector<16x16xbf16>, vector<16x4xbf16>, vector<16x4xf32> -> vector<16x4xf32>
    %97 = vector.extract_strided_slice %9 {offsets = [0, 20], sizes = [16, 4], strides = [1, 1]} : vector<16x64xf32> to vector<16x4xf32>
    %98 = vector.extract_strided_slice %10 {offsets = [0, 20], sizes = [16, 4], strides = [1, 1]} : vector<16x64xf32> to vector<16x4xf32>
    %99 = vector.extract_strided_slice %11 {offsets = [0, 20], sizes = [16, 4], strides = [1, 1]} : vector<16x64xf32> to vector<16x4xf32>
    %cst_28 = arith.constant dense<0.000000e+00> : vector<16x16xf32>
    %100 = tpu.matmul %97, %98, %cst_28 {dimension_numbers = #tpu.dot_dimension_numbers<[1], [1], [0], [0], [0, 0, 1, 0], [], []>} : vector<16x4xf32>, vector<16x4xf32>, vector<16x16xf32> -> vector<16x16xf32>
    %cst_29 = arith.constant dense<0xFF800000> : vector<16xf32>
    %101 = vector.multi_reduction <maximumf>, %100, %cst_29 [1] : vector<16x16xf32> to vector<16xf32>
    %102 = vector.shape_cast %101 : vector<16xf32> to vector<16x1xf32>
    %103 = vector.broadcast %102 : vector<16x1xf32> to vector<16x16xf32>
    %104 = arith.subf %100, %103 : vector<16x16xf32>
    %105 = math.exp %104 : vector<16x16xf32>
    %cst_30 = arith.constant dense<0.000000e+00> : vector<16xf32>
    %106 = vector.multi_reduction <add>, %105, %cst_30 [1] : vector<16x16xf32> to vector<16xf32>
    %107 = vector.shape_cast %106 : vector<16xf32> to vector<16x1xf32>
    %108 = tpu.reciprocal %107 {approx = true} : vector<16x1xf32> -> vector<16x1xf32>
    %109 = vector.broadcast %108 : vector<16x1xf32> to vector<16x16xf32>
    %110 = arith.mulf %105, %109 : vector<16x16xf32>
    %111 = arith.truncf %110 : vector<16x16xf32> to vector<16x16xbf16>
    %112 = arith.truncf %99 : vector<16x4xf32> to vector<16x4xbf16>
    %cst_31 = arith.constant dense<0.000000e+00> : vector<16x4xf32>
    %113 = tpu.matmul %111, %112, %cst_31 {dimension_numbers = #tpu.dot_dimension_numbers<[1], [0], [0], [1], [0, 0, 1, 1], [], []>} : vector<16x16xbf16>, vector<16x4xbf16>, vector<16x4xf32> -> vector<16x4xf32>
    %114 = vector.extract_strided_slice %9 {offsets = [0, 24], sizes = [16, 4], strides = [1, 1]} : vector<16x64xf32> to vector<16x4xf32>
    %115 = vector.extract_strided_slice %10 {offsets = [0, 24], sizes = [16, 4], strides = [1, 1]} : vector<16x64xf32> to vector<16x4xf32>
    %116 = vector.extract_strided_slice %11 {offsets = [0, 24], sizes = [16, 4], strides = [1, 1]} : vector<16x64xf32> to vector<16x4xf32>
    %cst_32 = arith.constant dense<0.000000e+00> : vector<16x16xf32>
    %117 = tpu.matmul %114, %115, %cst_32 {dimension_numbers = #tpu.dot_dimension_numbers<[1], [1], [0], [0], [0, 0, 1, 0], [], []>} : vector<16x4xf32>, vector<16x4xf32>, vector<16x16xf32> -> vector<16x16xf32>
    %cst_33 = arith.constant dense<0xFF800000> : vector<16xf32>
    %118 = vector.multi_reduction <maximumf>, %117, %cst_33 [1] : vector<16x16xf32> to vector<16xf32>
    %119 = vector.shape_cast %118 : vector<16xf32> to vector<16x1xf32>
    %120 = vector.broadcast %119 : vector<16x1xf32> to vector<16x16xf32>
    %121 = arith.subf %117, %120 : vector<16x16xf32>
    %122 = math.exp %121 : vector<16x16xf32>
    %cst_34 = arith.constant dense<0.000000e+00> : vector<16xf32>
    %123 = vector.multi_reduction <add>, %122, %cst_34 [1] : vector<16x16xf32> to vector<16xf32>
    %124 = vector.shape_cast %123 : vector<16xf32> to vector<16x1xf32>
    %125 = tpu.reciprocal %124 {approx = true} : vector<16x1xf32> -> vector<16x1xf32>
    %126 = vector.broadcast %125 : vector<16x1xf32> to vector<16x16xf32>
    %127 = arith.mulf %122, %126 : vector<16x16xf32>
    %128 = arith.truncf %127 : vector<16x16xf32> to vector<16x16xbf16>
    %129 = arith.truncf %116 : vector<16x4xf32> to vector<16x4xbf16>
    %cst_35 = arith.constant dense<0.000000e+00> : vector<16x4xf32>
    %130 = tpu.matmul %128, %129, %cst_35 {dimension_numbers = #tpu.dot_dimension_numbers<[1], [0], [0], [1], [0, 0, 1, 1], [], []>} : vector<16x16xbf16>, vector<16x4xbf16>, vector<16x4xf32> -> vector<16x4xf32>
    %131 = vector.extract_strided_slice %9 {offsets = [0, 28], sizes = [16, 4], strides = [1, 1]} : vector<16x64xf32> to vector<16x4xf32>
    %132 = vector.extract_strided_slice %10 {offsets = [0, 28], sizes = [16, 4], strides = [1, 1]} : vector<16x64xf32> to vector<16x4xf32>
    %133 = vector.extract_strided_slice %11 {offsets = [0, 28], sizes = [16, 4], strides = [1, 1]} : vector<16x64xf32> to vector<16x4xf32>
    %cst_36 = arith.constant dense<0.000000e+00> : vector<16x16xf32>
    %134 = tpu.matmul %131, %132, %cst_36 {dimension_numbers = #tpu.dot_dimension_numbers<[1], [1], [0], [0], [0, 0, 1, 0], [], []>} : vector<16x4xf32>, vector<16x4xf32>, vector<16x16xf32> -> vector<16x16xf32>
    %cst_37 = arith.constant dense<0xFF800000> : vector<16xf32>
    %135 = vector.multi_reduction <maximumf>, %134, %cst_37 [1] : vector<16x16xf32> to vector<16xf32>
    %136 = vector.shape_cast %135 : vector<16xf32> to vector<16x1xf32>
    %137 = vector.broadcast %136 : vector<16x1xf32> to vector<16x16xf32>
    %138 = arith.subf %134, %137 : vector<16x16xf32>
    %139 = math.exp %138 : vector<16x16xf32>
    %cst_38 = arith.constant dense<0.000000e+00> : vector<16xf32>
    %140 = vector.multi_reduction <add>, %139, %cst_38 [1] : vector<16x16xf32> to vector<16xf32>
    %141 = vector.shape_cast %140 : vector<16xf32> to vector<16x1xf32>
    %142 = tpu.reciprocal %141 {approx = true} : vector<16x1xf32> -> vector<16x1xf32>
    %143 = vector.broadcast %142 : vector<16x1xf32> to vector<16x16xf32>
    %144 = arith.mulf %139, %143 : vector<16x16xf32>
    %145 = arith.truncf %144 : vector<16x16xf32> to vector<16x16xbf16>
    %146 = arith.truncf %133 : vector<16x4xf32> to vector<16x4xbf16>
    %cst_39 = arith.constant dense<0.000000e+00> : vector<16x4xf32>
    %147 = tpu.matmul %145, %146, %cst_39 {dimension_numbers = #tpu.dot_dimension_numbers<[1], [0], [0], [1], [0, 0, 1, 1], [], []>} : vector<16x16xbf16>, vector<16x4xbf16>, vector<16x4xf32> -> vector<16x4xf32>
    %148 = vector.extract_strided_slice %9 {offsets = [0, 32], sizes = [16, 4], strides = [1, 1]} : vector<16x64xf32> to vector<16x4xf32>
    %149 = vector.extract_strided_slice %10 {offsets = [0, 32], sizes = [16, 4], strides = [1, 1]} : vector<16x64xf32> to vector<16x4xf32>
    %150 = vector.extract_strided_slice %11 {offsets = [0, 32], sizes = [16, 4], strides = [1, 1]} : vector<16x64xf32> to vector<16x4xf32>
    %cst_40 = arith.constant dense<0.000000e+00> : vector<16x16xf32>
    %151 = tpu.matmul %148, %149, %cst_40 {dimension_numbers = #tpu.dot_dimension_numbers<[1], [1], [0], [0], [0, 0, 1, 0], [], []>} : vector<16x4xf32>, vector<16x4xf32>, vector<16x16xf32> -> vector<16x16xf32>
    %cst_41 = arith.constant dense<0xFF800000> : vector<16xf32>
    %152 = vector.multi_reduction <maximumf>, %151, %cst_41 [1] : vector<16x16xf32> to vector<16xf32>
    %153 = vector.shape_cast %152 : vector<16xf32> to vector<16x1xf32>
    %154 = vector.broadcast %153 : vector<16x1xf32> to vector<16x16xf32>
    %155 = arith.subf %151, %154 : vector<16x16xf32>
    %156 = math.exp %155 : vector<16x16xf32>
    %cst_42 = arith.constant dense<0.000000e+00> : vector<16xf32>
    %157 = vector.multi_reduction <add>, %156, %cst_42 [1] : vector<16x16xf32> to vector<16xf32>
    %158 = vector.shape_cast %157 : vector<16xf32> to vector<16x1xf32>
    %159 = tpu.reciprocal %158 {approx = true} : vector<16x1xf32> -> vector<16x1xf32>
    %160 = vector.broadcast %159 : vector<16x1xf32> to vector<16x16xf32>
    %161 = arith.mulf %156, %160 : vector<16x16xf32>
    %162 = arith.truncf %161 : vector<16x16xf32> to vector<16x16xbf16>
    %163 = arith.truncf %150 : vector<16x4xf32> to vector<16x4xbf16>
    %cst_43 = arith.constant dense<0.000000e+00> : vector<16x4xf32>
    %164 = tpu.matmul %162, %163, %cst_43 {dimension_numbers = #tpu.dot_dimension_numbers<[1], [0], [0], [1], [0, 0, 1, 1], [], []>} : vector<16x16xbf16>, vector<16x4xbf16>, vector<16x4xf32> -> vector<16x4xf32>
    %165 = vector.extract_strided_slice %9 {offsets = [0, 36], sizes = [16, 4], strides = [1, 1]} : vector<16x64xf32> to vector<16x4xf32>
    %166 = vector.extract_strided_slice %10 {offsets = [0, 36], sizes = [16, 4], strides = [1, 1]} : vector<16x64xf32> to vector<16x4xf32>
    %167 = vector.extract_strided_slice %11 {offsets = [0, 36], sizes = [16, 4], strides = [1, 1]} : vector<16x64xf32> to vector<16x4xf32>
    %cst_44 = arith.constant dense<0.000000e+00> : vector<16x16xf32>
    %168 = tpu.matmul %165, %166, %cst_44 {dimension_numbers = #tpu.dot_dimension_numbers<[1], [1], [0], [0], [0, 0, 1, 0], [], []>} : vector<16x4xf32>, vector<16x4xf32>, vector<16x16xf32> -> vector<16x16xf32>
    %cst_45 = arith.constant dense<0xFF800000> : vector<16xf32>
    %169 = vector.multi_reduction <maximumf>, %168, %cst_45 [1] : vector<16x16xf32> to vector<16xf32>
    %170 = vector.shape_cast %169 : vector<16xf32> to vector<16x1xf32>
    %171 = vector.broadcast %170 : vector<16x1xf32> to vector<16x16xf32>
    %172 = arith.subf %168, %171 : vector<16x16xf32>
    %173 = math.exp %172 : vector<16x16xf32>
    %cst_46 = arith.constant dense<0.000000e+00> : vector<16xf32>
    %174 = vector.multi_reduction <add>, %173, %cst_46 [1] : vector<16x16xf32> to vector<16xf32>
    %175 = vector.shape_cast %174 : vector<16xf32> to vector<16x1xf32>
    %176 = tpu.reciprocal %175 {approx = true} : vector<16x1xf32> -> vector<16x1xf32>
    %177 = vector.broadcast %176 : vector<16x1xf32> to vector<16x16xf32>
    %178 = arith.mulf %173, %177 : vector<16x16xf32>
    %179 = arith.truncf %178 : vector<16x16xf32> to vector<16x16xbf16>
    %180 = arith.truncf %167 : vector<16x4xf32> to vector<16x4xbf16>
    %cst_47 = arith.constant dense<0.000000e+00> : vector<16x4xf32>
    %181 = tpu.matmul %179, %180, %cst_47 {dimension_numbers = #tpu.dot_dimension_numbers<[1], [0], [0], [1], [0, 0, 1, 1], [], []>} : vector<16x16xbf16>, vector<16x4xbf16>, vector<16x4xf32> -> vector<16x4xf32>
    %182 = vector.extract_strided_slice %9 {offsets = [0, 40], sizes = [16, 4], strides = [1, 1]} : vector<16x64xf32> to vector<16x4xf32>
    %183 = vector.extract_strided_slice %10 {offsets = [0, 40], sizes = [16, 4], strides = [1, 1]} : vector<16x64xf32> to vector<16x4xf32>
    %184 = vector.extract_strided_slice %11 {offsets = [0, 40], sizes = [16, 4], strides = [1, 1]} : vector<16x64xf32> to vector<16x4xf32>
    %cst_48 = arith.constant dense<0.000000e+00> : vector<16x16xf32>
    %185 = tpu.matmul %182, %183, %cst_48 {dimension_numbers = #tpu.dot_dimension_numbers<[1], [1], [0], [0], [0, 0, 1, 0], [], []>} : vector<16x4xf32>, vector<16x4xf32>, vector<16x16xf32> -> vector<16x16xf32>
    %cst_49 = arith.constant dense<0xFF800000> : vector<16xf32>
    %186 = vector.multi_reduction <maximumf>, %185, %cst_49 [1] : vector<16x16xf32> to vector<16xf32>
    %187 = vector.shape_cast %186 : vector<16xf32> to vector<16x1xf32>
    %188 = vector.broadcast %187 : vector<16x1xf32> to vector<16x16xf32>
    %189 = arith.subf %185, %188 : vector<16x16xf32>
    %190 = math.exp %189 : vector<16x16xf32>
    %cst_50 = arith.constant dense<0.000000e+00> : vector<16xf32>
    %191 = vector.multi_reduction <add>, %190, %cst_50 [1] : vector<16x16xf32> to vector<16xf32>
    %192 = vector.shape_cast %191 : vector<16xf32> to vector<16x1xf32>
    %193 = tpu.reciprocal %192 {approx = true} : vector<16x1xf32> -> vector<16x1xf32>
    %194 = vector.broadcast %193 : vector<16x1xf32> to vector<16x16xf32>
    %195 = arith.mulf %190, %194 : vector<16x16xf32>
    %196 = arith.truncf %195 : vector<16x16xf32> to vector<16x16xbf16>
    %197 = arith.truncf %184 : vector<16x4xf32> to vector<16x4xbf16>
    %cst_51 = arith.constant dense<0.000000e+00> : vector<16x4xf32>
    %198 = tpu.matmul %196, %197, %cst_51 {dimension_numbers = #tpu.dot_dimension_numbers<[1], [0], [0], [1], [0, 0, 1, 1], [], []>} : vector<16x16xbf16>, vector<16x4xbf16>, vector<16x4xf32> -> vector<16x4xf32>
    %199 = vector.extract_strided_slice %9 {offsets = [0, 44], sizes = [16, 4], strides = [1, 1]} : vector<16x64xf32> to vector<16x4xf32>
    %200 = vector.extract_strided_slice %10 {offsets = [0, 44], sizes = [16, 4], strides = [1, 1]} : vector<16x64xf32> to vector<16x4xf32>
    %201 = vector.extract_strided_slice %11 {offsets = [0, 44], sizes = [16, 4], strides = [1, 1]} : vector<16x64xf32> to vector<16x4xf32>
    %cst_52 = arith.constant dense<0.000000e+00> : vector<16x16xf32>
    %202 = tpu.matmul %199, %200, %cst_52 {dimension_numbers = #tpu.dot_dimension_numbers<[1], [1], [0], [0], [0, 0, 1, 0], [], []>} : vector<16x4xf32>, vector<16x4xf32>, vector<16x16xf32> -> vector<16x16xf32>
    %cst_53 = arith.constant dense<0xFF800000> : vector<16xf32>
    %203 = vector.multi_reduction <maximumf>, %202, %cst_53 [1] : vector<16x16xf32> to vector<16xf32>
    %204 = vector.shape_cast %203 : vector<16xf32> to vector<16x1xf32>
    %205 = vector.broadcast %204 : vector<16x1xf32> to vector<16x16xf32>
    %206 = arith.subf %202, %205 : vector<16x16xf32>
    %207 = math.exp %206 : vector<16x16xf32>
    %cst_54 = arith.constant dense<0.000000e+00> : vector<16xf32>
    %208 = vector.multi_reduction <add>, %207, %cst_54 [1] : vector<16x16xf32> to vector<16xf32>
    %209 = vector.shape_cast %208 : vector<16xf32> to vector<16x1xf32>
    %210 = tpu.reciprocal %209 {approx = true} : vector<16x1xf32> -> vector<16x1xf32>
    %211 = vector.broadcast %210 : vector<16x1xf32> to vector<16x16xf32>
    %212 = arith.mulf %207, %211 : vector<16x16xf32>
    %213 = arith.truncf %212 : vector<16x16xf32> to vector<16x16xbf16>
    %214 = arith.truncf %201 : vector<16x4xf32> to vector<16x4xbf16>
    %cst_55 = arith.constant dense<0.000000e+00> : vector<16x4xf32>
    %215 = tpu.matmul %213, %214, %cst_55 {dimension_numbers = #tpu.dot_dimension_numbers<[1], [0], [0], [1], [0, 0, 1, 1], [], []>} : vector<16x16xbf16>, vector<16x4xbf16>, vector<16x4xf32> -> vector<16x4xf32>
    %216 = vector.extract_strided_slice %9 {offsets = [0, 48], sizes = [16, 4], strides = [1, 1]} : vector<16x64xf32> to vector<16x4xf32>
    %217 = vector.extract_strided_slice %10 {offsets = [0, 48], sizes = [16, 4], strides = [1, 1]} : vector<16x64xf32> to vector<16x4xf32>
    %218 = vector.extract_strided_slice %11 {offsets = [0, 48], sizes = [16, 4], strides = [1, 1]} : vector<16x64xf32> to vector<16x4xf32>
    %cst_56 = arith.constant dense<0.000000e+00> : vector<16x16xf32>
    %219 = tpu.matmul %216, %217, %cst_56 {dimension_numbers = #tpu.dot_dimension_numbers<[1], [1], [0], [0], [0, 0, 1, 0], [], []>} : vector<16x4xf32>, vector<16x4xf32>, vector<16x16xf32> -> vector<16x16xf32>
    %cst_57 = arith.constant dense<0xFF800000> : vector<16xf32>
    %220 = vector.multi_reduction <maximumf>, %219, %cst_57 [1] : vector<16x16xf32> to vector<16xf32>
    %221 = vector.shape_cast %220 : vector<16xf32> to vector<16x1xf32>
    %222 = vector.broadcast %221 : vector<16x1xf32> to vector<16x16xf32>
    %223 = arith.subf %219, %222 : vector<16x16xf32>
    %224 = math.exp %223 : vector<16x16xf32>
    %cst_58 = arith.constant dense<0.000000e+00> : vector<16xf32>
    %225 = vector.multi_reduction <add>, %224, %cst_58 [1] : vector<16x16xf32> to vector<16xf32>
    %226 = vector.shape_cast %225 : vector<16xf32> to vector<16x1xf32>
    %227 = tpu.reciprocal %226 {approx = true} : vector<16x1xf32> -> vector<16x1xf32>
    %228 = vector.broadcast %227 : vector<16x1xf32> to vector<16x16xf32>
    %229 = arith.mulf %224, %228 : vector<16x16xf32>
    %230 = arith.truncf %229 : vector<16x16xf32> to vector<16x16xbf16>
    %231 = arith.truncf %218 : vector<16x4xf32> to vector<16x4xbf16>
    %cst_59 = arith.constant dense<0.000000e+00> : vector<16x4xf32>
    %232 = tpu.matmul %230, %231, %cst_59 {dimension_numbers = #tpu.dot_dimension_numbers<[1], [0], [0], [1], [0, 0, 1, 1], [], []>} : vector<16x16xbf16>, vector<16x4xbf16>, vector<16x4xf32> -> vector<16x4xf32>
    %233 = vector.extract_strided_slice %9 {offsets = [0, 52], sizes = [16, 4], strides = [1, 1]} : vector<16x64xf32> to vector<16x4xf32>
    %234 = vector.extract_strided_slice %10 {offsets = [0, 52], sizes = [16, 4], strides = [1, 1]} : vector<16x64xf32> to vector<16x4xf32>
    %235 = vector.extract_strided_slice %11 {offsets = [0, 52], sizes = [16, 4], strides = [1, 1]} : vector<16x64xf32> to vector<16x4xf32>
    %cst_60 = arith.constant dense<0.000000e+00> : vector<16x16xf32>
    %236 = tpu.matmul %233, %234, %cst_60 {dimension_numbers = #tpu.dot_dimension_numbers<[1], [1], [0], [0], [0, 0, 1, 0], [], []>} : vector<16x4xf32>, vector<16x4xf32>, vector<16x16xf32> -> vector<16x16xf32>
    %cst_61 = arith.constant dense<0xFF800000> : vector<16xf32>
    %237 = vector.multi_reduction <maximumf>, %236, %cst_61 [1] : vector<16x16xf32> to vector<16xf32>
    %238 = vector.shape_cast %237 : vector<16xf32> to vector<16x1xf32>
    %239 = vector.broadcast %238 : vector<16x1xf32> to vector<16x16xf32>
    %240 = arith.subf %236, %239 : vector<16x16xf32>
    %241 = math.exp %240 : vector<16x16xf32>
    %cst_62 = arith.constant dense<0.000000e+00> : vector<16xf32>
    %242 = vector.multi_reduction <add>, %241, %cst_62 [1] : vector<16x16xf32> to vector<16xf32>
    %243 = vector.shape_cast %242 : vector<16xf32> to vector<16x1xf32>
    %244 = tpu.reciprocal %243 {approx = true} : vector<16x1xf32> -> vector<16x1xf32>
    %245 = vector.broadcast %244 : vector<16x1xf32> to vector<16x16xf32>
    %246 = arith.mulf %241, %245 : vector<16x16xf32>
    %247 = arith.truncf %246 : vector<16x16xf32> to vector<16x16xbf16>
    %248 = arith.truncf %235 : vector<16x4xf32> to vector<16x4xbf16>
    %cst_63 = arith.constant dense<0.000000e+00> : vector<16x4xf32>
    %249 = tpu.matmul %247, %248, %cst_63 {dimension_numbers = #tpu.dot_dimension_numbers<[1], [0], [0], [1], [0, 0, 1, 1], [], []>} : vector<16x16xbf16>, vector<16x4xbf16>, vector<16x4xf32> -> vector<16x4xf32>
    %250 = vector.extract_strided_slice %9 {offsets = [0, 56], sizes = [16, 4], strides = [1, 1]} : vector<16x64xf32> to vector<16x4xf32>
    %251 = vector.extract_strided_slice %10 {offsets = [0, 56], sizes = [16, 4], strides = [1, 1]} : vector<16x64xf32> to vector<16x4xf32>
    %252 = vector.extract_strided_slice %11 {offsets = [0, 56], sizes = [16, 4], strides = [1, 1]} : vector<16x64xf32> to vector<16x4xf32>
    %cst_64 = arith.constant dense<0.000000e+00> : vector<16x16xf32>
    %253 = tpu.matmul %250, %251, %cst_64 {dimension_numbers = #tpu.dot_dimension_numbers<[1], [1], [0], [0], [0, 0, 1, 0], [], []>} : vector<16x4xf32>, vector<16x4xf32>, vector<16x16xf32> -> vector<16x16xf32>
    %cst_65 = arith.constant dense<0xFF800000> : vector<16xf32>
    %254 = vector.multi_reduction <maximumf>, %253, %cst_65 [1] : vector<16x16xf32> to vector<16xf32>
    %255 = vector.shape_cast %254 : vector<16xf32> to vector<16x1xf32>
    %256 = vector.broadcast %255 : vector<16x1xf32> to vector<16x16xf32>
    %257 = arith.subf %253, %256 : vector<16x16xf32>
    %258 = math.exp %257 : vector<16x16xf32>
    %cst_66 = arith.constant dense<0.000000e+00> : vector<16xf32>
    %259 = vector.multi_reduction <add>, %258, %cst_66 [1] : vector<16x16xf32> to vector<16xf32>
    %260 = vector.shape_cast %259 : vector<16xf32> to vector<16x1xf32>
    %261 = tpu.reciprocal %260 {approx = true} : vector<16x1xf32> -> vector<16x1xf32>
    %262 = vector.broadcast %261 : vector<16x1xf32> to vector<16x16xf32>
    %263 = arith.mulf %258, %262 : vector<16x16xf32>
    %264 = arith.truncf %263 : vector<16x16xf32> to vector<16x16xbf16>
    %265 = arith.truncf %252 : vector<16x4xf32> to vector<16x4xbf16>
    %cst_67 = arith.constant dense<0.000000e+00> : vector<16x4xf32>
    %266 = tpu.matmul %264, %265, %cst_67 {dimension_numbers = #tpu.dot_dimension_numbers<[1], [0], [0], [1], [0, 0, 1, 1], [], []>} : vector<16x16xbf16>, vector<16x4xbf16>, vector<16x4xf32> -> vector<16x4xf32>
    %267 = vector.extract_strided_slice %9 {offsets = [0, 60], sizes = [16, 4], strides = [1, 1]} : vector<16x64xf32> to vector<16x4xf32>
    %268 = vector.extract_strided_slice %10 {offsets = [0, 60], sizes = [16, 4], strides = [1, 1]} : vector<16x64xf32> to vector<16x4xf32>
    %269 = vector.extract_strided_slice %11 {offsets = [0, 60], sizes = [16, 4], strides = [1, 1]} : vector<16x64xf32> to vector<16x4xf32>
    %cst_68 = arith.constant dense<0.000000e+00> : vector<16x16xf32>
    %270 = tpu.matmul %267, %268, %cst_68 {dimension_numbers = #tpu.dot_dimension_numbers<[1], [1], [0], [0], [0, 0, 1, 0], [], []>} : vector<16x4xf32>, vector<16x4xf32>, vector<16x16xf32> -> vector<16x16xf32>
    %cst_69 = arith.constant dense<0xFF800000> : vector<16xf32>
    %271 = vector.multi_reduction <maximumf>, %270, %cst_69 [1] : vector<16x16xf32> to vector<16xf32>
    %272 = vector.shape_cast %271 : vector<16xf32> to vector<16x1xf32>
    %273 = vector.broadcast %272 : vector<16x1xf32> to vector<16x16xf32>
    %274 = arith.subf %270, %273 : vector<16x16xf32>
    %275 = math.exp %274 : vector<16x16xf32>
    %cst_70 = arith.constant dense<0.000000e+00> : vector<16xf32>
    %276 = vector.multi_reduction <add>, %275, %cst_70 [1] : vector<16x16xf32> to vector<16xf32>
    %277 = vector.shape_cast %276 : vector<16xf32> to vector<16x1xf32>
    %278 = tpu.reciprocal %277 {approx = true} : vector<16x1xf32> -> vector<16x1xf32>
    %279 = vector.broadcast %278 : vector<16x1xf32> to vector<16x16xf32>
    %280 = arith.mulf %275, %279 : vector<16x16xf32>
    %281 = arith.truncf %280 : vector<16x16xf32> to vector<16x16xbf16>
    %282 = arith.truncf %269 : vector<16x4xf32> to vector<16x4xbf16>
    %cst_71 = arith.constant dense<0.000000e+00> : vector<16x4xf32>
    %283 = tpu.matmul %281, %282, %cst_71 {dimension_numbers = #tpu.dot_dimension_numbers<[1], [0], [0], [1], [0, 0, 1, 1], [], []>} : vector<16x16xbf16>, vector<16x4xbf16>, vector<16x4xf32> -> vector<16x4xf32>
    %284 = tpu.concatenate %28, %45, %62, %79, %96, %113, %130, %147, %164, %181, %198, %215, %232, %249, %266, %283 in 1 : vector<16x4xf32>, vector<16x4xf32>, vector<16x4xf32>, vector<16x4xf32>, vector<16x4xf32>, vector<16x4xf32>, vector<16x4xf32>, vector<16x4xf32>, vector<16x4xf32>, vector<16x4xf32>, vector<16x4xf32>, vector<16x4xf32>, vector<16x4xf32>, vector<16x4xf32>, vector<16x4xf32>, vector<16x4xf32> -> vector<16x64xf32>
    %285 = arith.truncf %284 : vector<16x64xf32> to vector<16x64xbf16>
    %c0_72 = arith.constant 0 : index
    %c0_73 = arith.constant 0 : index
    %286 = vector.load %arg4[%c0_72, %c0_73] : memref<64x64xbf16, #tpu.memory_space<vmem>>, vector<64x64xbf16>
    %cst_74 = arith.constant dense<0.000000e+00> : vector<16x64xf32>
    %287 = tpu.matmul %285, %286, %cst_74 {dimension_numbers = #tpu.dot_dimension_numbers<[1], [0], [0], [1], [0, 0, 1, 1], [], []>} : vector<16x64xbf16>, vector<64x64xbf16>, vector<16x64xf32> -> vector<16x64xf32>
    %c0_75 = arith.constant 0 : index
    %c0_76 = arith.constant 0 : index
    %288 = vector.load %arg5[%c0_75, %c0_76] : memref<1x64xf32, #tpu.memory_space<vmem>>, vector<1x64xf32>
    %289 = vector.broadcast %288 : vector<1x64xf32> to vector<16x64xf32>
    %290 = arith.addf %287, %289 : vector<16x64xf32>
    %291 = arith.addf %290, %3 : vector<16x64xf32>
    %cst_77 = arith.constant 1.000000e+00 : f32
    %292 = vector.broadcast %cst_77 : f32 to vector<16x64xf32>
    %293 = arith.mulf %291, %292 : vector<16x64xf32>
    %c0_78 = arith.constant 0 : index
    %c0_79 = arith.constant 0 : index
    %c0_80 = arith.constant 0 : index
    %294 = vector.load %arg6[%c0_78, %c0_79, %c0_80] : memref<1x16x64xf32, #tpu.memory_space<vmem>>, vector<1x16x64xf32>
    %295 = vector.shape_cast %294 : vector<1x16x64xf32> to vector<16x64xf32>
    %296 = vector.shape_cast %293 : vector<16x64xf32> to vector<1x16x64xf32>
    tpu.vector_store %arg6[%c0_78, %c0_79, %c0_80], %296 {strides = array<i32>} : memref<1x16x64xf32, #tpu.memory_space<vmem>>, vector<1x16x64xf32>,
    return
  }
  func.func @transform_0(%arg0: i32) -> (i32, i32, i32) {
    %c0_i32 = arith.constant 0 : i32
    %c0_i32_0 = arith.constant 0 : i32
    %c0_i32_1 = arith.constant 0 : i32
    return %arg0, %c0_i32, %c0_i32_0 : i32, i32, i32
  }
  func.func @transform_1(%arg0: i32) -> (i32, i32, i32) {
    %c0_i32 = arith.constant 0 : i32
    %c0_i32_0 = arith.constant 0 : i32
    %c0_i32_1 = arith.constant 0 : i32
    return %arg0, %c0_i32, %c0_i32_0 : i32, i32, i32
  }
  func.func @transform_2(%arg0: i32) -> (i32, i32) {
    %c0_i32 = arith.constant 0 : i32
    %c0_i32_0 = arith.constant 0 : i32
    %c0_i32_1 = arith.constant 0 : i32
    return %c0_i32, %c0_i32_0 : i32, i32
  }
  func.func @transform_3(%arg0: i32) -> (i32, i32) {
    %c0_i32 = arith.constant 0 : i32
    %c0_i32_0 = arith.constant 0 : i32
    %c0_i32_1 = arith.constant 0 : i32
    return %c0_i32, %c0_i32_0 : i32, i32
  }
  func.func @transform_4(%arg0: i32) -> (i32, i32) {
    %c0_i32 = arith.constant 0 : i32
    %c0_i32_0 = arith.constant 0 : i32
    %c0_i32_1 = arith.constant 0 : i32
    return %c0_i32, %c0_i32_0 : i32, i32
  }
  func.func @transform_5(%arg0: i32) -> (i32, i32, i32) {
    %c0_i32 = arith.constant 0 : i32
    %c0_i32_0 = arith.constant 0 : i32
    %c0_i32_1 = arith.constant 0 : i32
    return %arg0, %c0_i32, %c0_i32_0 : i32, i32, i32
  }
}

</mosaic_0001>

<bundles_post_ra>
// kernel: mid_block.5
= control target key start
LH: loop header
LB: loop body
LE: loop exit
PB: predicated region body
PF: predicated region fallthrough
CT: control target
= control target key end

     0   :  { %s2689_s13 = smov 0   ;;  %s3382_s0 = inlined_call_operand.vmem [shape: f32[2,64,16], index: 0, kind: input, shape index: {}]   ;;  %s3383_s1 = inlined_call_operand.vmem [shape: f32[64,64], index: 1, kind: input, shape index: {}]   ;;  %s3384_s2 = inlined_call_operand.vmem [shape: f32[64,1], index: 2, kind: input, shape index: {}]   ;;  %s3385_s3 = inlined_call_operand.vmem [shape: f32[64,1], index: 3, kind: input, shape index: {}]   ;;  %s3386_s4 = inlined_call_operand.vmem [shape: bf16[64,192], index: 4, kind: input, shape index: {}]   ;;  %s3387_s5 = inlined_call_operand.vmem [shape: f32[64,1], index: 5, kind: input, shape index: {}]   ;;  %s3388_s6 = inlined_call_operand.vmem [shape: f32[64,1], index: 6, kind: input, shape index: {}]   ;;  %s3389_s7 = inlined_call_operand.vmem [shape: f32[64,1], index: 7, kind: input, shape index: {}]   ;;  %s3390_s8 = inlined_call_operand.vmem [shape: bf16[64,192], index: 8, kind: input, shape index: {}]   ;;  %s3391_s9 = inlined_call_operand.vmem [shape: f32[64,1], index: 9, kind: input, shape index: {}]   ;;  %s3392_s10 = inlined_call_operand.vmem [shape: f32[2,64,16], index: 10, kind: output, shape index: {}]  }
   0x1 LB: > { %s2010_s14 = sadd.s32 4294967295, %s2628_s13   ;;  %p2014_p0 = scmp.ge.s32.totalorder %s2628_s13, 1  ;;  %s2628_s13 = sphi %s2689_s13, %s20_s13  }
   0x2   : > { %p312_p1 = scmp.lt.s32.totalorder %s2628_s13, 3 }
   0x4   : > { %p313_p2 = pnand %p2014_p0, %p312_p1 }
   0x5   : > { %p350_p3 = scmp.lt.s32.totalorder (!%p313_p2), %s2010_s14, 1  ;;  %v369_v0 = vld [vmem:[%s3383_s1] sm:$0xff] (!%p313_p2)  ;;  %vm393_vm0 = vcmask (!%p313_p2), 523264   ;;  %v2755_v18 = vld [vmem:[%s3383_s1 + $0x8] sm:$0xff] (!%p313_p2)  ;;  %v2760_v19 = vld [vmem:[%s3383_s1 + $0x10] sm:$0xff] (!%p313_p2)  ;;  %vm523_vm1 = vcmask (!%p313_p2), 130048  }
   0x6   : > { %316 = sbr.rel (%p313_p2) target bundleno = 2181 (0x885), region = 60  ;;  %2199 = vmatprep.mubr.msk.f32.mxu0 (!%p313_p2), %vm393_vm0, %v369_v0  ;;  %2255 = vmatprep.mubr.msk.f32.mxu1 (!%p313_p2), %vm393_vm0, %v369_v0  ;;  %v2773_v23 = vld [vmem:[%s3383_s1 + $0x18] sm:$0xff] (!%p313_p2)  ;;  %v2778_v24 = vld [vmem:[%s3383_s1 + $0x20] sm:$0xff] (!%p313_p2)  ;;  %v2791_v28 = vld [vmem:[%s3383_s1 + $0x28] sm:$0xff] (!%p313_p2)  ;;  %v2630_v48 = vmov (!%p313_p2), 0   ;;  %s2631_s18 = smov (!%p313_p2), 1  }
   0x7   : > { %v2796_v29 = vld [vmem:[%s3383_s1 + $0x30] sm:$0xff] (!%p313_p2)  ;;  %v2805_v31 = vld [vmem:[%s3383_s1 + $0x38] sm:$0xff] (!%p313_p2)  ;;  %2371 = vset.pattern.permute.xlu1 (!%p313_p2), %v2630_v48  ;;  %2372 = vset.pattern.permute.xlu0 (!%p313_p2), %v2630_v48  ;;  %vm933_vm2 = vcmask (!%p313_p2), 7168   ;;  %vm942_vm3 = vcmask (!%p313_p2), 138240   ;;  %s2632_s19 = smov (!%p313_p2), 127   ;;  %s2633_s21 = smov (!%p313_p2), 126  }
   0x8   : > { %vm2959_vm4 = vmpackc.low (!%p313_p2), %vm942_vm3, %vm942_vm3 }
   0xd   : > { %s3396_s14 = smov (!%p350_p3, %s2010_s14), 1 }
   0xe   : > { %s2117_s17 = sshll.u32 %s3396_s14, 6 }
   0xf   : > { %s2710_s20 = scalar_lea.vmem %s3382_s0, %s2117_s17  ;;  %s3353_s24 = scalar_lea.vmem %s3392_s10, %s2117_s17 }
  0x10   : > { %v2713_v1 = vld [vmem:[%s2710_s20] sm:$0xff]  ;;  %v2716_v2 = vld [vmem:[%s2710_s20 + $0x8] sm:$0xff]  ;;  %v2719_v3 = vld [vmem:[%s2710_s20 + $0x10] sm:$0xff] }
  0x11   : > { %v2295_v4 = vpack.c.bf16 %v2716_v2, %v2713_v1  ;;  %v2724_v5 = vld [vmem:[%s2710_s20 + $0x18] sm:$0xff]  ;;  %v2729_v7 = vld [vmem:[%s2710_s20 + $0x20] sm:$0xff]  ;;  %v2732_v8 = vld [vmem:[%s2710_s20 + $0x28] sm:$0xff]  ;;  %v548_v13 = vmul.f32 %v2713_v1, %v2713_v1  ;;  %v549_v14 = vmul.f32 %v2716_v2, %v2716_v2  ;;  %v550_v16 = vmul.f32 %v2719_v3, %v2719_v3 }
  0x12   : > { %v2299_v6 = vpack.c.bf16 %v2724_v5, %v2719_v3  ;;  %v2303_v9 = vpack.c.bf16 %v2732_v8, %v2729_v7  ;;  %v2737_v10 = vld [vmem:[%s2710_s20 + $0x30] sm:$0xff]  ;;  %v2740_v11 = vld [vmem:[%s2710_s20 + $0x38] sm:$0xff]  ;;  %v551_v17 = vmul.f32 %v2724_v5, %v2724_v5  ;;  %v552_v21 = vmul.f32 %v2729_v7, %v2729_v7 }
  0x13   : > { %2296 = vmatprep.subr.bf16.mxu0 %v2295_v4  ;;  %v2307_v12 = vpack.c.bf16 %v2740_v11, %v2737_v10  ;;  %v2311_v15 = vpack.c.bf16 %v549_v14, %v548_v13  ;;  %v553_v22 = vmul.f32 %v2732_v8, %v2732_v8  ;;  %v554_v26 = vmul.f32 %v2737_v10, %v2737_v10  ;;  %v389_v13 = vld [vmem:[%s3385_s3 + $0x20] sm:$0xff] }
  0x14   : > { %2298 = vmatpush3.bf16.msra.mxu0 %v2295_v4  ;;  %v2315_v20 = vpack.c.bf16 %v551_v17, %v550_v16  ;;  %v555_v27 = vmul.f32 %v2740_v11, %v2740_v11  ;;  %v385_v4 = vld [vmem:[%s3385_s3] sm:$0xff] }
  0x15   : > { %2300 = vmatprep.subr.bf16.mxu0 %v2299_v6  ;;  %v2319_v25 = vpack.c.bf16 %v553_v22, %v552_v21 }
  0x16   : > { %v2323_v30 = vpack.c.bf16 %v555_v27, %v554_v26 }
  0x18   : > { %2302 = vmatpush3.bf16.msra.mxu0 %v2299_v6  ;;  %v386_v6 = vld [vmem:[%s3385_s3 + $0x8] sm:$0xff] }
  0x19   : > { %2304 = vmatprep.subr.bf16.mxu0 %v2303_v9 }
  0x1c   : > { %2306 = vmatpush3.bf16.msra.mxu0 %v2303_v9  ;;  %v387_v9 = vld [vmem:[%s3385_s3 + $0x10] sm:$0xff] }
  0x1d   : > { %2308 = vmatprep.subr.bf16.mxu0 %v2307_v12 }
  0x20   : > { %2310 = vmatpush3.bf16.msra.mxu0 %v2307_v12  ;;  %v388_v12 = vld [vmem:[%s3385_s3 + $0x18] sm:$0xff] }
  0x21   : > { %2312 = vmatprep.subr.bf16.mxu0 %v2311_v15 }
  0x23   : > { %2200 = vmatmul.mubr.msk.f32.vlgmr.msra.gmra.mrb[0].mxu0 %vm393_vm0, %v2755_v18 }
  0x24   : > { %2314 = vmatpush3.bf16.msra.mxu0 %v2311_v15  ;;  %2202 = vmatprep.mubr.msk.f32.mxu0 %vm393_vm0, %v2760_v19 }
  0x25   : > { %2316 = vmatprep.subr.bf16.mxu0 %v2315_v20 }
  0x27   : > { %2203 = vmatmul.mubr.msk.f32.gmra.mrb[2].mxu0 %vm393_vm0, %v2773_v23 }
  0x28   : > { %2318 = vmatpush3.bf16.msra.mxu0 %v2315_v20  ;;  %2205 = vmatprep.mubr.msk.f32.mxu0 %vm393_vm0, %v2778_v24 }
  0x29   : > { %2320 = vmatprep.subr.bf16.mxu0 %v2319_v25 }
  0x2b   : > { %2206 = vmatmul.mubr.msk.f32.gmra.mrb[4].mxu0 %vm393_vm0, %v2791_v28 }
  0x2c   : > { %2322 = vmatpush3.bf16.msra.mxu0 %v2319_v25  ;;  %2208 = vmatprep.mubr.msk.f32.mxu0 %vm393_vm0, %v2796_v29 }
  0x2d   : > { %2324 = vmatprep.subr.bf16.mxu0 %v2323_v30 }
  0x2f   : > { %2209 = vmatmul.mubr.msk.f32.gmra.mrb[6].mxu0 %vm393_vm0, %v2805_v31 }
  0x30   : > { %2326 = vmatpush3.bf16.msra.mxu0 %v2323_v30  ;;  %2227 = vmatprep.mubr.msk.f32.mxu0 %vm393_vm0, %v369_v0 }
  0x31   : > { %1107 = vmatprep.subr.bf16.mxu0 %v2630_v48 }
  0x33   : > { %2228 = vmatmul.mubr.msk.f32.vlgmr.msra.gmra.mrb[8].mxu0 %vm393_vm0, %v2755_v18 }
  0x34   : > { %2230 = vmatprep.mubr.msk.f32.mxu0 %vm393_vm0, %v2760_v19 }
  0x37   : > { %2231 = vmatmul.mubr.msk.f32.gmra.mrb[10].mxu0 %vm393_vm0, %v2773_v23 }
  0x38   : > { %2233 = vmatprep.mubr.msk.f32.mxu0 %vm393_vm0, %v2778_v24 }
  0x3b   : > { %2234 = vmatmul.mubr.msk.f32.gmra.mrb[12].mxu0 %vm393_vm0, %v2791_v28 }
  0x3c   : > { %2236 = vmatprep.mubr.msk.f32.mxu0 %vm393_vm0, %v2796_v29 }
  0x3f   : > { %2237 = vmatmul.mubr.msk.f32.gmra.mrb[14].mxu0 %vm393_vm0, %v2805_v31 }
  0xf6   : > { %v2201_v32 = vpop.f32.mrb[0].mxu0 }
  0xf7   : > { %v484_v33 = vpop.f32.mrb[1].mxu0  ;;  %v527_v34 = vsel %vm523_vm1, %v2201_v32, 0.0 }
  0xf8   : > { %528 = vadd.xlane.f32.xlu0 %v527_v34  ;;  %v524_v37 = vsel %vm523_vm1, %v484_v33, 0.0 }
  0xfa   : > { %v2204_v35 = vpop.f32.mrb[2].mxu0 }
  0xfb   : > { %v494_v36 = vpop.f32.mrb[3].mxu0  ;;  %v533_v38 = vsel %vm523_vm1, %v2204_v35, 0.0 }
  0xfc   : > { %525 = vadd.xlane.f32.xlu0 %v524_v37  ;;  %534 = vadd.xlane.f32.xlu1 %v533_v38  ;;  %v530_v41 = vsel %vm523_vm1, %v494_v36, 0.0 }
  0xfe   : > { %v2207_v39 = vpop.f32.mrb[4].mxu0 }
  0xff   : > { %v504_v40 = vpop.f32.mrb[5].mxu0  ;;  %v539_v42 = vsel %vm523_vm1, %v2207_v39, 0.0 }
 0x100   : > { %531 = vadd.xlane.f32.xlu0 %v530_v41  ;;  %540 = vadd.xlane.f32.xlu1 %v539_v42  ;;  %v536_v45 = vsel %vm523_vm1, %v504_v40, 0.0 }
 0x102   : > { %v2210_v43 = vpop.f32.mrb[6].mxu0 }
 0x103   : > { %v514_v44 = vpop.f32.mrb[7].mxu0  ;;  %v545_v46 = vsel %vm523_vm1, %v2210_v43, 0.0 }
 0x104   : > { %537 = vadd.xlane.f32.xlu0 %v536_v45  ;;  %546 = vadd.xlane.f32.xlu1 %v545_v46  ;;  %v542_v51 = vsel %vm523_vm1, %v514_v44, 0.0 }
 0x106   : > { %v2229_v47 = vpop.f32.mrb[8].mxu0 }
 0x107   : > { %v622_v49 = vpop.f32.mrb[9].mxu0  ;;  %v664_v50 = vsel %vm523_vm1, %v2229_v47, 0.0 }
 0x108   : > { %665 = vadd.xlane.f32.xlu1 %v664_v50  ;;  %543 = vadd.xlane.f32.xlu0 %v542_v51  ;;  %v661_v54 = vsel %vm523_vm1, %v622_v49, 0.0 }
 0x10a   : > { %v2232_v52 = vpop.f32.mrb[10].mxu0 }
 0x10b   : > { %v632_v53 = vpop.f32.mrb[11].mxu0  ;;  %v670_v56 = vsel %vm523_vm1, %v2232_v52, 0.0 }
 0x10c   : > { %662 = vadd.xlane.f32.xlu1 %v661_v54  ;;  %v667_v55 = vsel %vm523_vm1, %v632_v53, 0.0  ;;  %v378_v54 = vld [vmem:[%s3384_s2 + $0x8] sm:$0xff] }
 0x10d   : > { %668 = vadd.xlane.f32.xlu0 %v667_v55 }
 0x10e   : > { %v2235_v57 = vpop.f32.mrb[12].mxu0 }
 0x10f   : > { %v642_v58 = vpop.f32.mrb[13].mxu0  ;;  %v676_v60 = vsel %vm523_vm1, %v2235_v57, 0.0 }
 0x110   : > { %671 = vadd.xlane.f32.xlu1 %v670_v56  ;;  %v673_v59 = vsel %vm523_vm1, %v642_v58, 0.0 }
 0x111   : > { %674 = vadd.xlane.f32.xlu0 %v673_v59 }
 0x112   : > { %v2238_v61 = vpop.f32.mrb[14].mxu0 }
 0x113   : > { %v652_v62 = vpop.f32.mrb[15].mxu0  ;;  %v682_v0 = vsel %vm523_vm1, %v2238_v61, 0.0 }
 0x114   : > { %677 = vadd.xlane.f32.xlu1 %v676_v60  ;;  %v679_v63 = vsel %vm523_vm1, %v652_v62, 0.0 }
 0x115   : > { %680 = vadd.xlane.f32.xlu0 %v679_v63  ;;  %v377_v63 = vld [vmem:[%s3384_s2] sm:$0xff] }
 0x118   : > { %683 = vadd.xlane.f32.xlu1 %v682_v0 }
 0x129   : > { %783 = vperm.xlu1 %2371, %v385_v4  }
 0x12d   : > { %788 = vperm.xlu1 %2371, %v386_v6  }
 0x131   : > { %793 = vperm.xlu1 %2371, %v387_v9  }
 0x135   : > { %798 = vperm.xlu1 %2371, %v388_v12   ;;  %v380_v12 = vld [vmem:[%s3384_s2 + $0x18] sm:$0xff] }
 0x139   : > { %803 = vperm.xlu1 %2371, %v389_v13  }
 0x185   : > { %v2858_v14 = vpop.xlane.xlu0 %528 }
 0x186   : > { %v686_v25 = vmul.f32 %v2858_v14, %v2858_v14 }
 0x189   : > { %v2860_v15 = vpop.xlane.xlu0 %525  ;;  %v2862_v16 = vpop.xlane.xlu1 %534 }
 0x18a   : > { %v685_v32 = vmul.f32 %v2860_v15, %v2860_v15  ;;  %v688_v38 = vmul.f32 %v2862_v16, %v2862_v16 }
 0x18d   : > { %v2864_v17 = vpop.xlane.xlu0 %531  ;;  %v2866_v20 = vpop.xlane.xlu1 %540 }
 0x18e   : > { %v687_v35 = vmul.f32 %v2864_v17, %v2864_v17  ;;  %v690_v49 = vmul.f32 %v2866_v20, %v2866_v20 }
 0x191   : > { %v2868_v21 = vpop.xlane.xlu0 %537  ;;  %v2870_v22 = vpop.xlane.xlu1 %546 }
 0x192   : > { %v689_v42 = vmul.f32 %v2868_v21, %v2868_v21  ;;  %v692_v55 = vmul.f32 %v2870_v22, %v2870_v22 }
 0x195   : > { %v666_v26 = vpop.xlane.xlu1 %665  ;;  %v2874_v27 = vpop.xlane.xlu0 %543 }
 0x196   : > { %v694_v30 = vsub.f32 %v666_v26, %v686_v25  ;;  %v691_v51 = vmul.f32 %v2874_v27, %v2874_v27  ;;  %v390_v25 = vld [vmem:[%s3385_s3 + $0x28] sm:$0xff] }
 0x198   : > { %v702_v33 = vadd.f32 1e-05, %v694_v30 }
 0x199   : > { %v663_v34 = vpop.xlane.xlu1 %662 }
 0x19a   : > { %2517 = vrsqrt.f32 %v702_v33  ;;  %v693_v36 = vsub.f32 %v663_v34, %v685_v32  ;;  %v669_v37 = vpop.xlane.xlu0 %668  ;;  %v382_v32 = vld [vmem:[%s3384_s2 + $0x28] sm:$0xff]  ;;  %v379_v33 = vld [vmem:[%s3384_s2 + $0x10] sm:$0xff] }
 0x19b   : > { %v695_v40 = vsub.f32 %v669_v37, %v687_v35 }
 0x19c   : > { %v701_v39 = vadd.f32 1e-05, %v693_v36 }
 0x19d   : > { %v672_v41 = vpop.xlane.xlu1 %671  ;;  %v703_v45 = vadd.f32 1e-05, %v695_v40 }
 0x19e   : > { %2519 = vrsqrt.f32 %v701_v39  ;;  %v696_v43 = vsub.f32 %v672_v41, %v688_v38  ;;  %v675_v44 = vpop.xlane.xlu0 %674  ;;  %v384_v38 = vld [vmem:[%s3384_s2 + $0x38] sm:$0xff]  ;;  %v381_v39 = vld [vmem:[%s3384_s2 + $0x20] sm:$0xff] }
 0x19f   : > { %v697_v47 = vsub.f32 %v675_v44, %v689_v42  ;;  %v383_v44 = vld [vmem:[%s3384_s2 + $0x30] sm:$0xff] }
 0x1a0   : > { %v704_v46 = vadd.f32 1e-05, %v696_v43 }
 0x1a1   : > { %v678_v50 = vpop.xlane.xlu1 %677  ;;  %v705_v57 = vadd.f32 1e-05, %v697_v47  ;;  %v391_v47 = vld [vmem:[%s3385_s3 + $0x30] sm:$0xff] }
 0x1a2   : > { %2521 = vrsqrt.f32 %v704_v46  ;;  %v698_v52 = vsub.f32 %v678_v50, %v690_v49  ;;  %v681_v53 = vpop.xlane.xlu0 %680 }
 0x1a3   : > { %2523 = vrsqrt.f32 %v703_v45  ;;  %v699_v59 = vsub.f32 %v681_v53, %v691_v51  ;;  %v392_v45 = vld [vmem:[%s3385_s3 + $0x38] sm:$0xff] }
 0x1a4   : > { %v2518_v56 = vpop.eup %2517  ;;  %v706_v58 = vadd.f32 1e-05, %v698_v52 }
 0x1a5   : > { %v684_v60 = vpop.xlane.xlu1 %683  ;;  %v726_v61 = vmul.f32 %v2518_v56, %v378_v54  ;;  %v707_v4 = vadd.f32 1e-05, %v699_v59  ;;  %v718_v54 = vsub.f32 %v2716_v2, %v2858_v14 }
 0x1a6   : > { %2525 = vrsqrt.f32 %v706_v58  ;;  %v700_v62 = vsub.f32 %v684_v60, %v692_v55 }
 0x1a7   : > { %740 = vperm.xlu1 %2371, %v726_v61   ;;  %2527 = vrsqrt.f32 %v705_v57  ;;  %v717_v57 = vsub.f32 %v2713_v1, %v2860_v15  ;;  %v719_v1 = vsub.f32 %v2719_v3, %v2864_v17 }
 0x1a8   : > { %v2520_v0 = vpop.eup %2519  ;;  %v708_v6 = vadd.f32 1e-05, %v700_v62 }
 0x1a9   : > { %v725_v9 = vmul.f32 %v2520_v0, %v377_v63  ;;  %v784_v49 = vpop.permute.xlu1 %783  ;;  %v720_v63 = vsub.f32 %v2724_v5, %v2862_v16  ;;  %v721_v16 = vsub.f32 %v2729_v7, %v2868_v21  ;;  %v723_v7 = vsub.f32 %v2737_v10, %v2874_v27 }
 0x1aa   : > { %2529 = vrsqrt.f32 %v708_v6  ;;  %v722_v6 = vsub.f32 %v2732_v8, %v2866_v20  ;;  %v724_v8 = vsub.f32 %v2740_v11, %v2870_v22 }
 0x1ab   : > { %735 = vperm.xlu0 %2372, %v725_v9   ;;  %2531 = vrsqrt.f32 %v707_v4 }
 0x1ac   : > { %v2522_v13 = vpop.eup %2521 }
 0x1ad   : > { %v728_v26 = vmul.f32 %v2522_v13, %v380_v12  ;;  %v2524_v30 = vpop.eup %2523  ;;  %v789_v50 = vpop.permute.xlu1 %788 }
 0x1ae   : > { %v727_v36 = vmul.f32 %v2524_v30, %v379_v33 }
 0x1af   : > { %750 = vperm.xlu1 %2371, %v728_v26   ;;  %808 = vperm.xlu0 %2372, %v390_v25  }
 0x1b0   : > { %v2526_v34 = vpop.eup %2525 }
 0x1b1   : > { %v730_v35 = vmul.f32 %v2526_v34, %v382_v32  ;;  %v2528_v37 = vpop.eup %2527  ;;  %v794_v51 = vpop.permute.xlu1 %793 }
 0x1b2   : > { %v729_v42 = vmul.f32 %v2528_v37, %v381_v39 }
 0x1b3   : > { %760 = vperm.xlu0 %2372, %v730_v35   ;;  %745 = vperm.xlu1 %2371, %v727_v36  }
 0x1b4   : > { %v2530_v40 = vpop.eup %2529 }
 0x1b5   : > { %v732_v41 = vmul.f32 %v2530_v40, %v384_v38  ;;  %v2532_v43 = vpop.eup %2531  ;;  %v799_v52 = vpop.permute.xlu1 %798 }
 0x1b6   : > { %v731_v46 = vmul.f32 %v2532_v43, %v383_v44 }
 0x1b7   : > { %770 = vperm.xlu0 %2372, %v732_v41   ;;  %755 = vperm.xlu1 %2371, %v729_v42  }
 0x1b9   : > { %v804_v53 = vpop.permute.xlu1 %803 }
 0x1bb   : > { %818 = vperm.xlu0 %2372, %v392_v45   ;;  %765 = vperm.xlu1 %2371, %v731_v46  }
 0x1bf   : > { %813 = vperm.xlu1 %2371, %v391_v47  }
 0x226   : > { %v741_v55 = vpop.permute.xlu1 %740 }
 0x227   : > { %v774_v56 = vmul.f32 %v741_v55, %v718_v54 }
 0x229   : > { %v2927_v58 = vadd.f32 %v789_v50, %v774_v56 }
 0x22a   : > { %v736_v59 = vpop.permute.xlu0 %735 }
 0x22b   : > { %v2036_v60 = vmul.f32 -1.442695, %v2927_v58  ;;  %v773_v61 = vmul.f32 %v736_v59, %v717_v57 }
 0x22d   : > { %2533 = vpow2.f32 %v2036_v60  ;;  %v2930_v62 = vadd.f32 %v784_v49, %v773_v61 }
 0x22e   : > { %v751_v0 = vpop.permute.xlu1 %750  ;;  %v809_v4 = vpop.permute.xlu0 %808 }
 0x22f   : > { %v2035_v2 = vmul.f32 -1.442695, %v2930_v62  ;;  %v776_v14 = vmul.f32 %v751_v0, %v720_v63 }
 0x231   : > { %2535 = vpow2.f32 %v2035_v2  ;;  %v2937_v15 = vadd.f32 %v799_v52, %v776_v14 }
 0x232   : > { %v746_v9 = vpop.permute.xlu1 %745  ;;  %v761_v12 = vpop.permute.xlu0 %760 }
 0x233   : > { %v2038_v13 = vmul.f32 -1.442695, %v2937_v15  ;;  %v775_v25 = vmul.f32 %v746_v9, %v719_v1  ;;  %v778_v5 = vmul.f32 %v761_v12, %v722_v6 }
 0x235   : > { %2537 = vpow2.f32 %v2038_v13  ;;  %v823_v26 = vadd.f32 %v794_v51, %v775_v25  ;;  %v826_v30 = vadd.f32 %v809_v4, %v778_v5 }
 0x236   : > { %v756_v32 = vpop.permute.xlu1 %755  ;;  %v771_v3 = vpop.permute.xlu0 %770 }
 0x237   : > { %v2534_v17 = vpop.eup %2533  ;;  %v2037_v33 = vmul.f32 -1.442695, %v823_v26  ;;  %v2040_v34 = vmul.f32 -1.442695, %v826_v30  ;;  %v777_v35 = vmul.f32 %v756_v32, %v721_v16  ;;  %v780_v37 = vmul.f32 %v771_v3, %v724_v8 }
 0x238   : > { %v854_v20 = vadd.f32 1.0, %v2534_v17 }
 0x239   : > { %2539 = vpow2.f32 %v2037_v33  ;;  %v825_v36 = vadd.f32 %v804_v53, %v777_v35  ;;  %v2507_v33 = vld [vmem:[%s3390_s8 + $0x4] ss:$8 sps:$4 sm:$0xff]  }
 0x23a   : > { %v766_v38 = vpop.permute.xlu1 %765  ;;  %v819_v39 = vpop.permute.xlu0 %818  ;;  %2541 = vpow2.f32 %v2040_v34 }
 0x23b   : > { %v2536_v40 = vpop.eup %2535  ;;  %v2039_v21 = vmul.f32 -1.442695, %v825_v36  ;;  %v828_v41 = vadd.f32 %v819_v39, %v780_v37  ;;  %2543 = vrcp.f32 %v854_v20  ;;  %v779_v43 = vmul.f32 %v766_v38, %v723_v7 }
 0x23c   : > { %v853_v42 = vadd.f32 1.0, %v2536_v40 }
 0x23d   : > { %2545 = vpow2.f32 %v2039_v21  ;;  %v2042_v44 = vmul.f32 -1.442695, %v828_v41 }
 0x23e   : > { %2547 = vrcp.f32 %v853_v42  ;;  %v814_v11 = vpop.permute.xlu1 %813 }
 0x23f   : > { %v2538_v22 = vpop.eup %2537  ;;  %2549 = vpow2.f32 %v2042_v44  ;;  %v827_v45 = vadd.f32 %v814_v11, %v779_v43 }
 0x240   : > { %v856_v46 = vadd.f32 1.0, %v2538_v22 }
 0x241   : > { %v2041_v47 = vmul.f32 -1.442695, %v827_v45 }
 0x243   : > { %v2540_v49 = vpop.eup %2539  ;;  %2551 = vpow2.f32 %v2041_v47 }
 0x244   : > { %2553 = vrcp.f32 %v856_v46  ;;  %v855_v50 = vadd.f32 1.0, %v2540_v49  ;;  %v2542_v10 = vpop.eup %2541 }
 0x245   : > { %v2544_v27 = vpop.eup %2543  ;;  %v858_v51 = vadd.f32 1.0, %v2542_v10 }
 0x246   : > { %2555 = vrcp.f32 %v855_v50  ;;  %v878_v56 = vmul.f32 %v2544_v27, %v2927_v58 }
 0x247   : > { %v2546_v52 = vpop.eup %2545  ;;  %2557 = vrcp.f32 %v858_v51 }
 0x248   : > { %v2548_v53 = vpop.eup %2547  ;;  %v857_v54 = vadd.f32 1.0, %v2546_v52 }
 0x249   : > { %v2550_v55 = vpop.eup %2549  ;;  %v877_v57 = vmul.f32 %v2548_v53, %v2930_v62 }
 0x24a   : > { %2559 = vrcp.f32 %v857_v54  ;;  %v860_v59 = vadd.f32 1.0, %v2550_v55 }
 0x24b   : > { %v2373_v60 = vpack.i.bf16 %v878_v56, %v877_v57 }
 0x24c   : > { %2561 = vrcp.f32 %v860_v59  ;;  %v893_v59 = vld [vmem:[%s3387_s5] sm:$0xff] }
 0x24d   : > { %v2552_v61 = vpop.eup %2551  ;;  %2374 = vrot.lane.b32.xlu1 %v2373_v60, %s2631_s18  ;;  %v895_v60 = vld [vmem:[%s3387_s5 + $0x10] sm:$0xff] }
 0x24e   : > { %v2554_v63 = vpop.eup %2553  ;;  %v859_v0 = vadd.f32 1.0, %v2552_v61  ;;  %v2495_v61 = vld [vmem:[%s3386_s4 + $0x4] ss:$8 sps:$4 sm:$0xff]  }
 0x24f   : > { %v880_v2 = vmul.f32 %v2554_v63, %v2937_v15  ;;  %v894_v63 = vld [vmem:[%s3387_s5 + $0x8] sm:$0xff]  ;;  %2063 = vmatprep.mubr.msk.bf16.mxu0 %vm393_vm0, %v2495_v61 }
 0x250   : > { %v2556_v4 = vpop.eup %2555  ;;  %2563 = vrcp.f32 %v859_v0  ;;  %v897_v0 = vld [vmem:[%s3387_s5 + $0x20] sm:$0xff] }
 0x251   : > { %v879_v14 = vmul.f32 %v2556_v4, %v823_v26  ;;  %v2558_v1 = vpop.eup %2557  ;;  %v896_v4 = vld [vmem:[%s3387_s5 + $0x18] sm:$0xff] }
 0x252   : > { %v882_v9 = vmul.f32 %v2558_v1, %v826_v30  ;;  %v900_v1 = vld [vmem:[%s3387_s5 + $0x38] sm:$0xff] }
 0x253   : > { %v2378_v6 = vpack.i.bf16 %v880_v2, %v879_v14  ;;  %v899_v2 = vld [vmem:[%s3387_s5 + $0x30] sm:$0xff]  ;;  %v898_v14 = vld [vmem:[%s3387_s5 + $0x28] sm:$0xff] }
 0x254   : > { %v2560_v58 = vpop.eup %2559 }
 0x255   : > { %v881_v62 = vmul.f32 %v2560_v58, %v825_v36  ;;  %2379 = vrot.lane.b32.xlu0 %v2378_v6, %s2631_s18 }
 0x256   : > { %v2562_v13 = vpop.eup %2561 }
 0x257   : > { %v2383_v12 = vpack.i.bf16 %v882_v9, %v881_v62  ;;  %v884_v5 = vmul.f32 %v2562_v13, %v828_v41 }
 0x259   : > { %2384 = vrot.lane.b32.xlu1 %v2383_v12, %s2631_s18 }
 0x25a   : > { %v2564_v25 = vpop.eup %2563 }
 0x25b   : > { %v883_v16 = vmul.f32 %v2564_v25, %v827_v45 }
 0x25d   : > { %v2388_v32 = vpack.i.bf16 %v884_v5, %v883_v16 }
 0x25f   : > { %2389 = vrot.lane.b32.xlu0 %v2388_v32, %s2631_s18 }
 0x2bf   : > { %v2375_v15 = vpop.permute.xlu1 %2374 }
 0x2c0   : > { %v2377_v26 = vunpack.i.h.bf16 %v2375_v15  ;;  %v2376_v3 = vunpack.i.l.bf16 %v2375_v15 }
 0x2c2   : > { %v935_v30 = vsel %vm933_vm2, 0.0, %v2377_v26  ;;  %v934_v17 = vsel %vm933_vm2, 0.0, %v2376_v3 }
 0x2c3   : > { %v944_v34 = vsel %vm942_vm3, %v935_v30, 0.0  ;;  %v943_v35 = vsel %vm942_vm3, %v934_v17, 0.0  ;;  %v2052_v8 = vpack.c.bf16 %v935_v30, %v934_v17 }
 0x2c4   : > { %v2393_v20 = vpack.i.bf16 %v944_v34, %v943_v35 }
 0x2c5   : > { %2053 = vmatpush1.bf16.msk.msra.mxu0 %vm2959_vm4, %v2052_v8 }
 0x2c6   : > { %2394 = vrot.lane.b32.xlu1 %v2393_v20, %s2632_s19  ;;  %1109 = vmatprep.subr.bf16.mxu0 %v2630_v48 }
 0x2c7   : > { %v2380_v36 = vpop.permute.xlu0 %2379 }
 0x2c8   : > { %v2382_v37 = vunpack.i.h.bf16 %v2380_v36  ;;  %v2381_v38 = vunpack.i.l.bf16 %v2380_v36 }
 0x2ca   : > { %v937_v39 = vsel %vm933_vm2, 0.0, %v2382_v37  ;;  %v936_v40 = vsel %vm933_vm2, 0.0, %v2381_v38 }
 0x2cb   : > { %v946_v7 = vsel %vm942_vm3, %v937_v39, 0.0  ;;  %v945_v21 = vsel %vm942_vm3, %v936_v40, 0.0  ;;  %v2055_v41 = vpack.c.bf16 %v937_v39, %v936_v40  ;;  %v2385_v42 = vpop.permute.xlu1 %2384 }
 0x2cc   : > { %v2387_v43 = vunpack.i.h.bf16 %v2385_v42  ;;  %v2386_v44 = vunpack.i.l.bf16 %v2385_v42  ;;  %v2398_v11 = vpack.i.bf16 %v946_v7, %v945_v21 }
 0x2cd   : > { %2056 = vmatpush1.bf16.msk.msra.mxu0 %vm2959_vm4, %v2055_v41 }
 0x2ce   : > { %v939_v22 = vsel %vm933_vm2, 0.0, %v2387_v43  ;;  %v938_v45 = vsel %vm933_vm2, 0.0, %v2386_v44  ;;  %2399 = vrot.lane.b32.xlu0 %v2398_v11, %s2632_s19  ;;  %1111 = vmatprep.subr.bf16.mxu0 %v2630_v48 }
 0x2cf   : > { %v948_v46 = vsel %vm942_vm3, %v939_v22, 0.0  ;;  %v947_v47 = vsel %vm942_vm3, %v938_v45, 0.0  ;;  %v2058_v49 = vpack.c.bf16 %v939_v22, %v938_v45  ;;  %v2493_v45 = vld [vmem:[%s3386_s4] ss:$8 sps:$4 sm:$0xff]  }
 0x2d0   : > { %v2403_v50 = vpack.i.bf16 %v948_v46, %v947_v47  ;;  %v2496_v46 = vld [vmem:[%s3386_s4 + $0x14] ss:$8 sps:$4 sm:$0xff]   ;;  %v2498_v47 = vld [vmem:[%s3386_s4 + $0x10] ss:$8 sps:$4 sm:$0xff]  }
 0x2d1   : > { %v2390_v10 = vpop.permute.xlu0 %2389  ;;  %2059 = vmatpush1.bf16.msk.msra.mxu0 %vm2959_vm4, %v2058_v49  ;;  %v2499_v49 = vld [vmem:[%s3386_s4 + $0x24] ss:$8 sps:$4 sm:$0xff]  }
 0x2d2   : > { %v2392_v27 = vunpack.i.h.bf16 %v2390_v10  ;;  %v2391_v51 = vunpack.i.l.bf16 %v2390_v10  ;;  %2404 = vrot.lane.b32.xlu1 %v2403_v50, %s2632_s19  ;;  %1113 = vmatprep.subr.bf16.mxu0 %v2630_v48  ;;  %v2502_v10 = vld [vmem:[%s3386_s4 + $0x34] ss:$8 sps:$4 sm:$0xff]  }
 0x2d4   : > { %v941_v52 = vsel %vm933_vm2, 0.0, %v2392_v27  ;;  %v940_v53 = vsel %vm933_vm2, 0.0, %v2391_v51  ;;  %v2504_v27 = vld [vmem:[%s3386_s4 + $0x30] ss:$8 sps:$4 sm:$0xff]  }
 0x2d5   : > { %v950_v54 = vsel %vm942_vm3, %v941_v52, 0.0  ;;  %v949_v55 = vsel %vm942_vm3, %v940_v53, 0.0  ;;  %v2061_v56 = vpack.c.bf16 %v941_v52, %v940_v53 }
 0x2d6   : > { %2414 = vrot.lane.b32.xlu1 %v2393_v20, %s2633_s21  ;;  %v2408_v57 = vpack.i.bf16 %v950_v54, %v949_v55 }
 0x2d7   : > { %2062 = vmatpush1.bf16.msk.msra.mxu0 %vm2959_vm4, %v2061_v56 }
 0x2d8   : > { %2409 = vrot.lane.b32.xlu0 %v2408_v57, %s2632_s19  ;;  %1115 = vmatprep.subr.bf16.mxu0 %v2630_v48 }
 0x2da   : > { %2424 = vrot.lane.b32.xlu1 %v2403_v50, %s2633_s21  ;;  %v2501_v50 = vld [vmem:[%s3386_s4 + $0x20] ss:$8 sps:$4 sm:$0xff]  }
 0x2dc   : > { %2419 = vrot.lane.b32.xlu0 %v2398_v11, %s2633_s21 }
 0x2de   : > { %1021 = vperm.xlu1 %2371, %v893_v59  }
 0x2e0   : > { %2429 = vrot.lane.b32.xlu0 %v2408_v57, %s2633_s21 }
 0x2e2   : > { %1031 = vperm.xlu1 %2371, %v895_v60  }
 0x2e4   : > { %1026 = vperm.xlu0 %2372, %v894_v63  }
 0x2e6   : > { %1041 = vperm.xlu1 %2371, %v897_v0  }
 0x2e8   : > { %1036 = vperm.xlu0 %2372, %v896_v4  }
 0x2ea   : > { %1051 = vperm.xlu1 %2371, %v899_v2  }
 0x2ec   : > { %1046 = vperm.xlu0 %2372, %v898_v14  }
 0x2f0   : > { %1056 = vperm.xlu0 %2372, %v900_v1  }
 0x338   : > { %v2395_v6 = vpop.permute.xlu1 %2394 }
 0x339   : > { %v2397_v58 = vunpack.i.h.bf16 %v2395_v6  ;;  %v2396_v9 = vunpack.i.l.bf16 %v2395_v6 }
 0x33b   : > { %v1011_v62 = vpack.c.bf16 %v2397_v58, %v2396_v9 }
 0x33d   : > { %1116 = vmatpush1.bf16.msra.mxu0 %v1011_v62 }
 0x33e   : > { %1117 = vmatprep.subr.bf16.mxu0 %v2630_v48 }
 0x340   : > { %v2400_v12 = vpop.permute.xlu0 %2399 }
 0x341   : > { %v2402_v13 = vunpack.i.h.bf16 %v2400_v12  ;;  %v2401_v25 = vunpack.i.l.bf16 %v2400_v12 }
 0x343   : > { %v1012_v5 = vpack.c.bf16 %v2402_v13, %v2401_v25 }
 0x344   : > { %v2405_v16 = vpop.permute.xlu1 %2404 }
 0x345   : > { %v2407_v32 = vunpack.i.h.bf16 %v2405_v16  ;;  %v2406_v15 = vunpack.i.l.bf16 %v2405_v16  ;;  %1118 = vmatpush1.bf16.msra.mxu0 %v1012_v5 }
 0x346   : > { %1119 = vmatprep.subr.bf16.mxu0 %v2630_v48 }
 0x347   : > { %v1013_v26 = vpack.c.bf16 %v2407_v32, %v2406_v15 }
 0x348   : > { %v2415_v3 = vpop.permute.xlu1 %2414 }
 0x349   : > { %1120 = vmatpush1.bf16.msra.mxu0 %v1013_v26  ;;  %v2417_v35 = vunpack.i.h.bf16 %v2415_v3  ;;  %v2416_v8 = vunpack.i.l.bf16 %v2415_v3 }
 0x34a   : > { %v2410_v30 = vpop.permute.xlu0 %2409  ;;  %1121 = vmatprep.subr.bf16.mxu0 %v2630_v48 }
 0x34b   : > { %v2412_v17 = vunpack.i.h.bf16 %v2410_v30  ;;  %v2411_v34 = vunpack.i.l.bf16 %v2410_v30  ;;  %v1015_v37 = vpack.c.bf16 %v2417_v35, %v2416_v8 }
 0x34c   : > { %v2425_v40 = vpop.permute.xlu1 %2424 }
 0x34d   : > { %v1014_v20 = vpack.c.bf16 %v2412_v17, %v2411_v34  ;;  %v2427_v7 = vunpack.i.h.bf16 %v2425_v40  ;;  %v2426_v21 = vunpack.i.l.bf16 %v2425_v40 }
 0x34e   : > { %v2420_v36 = vpop.permute.xlu0 %2419 }
 0x34f   : > { %1122 = vmatpush1.bf16.msra.mxu0 %v1014_v20  ;;  %v2422_v38 = vunpack.i.h.bf16 %v2420_v36  ;;  %v2421_v39 = vunpack.i.l.bf16 %v2420_v36  ;;  %v1017_v43 = vpack.c.bf16 %v2427_v7, %v2426_v21 }
 0x350   : > { %1123 = vmatprep.subr.bf16.mxu0 %v2630_v48 }
 0x351   : > { %v1016_v41 = vpack.c.bf16 %v2422_v38, %v2421_v39 }
 0x352   : > { %v2430_v42 = vpop.permute.xlu0 %2429 }
 0x353   : > { %1124 = vmatpush1.bf16.msra.mxu0 %v1015_v37  ;;  %v2432_v44 = vunpack.i.h.bf16 %v2430_v42  ;;  %v2431_v11 = vunpack.i.l.bf16 %v2430_v42 }
 0x354   : > { %1125 = vmatprep.subr.bf16.mxu0 %v2630_v48 }
 0x355   : > { %v1018_v22 = vpack.c.bf16 %v2432_v44, %v2431_v11 }
 0x357   : > { %1126 = vmatpush1.bf16.msra.mxu0 %v1016_v41 }
 0x358   : > { %1127 = vmatprep.subr.bf16.mxu0 %v2630_v48 }
 0x35b   : > { %1128 = vmatpush1.bf16.msra.mxu0 %v1017_v43 }
 0x35c   : > { %1129 = vmatprep.subr.bf16.mxu0 %v2630_v48 }
 0x35d   : > { %v1022_v52 = vpop.permute.xlu1 %1021 }
 0x35f   : > { %1130 = vmatpush1.bf16.msra.mxu0 %v1018_v22 }
 0x361   : > { %v1032_v63 = vpop.permute.xlu1 %1031 }
 0x362   : > { %1140 = vmatmul.mubr.bf16.vlgmr.msra.gmra.mrb[16].mxu0 %v2493_v45  ;;  %v2613_v45 = vld [vmem:[%s3383_s1] sm:$0xff] }
 0x363   : > { %2064 = vmatprep.mubr.msk.bf16.mxu0 %vm393_vm0, %v2496_v46  ;;  %v1027_v54 = vpop.permute.xlu0 %1026 }
 0x365   : > { %v1042_v62 = vpop.permute.xlu1 %1041 }
 0x367   : > { %v1037_v4 = vpop.permute.xlu0 %1036 }
 0x369   : > { %v1052_v3 = vpop.permute.xlu1 %1051 }
 0x36a   : > { %1148 = vmatmul.mubr.bf16.gmra.mrb[20].mxu0 %v2498_v47 }
 0x36b   : > { %2065 = vmatprep.mubr.msk.bf16.mxu0 %vm393_vm0, %v2499_v49  ;;  %v1047_v13 = vpop.permute.xlu0 %1046 }
 0x36f   : > { %v1057_v17 = vpop.permute.xlu0 %1056 }
 0x372   : > { %1156 = vmatmul.mubr.bf16.gmra.mrb[24].mxu0 %v2501_v50 }
 0x373   : > { %2066 = vmatprep.mubr.msk.bf16.mxu0 %vm393_vm0, %v2502_v10 }
 0x37a   : > { %1164 = vmatmul.mubr.bf16.gmra.mrb[28].mxu0 %v2504_v27 }
 0x435   : > { %v1141_v51 = vpop.f32.mrb[16].mxu0 }
 0x436   : > { %v1143_v53 = vpop.f32.mrb[17].mxu0  ;;  %v3056_v56 = vadd.f32 %v1141_v51, %v1022_v52 }
 0x437   : > { %v1144_v55 = vpop.f32.mrb[18].mxu0 }
 0x438   : > { %v3058_v57 = vadd.f32 %v1144_v55, %v1027_v54  ;;  %v1146_v59 = vpop.f32.mrb[19].mxu0  ;;  %v1317_v37 = vmul.f32 %v3056_v56, %v3056_v56 }
 0x43a   : > { %v2327_v60 = vpack.c.bf16 %v3058_v57, %v3056_v56  ;;  %v1318_v35 = vmul.f32 %v3058_v57, %v3058_v57 }
 0x43c   : > { %2328 = vmatprep.subr.bf16.mxu1 %v2327_v60  ;;  %v2343_v40 = vpack.c.bf16 %v1318_v35, %v1317_v37 }
 0x43d   : > { %v1149_v61 = vpop.f32.mrb[20].mxu0  ;;  %2330 = vmatpush3.bf16.msra.mxu1 %v2327_v60 }
 0x43e   : > { %v1151_v0 = vpop.f32.mrb[21].mxu0  ;;  %v3062_v14 = vadd.f32 %v1149_v61, %v1032_v63 }
 0x43f   : > { %v1152_v2 = vpop.f32.mrb[22].mxu0 }
 0x440   : > { %v3064_v1 = vadd.f32 %v1152_v2, %v1037_v4  ;;  %v1154_v6 = vpop.f32.mrb[23].mxu0  ;;  %v1319_v7 = vmul.f32 %v3062_v14, %v3062_v14 }
 0x442   : > { %v2331_v58 = vpack.c.bf16 %v3064_v1, %v3062_v14  ;;  %v1320_v39 = vmul.f32 %v3064_v1, %v3064_v1 }
 0x444   : > { %2332 = vmatprep.subr.bf16.mxu1 %v2331_v58  ;;  %v2347_v41 = vpack.c.bf16 %v1320_v39, %v1319_v7 }
 0x445   : > { %v1157_v9 = vpop.f32.mrb[24].mxu0  ;;  %2334 = vmatpush3.bf16.msra.mxu1 %v2331_v58 }
 0x446   : > { %v1159_v12 = vpop.f32.mrb[25].mxu0  ;;  %v3068_v5 = vadd.f32 %v1157_v9, %v1042_v62 }
 0x447   : > { %v1160_v25 = vpop.f32.mrb[26].mxu0 }
 0x448   : > { %v3070_v16 = vadd.f32 %v1160_v25, %v1047_v13  ;;  %v1162_v32 = vpop.f32.mrb[27].mxu0  ;;  %v1321_v42 = vmul.f32 %v3068_v5, %v3068_v5 }
 0x449   : > { %v1180_v32 = vld [vmem:[%s3389_s7] sm:$0xff] }
 0x44a   : > { %v2335_v15 = vpack.c.bf16 %v3070_v16, %v3068_v5  ;;  %v1322_v21 = vmul.f32 %v3070_v16, %v3070_v16 }
 0x44c   : > { %2336 = vmatprep.subr.bf16.mxu1 %v2335_v15  ;;  %v2351_v44 = vpack.c.bf16 %v1322_v21, %v1321_v42 }
 0x44d   : > { %v1165_v26 = vpop.f32.mrb[28].mxu0  ;;  %2338 = vmatpush3.bf16.msra.mxu1 %v2335_v15  ;;  %v1182_v15 = vld [vmem:[%s3389_s7 + $0x10] sm:$0xff] }
 0x44e   : > { %v1167_v30 = vpop.f32.mrb[29].mxu0  ;;  %v3076_v8 = vadd.f32 %v1165_v26, %v1052_v3  ;;  %v1181_v26 = vld [vmem:[%s3389_s7 + $0x8] sm:$0xff]  ;;  %v1184_v3 = vld [vmem:[%s3389_s7 + $0x20] sm:$0xff] }
 0x44f   : > { %v1168_v34 = vpop.f32.mrb[30].mxu0  ;;  %v1183_v30 = vld [vmem:[%s3389_s7 + $0x18] sm:$0xff] }
 0x450   : > { %v3078_v20 = vadd.f32 %v1168_v34, %v1057_v17  ;;  %v1170_v36 = vpop.f32.mrb[31].mxu0  ;;  %v1323_v11 = vmul.f32 %v3076_v8, %v3076_v8  ;;  %v1185_v17 = vld [vmem:[%s3389_s7 + $0x28] sm:$0xff] }
 0x452   : > { %v2339_v38 = vpack.c.bf16 %v3078_v20, %v3076_v8  ;;  %v1324_v43 = vmul.f32 %v3078_v20, %v3078_v20 }
 0x454   : > { %2340 = vmatprep.subr.bf16.mxu1 %v2339_v38  ;;  %v2355_v22 = vpack.c.bf16 %v1324_v43, %v1323_v11 }
 0x455   : > { %2342 = vmatpush3.bf16.msra.mxu1 %v2339_v38 }
 0x456   : > { %2344 = vmatprep.subr.bf16.mxu1 %v2343_v40 }
 0x458   : > { %2256 = vmatmul.mubr.msk.f32.vlgmr.msra.gmra.mrb[0].mxu1 %vm393_vm0, %v2755_v18 }
 0x459   : > { %2346 = vmatpush3.bf16.msra.mxu1 %v2343_v40  ;;  %2258 = vmatprep.mubr.msk.f32.mxu1 %vm393_vm0, %v2760_v19 }
 0x45a   : > { %2348 = vmatprep.subr.bf16.mxu1 %v2347_v41 }
 0x45c   : > { %2259 = vmatmul.mubr.msk.f32.gmra.mrb[2].mxu1 %vm393_vm0, %v2773_v23 }
 0x45d   : > { %2350 = vmatpush3.bf16.msra.mxu1 %v2347_v41  ;;  %2261 = vmatprep.mubr.msk.f32.mxu1 %vm393_vm0, %v2778_v24 }
 0x45e   : > { %2352 = vmatprep.subr.bf16.mxu1 %v2351_v44 }
 0x460   : > { %2262 = vmatmul.mubr.msk.f32.gmra.mrb[4].mxu1 %vm393_vm0, %v2791_v28 }
 0x461   : > { %2354 = vmatpush3.bf16.msra.mxu1 %v2351_v44  ;;  %2264 = vmatprep.mubr.msk.f32.mxu1 %vm393_vm0, %v2796_v29 }
 0x462   : > { %2356 = vmatprep.subr.bf16.mxu1 %v2355_v22 }
 0x464   : > { %2265 = vmatmul.mubr.msk.f32.gmra.mrb[6].mxu1 %vm393_vm0, %v2805_v31 }
 0x465   : > { %2358 = vmatpush3.bf16.msra.mxu1 %v2355_v22  ;;  %2283 = vmatprep.mubr.msk.f32.mxu1 %vm393_vm0, %v2613_v45 }
 0x466   : > { %1874 = vmatprep.subr.bf16.mxu1 %v2630_v48 }
 0x468   : > { %2284 = vmatmul.mubr.msk.f32.vlgmr.msra.gmra.mrb[8].mxu1 %vm393_vm0, %v2755_v18 }
 0x469   : > { %2286 = vmatprep.mubr.msk.f32.mxu1 %vm393_vm0, %v2760_v19 }
 0x46c   : > { %2287 = vmatmul.mubr.msk.f32.gmra.mrb[10].mxu1 %vm393_vm0, %v2773_v23 }
 0x46d   : > { %2289 = vmatprep.mubr.msk.f32.mxu1 %vm393_vm0, %v2778_v24 }
 0x470   : > { %2290 = vmatmul.mubr.msk.f32.gmra.mrb[12].mxu1 %vm393_vm0, %v2791_v28 }
 0x471   : > { %2292 = vmatprep.mubr.msk.f32.mxu1 %vm393_vm0, %v2796_v29 }
 0x474   : > { %2293 = vmatmul.mubr.msk.f32.gmra.mrb[14].mxu1 %vm393_vm0, %v2805_v31 }
 0x475   : > { %2111 = vmatprep.mubr.msk.bf16.mxu1 %vm393_vm0, %v2507_v33  ;;  %v2616_v33 = vld [vmem:[%s2710_s20 + $0x10] sm:$0xff] }
 0x52b   : > { %v2257_v46 = vpop.f32.mrb[0].mxu1 }
 0x52c   : > { %v1254_v18 = vpop.f32.mrb[1].mxu1  ;;  %v1296_v47 = vsel %vm523_vm1, %v2257_v46, 0.0 }
 0x52d   : > { %1297 = vadd.xlane.f32.xlu0 %v1296_v47  ;;  %v1293_v19 = vsel %vm523_vm1, %v1254_v18, 0.0 }
 0x52e   : > { %1294 = vadd.xlane.f32.xlu1 %v1293_v19 }
 0x52f   : > { %v2260_v23 = vpop.f32.mrb[2].mxu1 }
 0x530   : > { %v1264_v49 = vpop.f32.mrb[3].mxu1  ;;  %v1302_v24 = vsel %vm523_vm1, %v2260_v23, 0.0 }
 0x531   : > { %v1299_v28 = vsel %vm523_vm1, %v1264_v49, 0.0 }
 0x532   : > { %1303 = vadd.xlane.f32.xlu1 %v1302_v24  ;;  %1300 = vadd.xlane.f32.xlu0 %v1299_v28 }
 0x533   : > { %v2263_v29 = vpop.f32.mrb[4].mxu1 }
 0x534   : > { %v1274_v50 = vpop.f32.mrb[5].mxu1  ;;  %v1308_v31 = vsel %vm523_vm1, %v2263_v29, 0.0 }
 0x535   : > { %v1305_v10 = vsel %vm523_vm1, %v1274_v50, 0.0 }
 0x536   : > { %1309 = vadd.xlane.f32.xlu1 %v1308_v31  ;;  %1306 = vadd.xlane.f32.xlu0 %v1305_v10 }
 0x537   : > { %v2266_v27 = vpop.f32.mrb[6].mxu1 }
 0x538   : > { %v1284_v51 = vpop.f32.mrb[7].mxu1  ;;  %v1314_v52 = vsel %vm523_vm1, %v2266_v27, 0.0 }
 0x539   : > { %v1311_v53 = vsel %vm523_vm1, %v1284_v51, 0.0 }
 0x53a   : > { %1315 = vadd.xlane.f32.xlu1 %v1314_v52  ;;  %1312 = vadd.xlane.f32.xlu0 %v1311_v53 }
 0x53b   : > { %v2285_v54 = vpop.f32.mrb[8].mxu1 }
 0x53c   : > { %v1391_v55 = vpop.f32.mrb[9].mxu1  ;;  %v1433_v59 = vsel %vm523_vm1, %v2285_v54, 0.0 }
 0x53d   : > { %v1430_v60 = vsel %vm523_vm1, %v1391_v55, 0.0 }
 0x53e   : > { %1434 = vadd.xlane.f32.xlu1 %v1433_v59  ;;  %1431 = vadd.xlane.f32.xlu0 %v1430_v60 }
 0x53f   : > { %v2288_v61 = vpop.f32.mrb[10].mxu1 }
 0x540   : > { %v1401_v63 = vpop.f32.mrb[11].mxu1  ;;  %v1439_v0 = vsel %vm523_vm1, %v2288_v61, 0.0 }
 0x541   : > { %v1436_v4 = vsel %vm523_vm1, %v1401_v63, 0.0 }
 0x542   : > { %1440 = vadd.xlane.f32.xlu1 %v1439_v0  ;;  %1437 = vadd.xlane.f32.xlu0 %v1436_v4  ;;  %v1173_v0 = vld [vmem:[%s3388_s6 + $0x8] sm:$0xff]  ;;  %v1172_v4 = vld [vmem:[%s3388_s6] sm:$0xff] }
 0x543   : > { %v2291_v2 = vpop.f32.mrb[12].mxu1 }
 0x544   : > { %v1411_v6 = vpop.f32.mrb[13].mxu1  ;;  %v1445_v58 = vsel %vm523_vm1, %v2291_v2, 0.0 }
 0x545   : > { %v1442_v9 = vsel %vm523_vm1, %v1411_v6, 0.0 }
 0x546   : > { %1446 = vadd.xlane.f32.xlu1 %v1445_v58  ;;  %1443 = vadd.xlane.f32.xlu0 %v1442_v9 }
 0x547   : > { %v2294_v62 = vpop.f32.mrb[14].mxu1 }
 0x548   : > { %v1421_v12 = vpop.f32.mrb[15].mxu1  ;;  %v1451_v13 = vsel %vm523_vm1, %v2294_v62, 0.0 }
 0x549   : > { %v1448_v25 = vsel %vm523_vm1, %v1421_v12, 0.0 }
 0x54a   : > { %1452 = vadd.xlane.f32.xlu1 %v1451_v13  ;;  %1449 = vadd.xlane.f32.xlu0 %v1448_v25  ;;  %v1175_v13 = vld [vmem:[%s3388_s6 + $0x18] sm:$0xff]  ;;  %v1174_v25 = vld [vmem:[%s3388_s6 + $0x10] sm:$0xff] }
 0x55b   : > { %1552 = vperm.xlu1 %2371, %v1180_v32  }
 0x55f   : > { %1562 = vperm.xlu1 %2371, %v1182_v15  }
 0x560   : > { %1557 = vperm.xlu0 %2372, %v1181_v26  }
 0x563   : > { %1572 = vperm.xlu1 %2371, %v1184_v3  }
 0x564   : > { %1567 = vperm.xlu0 %2372, %v1183_v30   ;;  %v1177_v30 = vld [vmem:[%s3388_s6 + $0x28] sm:$0xff] }
 0x568   : > { %1577 = vperm.xlu0 %2372, %v1185_v17   ;;  %v1176_v17 = vld [vmem:[%s3388_s6 + $0x20] sm:$0xff] }
 0x5ba   : > { %v3163_v34 = vpop.xlane.xlu0 %1297 }
 0x5bb   : > { %v3165_v35 = vpop.xlane.xlu1 %1294  ;;  %v1455_v21 = vmul.f32 %v3163_v34, %v3163_v34 }
 0x5bc   : > { %v1454_v41 = vmul.f32 %v3165_v35, %v3165_v35 }
 0x5bf   : > { %v3167_v36 = vpop.xlane.xlu1 %1303  ;;  %v3169_v37 = vpop.xlane.xlu0 %1300 }
 0x5c0   : > { %v1457_v22 = vmul.f32 %v3167_v36, %v3167_v36  ;;  %v1456_v45 = vmul.f32 %v3169_v37, %v3169_v37 }
 0x5c3   : > { %v3171_v38 = vpop.xlane.xlu1 %1309  ;;  %v3173_v39 = vpop.xlane.xlu0 %1306 }
 0x5c4   : > { %v1459_v24 = vmul.f32 %v3171_v38, %v3171_v38  ;;  %v1458_v28 = vmul.f32 %v3173_v39, %v3173_v39 }
 0x5c7   : > { %v3175_v40 = vpop.xlane.xlu1 %1315  ;;  %v3177_v7 = vpop.xlane.xlu0 %1312 }
 0x5c8   : > { %v1461_v52 = vmul.f32 %v3175_v40, %v3175_v40  ;;  %v1460_v53 = vmul.f32 %v3177_v7, %v3177_v7 }
 0x5cb   : > { %v1435_v42 = vpop.xlane.xlu1 %1434  ;;  %v1432_v43 = vpop.xlane.xlu0 %1431 }
 0x5cc   : > { %v1463_v44 = vsub.f32 %v1435_v42, %v1455_v21  ;;  %v1462_v11 = vsub.f32 %v1432_v43, %v1454_v41 }
 0x5ce   : > { %v1471_v46 = vadd.f32 1e-05, %v1463_v44  ;;  %v1470_v18 = vadd.f32 1e-05, %v1462_v11  ;;  %v1179_v44 = vld [vmem:[%s3388_s6 + $0x38] sm:$0xff]  ;;  %v1178_v11 = vld [vmem:[%s3388_s6 + $0x30] sm:$0xff] }
 0x5cf   : > { %v1441_v47 = vpop.xlane.xlu1 %1440  ;;  %v1438_v19 = vpop.xlane.xlu0 %1437 }
 0x5d0   : > { %2565 = vrsqrt.f32 %v1471_v46  ;;  %v1465_v23 = vsub.f32 %v1441_v47, %v1457_v22  ;;  %v1464_v49 = vsub.f32 %v1438_v19, %v1456_v45  ;;  %v1187_v47 = vld [vmem:[%s3389_s7 + $0x38] sm:$0xff]  ;;  %v1186_v19 = vld [vmem:[%s3389_s7 + $0x30] sm:$0xff] }
 0x5d1   : > { %2567 = vrsqrt.f32 %v1470_v18 }
 0x5d2   : > { %v1473_v29 = vadd.f32 1e-05, %v1465_v23  ;;  %v1472_v50 = vadd.f32 1e-05, %v1464_v49 }
 0x5d3   : > { %v1447_v31 = vpop.xlane.xlu1 %1446  ;;  %v1444_v10 = vpop.xlane.xlu0 %1443 }
 0x5d4   : > { %2569 = vrsqrt.f32 %v1473_v29  ;;  %v1467_v27 = vsub.f32 %v1447_v31, %v1459_v24  ;;  %v1466_v51 = vsub.f32 %v1444_v10, %v1458_v28  ;;  %v1487_v31 = vsub.f32 %v3058_v57, %v3163_v34 }
 0x5d5   : > { %2571 = vrsqrt.f32 %v1472_v50  ;;  %v1486_v10 = vsub.f32 %v3056_v56, %v3165_v35 }
 0x5d6   : > { %v1475_v54 = vadd.f32 1e-05, %v1467_v27  ;;  %v1474_v55 = vadd.f32 1e-05, %v1466_v51 }
 0x5d7   : > { %v1453_v59 = vpop.xlane.xlu1 %1452  ;;  %v1450_v60 = vpop.xlane.xlu0 %1449 }
 0x5d8   : > { %2573 = vrsqrt.f32 %v1475_v54  ;;  %v1469_v61 = vsub.f32 %v1453_v59, %v1461_v52  ;;  %v1468_v63 = vsub.f32 %v1450_v60, %v1460_v53  ;;  %v1488_v59 = vsub.f32 %v3062_v14, %v3169_v37 }
 0x5d9   : > { %2575 = vrsqrt.f32 %v1474_v55  ;;  %v1489_v55 = vsub.f32 %v3064_v1, %v3167_v36  ;;  %v1490_v1 = vsub.f32 %v3068_v5, %v3173_v39  ;;  %v1492_v5 = vsub.f32 %v3076_v8, %v3177_v7 }
 0x5da   : > { %v2566_v2 = vpop.eup %2565  ;;  %v1477_v6 = vadd.f32 1e-05, %v1469_v61  ;;  %v1476_v58 = vadd.f32 1e-05, %v1468_v63 }
 0x5db   : > { %v2568_v9 = vpop.eup %2567  ;;  %v1495_v62 = vmul.f32 %v2566_v2, %v1173_v0  ;;  %v1553_v23 = vpop.permute.xlu1 %1552  ;;  %v1491_v0 = vsub.f32 %v3070_v16, %v3171_v38  ;;  %v1493_v16 = vsub.f32 %v3078_v20, %v3175_v40 }
 0x5dc   : > { %2577 = vrsqrt.f32 %v1477_v6  ;;  %v1494_v12 = vmul.f32 %v2568_v9, %v1172_v4 }
 0x5dd   : > { %2579 = vrsqrt.f32 %v1476_v58  ;;  %1509 = vperm.xlu1 %2371, %v1495_v62  }
 0x5de   : > { %v2570_v32 = vpop.eup %2569  ;;  %1504 = vperm.xlu0 %2372, %v1494_v12  }
 0x5df   : > { %v2572_v15 = vpop.eup %2571  ;;  %v1497_v26 = vmul.f32 %v2570_v32, %v1175_v13  ;;  %v1558_v49 = vpop.permute.xlu0 %1557 }
 0x5e0   : > { %v1496_v3 = vmul.f32 %v2572_v15, %v1174_v25  ;;  %v1563_v24 = vpop.permute.xlu1 %1562 }
 0x5e2   : > { %v2574_v21 = vpop.eup %2573  ;;  %1519 = vperm.xlu0 %2372, %v1497_v26   ;;  %1514 = vperm.xlu1 %2371, %v1496_v3  }
 0x5e3   : > { %v2576_v41 = vpop.eup %2575  ;;  %v1499_v42 = vmul.f32 %v2574_v21, %v1177_v30  ;;  %v1568_v28 = vpop.permute.xlu0 %1567 }
 0x5e4   : > { %v1498_v43 = vmul.f32 %v2576_v41, %v1176_v17  ;;  %v1573_v29 = vpop.permute.xlu1 %1572 }
 0x5e6   : > { %v2578_v22 = vpop.eup %2577  ;;  %1529 = vperm.xlu0 %2372, %v1499_v42   ;;  %1524 = vperm.xlu1 %2371, %v1498_v43  }
 0x5e7   : > { %v2580_v45 = vpop.eup %2579  ;;  %v1501_v46 = vmul.f32 %v2578_v22, %v1179_v44  ;;  %v1578_v50 = vpop.permute.xlu0 %1577 }
 0x5e8   : > { %v1500_v18 = vmul.f32 %v2580_v45, %v1178_v11 }
 0x5ea   : > { %1539 = vperm.xlu0 %2372, %v1501_v46   ;;  %1534 = vperm.xlu1 %2371, %v1500_v18  }
 0x5ee   : > { %1587 = vperm.xlu0 %2372, %v1187_v47   ;;  %1582 = vperm.xlu1 %2371, %v1186_v19  }
 0x65c   : > { %v1510_v27 = vpop.permute.xlu1 %1509 }
 0x65d   : > { %v1543_v51 = vmul.f32 %v1510_v27, %v1487_v31  ;;  %v1505_v52 = vpop.permute.xlu0 %1504 }
 0x65e   : > { %v1542_v53 = vmul.f32 %v1505_v52, %v1486_v10 }
 0x65f   : > { %v3229_v54 = vadd.f32 %v1558_v49, %v1543_v51 }
 0x660   : > { %v3235_v60 = vadd.f32 %v1553_v23, %v1542_v53 }
 0x661   : > { %v2084_v61 = vmul.f32 -1.442695, %v3229_v54  ;;  %v1515_v57 = vpop.permute.xlu1 %1514  ;;  %v1520_v34 = vpop.permute.xlu0 %1519 }
 0x662   : > { %v2083_v56 = vmul.f32 -1.442695, %v3235_v60  ;;  %v1544_v35 = vmul.f32 %v1515_v57, %v1488_v59  ;;  %v1545_v63 = vmul.f32 %v1520_v34, %v1489_v55 }
 0x663   : > { %2581 = vpow2.f32 %v2084_v61 }
 0x664   : > { %2583 = vpow2.f32 %v2083_v56  ;;  %v1592_v36 = vadd.f32 %v1563_v24, %v1544_v35  ;;  %v1593_v14 = vadd.f32 %v1568_v28, %v1545_v63 }
 0x665   : > { %v1525_v37 = vpop.permute.xlu1 %1524  ;;  %v1530_v4 = vpop.permute.xlu0 %1529 }
 0x666   : > { %v2085_v2 = vmul.f32 -1.442695, %v1592_v36  ;;  %v2086_v6 = vmul.f32 -1.442695, %v1593_v14  ;;  %v1546_v58 = vmul.f32 %v1525_v37, %v1490_v1  ;;  %v1547_v9 = vmul.f32 %v1530_v4, %v1491_v0 }
 0x668   : > { %2585 = vpow2.f32 %v2085_v2  ;;  %v1594_v62 = vadd.f32 %v1573_v29, %v1546_v58  ;;  %v1595_v12 = vadd.f32 %v1578_v50, %v1547_v9 }
 0x669   : > { %2587 = vpow2.f32 %v2086_v6  ;;  %v1535_v13 = vpop.permute.xlu1 %1534  ;;  %v1540_v25 = vpop.permute.xlu0 %1539 }
 0x66a   : > { %v2087_v38 = vmul.f32 -1.442695, %v1594_v62  ;;  %v2088_v39 = vmul.f32 -1.442695, %v1595_v12  ;;  %v1548_v32 = vmul.f32 %v1535_v13, %v1492_v5  ;;  %v1549_v15 = vmul.f32 %v1540_v25, %v1493_v16 }
 0x66c   : > { %2589 = vpow2.f32 %v2087_v38 }
 0x66d   : > { %v2582_v26 = vpop.eup %2581  ;;  %2591 = vpow2.f32 %v2088_v39  ;;  %v1583_v3 = vpop.permute.xlu1 %1582 }
 0x66e   : > { %v1588_v30 = vpop.permute.xlu0 %1587  ;;  %v2584_v17 = vpop.eup %2583  ;;  %v1623_v21 = vadd.f32 1.0, %v2582_v26  ;;  %v1596_v41 = vadd.f32 %v1583_v3, %v1548_v32 }
 0x66f   : > { %v1597_v42 = vadd.f32 %v1588_v30, %v1549_v15  ;;  %v1622_v43 = vadd.f32 1.0, %v2584_v17 }
 0x670   : > { %2593 = vrcp.f32 %v1623_v21  ;;  %v2089_v44 = vmul.f32 -1.442695, %v1596_v41 }
 0x671   : > { %v2090_v20 = vmul.f32 -1.442695, %v1597_v42  ;;  %2595 = vrcp.f32 %v1622_v43 }
 0x672   : > { %v2586_v40 = vpop.eup %2585  ;;  %2597 = vpow2.f32 %v2089_v44 }
 0x673   : > { %v2588_v8 = vpop.eup %2587  ;;  %v1624_v7 = vadd.f32 1.0, %v2586_v40  ;;  %2599 = vpow2.f32 %v2090_v20 }
 0x674   : > { %v1625_v11 = vadd.f32 1.0, %v2588_v8 }
 0x675   : > { %2601 = vrcp.f32 %v1624_v7 }
 0x676   : > { %v2590_v22 = vpop.eup %2589  ;;  %2603 = vrcp.f32 %v1625_v11 }
 0x677   : > { %v2592_v45 = vpop.eup %2591  ;;  %v1626_v46 = vadd.f32 1.0, %v2590_v22 }
 0x678   : > { %v1627_v18 = vadd.f32 1.0, %v2592_v45 }
 0x679   : > { %2605 = vrcp.f32 %v1626_v46  ;;  %v1662_v46 = vld [vmem:[%s3391_s9] sm:$0xff] }
 0x67a   : > { %v2594_v47 = vpop.eup %2593  ;;  %2607 = vrcp.f32 %v1627_v18  ;;  %v1664_v18 = vld [vmem:[%s3391_s9 + $0x10] sm:$0xff] }
 0x67b   : > { %v2596_v19 = vpop.eup %2595  ;;  %v1647_v23 = vmul.f32 %v2594_v47, %v3229_v54  ;;  %v1663_v47 = vld [vmem:[%s3391_s9 + $0x8] sm:$0xff] }
 0x67c   : > { %v2598_v49 = vpop.eup %2597  ;;  %v1646_v24 = vmul.f32 %v2596_v19, %v3235_v60  ;;  %v1666_v19 = vld [vmem:[%s3391_s9 + $0x20] sm:$0xff] }
 0x67d   : > { %v2600_v28 = vpop.eup %2599  ;;  %v1628_v29 = vadd.f32 1.0, %v2598_v49  ;;  %v1668_v49 = vld [vmem:[%s3391_s9 + $0x30] sm:$0xff] }
 0x67e   : > { %v1629_v50 = vadd.f32 1.0, %v2600_v28  ;;  %v2433_v31 = vpack.i.bf16 %v1647_v23, %v1646_v24  ;;  %v1665_v23 = vld [vmem:[%s3391_s9 + $0x18] sm:$0xff]  ;;  %v1667_v24 = vld [vmem:[%s3391_s9 + $0x28] sm:$0xff] }
 0x67f   : > { %v2602_v10 = vpop.eup %2601  ;;  %2609 = vrcp.f32 %v1628_v29  ;;  %v1669_v28 = vld [vmem:[%s3391_s9 + $0x38] sm:$0xff] }
 0x680   : > { %v2604_v27 = vpop.eup %2603  ;;  %v1648_v51 = vmul.f32 %v2602_v10, %v1592_v36  ;;  %2611 = vrcp.f32 %v1629_v50  ;;  %2434 = vrot.lane.b32.xlu1 %v2433_v31, %s2631_s18 }
 0x681   : > { %v1649_v52 = vmul.f32 %v2604_v27, %v1593_v14 }
 0x683   : > { %v2606_v53 = vpop.eup %2605  ;;  %v2438_v55 = vpack.i.bf16 %v1649_v52, %v1648_v51 }
 0x684   : > { %v2608_v59 = vpop.eup %2607  ;;  %v1650_v61 = vmul.f32 %v2606_v53, %v1594_v62 }
 0x685   : > { %v1651_v54 = vmul.f32 %v2608_v59, %v1595_v12  ;;  %2439 = vrot.lane.b32.xlu0 %v2438_v55, %s2631_s18 }
 0x687   : > { %v2443_v60 = vpack.i.bf16 %v1651_v54, %v1650_v61 }
 0x689   : > { %v2610_v57 = vpop.eup %2609  ;;  %2444 = vrot.lane.b32.xlu1 %v2443_v60, %s2631_s18 }
 0x68a   : > { %v2612_v34 = vpop.eup %2611  ;;  %v1652_v56 = vmul.f32 %v2610_v57, %v1596_v41 }
 0x68b   : > { %v1653_v35 = vmul.f32 %v2612_v34, %v1597_v42 }
 0x68d   : > { %v2448_v63 = vpack.i.bf16 %v1653_v35, %v1652_v56 }
 0x68f   : > { %2449 = vrot.lane.b32.xlu0 %v2448_v63, %s2631_s18 }
 0x6f2   : > { %v2435_v0 = vpop.permute.xlu1 %2434 }
 0x6f3   : > { %v2437_v1 = vunpack.i.h.bf16 %v2435_v0  ;;  %v2436_v36 = vunpack.i.l.bf16 %v2435_v0 }
 0x6f5   : > { %v1703_v14 = vsel %vm933_vm2, 0.0, %v2437_v1  ;;  %v1702_v37 = vsel %vm933_vm2, 0.0, %v2436_v36 }
 0x6f6   : > { %v1711_v4 = vsel %vm942_vm3, %v1703_v14, 0.0  ;;  %v1710_v2 = vsel %vm942_vm3, %v1702_v37, 0.0  ;;  %v2100_v6 = vpack.c.bf16 %v1703_v14, %v1702_v37 }
 0x6f7   : > { %v2440_v58 = vpop.permute.xlu0 %2439  ;;  %v2453_v9 = vpack.i.bf16 %v1711_v4, %v1710_v2 }
 0x6f8   : > { %v2442_v62 = vunpack.i.h.bf16 %v2440_v58  ;;  %v2441_v12 = vunpack.i.l.bf16 %v2440_v58  ;;  %2101 = vmatpush1.bf16.msk.msra.mxu1 %vm2959_vm4, %v2100_v6 }
 0x6f9   : > { %2454 = vrot.lane.b32.xlu1 %v2453_v9, %s2632_s19  ;;  %1876 = vmatprep.subr.bf16.mxu1 %v2630_v48 }
 0x6fa   : > { %v1705_v13 = vsel %vm933_vm2, 0.0, %v2442_v62  ;;  %v1704_v25 = vsel %vm933_vm2, 0.0, %v2441_v12 }
 0x6fb   : > { %v1713_v16 = vsel %vm942_vm3, %v1705_v13, 0.0  ;;  %v1712_v5 = vsel %vm942_vm3, %v1704_v25, 0.0  ;;  %v2103_v38 = vpack.c.bf16 %v1705_v13, %v1704_v25  ;;  %v2445_v39 = vpop.permute.xlu1 %2444 }
 0x6fc   : > { %v2447_v32 = vunpack.i.h.bf16 %v2445_v39  ;;  %v2446_v15 = vunpack.i.l.bf16 %v2445_v39  ;;  %v2458_v26 = vpack.i.bf16 %v1713_v16, %v1712_v5  ;;  %v2505_v16 = vld [vmem:[%s3390_s8] ss:$8 sps:$4 sm:$0xff]   ;;  %v2508_v5 = vld [vmem:[%s3390_s8 + $0x14] ss:$8 sps:$4 sm:$0xff]  }
 0x6fd   : > { %2104 = vmatpush1.bf16.msk.msra.mxu1 %vm2959_vm4, %v2103_v38  ;;  %v2510_v38 = vld [vmem:[%s3390_s8 + $0x10] ss:$8 sps:$4 sm:$0xff]   ;;  %v2513_v39 = vld [vmem:[%s3390_s8 + $0x20] ss:$8 sps:$4 sm:$0xff]  }
 0x6fe   : > { %v1707_v3 = vsel %vm933_vm2, 0.0, %v2447_v32  ;;  %v1706_v30 = vsel %vm933_vm2, 0.0, %v2446_v15  ;;  %2459 = vrot.lane.b32.xlu0 %v2458_v26, %s2632_s19  ;;  %1878 = vmatprep.subr.bf16.mxu1 %v2630_v48  ;;  %v2514_v32 = vld [vmem:[%s3390_s8 + $0x34] ss:$8 sps:$4 sm:$0xff]   ;;  %v2516_v15 = vld [vmem:[%s3390_s8 + $0x30] ss:$8 sps:$4 sm:$0xff]  }
 0x6ff   : > { %v1715_v17 = vsel %vm942_vm3, %v1707_v3, 0.0  ;;  %v1714_v21 = vsel %vm942_vm3, %v1706_v30, 0.0  ;;  %v2106_v41 = vpack.c.bf16 %v1707_v3, %v1706_v30 }
 0x700   : > { %v2463_v42 = vpack.i.bf16 %v1715_v17, %v1714_v21 }
 0x701   : > { %v2450_v43 = vpop.permute.xlu0 %2449  ;;  %2107 = vmatpush1.bf16.msk.msra.mxu1 %vm2959_vm4, %v2106_v41 }
 0x702   : > { %v2452_v44 = vunpack.i.h.bf16 %v2450_v43  ;;  %v2451_v20 = vunpack.i.l.bf16 %v2450_v43  ;;  %2464 = vrot.lane.b32.xlu1 %v2463_v42, %s2632_s19  ;;  %1880 = vmatprep.subr.bf16.mxu1 %v2630_v48 }
 0x704   : > { %v1709_v40 = vsel %vm933_vm2, 0.0, %v2452_v44  ;;  %v1708_v8 = vsel %vm933_vm2, 0.0, %v2451_v20 }
 0x705   : > { %v1717_v7 = vsel %vm942_vm3, %v1709_v40, 0.0  ;;  %v1716_v11 = vsel %vm942_vm3, %v1708_v8, 0.0  ;;  %v2109_v22 = vpack.c.bf16 %v1709_v40, %v1708_v8  ;;  %v2615_v40 = vld [vmem:[%s2710_s20 + $0x8] sm:$0xff] }
 0x706   : > { %2474 = vrot.lane.b32.xlu1 %v2453_v9, %s2633_s21  ;;  %v2468_v45 = vpack.i.bf16 %v1717_v7, %v1716_v11 }
 0x707   : > { %2110 = vmatpush1.bf16.msk.msra.mxu1 %vm2959_vm4, %v2109_v22 }
 0x708   : > { %2469 = vrot.lane.b32.xlu0 %v2468_v45, %s2632_s19  ;;  %1882 = vmatprep.subr.bf16.mxu1 %v2630_v48 }
 0x70a   : > { %2484 = vrot.lane.b32.xlu1 %v2463_v42, %s2633_s21  ;;  %v2614_v42 = vld [vmem:[%s2710_s20] sm:$0xff] }
 0x70c   : > { %2479 = vrot.lane.b32.xlu0 %v2458_v26, %s2633_s21 }
 0x70e   : > { %1788 = vperm.xlu1 %2371, %v1662_v46  }
 0x710   : > { %2489 = vrot.lane.b32.xlu0 %v2468_v45, %s2633_s21 }
 0x712   : > { %1798 = vperm.xlu1 %2371, %v1664_v18  }
 0x714   : > { %1793 = vperm.xlu0 %2372, %v1663_v47  }
 0x716   : > { %1808 = vperm.xlu1 %2371, %v1666_v19  }
 0x718   : > { %1803 = vperm.xlu0 %2372, %v1665_v23  }
 0x71a   : > { %1818 = vperm.xlu1 %2371, %v1668_v49   ;;  %v2617_v49 = vld [vmem:[%s2710_s20 + $0x18] sm:$0xff] }
 0x71c   : > { %1813 = vperm.xlu0 %2372, %v1667_v24  }
 0x720   : > { %1823 = vperm.xlu0 %2372, %v1669_v28  }
 0x76b   : > { %v2455_v29 = vpop.permute.xlu1 %2454 }
 0x76c   : > { %v2457_v50 = vunpack.i.h.bf16 %v2455_v29  ;;  %v2456_v31 = vunpack.i.l.bf16 %v2455_v29 }
 0x76e   : > { %v1778_v10 = vpack.c.bf16 %v2457_v50, %v2456_v31 }
 0x770   : > { %v2460_v27 = vpop.permute.xlu0 %2459  ;;  %1883 = vmatpush1.bf16.msra.mxu1 %v1778_v10 }
 0x771   : > { %v2462_v51 = vunpack.i.h.bf16 %v2460_v27  ;;  %v2461_v52 = vunpack.i.l.bf16 %v2460_v27  ;;  %1884 = vmatprep.subr.bf16.mxu1 %v2630_v48 }
 0x773   : > { %v1779_v53 = vpack.c.bf16 %v2462_v51, %v2461_v52  ;;  %v2618_v51 = vld [vmem:[%s2710_s20 + $0x20] sm:$0xff] }
 0x774   : > { %v2465_v55 = vpop.permute.xlu1 %2464 }
 0x775   : > { %v2467_v59 = vunpack.i.h.bf16 %v2465_v55  ;;  %v2466_v61 = vunpack.i.l.bf16 %v2465_v55  ;;  %1885 = vmatpush1.bf16.msra.mxu1 %v1779_v53 }
 0x776   : > { %1886 = vmatprep.subr.bf16.mxu1 %v2630_v48 }
 0x777   : > { %v1780_v54 = vpack.c.bf16 %v2467_v59, %v2466_v61  ;;  %v2619_v59 = vld [vmem:[%s2710_s20 + $0x28] sm:$0xff] }
 0x778   : > { %v2475_v60 = vpop.permute.xlu1 %2474 }
 0x779   : > { %1887 = vmatpush1.bf16.msra.mxu1 %v1780_v54  ;;  %v2477_v35 = vunpack.i.h.bf16 %v2475_v60  ;;  %v2476_v63 = vunpack.i.l.bf16 %v2475_v60 }
 0x77a   : > { %v2470_v57 = vpop.permute.xlu0 %2469  ;;  %1888 = vmatprep.subr.bf16.mxu1 %v2630_v48 }
 0x77b   : > { %v2472_v34 = vunpack.i.h.bf16 %v2470_v57  ;;  %v2471_v56 = vunpack.i.l.bf16 %v2470_v57  ;;  %v1782_v36 = vpack.c.bf16 %v2477_v35, %v2476_v63  ;;  %v2620_v63 = vld [vmem:[%s2710_s20 + $0x30] sm:$0xff] }
 0x77c   : > { %v2485_v4 = vpop.permute.xlu1 %2484 }
 0x77d   : > { %v1781_v0 = vpack.c.bf16 %v2472_v34, %v2471_v56  ;;  %v2487_v2 = vunpack.i.h.bf16 %v2485_v4  ;;  %v2486_v6 = vunpack.i.l.bf16 %v2485_v4 }
 0x77e   : > { %v2480_v1 = vpop.permute.xlu0 %2479 }
 0x77f   : > { %1889 = vmatpush1.bf16.msra.mxu1 %v1781_v0  ;;  %v2482_v14 = vunpack.i.h.bf16 %v2480_v1  ;;  %v2481_v37 = vunpack.i.l.bf16 %v2480_v1  ;;  %v1784_v62 = vpack.c.bf16 %v2487_v2, %v2486_v6 }
 0x780   : > { %1890 = vmatprep.subr.bf16.mxu1 %v2630_v48 }
 0x781   : > { %v1783_v58 = vpack.c.bf16 %v2482_v14, %v2481_v37  ;;  %v2621_v14 = vld [vmem:[%s2710_s20 + $0x38] sm:$0xff] }
 0x782   : > { %v2490_v9 = vpop.permute.xlu0 %2489 }
 0x783   : > { %1891 = vmatpush1.bf16.msra.mxu1 %v1782_v36  ;;  %v2492_v12 = vunpack.i.h.bf16 %v2490_v9  ;;  %v2491_v13 = vunpack.i.l.bf16 %v2490_v9 }
 0x784   : > { %1892 = vmatprep.subr.bf16.mxu1 %v2630_v48 }
 0x785   : > { %v1785_v25 = vpack.c.bf16 %v2492_v12, %v2491_v13 }
 0x787   : > { %1893 = vmatpush1.bf16.msra.mxu1 %v1783_v58 }
 0x788   : > { %1894 = vmatprep.subr.bf16.mxu1 %v2630_v48 }
 0x78b   : > { %1895 = vmatpush1.bf16.msra.mxu1 %v1784_v62 }
 0x78c   : > { %1896 = vmatprep.subr.bf16.mxu1 %v2630_v48  ;;  %v2511_v48 = vld [vmem:[%s3390_s8 + $0x24] ss:$8 sps:$4 sm:$0xff]  }
 0x78d   : > { %v1789_v26 = vpop.permute.xlu1 %1788 }
 0x78f   : > { %1897 = vmatpush1.bf16.msra.mxu1 %v1785_v25 }
 0x791   : > { %v1799_v7 = vpop.permute.xlu1 %1798 }
 0x792   : > { %1907 = vmatmul.mubr.bf16.vlgmr.msra.gmra.mrb[16].mxu1 %v2505_v16 }
 0x793   : > { %2112 = vmatprep.mubr.msk.bf16.mxu1 %vm393_vm0, %v2508_v5  ;;  %v1794_v21 = vpop.permute.xlu0 %1793 }
 0x795   : > { %v1809_v28 = vpop.permute.xlu1 %1808 }
 0x797   : > { %v1804_v46 = vpop.permute.xlu0 %1803 }
 0x799   : > { %v1819_v54 = vpop.permute.xlu1 %1818 }
 0x79a   : > { %1915 = vmatmul.mubr.bf16.gmra.mrb[20].mxu1 %v2510_v38 }
 0x79b   : > { %2113 = vmatprep.mubr.msk.bf16.mxu1 %vm393_vm0, %v2511_v48  ;;  %v1814_v10 = vpop.permute.xlu0 %1813 }
 0x79f   : > { %v1824_v56 = vpop.permute.xlu0 %1823 }
 0x7a2   : > { %1923 = vmatmul.mubr.bf16.gmra.mrb[24].mxu1 %v2513_v39 }
 0x7a3   : > { %2114 = vmatprep.mubr.msk.bf16.mxu1 %vm393_vm0, %v2514_v32 }
 0x7aa   : > { %1931 = vmatmul.mubr.bf16.gmra.mrb[28].mxu1 %v2516_v15 }
 0x865   : > { %v1908_v3 = vpop.f32.mrb[16].mxu1 }
 0x866   : > { %v1909_v30 = vadd.f32 %v1908_v3, %v1789_v26  ;;  %v1910_v17 = vpop.f32.mrb[17].mxu1 }
 0x867   : > { %v1911_v41 = vpop.f32.mrb[18].mxu1 }
 0x868   : > { %v1939_v43 = vadd.f32 %v2614_v42, %v1909_v30  ;;  %v1912_v44 = vadd.f32 %v1911_v41, %v1794_v21  ;;  %v1913_v20 = vpop.f32.mrb[19].mxu1 }
 0x86a   : > { %1947 = vst.msk [vmem:[%s3353_s24] sm:$0xff] %vm523_vm1, %v1939_v43  ;;  %v1940_v8 = vadd.f32 %v2615_v40, %v1912_v44 }
 0x86c   : > { %1948 = vst.msk [vmem:[%s3353_s24 + $0x8] sm:$0xff] %vm523_vm1, %v1940_v8 }
 0x86d   : > { %v1916_v11 = vpop.f32.mrb[20].mxu1 }
 0x86e   : > { %v1917_v22 = vadd.f32 %v1916_v11, %v1799_v7  ;;  %v1918_v45 = vpop.f32.mrb[21].mxu1 }
 0x86f   : > { %v1919_v18 = vpop.f32.mrb[22].mxu1 }
 0x870   : > { %v1941_v47 = vadd.f32 %v2616_v33, %v1917_v22  ;;  %v1920_v19 = vadd.f32 %v1919_v18, %v1804_v46  ;;  %v1921_v23 = vpop.f32.mrb[23].mxu1 }
 0x872   : > { %1949 = vst.msk [vmem:[%s3353_s24 + $0x10] sm:$0xff] %vm523_vm1, %v1941_v47  ;;  %v1942_v24 = vadd.f32 %v2617_v49, %v1920_v19 }
 0x874   : > { %1950 = vst.msk [vmem:[%s3353_s24 + $0x18] sm:$0xff] %vm523_vm1, %v1942_v24 }
 0x875   : > { %v1924_v29 = vpop.f32.mrb[24].mxu1 }
 0x876   : > { %v1925_v50 = vadd.f32 %v1924_v29, %v1809_v28  ;;  %v1926_v31 = vpop.f32.mrb[25].mxu1 }
 0x877   : > { %v1927_v27 = vpop.f32.mrb[26].mxu1 }
 0x878   : > { %v1943_v52 = vadd.f32 %v2618_v51, %v1925_v50  ;;  %v1928_v53 = vadd.f32 %v1927_v27, %v1814_v10  ;;  %v1929_v55 = vpop.f32.mrb[27].mxu1 }
 0x87a   : > { %1951 = vst.msk [vmem:[%s3353_s24 + $0x20] sm:$0xff] %vm523_vm1, %v1943_v52  ;;  %v1944_v61 = vadd.f32 %v2619_v59, %v1928_v53 }
 0x87c   : > { %1952 = vst.msk [vmem:[%s3353_s24 + $0x28] sm:$0xff] %vm523_vm1, %v1944_v61 }
 0x87d   : > { %v1932_v60 = vpop.f32.mrb[28].mxu1 }
 0x87e   : > { %v1933_v57 = vadd.f32 %v1932_v60, %v1819_v54  ;;  %v1934_v34 = vpop.f32.mrb[29].mxu1 }
 0x87f   : > { %v1935_v35 = vpop.f32.mrb[30].mxu1 }
 0x880   : > { %v1945_v0 = vadd.f32 %v2620_v63, %v1933_v57  ;;  %v1936_v1 = vadd.f32 %v1935_v35, %v1824_v56  ;;  %v1937_v36 = vpop.f32.mrb[31].mxu1 }
 0x882   : > { %1953 = vst.msk [vmem:[%s3353_s24 + $0x30] sm:$0xff] %vm523_vm1, %v1945_v0  ;;  %v1946_v37 = vadd.f32 %v2621_v14, %v1936_v1 }
 0x884   : > { %1954 = vst.msk [vmem:[%s3353_s24 + $0x38] sm:$0xff] %vm523_vm1, %v1946_v37 }
 0x885 PF: > { %s20_s13 = sadd.s32 1, %s2628_s13  }
 0x886   : > { %p17_p4 = scmp.ge.s32.totalorder %s20_s13, 4  }
 0x888   :  { %19 = sbr.rel (!%p17_p4) target bundleno = 1 (0x1), region = 90 }

// kernel: mid_block.3
= control target key start
LH: loop header
LB: loop body
LE: loop exit
PB: predicated region body
PF: predicated region fallthrough
CT: control target
= control target key end

     0   :  { %s3427_s25 = smov 0   ;;  %s4338_s0 = inlined_call_operand.vmem [shape: f32[2,64,16], index: 0, kind: input, shape index: {}]   ;;  %s4339_s1 = inlined_call_operand.vmem [shape: f32[64,64], index: 1, kind: input, shape index: {}]   ;;  %s4340_s2 = inlined_call_operand.vmem [shape: f32[64,1], index: 2, kind: input, shape index: {}]   ;;  %s4341_s3 = inlined_call_operand.vmem [shape: f32[64,1], index: 3, kind: input, shape index: {}]   ;;  %s4342_s4 = inlined_call_operand.vmem [shape: bf16[64,192], index: 4, kind: input, shape index: {}]   ;;  %s4343_s5 = inlined_call_operand.vmem [shape: f32[64,1], index: 5, kind: input, shape index: {}]   ;;  %s4344_s6 = inlined_call_operand.vmem [shape: f32[64,1], index: 6, kind: input, shape index: {}]   ;;  %s4345_s7 = inlined_call_operand.vmem [shape: f32[64,1], index: 7, kind: input, shape index: {}]   ;;  %s4346_s8 = inlined_call_operand.vmem [shape: bf16[64,192], index: 8, kind: input, shape index: {}]   ;;  %s4347_s9 = inlined_call_operand.vmem [shape: f32[64,1], index: 9, kind: input, shape index: {}]   ;;  %s4348_s10 = inlined_call_operand.vmem [shape: f32[64,1], index: 10, kind: input, shape index: {}]   ;;  %s4349_s11 = inlined_call_operand.vmem [shape: f32[64,1], index: 11, kind: input, shape index: {}]   ;;  %s4350_s12 = inlined_call_operand.vmem [shape: f32[2,64,16], index: 12, kind: output, shape index: {0}]   ;;  %s4351_s13 = inlined_call_operand.vmem [shape: f32[2,64,16], index: 13, kind: output, shape index: {1}]  }
   0x1 LB: > { %s2571_s26 = sadd.s32 4294967295, %s3351_s25   ;;  %p2575_p0 = scmp.ge.s32.totalorder %s3351_s25, 1  ;;  %s3351_s25 = sphi %s3427_s25, %s24_s25  }
   0x2   : > { %p390_p1 = scmp.lt.s32.totalorder %s3351_s25, 3 }
   0x4   : > { %p391_p2 = pnand %p2575_p0, %p390_p1 }
   0x5   : > { %p439_p3 = scmp.lt.s32.totalorder (!%p391_p2), %s2571_s26, 1  ;;  %v3438_v0 = vld [vmem:[%s4339_s1] sm:$0xff] (!%p391_p2)  ;;  %vm487_vm0 = vcmask (!%p391_p2), 523264   ;;  %v3503_v25 = vld [vmem:[%s4339_s1 + $0x8] sm:$0xff] (!%p391_p2)  ;;  %v3508_v26 = vld [vmem:[%s4339_s1 + $0x10] sm:$0xff] (!%p391_p2)  ;;  %v3353_v32 = vmov (!%p391_p2), 0  }
   0x6   : > { %394 = sbr.rel (%p391_p2) target bundleno = 2717 (0xa9d), region = 68  ;;  %2811 = vmatprep.mubr.msk.f32.mxu0 (!%p391_p2), %vm487_vm0, %v3438_v0  ;;  %2839 = vmatprep.mubr.msk.f32.mxu1 (!%p391_p2), %vm487_vm0, %v3438_v0  ;;  %v3517_v27 = vld [vmem:[%s4339_s1 + $0x18] sm:$0xff] (!%p391_p2)  ;;  %v3524_v28 = vld [vmem:[%s4339_s1 + $0x20] sm:$0xff] (!%p391_p2)  ;;  %v3535_v29 = vld [vmem:[%s4339_s1 + $0x28] sm:$0xff] (!%p391_p2)  ;;  %vm617_vm1 = vcmask (!%p391_p2), 130048   ;;  %s3354_s20 = smov (!%p391_p2), 1  }
   0x7   : > { %v3542_v30 = vld [vmem:[%s4339_s1 + $0x30] sm:$0xff] (!%p391_p2)  ;;  %v3553_v31 = vld [vmem:[%s4339_s1 + $0x38] sm:$0xff] (!%p391_p2)  ;;  %3071 = vset.pattern.permute.xlu1 (!%p391_p2), %v3353_v32  ;;  %3072 = vset.pattern.permute.xlu0 (!%p391_p2), %v3353_v32  ;;  %vm1027_vm2 = vcmask (!%p391_p2), 7168   ;;  %vm1036_vm3 = vcmask (!%p391_p2), 138240   ;;  %s3355_s21 = smov (!%p391_p2), 127   ;;  %s3356_s22 = smov (!%p391_p2), 126  }
   0x8   : > { %vm3692_vm4 = vmpackc.low (!%p391_p2), %vm1036_vm3, %vm1036_vm3 }
   0xd   : > { %s4355_s26 = smov (!%p439_p3, %s2571_s26), 1 }
   0xe   : > { %s3444_s29 = sshll.u32 %s4355_s26, 6 }
   0xf   : > { %s3450_s15 = scalar_lea.vmem %s4338_s0, %s3444_s29  ;;  %s4305_s16 = scalar_lea.vmem %s4351_s13, %s3444_s29 }
  0x10   : > { %v3453_v1 = vld [vmem:[%s3450_s15] sm:$0xff]  ;;  %v3456_v2 = vld [vmem:[%s3450_s15 + $0x8] sm:$0xff]  ;;  %v3459_v3 = vld [vmem:[%s3450_s15 + $0x10] sm:$0xff] }
  0x11   : > { %v2963_v4 = vpack.c.bf16 %v3456_v2, %v3453_v1  ;;  %v642_v5 = vmul.f32 %v3453_v1, %v3453_v1  ;;  %v643_v6 = vmul.f32 %v3456_v2, %v3456_v2  ;;  %v3468_v7 = vld [vmem:[%s3450_s15 + $0x18] sm:$0xff]  ;;  %v644_v8 = vmul.f32 %v3459_v3, %v3459_v3  ;;  %v3473_v9 = vld [vmem:[%s3450_s15 + $0x20] sm:$0xff]  ;;  %v3476_v10 = vld [vmem:[%s3450_s15 + $0x28] sm:$0xff] }
  0x12   : > { %v2967_v11 = vpack.c.bf16 %v3468_v7, %v3459_v3  ;;  %v645_v12 = vmul.f32 %v3468_v7, %v3468_v7  ;;  %v3483_v13 = vld [vmem:[%s3450_s15 + $0x30] sm:$0xff]  ;;  %v646_v15 = vmul.f32 %v3473_v9, %v3473_v9  ;;  %v647_v16 = vmul.f32 %v3476_v10, %v3476_v10  ;;  %v3490_v18 = vld [vmem:[%s3450_s15 + $0x38] sm:$0xff] }
  0x13   : > { %2964 = vmatprep.subr.bf16.mxu0 %v2963_v4  ;;  %v2979_v14 = vpack.c.bf16 %v643_v6, %v642_v5  ;;  %v2971_v19 = vpack.c.bf16 %v3476_v10, %v3473_v9  ;;  %v648_v21 = vmul.f32 %v3483_v13, %v3483_v13  ;;  %v649_v22 = vmul.f32 %v3490_v18, %v3490_v18  ;;  %v479_v5 = vld [vmem:[%s4341_s3] sm:$0xff]  ;;  %v480_v6 = vld [vmem:[%s4341_s3 + $0x8] sm:$0xff] }
  0x14   : > { %2966 = vmatpush3.bf16.msra.mxu0 %v2963_v4  ;;  %v2983_v17 = vpack.c.bf16 %v645_v12, %v644_v8  ;;  %v2987_v20 = vpack.c.bf16 %v647_v16, %v646_v15  ;;  %v2975_v23 = vpack.c.bf16 %v3490_v18, %v3483_v13  ;;  %v481_v8 = vld [vmem:[%s4341_s3 + $0x10] sm:$0xff]  ;;  %v483_v12 = vld [vmem:[%s4341_s3 + $0x20] sm:$0xff] }
  0x15   : > { %2980 = vmatprep.subr.bf16.mxu1 %v2979_v14  ;;  %2968 = vmatprep.subr.bf16.mxu0 %v2967_v11  ;;  %v2991_v24 = vpack.c.bf16 %v649_v22, %v648_v21 }
  0x16   : > { %2982 = vmatpush3.bf16.msra.mxu1 %v2979_v14 }
  0x17   : > { %2984 = vmatprep.subr.bf16.mxu1 %v2983_v17 }
  0x18   : > { %2970 = vmatpush3.bf16.msra.mxu0 %v2967_v11  ;;  %v482_v11 = vld [vmem:[%s4341_s3 + $0x18] sm:$0xff] }
  0x19   : > { %2972 = vmatprep.subr.bf16.mxu0 %v2971_v19 }
  0x1a   : > { %2986 = vmatpush3.bf16.msra.mxu1 %v2983_v17 }
  0x1b   : > { %2988 = vmatprep.subr.bf16.mxu1 %v2987_v20 }
  0x1c   : > { %2974 = vmatpush3.bf16.msra.mxu0 %v2971_v19 }
  0x1d   : > { %2976 = vmatprep.subr.bf16.mxu0 %v2975_v23 }
  0x1e   : > { %2990 = vmatpush3.bf16.msra.mxu1 %v2987_v20 }
  0x1f   : > { %2992 = vmatprep.subr.bf16.mxu1 %v2991_v24 }
  0x20   : > { %2978 = vmatpush3.bf16.msra.mxu0 %v2975_v23 }
  0x21   : > { %1201 = vmatprep.subr.bf16.mxu0 %v3353_v32 }
  0x22   : > { %2994 = vmatpush3.bf16.msra.mxu1 %v2991_v24 }
  0x23   : > { %2812 = vmatmul.mubr.msk.f32.vlgmr.msra.gmra.mrb[0].mxu0 %vm487_vm0, %v3503_v25 }
  0x24   : > { %2814 = vmatprep.mubr.msk.f32.mxu0 %vm487_vm0, %v3508_v26 }
  0x25   : > { %2840 = vmatmul.mubr.msk.f32.vlgmr.msra.gmra.mrb[0].mxu1 %vm487_vm0, %v3503_v25 }
  0x26   : > { %2842 = vmatprep.mubr.msk.f32.mxu1 %vm487_vm0, %v3508_v26 }
  0x27   : > { %2815 = vmatmul.mubr.msk.f32.gmra.mrb[2].mxu0 %vm487_vm0, %v3517_v27 }
  0x28   : > { %2817 = vmatprep.mubr.msk.f32.mxu0 %vm487_vm0, %v3524_v28 }
  0x29   : > { %2843 = vmatmul.mubr.msk.f32.gmra.mrb[2].mxu1 %vm487_vm0, %v3517_v27 }
  0x2a   : > { %2845 = vmatprep.mubr.msk.f32.mxu1 %vm487_vm0, %v3524_v28 }
  0x2b   : > { %2818 = vmatmul.mubr.msk.f32.gmra.mrb[4].mxu0 %vm487_vm0, %v3535_v29 }
  0x2c   : > { %2820 = vmatprep.mubr.msk.f32.mxu0 %vm487_vm0, %v3542_v30 }
  0x2d   : > { %2846 = vmatmul.mubr.msk.f32.gmra.mrb[4].mxu1 %vm487_vm0, %v3535_v29 }
  0x2e   : > { %2848 = vmatprep.mubr.msk.f32.mxu1 %vm487_vm0, %v3542_v30 }
  0x2f   : > { %2821 = vmatmul.mubr.msk.f32.gmra.mrb[6].mxu0 %vm487_vm0, %v3553_v31 }
  0x31   : > { %2849 = vmatmul.mubr.msk.f32.gmra.mrb[6].mxu1 %vm487_vm0, %v3553_v31 }
  0x32   : > { %2867 = vmatprep.mubr.msk.f32.mxu1 %vm487_vm0, %v3438_v0 }
  0xf6   : > { %v2813_v33 = vpop.f32.mrb[0].mxu0 }
  0xf7   : > { %v621_v34 = vsel %vm617_vm1, %v2813_v33, 0.0  ;;  %v578_v35 = vpop.f32.mrb[1].mxu0 }
  0xf8   : > { %v2841_v36 = vpop.f32.mrb[0].mxu1  ;;  %622 = vadd.xlane.f32.xlu0 %v621_v34  ;;  %v618_v40 = vsel %vm617_vm1, %v578_v35, 0.0 }
  0xf9   : > { %v716_v37 = vpop.f32.mrb[1].mxu1  ;;  %v758_v38 = vsel %vm617_vm1, %v2841_v36, 0.0 }
  0xfa   : > { %759 = vadd.xlane.f32.xlu1 %v758_v38  ;;  %v2816_v39 = vpop.f32.mrb[2].mxu0  ;;  %v755_v43 = vsel %vm617_vm1, %v716_v37, 0.0 }
  0xfb   : > { %v588_v41 = vpop.f32.mrb[3].mxu0  ;;  %v627_v47 = vsel %vm617_vm1, %v2816_v39, 0.0 }
  0xfc   : > { %619 = vadd.xlane.f32.xlu0 %v618_v40  ;;  %v2844_v42 = vpop.f32.mrb[2].mxu1  ;;  %v624_v44 = vsel %vm617_vm1, %v588_v41, 0.0  ;;  %v472_v41 = vld [vmem:[%s4340_s2 + $0x8] sm:$0xff] }
  0xfd   : > { %v726_v45 = vpop.f32.mrb[3].mxu1  ;;  %v764_v53 = vsel %vm617_vm1, %v2844_v42, 0.0 }
  0xfe   : > { %756 = vadd.xlane.f32.xlu1 %v755_v43  ;;  %v2819_v46 = vpop.f32.mrb[4].mxu0  ;;  %v761_v50 = vsel %vm617_vm1, %v726_v45, 0.0 }
  0xff   : > { %v598_v48 = vpop.f32.mrb[5].mxu0  ;;  %v633_v58 = vsel %vm617_vm1, %v2819_v46, 0.0 }
 0x100   : > { %625 = vadd.xlane.f32.xlu0 %v624_v44  ;;  %v2847_v49 = vpop.f32.mrb[4].mxu1  ;;  %v630_v56 = vsel %vm617_vm1, %v598_v48, 0.0 }
 0x101   : > { %v736_v51 = vpop.f32.mrb[5].mxu1  ;;  %v770_v60 = vsel %vm617_vm1, %v2847_v49, 0.0  ;;  %v471_v49 = vld [vmem:[%s4340_s2] sm:$0xff] }
 0x102   : > { %628 = vadd.xlane.f32.xlu1 %v627_v47  ;;  %v2822_v52 = vpop.f32.mrb[6].mxu0  ;;  %v767_v59 = vsel %vm617_vm1, %v736_v51, 0.0 }
 0x103   : > { %v608_v54 = vpop.f32.mrb[7].mxu0  ;;  %v639_v62 = vsel %vm617_vm1, %v2822_v52, 0.0 }
 0x104   : > { %762 = vadd.xlane.f32.xlu0 %v761_v50  ;;  %v2850_v55 = vpop.f32.mrb[6].mxu1  ;;  %v636_v61 = vsel %vm617_vm1, %v608_v54, 0.0 }
 0x105   : > { %v746_v57 = vpop.f32.mrb[7].mxu1  ;;  %v776_v4 = vsel %vm617_vm1, %v2850_v55, 0.0 }
 0x106   : > { %765 = vadd.xlane.f32.xlu1 %v764_v53  ;;  %v773_v63 = vsel %vm617_vm1, %v746_v57, 0.0 }
 0x108   : > { %631 = vadd.xlane.f32.xlu0 %v630_v56 }
 0x10a   : > { %634 = vadd.xlane.f32.xlu1 %v633_v58 }
 0x10c   : > { %768 = vadd.xlane.f32.xlu0 %v767_v59 }
 0x10e   : > { %771 = vadd.xlane.f32.xlu1 %v770_v60 }
 0x110   : > { %637 = vadd.xlane.f32.xlu0 %v636_v61  ;;  %v484_v61 = vld [vmem:[%s4341_s3 + $0x28] sm:$0xff] }
 0x112   : > { %640 = vadd.xlane.f32.xlu1 %v639_v62 }
 0x114   : > { %774 = vadd.xlane.f32.xlu0 %v773_v63  ;;  %v474_v63 = vld [vmem:[%s4340_s2 + $0x18] sm:$0xff] }
 0x116   : > { %777 = vadd.xlane.f32.xlu1 %v776_v4 }
 0x127   : > { %877 = vperm.xlu1 %3071, %v479_v5  }
 0x12b   : > { %882 = vperm.xlu1 %3071, %v480_v6  }
 0x12f   : > { %887 = vperm.xlu1 %3071, %v481_v8  }
 0x133   : > { %892 = vperm.xlu1 %3071, %v482_v11  }
 0x137   : > { %897 = vperm.xlu1 %3071, %v483_v12  }
 0x185   : > { %v3599_v14 = vpop.xlane.xlu0 %622 }
 0x186   : > { %v780_v15 = vmul.f32 %v3599_v14, %v3599_v14 }
 0x187   : > { %v760_v16 = vpop.xlane.xlu1 %759 }
 0x188   : > { %v788_v17 = vsub.f32 %v760_v16, %v780_v15 }
 0x189   : > { %v3603_v19 = vpop.xlane.xlu0 %619 }
 0x18a   : > { %v796_v20 = vadd.f32 1e-05, %v788_v17  ;;  %v779_v21 = vmul.f32 %v3603_v19, %v3603_v19 }
 0x18b   : > { %v757_v22 = vpop.xlane.xlu1 %756 }
 0x18c   : > { %3217 = vrsqrt.f32 %v796_v20  ;;  %v787_v23 = vsub.f32 %v757_v22, %v779_v21  ;;  %v473_v20 = vld [vmem:[%s4340_s2 + $0x10] sm:$0xff] }
 0x18d   : > { %v3607_v24 = vpop.xlane.xlu0 %625 }
 0x18e   : > { %v795_v33 = vadd.f32 1e-05, %v787_v23  ;;  %v781_v34 = vmul.f32 %v3607_v24, %v3607_v24 }
 0x18f   : > { %v3611_v35 = vpop.xlane.xlu1 %628 }
 0x190   : > { %3219 = vrsqrt.f32 %v795_v33  ;;  %v782_v37 = vmul.f32 %v3611_v35, %v3611_v35  ;;  %v475_v33 = vld [vmem:[%s4340_s2 + $0x20] sm:$0xff] }
 0x191   : > { %v763_v36 = vpop.xlane.xlu0 %762 }
 0x192   : > { %v789_v38 = vsub.f32 %v763_v36, %v781_v34  ;;  %v476_v34 = vld [vmem:[%s4340_s2 + $0x28] sm:$0xff] }
 0x193   : > { %v766_v39 = vpop.xlane.xlu1 %765 }
 0x194   : > { %v790_v40 = vsub.f32 %v766_v39, %v782_v37  ;;  %v797_v44 = vadd.f32 1e-05, %v789_v38  ;;  %v477_v39 = vld [vmem:[%s4340_s2 + $0x30] sm:$0xff] }
 0x195   : > { %v3618_v42 = vpop.xlane.xlu0 %631 }
 0x196   : > { %v3218_v43 = vpop.eup %3217  ;;  %v798_v45 = vadd.f32 1e-05, %v790_v40  ;;  %v783_v46 = vmul.f32 %v3618_v42, %v3618_v42 }
 0x197   : > { %v3622_v47 = vpop.xlane.xlu1 %634  ;;  %v820_v48 = vmul.f32 %v3218_v43, %v472_v41  ;;  %v478_v41 = vld [vmem:[%s4340_s2 + $0x38] sm:$0xff] }
 0x198   : > { %3221 = vrsqrt.f32 %v798_v45  ;;  %v784_v52 = vmul.f32 %v3622_v47, %v3622_v47 }
 0x199   : > { %v769_v50 = vpop.xlane.xlu0 %768  ;;  %834 = vperm.xlu1 %3071, %v820_v48   ;;  %3223 = vrsqrt.f32 %v797_v44  ;;  %v486_v48 = vld [vmem:[%s4341_s3 + $0x38] sm:$0xff] }
 0x19a   : > { %v3220_v51 = vpop.eup %3219  ;;  %v791_v53 = vsub.f32 %v769_v50, %v783_v46  ;;  %v485_v46 = vld [vmem:[%s4341_s3 + $0x30] sm:$0xff] }
 0x19b   : > { %v772_v54 = vpop.xlane.xlu1 %771  ;;  %v819_v55 = vmul.f32 %v3220_v51, %v471_v49 }
 0x19c   : > { %v799_v56 = vadd.f32 1e-05, %v791_v53  ;;  %v792_v57 = vsub.f32 %v772_v54, %v784_v52  ;;  %v812_v54 = vsub.f32 %v3456_v2, %v3599_v14  ;;  %v813_v2 = vsub.f32 %v3459_v3, %v3607_v24 }
 0x19d   : > { %829 = vperm.xlu0 %3072, %v819_v55   ;;  %v3629_v58 = vpop.xlane.xlu0 %637 }
 0x19e   : > { %3225 = vrsqrt.f32 %v799_v56  ;;  %v800_v59 = vadd.f32 1e-05, %v792_v57  ;;  %v785_v60 = vmul.f32 %v3629_v58, %v3629_v58  ;;  %v811_v57 = vsub.f32 %v3453_v1, %v3603_v19 }
 0x19f   : > { %v3636_v62 = vpop.xlane.xlu1 %640 }
 0x1a0   : > { %3227 = vrsqrt.f32 %v800_v59  ;;  %v786_v6 = vmul.f32 %v3636_v62, %v3636_v62 }
 0x1a1   : > { %v775_v4 = vpop.xlane.xlu0 %774  ;;  %902 = vperm.xlu0 %3072, %v484_v61  }
 0x1a2   : > { %v3222_v5 = vpop.eup %3221  ;;  %v793_v8 = vsub.f32 %v775_v4, %v785_v60 }
 0x1a3   : > { %v778_v11 = vpop.xlane.xlu1 %777  ;;  %v822_v12 = vmul.f32 %v3222_v5, %v474_v63  ;;  %v3224_v15 = vpop.eup %3223 }
 0x1a4   : > { %v801_v16 = vadd.f32 1e-05, %v793_v8  ;;  %v794_v17 = vsub.f32 %v778_v11, %v786_v6  ;;  %v821_v22 = vmul.f32 %v3224_v15, %v473_v20  ;;  %v814_v6 = vsub.f32 %v3468_v7, %v3611_v35 }
 0x1a5   : > { %844 = vperm.xlu1 %3071, %v822_v12   ;;  %v815_v20 = vsub.f32 %v3473_v9, %v3618_v42  ;;  %v816_v7 = vsub.f32 %v3476_v10, %v3622_v47  ;;  %v817_v10 = vsub.f32 %v3483_v13, %v3629_v58 }
 0x1a6   : > { %3229 = vrsqrt.f32 %v801_v16  ;;  %v802_v21 = vadd.f32 1e-05, %v794_v17 }
 0x1a7   : > { %v878_v49 = vpop.permute.xlu1 %877 }
 0x1a8   : > { %v3226_v23 = vpop.eup %3225  ;;  %3231 = vrsqrt.f32 %v802_v21 }
 0x1a9   : > { %839 = vperm.xlu1 %3071, %v821_v22   ;;  %v823_v37 = vmul.f32 %v3226_v23, %v475_v33 }
 0x1aa   : > { %v3228_v36 = vpop.eup %3227 }
 0x1ab   : > { %v824_v38 = vmul.f32 %v3228_v36, %v476_v34  ;;  %v883_v50 = vpop.permute.xlu1 %882 }
 0x1ad   : > { %849 = vperm.xlu1 %3071, %v823_v37   ;;  %854 = vperm.xlu0 %3072, %v824_v38  }
 0x1af   : > { %v888_v51 = vpop.permute.xlu1 %887 }
 0x1b0   : > { %v3230_v40 = vpop.eup %3229 }
 0x1b1   : > { %v825_v43 = vmul.f32 %v3230_v40, %v477_v39  ;;  %v818_v40 = vsub.f32 %v3490_v18, %v3636_v62 }
 0x1b2   : > { %v3232_v44 = vpop.eup %3231 }
 0x1b3   : > { %859 = vperm.xlu1 %3071, %v825_v43   ;;  %v826_v45 = vmul.f32 %v3232_v44, %v478_v41  ;;  %v893_v52 = vpop.permute.xlu1 %892 }
 0x1b5   : > { %864 = vperm.xlu0 %3072, %v826_v45  }
 0x1b7   : > { %907 = vperm.xlu1 %3071, %v485_v46   ;;  %v898_v53 = vpop.permute.xlu1 %897 }
 0x1b9   : > { %912 = vperm.xlu0 %3072, %v486_v48  }
 0x218   : > { %v835_v55 = vpop.permute.xlu1 %834 }
 0x219   : > { %v868_v56 = vmul.f32 %v835_v55, %v812_v54 }
 0x21b   : > { %v916_v59 = vadd.f32 %v883_v50, %v868_v56 }
 0x21c   : > { %v830_v60 = vpop.permute.xlu0 %829 }
 0x21d   : > { %v2599_v61 = vmul.f32 -1.442695, %v916_v59  ;;  %v867_v63 = vmul.f32 %v830_v60, %v811_v57 }
 0x21f   : > { %3233 = vpow2.f32 %v2599_v61  ;;  %v915_v4 = vadd.f32 %v878_v49, %v867_v63 }
 0x220   : > { %v903_v12 = vpop.permute.xlu0 %902 }
 0x221   : > { %v2598_v5 = vmul.f32 -1.442695, %v915_v4 }
 0x223   : > { %3235 = vpow2.f32 %v2598_v5 }
 0x224   : > { %v845_v8 = vpop.permute.xlu1 %844 }
 0x225   : > { %v870_v11 = vmul.f32 %v845_v8, %v814_v6 }
 0x227   : > { %v3672_v14 = vadd.f32 %v893_v52, %v870_v11 }
 0x228   : > { %v840_v1 = vpop.permute.xlu1 %839 }
 0x229   : > { %v3234_v19 = vpop.eup %3233  ;;  %v2601_v15 = vmul.f32 -1.442695, %v3672_v14  ;;  %v869_v16 = vmul.f32 %v840_v1, %v813_v2 }
 0x22a   : > { %v948_v17 = vadd.f32 1.0, %v3234_v19 }
 0x22b   : > { %3237 = vpow2.f32 %v2601_v15  ;;  %v917_v35 = vadd.f32 %v888_v51, %v869_v16 }
 0x22c   : > { %v850_v21 = vpop.permute.xlu1 %849  ;;  %v855_v22 = vpop.permute.xlu0 %854  ;;  %3239 = vrcp.f32 %v948_v17 }
 0x22d   : > { %v3236_v23 = vpop.eup %3235  ;;  %v2600_v3 = vmul.f32 -1.442695, %v917_v35  ;;  %v871_v24 = vmul.f32 %v850_v21, %v815_v20  ;;  %v872_v33 = vmul.f32 %v855_v22, %v816_v7 }
 0x22e   : > { %v947_v34 = vadd.f32 1.0, %v3236_v23 }
 0x22f   : > { %3241 = vpow2.f32 %v2600_v3  ;;  %v919_v36 = vadd.f32 %v898_v53, %v871_v24  ;;  %v920_v37 = vadd.f32 %v903_v12, %v872_v33  ;;  %v3207_v33 = vld [vmem:[%s4346_s8 + $0x4] ss:$8 sps:$4 sm:$0xff]  }
 0x230   : > { %3243 = vrcp.f32 %v947_v34 }
 0x231   : > { %v2602_v38 = vmul.f32 -1.442695, %v919_v36  ;;  %v2603_v39 = vmul.f32 -1.442695, %v920_v37 }
 0x232   : > { %v860_v9 = vpop.permute.xlu1 %859 }
 0x233   : > { %3245 = vpow2.f32 %v2602_v38  ;;  %v873_v41 = vmul.f32 %v860_v9, %v817_v10 }
 0x234   : > { %3247 = vpow2.f32 %v2603_v39  ;;  %v865_v42 = vpop.permute.xlu0 %864 }
 0x235   : > { %v3238_v47 = vpop.eup %3237  ;;  %v874_v45 = vmul.f32 %v865_v42, %v818_v40 }
 0x236   : > { %v950_v43 = vadd.f32 1.0, %v3238_v47  ;;  %v908_v44 = vpop.permute.xlu1 %907  ;;  %v3240_v48 = vpop.eup %3239 }
 0x237   : > { %v921_v46 = vadd.f32 %v908_v44, %v873_v41  ;;  %v972_v58 = vmul.f32 %v3240_v48, %v916_v59 }
 0x238   : > { %v913_v49 = vpop.permute.xlu0 %912  ;;  %3249 = vrcp.f32 %v950_v43 }
 0x239   : > { %v3242_v50 = vpop.eup %3241  ;;  %v2604_v51 = vmul.f32 -1.442695, %v921_v46  ;;  %v922_v52 = vadd.f32 %v913_v49, %v874_v45 }
 0x23a   : > { %v3244_v53 = vpop.eup %3243  ;;  %v949_v13 = vadd.f32 1.0, %v3242_v50 }
 0x23b   : > { %v971_v54 = vmul.f32 %v3244_v53, %v915_v4  ;;  %3251 = vpow2.f32 %v2604_v51  ;;  %v2605_v55 = vmul.f32 -1.442695, %v922_v52 }
 0x23c   : > { %3253 = vrcp.f32 %v949_v13 }
 0x23d   : > { %v3246_v56 = vpop.eup %3245  ;;  %3255 = vpow2.f32 %v2605_v55  ;;  %v3073_v18 = vpack.i.bf16 %v972_v58, %v971_v54 }
 0x23e   : > { %v3248_v62 = vpop.eup %3247  ;;  %v951_v57 = vadd.f32 1.0, %v3246_v56 }
 0x23f   : > { %v952_v60 = vadd.f32 1.0, %v3248_v62  ;;  %3074 = vrot.lane.b32.xlu1 %v3073_v18, %s3354_s20 }
 0x240   : > { %3257 = vrcp.f32 %v951_v57 }
 0x241   : > { %3259 = vrcp.f32 %v952_v60 }
 0x242   : > { %v3250_v61 = vpop.eup %3249 }
 0x243   : > { %v974_v4 = vmul.f32 %v3250_v61, %v3672_v14 }
 0x245   : > { %v3252_v63 = vpop.eup %3251 }
 0x246   : > { %v3254_v5 = vpop.eup %3253  ;;  %v953_v6 = vadd.f32 1.0, %v3252_v63  ;;  %v987_v63 = vld [vmem:[%s4343_s5] sm:$0xff] }
 0x247   : > { %v3256_v59 = vpop.eup %3255  ;;  %v973_v8 = vmul.f32 %v3254_v5, %v917_v35  ;;  %v989_v5 = vld [vmem:[%s4343_s5 + $0x10] sm:$0xff] }
 0x248   : > { %3261 = vrcp.f32 %v953_v6  ;;  %v954_v11 = vadd.f32 1.0, %v3256_v59  ;;  %v3195_v6 = vld [vmem:[%s4342_s4 + $0x4] ss:$8 sps:$4 sm:$0xff]  }
 0x249   : > { %v3078_v12 = vpack.i.bf16 %v974_v4, %v973_v8  ;;  %v991_v59 = vld [vmem:[%s4343_s5 + $0x20] sm:$0xff]  ;;  %v988_v4 = vld [vmem:[%s4343_s5 + $0x8] sm:$0xff]  ;;  %2626 = vmatprep.mubr.msk.bf16.mxu0 %vm487_vm0, %v3195_v6  ;;  %v993_v8 = vld [vmem:[%s4343_s5 + $0x30] sm:$0xff] }
 0x24a   : > { %v3258_v2 = vpop.eup %3257  ;;  %3263 = vrcp.f32 %v954_v11  ;;  %v990_v11 = vld [vmem:[%s4343_s5 + $0x18] sm:$0xff] }
 0x24b   : > { %v3260_v1 = vpop.eup %3259  ;;  %v975_v19 = vmul.f32 %v3258_v2, %v919_v36  ;;  %3079 = vrot.lane.b32.xlu0 %v3078_v12, %s3354_s20  ;;  %v992_v12 = vld [vmem:[%s4343_s5 + $0x28] sm:$0xff]  ;;  %v994_v2 = vld [vmem:[%s4343_s5 + $0x38] sm:$0xff] }
 0x24c   : > { %v976_v15 = vmul.f32 %v3260_v1, %v920_v37 }
 0x24e   : > { %v3083_v16 = vpack.i.bf16 %v976_v15, %v975_v19 }
 0x250   : > { %3084 = vrot.lane.b32.xlu1 %v3083_v16, %s3354_s20 }
 0x252   : > { %v3262_v17 = vpop.eup %3261 }
 0x253   : > { %v977_v7 = vmul.f32 %v3262_v17, %v921_v46 }
 0x254   : > { %v3264_v20 = vpop.eup %3263 }
 0x255   : > { %v978_v21 = vmul.f32 %v3264_v20, %v922_v52 }
 0x257   : > { %v3088_v22 = vpack.i.bf16 %v978_v21, %v977_v7 }
 0x259   : > { %3089 = vrot.lane.b32.xlu0 %v3088_v22, %s3354_s20 }
 0x2b1   : > { %v3075_v14 = vpop.permute.xlu1 %3074 }
 0x2b2   : > { %v3077_v35 = vunpack.i.h.bf16 %v3075_v14  ;;  %v3076_v23 = vunpack.i.l.bf16 %v3075_v14 }
 0x2b4   : > { %v1029_v3 = vsel %vm1027_vm2, 0.0, %v3077_v35  ;;  %v1028_v24 = vsel %vm1027_vm2, 0.0, %v3076_v23 }
 0x2b5   : > { %v2615_v34 = vpack.c.bf16 %v1029_v3, %v1028_v24  ;;  %v1037_v36 = vsel %vm1036_vm3, %v1028_v24, 0.0  ;;  %v1038_v37 = vsel %vm1036_vm3, %v1029_v3, 0.0 }
 0x2b6   : > { %v3093_v38 = vpack.i.bf16 %v1038_v37, %v1037_v36 }
 0x2b7   : > { %2616 = vmatpush1.bf16.msk.msra.mxu0 %vm3692_vm4, %v2615_v34 }
 0x2b8   : > { %3094 = vrot.lane.b32.xlu1 %v3093_v38, %s3355_s21  ;;  %1203 = vmatprep.subr.bf16.mxu0 %v3353_v32 }
 0x2bd   : > { %v3080_v39 = vpop.permute.xlu0 %3079 }
 0x2be   : > { %v3082_v9 = vunpack.i.h.bf16 %v3080_v39  ;;  %v3081_v10 = vunpack.i.l.bf16 %v3080_v39 }
 0x2c0   : > { %v1031_v42 = vsel %vm1027_vm2, 0.0, %v3082_v9  ;;  %v1030_v47 = vsel %vm1027_vm2, 0.0, %v3081_v10 }
 0x2c1   : > { %v2618_v40 = vpack.c.bf16 %v1031_v42, %v1030_v47  ;;  %v1039_v41 = vsel %vm1036_vm3, %v1030_v47, 0.0  ;;  %v1040_v43 = vsel %vm1036_vm3, %v1031_v42, 0.0 }
 0x2c2   : > { %v3085_v44 = vpop.permute.xlu1 %3084  ;;  %v3098_v45 = vpack.i.bf16 %v1040_v43, %v1039_v41 }
 0x2c3   : > { %v3087_v46 = vunpack.i.h.bf16 %v3085_v44  ;;  %v3086_v48 = vunpack.i.l.bf16 %v3085_v44  ;;  %2619 = vmatpush1.bf16.msk.msra.mxu0 %vm3692_vm4, %v2618_v40 }
 0x2c4   : > { %3099 = vrot.lane.b32.xlu0 %v3098_v45, %s3355_s21  ;;  %1205 = vmatprep.subr.bf16.mxu0 %v3353_v32 }
 0x2c5   : > { %v1033_v49 = vsel %vm1027_vm2, 0.0, %v3087_v46  ;;  %v1032_v50 = vsel %vm1027_vm2, 0.0, %v3086_v48 }
 0x2c6   : > { %v2621_v51 = vpack.c.bf16 %v1033_v49, %v1032_v50  ;;  %v1041_v52 = vsel %vm1036_vm3, %v1032_v50, 0.0  ;;  %v1042_v53 = vsel %vm1036_vm3, %v1033_v49, 0.0 }
 0x2c7   : > { %v3103_v13 = vpack.i.bf16 %v1042_v53, %v1041_v52  ;;  %v3196_v52 = vld [vmem:[%s4342_s4 + $0x14] ss:$8 sps:$4 sm:$0xff]   ;;  %v3198_v53 = vld [vmem:[%s4342_s4 + $0x10] ss:$8 sps:$4 sm:$0xff]  }
 0x2c8   : > { %2622 = vmatpush1.bf16.msk.msra.mxu0 %vm3692_vm4, %v2621_v51  ;;  %v3193_v51 = vld [vmem:[%s4342_s4] ss:$8 sps:$4 sm:$0xff]  }
 0x2c9   : > { %3104 = vrot.lane.b32.xlu1 %v3103_v13, %s3355_s21  ;;  %1207 = vmatprep.subr.bf16.mxu0 %v3353_v32 }
 0x2cb   : > { %v3090_v58 = vpop.permute.xlu0 %3089 }
 0x2cc   : > { %v3092_v54 = vunpack.i.h.bf16 %v3090_v58  ;;  %v3091_v55 = vunpack.i.l.bf16 %v3090_v58  ;;  %v3201_v58 = vld [vmem:[%s4342_s4 + $0x20] ss:$8 sps:$4 sm:$0xff]  }
 0x2cd   : > { %3114 = vrot.lane.b32.xlu1 %v3093_v38, %s3356_s22 }
 0x2ce   : > { %v1035_v56 = vsel %vm1027_vm2, 0.0, %v3092_v54  ;;  %v1034_v18 = vsel %vm1027_vm2, 0.0, %v3091_v55  ;;  %v3202_v54 = vld [vmem:[%s4342_s4 + $0x34] ss:$8 sps:$4 sm:$0xff]   ;;  %v3204_v55 = vld [vmem:[%s4342_s4 + $0x30] ss:$8 sps:$4 sm:$0xff]  }
 0x2cf   : > { %v2624_v62 = vpack.c.bf16 %v1035_v56, %v1034_v18  ;;  %v1043_v57 = vsel %vm1036_vm3, %v1034_v18, 0.0  ;;  %v1044_v60 = vsel %vm1036_vm3, %v1035_v56, 0.0 }
 0x2d0   : > { %v3108_v61 = vpack.i.bf16 %v1044_v60, %v1043_v57 }
 0x2d1   : > { %3124 = vrot.lane.b32.xlu1 %v3103_v13, %s3356_s22  ;;  %2625 = vmatpush1.bf16.msk.msra.mxu0 %vm3692_vm4, %v2624_v62  ;;  %v3199_v13 = vld [vmem:[%s4342_s4 + $0x24] ss:$8 sps:$4 sm:$0xff]  }
 0x2d2   : > { %3109 = vrot.lane.b32.xlu0 %v3108_v61, %s3355_s21  ;;  %1209 = vmatprep.subr.bf16.mxu0 %v3353_v32 }
 0x2d5   : > { %1115 = vperm.xlu1 %3071, %v987_v63  }
 0x2d6   : > { %3119 = vrot.lane.b32.xlu0 %v3098_v45, %s3356_s22 }
 0x2d9   : > { %1125 = vperm.xlu1 %3071, %v989_v5  }
 0x2da   : > { %3129 = vrot.lane.b32.xlu0 %v3108_v61, %s3356_s22 }
 0x2dd   : > { %1135 = vperm.xlu1 %3071, %v991_v59  }
 0x2de   : > { %1120 = vperm.xlu0 %3072, %v988_v4  }
 0x2e1   : > { %1145 = vperm.xlu1 %3071, %v993_v8  }
 0x2e2   : > { %1130 = vperm.xlu0 %3072, %v990_v11  }
 0x2e6   : > { %1140 = vperm.xlu0 %3072, %v992_v12  }
 0x2ea   : > { %1150 = vperm.xlu0 %3072, %v994_v2  }
 0x32a   : > { %v3095_v1 = vpop.permute.xlu1 %3094 }
 0x32b   : > { %v3097_v19 = vunpack.i.h.bf16 %v3095_v1  ;;  %v3096_v15 = vunpack.i.l.bf16 %v3095_v1 }
 0x32d   : > { %v1105_v16 = vpack.c.bf16 %v3097_v19, %v3096_v15 }
 0x32f   : > { %1210 = vmatpush1.bf16.msra.mxu0 %v1105_v16 }
 0x330   : > { %1211 = vmatprep.subr.bf16.mxu0 %v3353_v32 }
 0x336   : > { %v3100_v17 = vpop.permute.xlu0 %3099 }
 0x337   : > { %v3102_v20 = vunpack.i.h.bf16 %v3100_v17  ;;  %v3101_v7 = vunpack.i.l.bf16 %v3100_v17 }
 0x339   : > { %v1106_v21 = vpack.c.bf16 %v3102_v20, %v3101_v7 }
 0x33b   : > { %v3105_v22 = vpop.permute.xlu1 %3104  ;;  %1212 = vmatpush1.bf16.msra.mxu0 %v1106_v21 }
 0x33c   : > { %v3107_v14 = vunpack.i.h.bf16 %v3105_v22  ;;  %v3106_v35 = vunpack.i.l.bf16 %v3105_v22  ;;  %1213 = vmatprep.subr.bf16.mxu0 %v3353_v32 }
 0x33e   : > { %v1107_v23 = vpack.c.bf16 %v3107_v14, %v3106_v35 }
 0x33f   : > { %v3115_v3 = vpop.permute.xlu1 %3114 }
 0x340   : > { %1214 = vmatpush1.bf16.msra.mxu0 %v1107_v23  ;;  %v3117_v37 = vunpack.i.h.bf16 %v3115_v3  ;;  %v3116_v38 = vunpack.i.l.bf16 %v3115_v3 }
 0x341   : > { %1215 = vmatprep.subr.bf16.mxu0 %v3353_v32 }
 0x342   : > { %v1109_v10 = vpack.c.bf16 %v3117_v37, %v3116_v38 }
 0x343   : > { %v3125_v40 = vpop.permute.xlu1 %3124 }
 0x344   : > { %v3110_v24 = vpop.permute.xlu0 %3109  ;;  %v3127_v41 = vunpack.i.h.bf16 %v3125_v40  ;;  %v3126_v43 = vunpack.i.l.bf16 %v3125_v40 }
 0x345   : > { %v3112_v34 = vunpack.i.h.bf16 %v3110_v24  ;;  %v3111_v36 = vunpack.i.l.bf16 %v3110_v24 }
 0x346   : > { %v1111_v46 = vpack.c.bf16 %v3127_v41, %v3126_v43 }
 0x347   : > { %v1108_v39 = vpack.c.bf16 %v3112_v34, %v3111_v36 }
 0x348   : > { %v3120_v9 = vpop.permute.xlu0 %3119 }
 0x349   : > { %1216 = vmatpush1.bf16.msra.mxu0 %v1108_v39  ;;  %v3122_v42 = vunpack.i.h.bf16 %v3120_v9  ;;  %v3121_v47 = vunpack.i.l.bf16 %v3120_v9 }
 0x34a   : > { %1217 = vmatprep.subr.bf16.mxu0 %v3353_v32 }
 0x34b   : > { %v1110_v44 = vpack.c.bf16 %v3122_v42, %v3121_v47 }
 0x34c   : > { %v3130_v45 = vpop.permute.xlu0 %3129 }
 0x34d   : > { %1218 = vmatpush1.bf16.msra.mxu0 %v1109_v10  ;;  %v3132_v48 = vunpack.i.h.bf16 %v3130_v45  ;;  %v3131_v49 = vunpack.i.l.bf16 %v3130_v45 }
 0x34e   : > { %1219 = vmatprep.subr.bf16.mxu0 %v3353_v32 }
 0x34f   : > { %v1112_v50 = vpack.c.bf16 %v3132_v48, %v3131_v49 }
 0x351   : > { %1220 = vmatpush1.bf16.msra.mxu0 %v1110_v44 }
 0x352   : > { %1221 = vmatprep.subr.bf16.mxu0 %v3353_v32 }
 0x354   : > { %v1116_v18 = vpop.permute.xlu1 %1115 }
 0x355   : > { %1222 = vmatpush1.bf16.msra.mxu0 %v1111_v46 }
 0x356   : > { %1223 = vmatprep.subr.bf16.mxu0 %v3353_v32 }
 0x358   : > { %v1126_v4 = vpop.permute.xlu1 %1125 }
 0x359   : > { %1224 = vmatpush1.bf16.msra.mxu0 %v1112_v50 }
 0x35c   : > { %1234 = vmatmul.mubr.bf16.vlgmr.msra.gmra.mrb[8].mxu0 %v3193_v51  ;;  %v1136_v16 = vpop.permute.xlu1 %1135  ;;  %v3848_v51 = vld [vmem:[%s4339_s1] sm:$0xff] }
 0x35d   : > { %2627 = vmatprep.mubr.msk.bf16.mxu0 %vm487_vm0, %v3196_v52  ;;  %v1121_v57 = vpop.permute.xlu0 %1120 }
 0x360   : > { %v1146_v3 = vpop.permute.xlu1 %1145 }
 0x361   : > { %v1131_v11 = vpop.permute.xlu0 %1130 }
 0x364   : > { %1242 = vmatmul.mubr.bf16.gmra.mrb[12].mxu0 %v3198_v53 }
 0x365   : > { %2628 = vmatprep.mubr.msk.bf16.mxu0 %vm487_vm0, %v3199_v13  ;;  %v1141_v20 = vpop.permute.xlu0 %1140 }
 0x369   : > { %v1151_v34 = vpop.permute.xlu0 %1150 }
 0x36c   : > { %1250 = vmatmul.mubr.bf16.gmra.mrb[16].mxu0 %v3201_v58 }
 0x36d   : > { %2629 = vmatprep.mubr.msk.bf16.mxu0 %vm487_vm0, %v3202_v54 }
 0x374   : > { %1258 = vmatmul.mubr.bf16.gmra.mrb[20].mxu0 %v3204_v55 }
 0x375   : > { %2923 = vmatprep.mubr.msk.f32.mxu0 %vm487_vm0, %v3438_v0 }
 0x42f   : > { %v1235_v56 = vpop.f32.mrb[8].mxu0 }
 0x430   : > { %v1237_v62 = vpop.f32.mrb[9].mxu0  ;;  %v3791_v61 = vadd.f32 %v1235_v56, %v1116_v18 }
 0x431   : > { %v1238_v60 = vpop.f32.mrb[10].mxu0 }
 0x432   : > { %v3793_v63 = vadd.f32 %v1238_v60, %v1121_v57  ;;  %v1240_v5 = vpop.f32.mrb[11].mxu0  ;;  %v1411_v10 = vmul.f32 %v3791_v61, %v3791_v61 }
 0x434   : > { %v2995_v6 = vpack.c.bf16 %v3793_v63, %v3791_v61  ;;  %v1412_v37 = vmul.f32 %v3793_v63, %v3793_v63 }
 0x436   : > { %2996 = vmatprep.subr.bf16.mxu1 %v2995_v6  ;;  %v3011_v40 = vpack.c.bf16 %v1412_v37, %v1411_v10 }
 0x437   : > { %v1243_v59 = vpop.f32.mrb[12].mxu0  ;;  %2998 = vmatpush3.bf16.msra.mxu1 %v2995_v6 }
 0x438   : > { %v1245_v8 = vpop.f32.mrb[13].mxu0  ;;  %v3797_v12 = vadd.f32 %v1243_v59, %v1126_v4 }
 0x439   : > { %v1246_v0 = vpop.f32.mrb[14].mxu0 }
 0x43a   : > { %v3799_v2 = vadd.f32 %v1246_v0, %v1131_v11  ;;  %v1248_v1 = vpop.f32.mrb[15].mxu0  ;;  %v1413_v41 = vmul.f32 %v3797_v12, %v3797_v12 }
 0x43c   : > { %v2999_v19 = vpack.c.bf16 %v3799_v2, %v3797_v12  ;;  %v1414_v47 = vmul.f32 %v3799_v2, %v3799_v2 }
 0x43e   : > { %3000 = vmatprep.subr.bf16.mxu1 %v2999_v19  ;;  %v3015_v44 = vpack.c.bf16 %v1414_v47, %v1413_v41 }
 0x43f   : > { %v1251_v15 = vpop.f32.mrb[16].mxu0  ;;  %3002 = vmatpush3.bf16.msra.mxu1 %v2999_v19 }
 0x440   : > { %v1253_v17 = vpop.f32.mrb[17].mxu0  ;;  %v3803_v21 = vadd.f32 %v1251_v15, %v1136_v16 }
 0x441   : > { %v1254_v7 = vpop.f32.mrb[18].mxu0 }
 0x442   : > { %v3805_v22 = vadd.f32 %v1254_v7, %v1141_v20  ;;  %v1256_v14 = vpop.f32.mrb[19].mxu0  ;;  %v1415_v45 = vmul.f32 %v3803_v21, %v3803_v21 }
 0x443   : > { %v1274_v14 = vld [vmem:[%s4345_s7] sm:$0xff] }
 0x444   : > { %v3003_v35 = vpack.c.bf16 %v3805_v22, %v3803_v21  ;;  %v1416_v43 = vmul.f32 %v3805_v22, %v3805_v22 }
 0x446   : > { %3004 = vmatprep.subr.bf16.mxu1 %v3003_v35  ;;  %v3019_v48 = vpack.c.bf16 %v1416_v43, %v1415_v45 }
 0x447   : > { %v1259_v23 = vpop.f32.mrb[20].mxu0  ;;  %3006 = vmatpush3.bf16.msra.mxu1 %v3003_v35  ;;  %v1276_v35 = vld [vmem:[%s4345_s7 + $0x10] sm:$0xff] }
 0x448   : > { %v1261_v24 = vpop.f32.mrb[21].mxu0  ;;  %v3811_v38 = vadd.f32 %v1259_v23, %v1146_v3  ;;  %v1275_v23 = vld [vmem:[%s4345_s7 + $0x8] sm:$0xff]  ;;  %v1278_v3 = vld [vmem:[%s4345_s7 + $0x20] sm:$0xff] }
 0x449   : > { %v1262_v36 = vpop.f32.mrb[22].mxu0  ;;  %v1277_v24 = vld [vmem:[%s4345_s7 + $0x18] sm:$0xff] }
 0x44a   : > { %v3813_v39 = vadd.f32 %v1262_v36, %v1151_v34  ;;  %v1264_v9 = vpop.f32.mrb[23].mxu0  ;;  %v1417_v49 = vmul.f32 %v3811_v38, %v3811_v38  ;;  %v1279_v34 = vld [vmem:[%s4345_s7 + $0x28] sm:$0xff] }
 0x44c   : > { %v3007_v42 = vpack.c.bf16 %v3813_v39, %v3811_v38  ;;  %v1418_v46 = vmul.f32 %v3813_v39, %v3813_v39 }
 0x44e   : > { %3008 = vmatprep.subr.bf16.mxu1 %v3007_v42  ;;  %v3023_v50 = vpack.c.bf16 %v1418_v46, %v1417_v49 }
 0x44f   : > { %3010 = vmatpush3.bf16.msra.mxu1 %v3007_v42 }
 0x450   : > { %3012 = vmatprep.subr.bf16.mxu1 %v3011_v40 }
 0x452   : > { %2868 = vmatmul.mubr.msk.f32.vlgmr.msra.gmra.mrb[8].mxu1 %vm487_vm0, %v3503_v25 }
 0x453   : > { %3014 = vmatpush3.bf16.msra.mxu1 %v3011_v40  ;;  %2870 = vmatprep.mubr.msk.f32.mxu1 %vm487_vm0, %v3508_v26 }
 0x454   : > { %3016 = vmatprep.subr.bf16.mxu1 %v3015_v44 }
 0x456   : > { %2871 = vmatmul.mubr.msk.f32.gmra.mrb[10].mxu1 %vm487_vm0, %v3517_v27 }
 0x457   : > { %3018 = vmatpush3.bf16.msra.mxu1 %v3015_v44  ;;  %2873 = vmatprep.mubr.msk.f32.mxu1 %vm487_vm0, %v3524_v28 }
 0x458   : > { %3020 = vmatprep.subr.bf16.mxu1 %v3019_v48 }
 0x45a   : > { %2874 = vmatmul.mubr.msk.f32.gmra.mrb[12].mxu1 %vm487_vm0, %v3535_v29 }
 0x45b   : > { %3022 = vmatpush3.bf16.msra.mxu1 %v3019_v48  ;;  %2876 = vmatprep.mubr.msk.f32.mxu1 %vm487_vm0, %v3542_v30 }
 0x45c   : > { %3024 = vmatprep.subr.bf16.mxu1 %v3023_v50 }
 0x45e   : > { %2877 = vmatmul.mubr.msk.f32.gmra.mrb[14].mxu1 %vm487_vm0, %v3553_v31 }
 0x45f   : > { %3026 = vmatpush3.bf16.msra.mxu1 %v3023_v50  ;;  %2895 = vmatprep.mubr.msk.f32.mxu1 %vm487_vm0, %v3848_v51 }
 0x460   : > { %1968 = vmatprep.subr.bf16.mxu1 %v3353_v32 }
 0x462   : > { %2896 = vmatmul.mubr.msk.f32.vlgmr.msra.gmra.mrb[16].mxu1 %vm487_vm0, %v3503_v25 }
 0x463   : > { %2898 = vmatprep.mubr.msk.f32.mxu1 %vm487_vm0, %v3508_v26 }
 0x466   : > { %2899 = vmatmul.mubr.msk.f32.gmra.mrb[18].mxu1 %vm487_vm0, %v3517_v27 }
 0x467   : > { %2901 = vmatprep.mubr.msk.f32.mxu1 %vm487_vm0, %v3524_v28 }
 0x46a   : > { %2902 = vmatmul.mubr.msk.f32.gmra.mrb[20].mxu1 %vm487_vm0, %v3535_v29 }
 0x46b   : > { %2904 = vmatprep.mubr.msk.f32.mxu1 %vm487_vm0, %v3542_v30 }
 0x46e   : > { %2905 = vmatmul.mubr.msk.f32.gmra.mrb[22].mxu1 %vm487_vm0, %v3553_v31 }
 0x46f   : > { %2674 = vmatprep.mubr.msk.bf16.mxu1 %vm487_vm0, %v3207_v33 }
 0x525   : > { %v2869_v52 = vpop.f32.mrb[8].mxu1 }
 0x526   : > { %v1348_v25 = vpop.f32.mrb[9].mxu1  ;;  %v1390_v53 = vsel %vm617_vm1, %v2869_v52, 0.0 }
 0x527   : > { %1391 = vadd.xlane.f32.xlu0 %v1390_v53  ;;  %v1387_v26 = vsel %vm617_vm1, %v1348_v25, 0.0 }
 0x528   : > { %1388 = vadd.xlane.f32.xlu1 %v1387_v26 }
 0x529   : > { %v2872_v27 = vpop.f32.mrb[10].mxu1 }
 0x52a   : > { %v1358_v13 = vpop.f32.mrb[11].mxu1  ;;  %v1396_v28 = vsel %vm617_vm1, %v2872_v27, 0.0 }
 0x52b   : > { %v1393_v29 = vsel %vm617_vm1, %v1358_v13, 0.0 }
 0x52c   : > { %1397 = vadd.xlane.f32.xlu1 %v1396_v28  ;;  %1394 = vadd.xlane.f32.xlu0 %v1393_v29 }
 0x52d   : > { %v2875_v30 = vpop.f32.mrb[12].mxu1 }
 0x52e   : > { %v1368_v58 = vpop.f32.mrb[13].mxu1  ;;  %v1402_v31 = vsel %vm617_vm1, %v2875_v30, 0.0 }
 0x52f   : > { %v1399_v54 = vsel %vm617_vm1, %v1368_v58, 0.0 }
 0x530   : > { %1403 = vadd.xlane.f32.xlu1 %v1402_v31  ;;  %1400 = vadd.xlane.f32.xlu0 %v1399_v54 }
 0x531   : > { %v2878_v55 = vpop.f32.mrb[14].mxu1 }
 0x532   : > { %v1378_v56 = vpop.f32.mrb[15].mxu1  ;;  %v1408_v18 = vsel %vm617_vm1, %v2878_v55, 0.0 }
 0x533   : > { %v1405_v62 = vsel %vm617_vm1, %v1378_v56, 0.0 }
 0x534   : > { %1409 = vadd.xlane.f32.xlu1 %v1408_v18  ;;  %1406 = vadd.xlane.f32.xlu0 %v1405_v62 }
 0x535   : > { %v2897_v57 = vpop.f32.mrb[16].mxu1 }
 0x536   : > { %v1485_v60 = vpop.f32.mrb[17].mxu1  ;;  %v1527_v5 = vsel %vm617_vm1, %v2897_v57, 0.0 }
 0x537   : > { %v1524_v6 = vsel %vm617_vm1, %v1485_v60, 0.0 }
 0x538   : > { %1528 = vadd.xlane.f32.xlu1 %v1527_v5  ;;  %1525 = vadd.xlane.f32.xlu0 %v1524_v6 }
 0x539   : > { %v2900_v59 = vpop.f32.mrb[18].mxu1 }
 0x53a   : > { %v1495_v4 = vpop.f32.mrb[19].mxu1  ;;  %v1533_v8 = vsel %vm617_vm1, %v2900_v59, 0.0 }
 0x53b   : > { %v1530_v11 = vsel %vm617_vm1, %v1495_v4, 0.0 }
 0x53c   : > { %1534 = vadd.xlane.f32.xlu1 %v1533_v8  ;;  %1531 = vadd.xlane.f32.xlu0 %v1530_v11  ;;  %v1267_v11 = vld [vmem:[%s4344_s6 + $0x8] sm:$0xff] }
 0x53d   : > { %v2903_v0 = vpop.f32.mrb[20].mxu1 }
 0x53e   : > { %v1505_v1 = vpop.f32.mrb[21].mxu1  ;;  %v1539_v19 = vsel %vm617_vm1, %v2903_v0, 0.0  ;;  %v1266_v0 = vld [vmem:[%s4344_s6] sm:$0xff] }
 0x53f   : > { %v1536_v15 = vsel %vm617_vm1, %v1505_v1, 0.0 }
 0x540   : > { %1540 = vadd.xlane.f32.xlu1 %v1539_v19  ;;  %1537 = vadd.xlane.f32.xlu0 %v1536_v15 }
 0x541   : > { %v2906_v16 = vpop.f32.mrb[22].mxu1 }
 0x542   : > { %v1515_v17 = vpop.f32.mrb[23].mxu1  ;;  %v1545_v20 = vsel %vm617_vm1, %v2906_v16, 0.0 }
 0x543   : > { %v1542_v7 = vsel %vm617_vm1, %v1515_v17, 0.0 }
 0x544   : > { %1546 = vadd.xlane.f32.xlu1 %v1545_v20  ;;  %1543 = vadd.xlane.f32.xlu0 %v1542_v7  ;;  %v1269_v7 = vld [vmem:[%s4344_s6 + $0x18] sm:$0xff] }
 0x555   : > { %1646 = vperm.xlu1 %3071, %v1274_v14   ;;  %v1268_v14 = vld [vmem:[%s4344_s6 + $0x10] sm:$0xff] }
 0x559   : > { %1656 = vperm.xlu1 %3071, %v1276_v35  }
 0x55a   : > { %1651 = vperm.xlu0 %3072, %v1275_v23  }
 0x55d   : > { %1666 = vperm.xlu1 %3071, %v1278_v3  }
 0x55e   : > { %1661 = vperm.xlu0 %3072, %v1277_v24  }
 0x562   : > { %1671 = vperm.xlu0 %3072, %v1279_v34   ;;  %v1271_v34 = vld [vmem:[%s4344_s6 + $0x28] sm:$0xff] }
 0x5b4   : > { %v3901_v36 = vpop.xlane.xlu0 %1391 }
 0x5b5   : > { %v3903_v37 = vpop.xlane.xlu1 %1388  ;;  %v1549_v43 = vmul.f32 %v3901_v36, %v3901_v36 }
 0x5b6   : > { %v1548_v44 = vmul.f32 %v3903_v37, %v3903_v37 }
 0x5b9   : > { %v3905_v9 = vpop.xlane.xlu1 %1397  ;;  %v3907_v10 = vpop.xlane.xlu0 %1394 }
 0x5ba   : > { %v1551_v50 = vmul.f32 %v3905_v9, %v3905_v9  ;;  %v1550_v52 = vmul.f32 %v3907_v10, %v3907_v10 }
 0x5bd   : > { %v3909_v42 = vpop.xlane.xlu1 %1403  ;;  %v3911_v47 = vpop.xlane.xlu0 %1400 }
 0x5be   : > { %v1553_v29 = vmul.f32 %v3909_v42, %v3909_v42  ;;  %v1552_v30 = vmul.f32 %v3911_v47, %v3911_v47 }
 0x5c1   : > { %v3913_v40 = vpop.xlane.xlu1 %1409  ;;  %v3915_v41 = vpop.xlane.xlu0 %1406 }
 0x5c2   : > { %v1555_v62 = vmul.f32 %v3913_v40, %v3913_v40  ;;  %v1554_v57 = vmul.f32 %v3915_v41, %v3915_v41 }
 0x5c5   : > { %v1529_v45 = vpop.xlane.xlu1 %1528  ;;  %v1526_v46 = vpop.xlane.xlu0 %1525 }
 0x5c6   : > { %v1557_v48 = vsub.f32 %v1529_v45, %v1549_v43  ;;  %v1556_v49 = vsub.f32 %v1526_v46, %v1548_v44  ;;  %v1270_v43 = vld [vmem:[%s4344_s6 + $0x20] sm:$0xff] }
 0x5c8   : > { %v1565_v25 = vadd.f32 1e-05, %v1557_v48  ;;  %v1564_v53 = vadd.f32 1e-05, %v1556_v49  ;;  %v1273_v49 = vld [vmem:[%s4344_s6 + $0x38] sm:$0xff] }
 0x5c9   : > { %v1535_v26 = vpop.xlane.xlu1 %1534  ;;  %v1532_v27 = vpop.xlane.xlu0 %1531 }
 0x5ca   : > { %3265 = vrsqrt.f32 %v1565_v25  ;;  %v1559_v13 = vsub.f32 %v1535_v26, %v1551_v50  ;;  %v1558_v28 = vsub.f32 %v1532_v27, %v1550_v52  ;;  %v1272_v50 = vld [vmem:[%s4344_s6 + $0x30] sm:$0xff]  ;;  %v1281_v27 = vld [vmem:[%s4345_s7 + $0x38] sm:$0xff] }
 0x5cb   : > { %3267 = vrsqrt.f32 %v1564_v53 }
 0x5cc   : > { %v1567_v58 = vadd.f32 1e-05, %v1559_v13  ;;  %v1566_v31 = vadd.f32 1e-05, %v1558_v28  ;;  %v1280_v13 = vld [vmem:[%s4345_s7 + $0x30] sm:$0xff] }
 0x5cd   : > { %v1541_v54 = vpop.xlane.xlu1 %1540  ;;  %v1538_v55 = vpop.xlane.xlu0 %1537 }
 0x5ce   : > { %3269 = vrsqrt.f32 %v1567_v58  ;;  %v1561_v56 = vsub.f32 %v1541_v54, %v1553_v29  ;;  %v1560_v18 = vsub.f32 %v1538_v55, %v1552_v30  ;;  %v1581_v55 = vsub.f32 %v3793_v63, %v3901_v36 }
 0x5cf   : > { %3271 = vrsqrt.f32 %v1566_v31 }
 0x5d0   : > { %v1569_v60 = vadd.f32 1e-05, %v1561_v56  ;;  %v1568_v5 = vadd.f32 1e-05, %v1560_v18  ;;  %v1580_v56 = vsub.f32 %v3791_v61, %v3903_v37 }
 0x5d1   : > { %v1547_v6 = vpop.xlane.xlu1 %1546  ;;  %v1544_v59 = vpop.xlane.xlu0 %1543 }
 0x5d2   : > { %3273 = vrsqrt.f32 %v1569_v60  ;;  %v1563_v4 = vsub.f32 %v1547_v6, %v1555_v62  ;;  %v1562_v8 = vsub.f32 %v1544_v59, %v1554_v57  ;;  %v1583_v6 = vsub.f32 %v3799_v2, %v3905_v9 }
 0x5d3   : > { %3275 = vrsqrt.f32 %v1568_v5  ;;  %v1582_v59 = vsub.f32 %v3797_v12, %v3907_v10  ;;  %v1584_v2 = vsub.f32 %v3803_v21, %v3911_v47  ;;  %v1586_v21 = vsub.f32 %v3811_v38, %v3915_v41 }
 0x5d4   : > { %v3266_v1 = vpop.eup %3265  ;;  %v1571_v19 = vadd.f32 1e-05, %v1563_v4  ;;  %v1570_v15 = vadd.f32 1e-05, %v1562_v8 }
 0x5d5   : > { %v3268_v16 = vpop.eup %3267  ;;  %v1589_v17 = vmul.f32 %v3266_v1, %v1267_v11  ;;  %v1647_v28 = vpop.permute.xlu1 %1646 }
 0x5d6   : > { %3277 = vrsqrt.f32 %v1571_v19  ;;  %v1588_v20 = vmul.f32 %v3268_v16, %v1266_v0  ;;  %v1585_v0 = vsub.f32 %v3805_v22, %v3909_v42  ;;  %v1587_v22 = vsub.f32 %v3813_v39, %v3913_v40 }
 0x5d7   : > { %3279 = vrsqrt.f32 %v1570_v15  ;;  %1603 = vperm.xlu1 %3071, %v1589_v17  }
 0x5d8   : > { %v3270_v35 = vpop.eup %3269  ;;  %1598 = vperm.xlu0 %3072, %v1588_v20  }
 0x5d9   : > { %v3272_v23 = vpop.eup %3271  ;;  %v1591_v3 = vmul.f32 %v3270_v35, %v1269_v7  ;;  %v1652_v29 = vpop.permute.xlu0 %1651 }
 0x5da   : > { %v1590_v24 = vmul.f32 %v3272_v23, %v1268_v14  ;;  %v1657_v30 = vpop.permute.xlu1 %1656 }
 0x5dc   : > { %v3274_v44 = vpop.eup %3273  ;;  %1613 = vperm.xlu0 %3072, %v1591_v3   ;;  %1608 = vperm.xlu1 %3071, %v1590_v24  }
 0x5dd   : > { %v3276_v45 = vpop.eup %3275  ;;  %v1593_v46 = vmul.f32 %v3274_v44, %v1271_v34  ;;  %v1662_v58 = vpop.permute.xlu0 %1661 }
 0x5de   : > { %v1592_v48 = vmul.f32 %v3276_v45, %v1270_v43  ;;  %v1667_v31 = vpop.permute.xlu1 %1666 }
 0x5e0   : > { %v3278_v52 = vpop.eup %3277  ;;  %1623 = vperm.xlu0 %3072, %v1593_v46   ;;  %1618 = vperm.xlu1 %3071, %v1592_v48  }
 0x5e1   : > { %v3280_v25 = vpop.eup %3279  ;;  %v1595_v53 = vmul.f32 %v3278_v52, %v1273_v49  ;;  %v1672_v54 = vpop.permute.xlu0 %1671 }
 0x5e2   : > { %v1594_v26 = vmul.f32 %v3280_v25, %v1272_v50 }
 0x5e4   : > { %1633 = vperm.xlu0 %3072, %v1595_v53   ;;  %1628 = vperm.xlu1 %3071, %v1594_v26  }
 0x5e8   : > { %1681 = vperm.xlu0 %3072, %v1281_v27   ;;  %1676 = vperm.xlu1 %3071, %v1280_v13  }
 0x656   : > { %v1604_v18 = vpop.permute.xlu1 %1603 }
 0x657   : > { %v1637_v62 = vmul.f32 %v1604_v18, %v1581_v55  ;;  %v1599_v57 = vpop.permute.xlu0 %1598 }
 0x658   : > { %v1636_v60 = vmul.f32 %v1599_v57, %v1580_v56 }
 0x659   : > { %v3967_v5 = vadd.f32 %v1652_v29, %v1637_v62 }
 0x65a   : > { %v3973_v4 = vadd.f32 %v1647_v28, %v1636_v60 }
 0x65b   : > { %v2647_v8 = vmul.f32 -1.442695, %v3967_v5  ;;  %v1609_v63 = vpop.permute.xlu1 %1608  ;;  %v1614_v36 = vpop.permute.xlu0 %1613 }
 0x65c   : > { %v2646_v61 = vmul.f32 -1.442695, %v3973_v4  ;;  %v1638_v37 = vmul.f32 %v1609_v63, %v1582_v59  ;;  %v1639_v11 = vmul.f32 %v1614_v36, %v1583_v6 }
 0x65d   : > { %3281 = vpow2.f32 %v2647_v8 }
 0x65e   : > { %3283 = vpow2.f32 %v2646_v61  ;;  %v1686_v9 = vadd.f32 %v1657_v30, %v1638_v37  ;;  %v1687_v12 = vadd.f32 %v1662_v58, %v1639_v11 }
 0x65f   : > { %v1619_v10 = vpop.permute.xlu1 %1618  ;;  %v1624_v1 = vpop.permute.xlu0 %1623 }
 0x660   : > { %v2648_v19 = vmul.f32 -1.442695, %v1686_v9  ;;  %v2649_v15 = vmul.f32 -1.442695, %v1687_v12  ;;  %v1640_v16 = vmul.f32 %v1619_v10, %v1584_v2  ;;  %v1641_v17 = vmul.f32 %v1624_v1, %v1585_v0 }
 0x662   : > { %3285 = vpow2.f32 %v2648_v19  ;;  %v1688_v20 = vadd.f32 %v1667_v31, %v1640_v16  ;;  %v1689_v7 = vadd.f32 %v1672_v54, %v1641_v17 }
 0x663   : > { %3287 = vpow2.f32 %v2649_v15  ;;  %v1629_v14 = vpop.permute.xlu1 %1628  ;;  %v1634_v35 = vpop.permute.xlu0 %1633 }
 0x664   : > { %v2650_v42 = vmul.f32 -1.442695, %v1688_v20  ;;  %v2651_v47 = vmul.f32 -1.442695, %v1689_v7  ;;  %v1642_v23 = vmul.f32 %v1629_v14, %v1586_v21  ;;  %v1643_v3 = vmul.f32 %v1634_v35, %v1587_v22 }
 0x666   : > { %3289 = vpow2.f32 %v2650_v42 }
 0x667   : > { %v3282_v24 = vpop.eup %3281  ;;  %3291 = vpow2.f32 %v2651_v47  ;;  %v1677_v34 = vpop.permute.xlu1 %1676 }
 0x668   : > { %v1682_v43 = vpop.permute.xlu0 %1681  ;;  %v3284_v44 = vpop.eup %3283  ;;  %v1717_v45 = vadd.f32 1.0, %v3282_v24  ;;  %v1690_v46 = vadd.f32 %v1677_v34, %v1642_v23 }
 0x669   : > { %v1691_v48 = vadd.f32 %v1682_v43, %v1643_v3  ;;  %v1716_v49 = vadd.f32 1.0, %v3284_v44 }
 0x66a   : > { %3293 = vrcp.f32 %v1717_v45  ;;  %v2652_v50 = vmul.f32 -1.442695, %v1690_v46 }
 0x66b   : > { %v2653_v39 = vmul.f32 -1.442695, %v1691_v48  ;;  %3295 = vrcp.f32 %v1716_v49 }
 0x66c   : > { %v3286_v40 = vpop.eup %3285  ;;  %3297 = vpow2.f32 %v2652_v50 }
 0x66d   : > { %v3288_v38 = vpop.eup %3287  ;;  %v1718_v41 = vadd.f32 1.0, %v3286_v40  ;;  %3299 = vpow2.f32 %v2653_v39 }
 0x66e   : > { %v1719_v52 = vadd.f32 1.0, %v3288_v38 }
 0x66f   : > { %3301 = vrcp.f32 %v1718_v41 }
 0x670   : > { %v3290_v25 = vpop.eup %3289  ;;  %3303 = vrcp.f32 %v1719_v52 }
 0x671   : > { %v3292_v53 = vpop.eup %3291  ;;  %v1720_v26 = vadd.f32 1.0, %v3290_v25 }
 0x672   : > { %v1721_v27 = vadd.f32 1.0, %v3292_v53 }
 0x673   : > { %3305 = vrcp.f32 %v1720_v26 }
 0x674   : > { %v3294_v13 = vpop.eup %3293  ;;  %3307 = vrcp.f32 %v1721_v27  ;;  %v1756_v27 = vld [vmem:[%s4347_s9] sm:$0xff] }
 0x675   : > { %v3296_v28 = vpop.eup %3295  ;;  %v1741_v29 = vmul.f32 %v3294_v13, %v3967_v5  ;;  %v1758_v13 = vld [vmem:[%s4347_s9 + $0x10] sm:$0xff] }
 0x676   : > { %v3298_v30 = vpop.eup %3297  ;;  %v1740_v58 = vmul.f32 %v3296_v28, %v3973_v4  ;;  %v1757_v28 = vld [vmem:[%s4347_s9 + $0x8] sm:$0xff] }
 0x677   : > { %v3300_v31 = vpop.eup %3299  ;;  %v1722_v54 = vadd.f32 1.0, %v3298_v30  ;;  %v1759_v30 = vld [vmem:[%s4347_s9 + $0x18] sm:$0xff] }
 0x678   : > { %v1723_v55 = vadd.f32 1.0, %v3300_v31  ;;  %v3133_v56 = vpack.i.bf16 %v1741_v29, %v1740_v58  ;;  %v1760_v29 = vld [vmem:[%s4347_s9 + $0x20] sm:$0xff]  ;;  %v1762_v58 = vld [vmem:[%s4347_s9 + $0x30] sm:$0xff]  ;;  %v1761_v31 = vld [vmem:[%s4347_s9 + $0x28] sm:$0xff] }
 0x679   : > { %v3302_v18 = vpop.eup %3301  ;;  %3309 = vrcp.f32 %v1722_v54  ;;  %v1763_v54 = vld [vmem:[%s4347_s9 + $0x38] sm:$0xff] }
 0x67a   : > { %v3304_v62 = vpop.eup %3303  ;;  %v1742_v57 = vmul.f32 %v3302_v18, %v1686_v9  ;;  %3311 = vrcp.f32 %v1723_v55  ;;  %3134 = vrot.lane.b32.xlu1 %v3133_v56, %s3354_s20 }
 0x67b   : > { %v1743_v60 = vmul.f32 %v3304_v62, %v1687_v12 }
 0x67d   : > { %v3306_v6 = vpop.eup %3305  ;;  %v3138_v59 = vpack.i.bf16 %v1743_v60, %v1742_v57 }
 0x67e   : > { %v3308_v8 = vpop.eup %3307  ;;  %v1744_v63 = vmul.f32 %v3306_v6, %v1688_v20 }
 0x67f   : > { %v1745_v5 = vmul.f32 %v3308_v8, %v1689_v7  ;;  %3139 = vrot.lane.b32.xlu0 %v3138_v59, %s3354_s20 }
 0x681   : > { %v3143_v4 = vpack.i.bf16 %v1745_v5, %v1744_v63 }
 0x683   : > { %v3310_v36 = vpop.eup %3309  ;;  %3144 = vrot.lane.b32.xlu1 %v3143_v4, %s3354_s20 }
 0x684   : > { %v3312_v61 = vpop.eup %3311  ;;  %v1746_v37 = vmul.f32 %v3310_v36, %v1690_v46 }
 0x685   : > { %v1747_v11 = vmul.f32 %v3312_v61, %v1691_v48 }
 0x687   : > { %v3148_v0 = vpack.i.bf16 %v1747_v11, %v1746_v37 }
 0x689   : > { %3149 = vrot.lane.b32.xlu0 %v3148_v0, %s3354_s20 }
 0x6ec   : > { %v3135_v2 = vpop.permute.xlu1 %3134 }
 0x6ed   : > { %v3137_v9 = vunpack.i.h.bf16 %v3135_v2  ;;  %v3136_v12 = vunpack.i.l.bf16 %v3135_v2 }
 0x6ef   : > { %v1797_v10 = vsel %vm1027_vm2, 0.0, %v3137_v9  ;;  %v1796_v1 = vsel %vm1027_vm2, 0.0, %v3136_v12 }
 0x6f0   : > { %v1805_v19 = vsel %vm1036_vm3, %v1797_v10, 0.0  ;;  %v1804_v15 = vsel %vm1036_vm3, %v1796_v1, 0.0  ;;  %v2663_v16 = vpack.c.bf16 %v1797_v10, %v1796_v1 }
 0x6f1   : > { %v3140_v17 = vpop.permute.xlu0 %3139  ;;  %v3153_v20 = vpack.i.bf16 %v1805_v19, %v1804_v15 }
 0x6f2   : > { %v3142_v7 = vunpack.i.h.bf16 %v3140_v17  ;;  %v3141_v14 = vunpack.i.l.bf16 %v3140_v17  ;;  %2664 = vmatpush1.bf16.msk.msra.mxu1 %vm3692_vm4, %v2663_v16 }
 0x6f3   : > { %3154 = vrot.lane.b32.xlu1 %v3153_v20, %s3355_s21  ;;  %1970 = vmatprep.subr.bf16.mxu1 %v3353_v32 }
 0x6f4   : > { %v1799_v35 = vsel %vm1027_vm2, 0.0, %v3142_v7  ;;  %v1798_v22 = vsel %vm1027_vm2, 0.0, %v3141_v14 }
 0x6f5   : > { %v1807_v21 = vsel %vm1036_vm3, %v1799_v35, 0.0  ;;  %v1806_v42 = vsel %vm1036_vm3, %v1798_v22, 0.0  ;;  %v2666_v47 = vpack.c.bf16 %v1799_v35, %v1798_v22  ;;  %v3145_v23 = vpop.permute.xlu1 %3144 }
 0x6f6   : > { %v3147_v3 = vunpack.i.h.bf16 %v3145_v23  ;;  %v3146_v24 = vunpack.i.l.bf16 %v3145_v23  ;;  %v3158_v34 = vpack.i.bf16 %v1807_v21, %v1806_v42  ;;  %v3205_v42 = vld [vmem:[%s4346_s8] ss:$8 sps:$4 sm:$0xff]   ;;  %v3210_v23 = vld [vmem:[%s4346_s8 + $0x10] ss:$8 sps:$4 sm:$0xff]  }
 0x6f7   : > { %2667 = vmatpush1.bf16.msk.msra.mxu1 %vm3692_vm4, %v2666_v47  ;;  %v3208_v47 = vld [vmem:[%s4346_s8 + $0x14] ss:$8 sps:$4 sm:$0xff]  }
 0x6f8   : > { %v1801_v43 = vsel %vm1027_vm2, 0.0, %v3147_v3  ;;  %v1800_v44 = vsel %vm1027_vm2, 0.0, %v3146_v24  ;;  %3159 = vrot.lane.b32.xlu0 %v3158_v34, %s3355_s21  ;;  %1972 = vmatprep.subr.bf16.mxu1 %v3353_v32  ;;  %v3213_v3 = vld [vmem:[%s4346_s8 + $0x20] ss:$8 sps:$4 sm:$0xff]   ;;  %v3214_v24 = vld [vmem:[%s4346_s8 + $0x34] ss:$8 sps:$4 sm:$0xff]  }
 0x6f9   : > { %v1809_v45 = vsel %vm1036_vm3, %v1801_v43, 0.0  ;;  %v1808_v46 = vsel %vm1036_vm3, %v1800_v44, 0.0  ;;  %v2669_v48 = vpack.c.bf16 %v1801_v43, %v1800_v44 }
 0x6fa   : > { %v3163_v49 = vpack.i.bf16 %v1809_v45, %v1808_v46 }
 0x6fb   : > { %v3150_v50 = vpop.permute.xlu0 %3149  ;;  %2670 = vmatpush1.bf16.msk.msra.mxu1 %vm3692_vm4, %v2669_v48 }
 0x6fc   : > { %v3152_v39 = vunpack.i.h.bf16 %v3150_v50  ;;  %v3151_v40 = vunpack.i.l.bf16 %v3150_v50  ;;  %3164 = vrot.lane.b32.xlu1 %v3163_v49, %s3355_s21  ;;  %1974 = vmatprep.subr.bf16.mxu1 %v3353_v32  ;;  %v3330_v50 = vld [vmem:[%s3450_s15] sm:$0xff] }
 0x6fe   : > { %v1803_v38 = vsel %vm1027_vm2, 0.0, %v3152_v39  ;;  %v1802_v41 = vsel %vm1027_vm2, 0.0, %v3151_v40 }
 0x6ff   : > { %v1811_v52 = vsel %vm1036_vm3, %v1803_v38, 0.0  ;;  %v1810_v25 = vsel %vm1036_vm3, %v1802_v41, 0.0  ;;  %v2672_v53 = vpack.c.bf16 %v1803_v38, %v1802_v41  ;;  %v3331_v41 = vld [vmem:[%s3450_s15 + $0x8] sm:$0xff] }
 0x700   : > { %3174 = vrot.lane.b32.xlu1 %v3153_v20, %s3356_s22  ;;  %v3168_v26 = vpack.i.bf16 %v1811_v52, %v1810_v25 }
 0x701   : > { %2673 = vmatpush1.bf16.msk.msra.mxu1 %vm3692_vm4, %v2672_v53 }
 0x702   : > { %3169 = vrot.lane.b32.xlu0 %v3168_v26, %s3355_s21  ;;  %1976 = vmatprep.subr.bf16.mxu1 %v3353_v32  ;;  %s4090_s21 = scalar_lea.vmem %s4350_s12, %s3444_s29 }
 0x704   : > { %3184 = vrot.lane.b32.xlu1 %v3163_v49, %s3356_s22 }
 0x706   : > { %3179 = vrot.lane.b32.xlu0 %v3158_v34, %s3356_s22  ;;  %v3216_v34 = vld [vmem:[%s4346_s8 + $0x30] ss:$8 sps:$4 sm:$0xff]  }
 0x708   : > { %1882 = vperm.xlu1 %3071, %v1756_v27  }
 0x70a   : > { %3189 = vrot.lane.b32.xlu0 %v3168_v26, %s3356_s22 }
 0x70c   : > { %1892 = vperm.xlu1 %3071, %v1758_v13  }
 0x70e   : > { %1887 = vperm.xlu0 %3072, %v1757_v28  }
 0x710   : > { %1902 = vperm.xlu1 %3071, %v1760_v29   ;;  %v3332_v29 = vld [vmem:[%s3450_s15 + $0x10] sm:$0xff] }
 0x712   : > { %1897 = vperm.xlu0 %3072, %v1759_v30  }
 0x714   : > { %1912 = vperm.xlu1 %3071, %v1762_v58  }
 0x716   : > { %1907 = vperm.xlu0 %3072, %v1761_v31  }
 0x71a   : > { %1917 = vperm.xlu0 %3072, %v1763_v54   ;;  %v3333_v54 = vld [vmem:[%s3450_s15 + $0x18] sm:$0xff] }
 0x765   : > { %v3155_v55 = vpop.permute.xlu1 %3154 }
 0x766   : > { %v3157_v56 = vunpack.i.h.bf16 %v3155_v55  ;;  %v3156_v18 = vunpack.i.l.bf16 %v3155_v55 }
 0x768   : > { %v1872_v62 = vpack.c.bf16 %v3157_v56, %v3156_v18 }
 0x76a   : > { %v3160_v57 = vpop.permute.xlu0 %3159  ;;  %1977 = vmatpush1.bf16.msra.mxu1 %v1872_v62 }
 0x76b   : > { %v3162_v60 = vunpack.i.h.bf16 %v3160_v57  ;;  %v3161_v6 = vunpack.i.l.bf16 %v3160_v57  ;;  %1978 = vmatprep.subr.bf16.mxu1 %v3353_v32 }
 0x76d   : > { %v1873_v59 = vpack.c.bf16 %v3162_v60, %v3161_v6 }
 0x76e   : > { %v3165_v8 = vpop.permute.xlu1 %3164 }
 0x76f   : > { %v3167_v63 = vunpack.i.h.bf16 %v3165_v8  ;;  %v3166_v5 = vunpack.i.l.bf16 %v3165_v8  ;;  %1979 = vmatpush1.bf16.msra.mxu1 %v1873_v59  ;;  %v3334_v8 = vld [vmem:[%s3450_s15 + $0x20] sm:$0xff] }
 0x770   : > { %1980 = vmatprep.subr.bf16.mxu1 %v3353_v32 }
 0x771   : > { %v1874_v4 = vpack.c.bf16 %v3167_v63, %v3166_v5 }
 0x772   : > { %v3175_v36 = vpop.permute.xlu1 %3174 }
 0x773   : > { %1981 = vmatpush1.bf16.msra.mxu1 %v1874_v4  ;;  %v3177_v0 = vunpack.i.h.bf16 %v3175_v36  ;;  %v3176_v2 = vunpack.i.l.bf16 %v3175_v36  ;;  %v3335_v36 = vld [vmem:[%s3450_s15 + $0x28] sm:$0xff] }
 0x774   : > { %v3170_v61 = vpop.permute.xlu0 %3169  ;;  %1982 = vmatprep.subr.bf16.mxu1 %v3353_v32 }
 0x775   : > { %v3172_v37 = vunpack.i.h.bf16 %v3170_v61  ;;  %v3171_v11 = vunpack.i.l.bf16 %v3170_v61  ;;  %v1876_v10 = vpack.c.bf16 %v3177_v0, %v3176_v2 }
 0x776   : > { %v3185_v15 = vpop.permute.xlu1 %3184 }
 0x777   : > { %v1875_v9 = vpack.c.bf16 %v3172_v37, %v3171_v11  ;;  %v3187_v16 = vunpack.i.h.bf16 %v3185_v15  ;;  %v3186_v17 = vunpack.i.l.bf16 %v3185_v15 }
 0x778   : > { %v3180_v12 = vpop.permute.xlu0 %3179 }
 0x779   : > { %1983 = vmatpush1.bf16.msra.mxu1 %v1875_v9  ;;  %v3182_v1 = vunpack.i.h.bf16 %v3180_v12  ;;  %v3181_v19 = vunpack.i.l.bf16 %v3180_v12  ;;  %v1878_v14 = vpack.c.bf16 %v3187_v16, %v3186_v17  ;;  %v3337_v17 = vld [vmem:[%s3450_s15 + $0x38] sm:$0xff] }
 0x77a   : > { %1984 = vmatprep.subr.bf16.mxu1 %v3353_v32 }
 0x77b   : > { %v1877_v20 = vpack.c.bf16 %v3182_v1, %v3181_v19  ;;  %v3336_v1 = vld [vmem:[%s3450_s15 + $0x30] sm:$0xff] }
 0x77c   : > { %v3190_v7 = vpop.permute.xlu0 %3189 }
 0x77d   : > { %1985 = vmatpush1.bf16.msra.mxu1 %v1876_v10  ;;  %v3192_v35 = vunpack.i.h.bf16 %v3190_v7  ;;  %v3191_v22 = vunpack.i.l.bf16 %v3190_v7 }
 0x77e   : > { %1986 = vmatprep.subr.bf16.mxu1 %v3353_v32 }
 0x77f   : > { %v1879_v21 = vpack.c.bf16 %v3192_v35, %v3191_v22 }
 0x781   : > { %1987 = vmatpush1.bf16.msra.mxu1 %v1877_v20 }
 0x782   : > { %1988 = vmatprep.subr.bf16.mxu1 %v3353_v32 }
 0x785   : > { %1989 = vmatpush1.bf16.msra.mxu1 %v1878_v14 }
 0x786   : > { %1990 = vmatprep.subr.bf16.mxu1 %v3353_v32  ;;  %v3211_v32 = vld [vmem:[%s4346_s8 + $0x24] ss:$8 sps:$4 sm:$0xff]  }
 0x787   : > { %v1883_v43 = vpop.permute.xlu1 %1882 }
 0x789   : > { %1991 = vmatpush1.bf16.msra.mxu1 %v1879_v21 }
 0x78b   : > { %v1893_v53 = vpop.permute.xlu1 %1892 }
 0x78c   : > { %2001 = vmatmul.mubr.bf16.vlgmr.msra.gmra.mrb[24].mxu1 %v3205_v42 }
 0x78d   : > { %2675 = vmatprep.mubr.msk.bf16.mxu1 %vm487_vm0, %v3208_v47  ;;  %v1888_v48 = vpop.permute.xlu0 %1887  ;;  %v3338_v47 = vld [vmem:[%s4339_s1 + $0x8] sm:$0xff] }
 0x78f   : > { %v1903_v18 = vpop.permute.xlu1 %1902 }
 0x791   : > { %v1898_v33 = vpop.permute.xlu0 %1897 }
 0x793   : > { %v1913_v11 = vpop.permute.xlu1 %1912 }
 0x794   : > { %2009 = vmatmul.mubr.bf16.gmra.mrb[28].mxu1 %v3210_v23 }
 0x795   : > { %2676 = vmatprep.mubr.msk.bf16.mxu1 %vm487_vm0, %v3211_v32  ;;  %v1908_v6 = vpop.permute.xlu0 %1907 }
 0x799   : > { %v1918_v12 = vpop.permute.xlu0 %1917 }
 0x79c   : > { %2017 = vmatmul.mubr.bf16.gmra.mrb[32].mxu1 %v3213_v3  ;;  %v3339_v3 = vld [vmem:[%s4339_s1 + $0x10] sm:$0xff] }
 0x79d   : > { %2677 = vmatprep.mubr.msk.bf16.mxu1 %vm487_vm0, %v3214_v24 }
 0x7a4   : > { %2025 = vmatmul.mubr.bf16.gmra.mrb[36].mxu1 %v3216_v34  ;;  %v3340_v34 = vld [vmem:[%s4339_s1 + $0x18] sm:$0xff] }
 0x85f   : > { %v2002_v44 = vpop.f32.mrb[24].mxu1 }
 0x860   : > { %v2003_v45 = vadd.f32 %v2002_v44, %v1883_v43  ;;  %v2004_v46 = vpop.f32.mrb[25].mxu1 }
 0x861   : > { %v2005_v49 = vpop.f32.mrb[26].mxu1 }
 0x862   : > { %v4093_v39 = vadd.f32 %v3330_v50, %v2003_v45  ;;  %v2006_v40 = vadd.f32 %v2005_v49, %v1888_v48  ;;  %v2007_v38 = vpop.f32.mrb[27].mxu1  ;;  %v3341_v45 = vld [vmem:[%s4339_s1 + $0x20] sm:$0xff]  ;;  %v3342_v48 = vld [vmem:[%s4339_s1 + $0x28] sm:$0xff]  ;;  %v3343_v50 = vld [vmem:[%s4339_s1 + $0x30] sm:$0xff] }
 0x864   : > { %2041 = vst.msk [vmem:[%s4090_s21] sm:$0xff] %vm617_vm1, %v4093_v39  ;;  %v4099_v52 = vadd.f32 %v3331_v41, %v2006_v40  ;;  %v2194_v35 = vmul.f32 %v4093_v39, %v4093_v39  ;;  %v3344_v40 = vld [vmem:[%s4339_s1 + $0x38] sm:$0xff] }
 0x866   : > { %2042 = vst.msk [vmem:[%s4090_s21 + $0x8] sm:$0xff] %vm617_vm1, %v4099_v52  ;;  %v3027_v25 = vpack.c.bf16 %v4099_v52, %v4093_v39  ;;  %v2195_v7 = vmul.f32 %v4099_v52, %v4099_v52 }
 0x867   : > { %v2010_v26 = vpop.f32.mrb[28].mxu1 }
 0x868   : > { %v2011_v27 = vadd.f32 %v2010_v26, %v1893_v53  ;;  %v2012_v13 = vpop.f32.mrb[29].mxu1  ;;  %3028 = vmatprep.subr.bf16.mxu0 %v3027_v25  ;;  %v3043_v22 = vpack.c.bf16 %v2195_v7, %v2194_v35  ;;  %v2060_v7 = vld [vmem:[%s4349_s11 + $0x18] sm:$0xff] }
 0x869   : > { %v2013_v28 = vpop.f32.mrb[30].mxu1  ;;  %3030 = vmatpush3.bf16.msra.mxu0 %v3027_v25 }
 0x86a   : > { %v4107_v30 = vadd.f32 %v3332_v29, %v2011_v27  ;;  %v2014_v58 = vadd.f32 %v2013_v28, %v1898_v33  ;;  %v2015_v31 = vpop.f32.mrb[31].mxu1 }
 0x86c   : > { %2043 = vst.msk [vmem:[%s4090_s21 + $0x10] sm:$0xff] %vm617_vm1, %v4107_v30  ;;  %v4113_v55 = vadd.f32 %v3333_v54, %v2014_v58  ;;  %v2196_v42 = vmul.f32 %v4107_v30, %v4107_v30 }
 0x86e   : > { %2044 = vst.msk [vmem:[%s4090_s21 + $0x18] sm:$0xff] %vm617_vm1, %v4113_v55  ;;  %v3031_v56 = vpack.c.bf16 %v4113_v55, %v4107_v30  ;;  %v2197_v21 = vmul.f32 %v4113_v55, %v4113_v55 }
 0x86f   : > { %v2018_v62 = vpop.f32.mrb[32].mxu1 }
 0x870   : > { %v2019_v57 = vadd.f32 %v2018_v62, %v1903_v18  ;;  %v2020_v60 = vpop.f32.mrb[33].mxu1  ;;  %3032 = vmatprep.subr.bf16.mxu0 %v3031_v56  ;;  %v3047_v23 = vpack.c.bf16 %v2197_v21, %v2196_v42 }
 0x871   : > { %v2021_v59 = vpop.f32.mrb[34].mxu1  ;;  %3034 = vmatpush3.bf16.msra.mxu0 %v3031_v56 }
 0x872   : > { %v4121_v63 = vadd.f32 %v3334_v8, %v2019_v57  ;;  %v2022_v5 = vadd.f32 %v2021_v59, %v1908_v6  ;;  %v2023_v4 = vpop.f32.mrb[35].mxu1 }
 0x874   : > { %2045 = vst.msk [vmem:[%s4090_s21 + $0x20] sm:$0xff] %vm617_vm1, %v4121_v63  ;;  %v4127_v61 = vadd.f32 %v3335_v36, %v2022_v5  ;;  %v2198_v24 = vmul.f32 %v4121_v63, %v4121_v63 }
 0x876   : > { %2046 = vst.msk [vmem:[%s4090_s21 + $0x28] sm:$0xff] %vm617_vm1, %v4127_v61  ;;  %v3035_v37 = vpack.c.bf16 %v4127_v61, %v4121_v63  ;;  %v2199_v32 = vmul.f32 %v4127_v61, %v4127_v61 }
 0x877   : > { %v2026_v0 = vpop.f32.mrb[36].mxu1 }
 0x878   : > { %v2027_v2 = vadd.f32 %v2026_v0, %v1913_v11  ;;  %v2028_v9 = vpop.f32.mrb[37].mxu1  ;;  %3036 = vmatprep.subr.bf16.mxu0 %v3035_v37  ;;  %v3051_v43 = vpack.c.bf16 %v2199_v32, %v2198_v24 }
 0x879   : > { %v2029_v10 = vpop.f32.mrb[38].mxu1  ;;  %3038 = vmatpush3.bf16.msra.mxu0 %v3035_v37 }
 0x87a   : > { %v4135_v19 = vadd.f32 %v3336_v1, %v2027_v2  ;;  %v2030_v15 = vadd.f32 %v2029_v10, %v1918_v12  ;;  %v2031_v16 = vpop.f32.mrb[39].mxu1  ;;  %v2057_v1 = vld [vmem:[%s4349_s11] sm:$0xff] }
 0x87b   : > { %v2058_v16 = vld [vmem:[%s4349_s11 + $0x8] sm:$0xff] }
 0x87c   : > { %2047 = vst.msk [vmem:[%s4090_s21 + $0x30] sm:$0xff] %vm617_vm1, %v4135_v19  ;;  %v4141_v20 = vadd.f32 %v3337_v17, %v2030_v15  ;;  %v2200_v46 = vmul.f32 %v4135_v19, %v4135_v19  ;;  %v2059_v15 = vld [vmem:[%s4349_s11 + $0x10] sm:$0xff]  ;;  %v2061_v17 = vld [vmem:[%s4349_s11 + $0x20] sm:$0xff] }
 0x87e   : > { %2048 = vst.msk [vmem:[%s4090_s21 + $0x38] sm:$0xff] %vm617_vm1, %v4141_v20  ;;  %v3039_v14 = vpack.c.bf16 %v4141_v20, %v4135_v19  ;;  %v2201_v44 = vmul.f32 %v4141_v20, %v4141_v20 }
 0x880   : > { %3040 = vmatprep.subr.bf16.mxu0 %v3039_v14  ;;  %v3055_v49 = vpack.c.bf16 %v2201_v44, %v2200_v46 }
 0x881   : > { %3042 = vmatpush3.bf16.msra.mxu0 %v3039_v14  ;;  %v2062_v14 = vld [vmem:[%s4349_s11 + $0x28] sm:$0xff] }
 0x882   : > { %3044 = vmatprep.subr.bf16.mxu0 %v3043_v22 }
 0x884   : > { %2924 = vmatmul.mubr.msk.f32.vlgmr.msra.gmra.mrb[24].mxu0 %vm487_vm0, %v3338_v47 }
 0x885   : > { %3046 = vmatpush3.bf16.msra.mxu0 %v3043_v22  ;;  %2926 = vmatprep.mubr.msk.f32.mxu0 %vm487_vm0, %v3339_v3 }
 0x886   : > { %3048 = vmatprep.subr.bf16.mxu0 %v3047_v23 }
 0x888   : > { %2927 = vmatmul.mubr.msk.f32.gmra.mrb[26].mxu0 %vm487_vm0, %v3340_v34 }
 0x889   : > { %3050 = vmatpush3.bf16.msra.mxu0 %v3047_v23  ;;  %2929 = vmatprep.mubr.msk.f32.mxu0 %vm487_vm0, %v3341_v45 }
 0x88a   : > { %3052 = vmatprep.subr.bf16.mxu0 %v3051_v43 }
 0x88c   : > { %2930 = vmatmul.mubr.msk.f32.gmra.mrb[28].mxu0 %vm487_vm0, %v3342_v48 }
 0x88d   : > { %3054 = vmatpush3.bf16.msra.mxu0 %v3051_v43  ;;  %2932 = vmatprep.mubr.msk.f32.mxu0 %vm487_vm0, %v3343_v50 }
 0x88e   : > { %3056 = vmatprep.subr.bf16.mxu0 %v3055_v49 }
 0x890   : > { %2933 = vmatmul.mubr.msk.f32.gmra.mrb[30].mxu0 %vm487_vm0, %v3344_v40 }
 0x891   : > { %3058 = vmatpush3.bf16.msra.mxu0 %v3055_v49  ;;  %2951 = vmatprep.mubr.msk.f32.mxu0 %vm487_vm0, %v3848_v51 }
 0x894   : > { %2952 = vmatmul.mubr.msk.f32.vlgmr.msra.gmra.mrb[32].mxu0 %vm487_vm0, %v3338_v47 }
 0x895   : > { %2954 = vmatprep.mubr.msk.f32.mxu0 %vm487_vm0, %v3339_v3 }
 0x898   : > { %2955 = vmatmul.mubr.msk.f32.gmra.mrb[34].mxu0 %vm487_vm0, %v3340_v34 }
 0x899   : > { %2957 = vmatprep.mubr.msk.f32.mxu0 %vm487_vm0, %v3341_v45 }
 0x89c   : > { %2958 = vmatmul.mubr.msk.f32.gmra.mrb[36].mxu0 %vm487_vm0, %v3342_v48 }
 0x89d   : > { %2960 = vmatprep.mubr.msk.f32.mxu0 %vm487_vm0, %v3343_v50 }
 0x8a0   : > { %2961 = vmatmul.mubr.msk.f32.gmra.mrb[38].mxu0 %vm487_vm0, %v3344_v40 }
 0x957   : > { %v2925_v38 = vpop.f32.mrb[24].mxu0 }
 0x958   : > { %v2173_v41 = vsel %vm617_vm1, %v2925_v38, 0.0  ;;  %v2131_v25 = vpop.f32.mrb[25].mxu0 }
 0x959   : > { %v2170_v51 = vsel %vm617_vm1, %v2131_v25, 0.0  ;;  %2174 = vadd.xlane.f32.xlu0 %v2173_v41 }
 0x95a   : > { %2171 = vadd.xlane.f32.xlu1 %v2170_v51 }
 0x95b   : > { %v2928_v53 = vpop.f32.mrb[26].mxu0 }
 0x95c   : > { %v2179_v26 = vsel %vm617_vm1, %v2928_v53, 0.0  ;;  %v2141_v27 = vpop.f32.mrb[27].mxu0 }
 0x95d   : > { %v2176_v13 = vsel %vm617_vm1, %v2141_v27, 0.0 }
 0x95e   : > { %2180 = vadd.xlane.f32.xlu1 %v2179_v26  ;;  %2177 = vadd.xlane.f32.xlu0 %v2176_v13 }
 0x95f   : > { %v2931_v33 = vpop.f32.mrb[28].mxu0 }
 0x960   : > { %v2185_v28 = vsel %vm617_vm1, %v2931_v33, 0.0  ;;  %v2151_v29 = vpop.f32.mrb[29].mxu0 }
 0x961   : > { %v2182_v58 = vsel %vm617_vm1, %v2151_v29, 0.0 }
 0x962   : > { %2186 = vadd.xlane.f32.xlu1 %v2185_v28  ;;  %2183 = vadd.xlane.f32.xlu0 %v2182_v58 }
 0x963   : > { %v2934_v31 = vpop.f32.mrb[30].mxu0 }
 0x964   : > { %v2191_v54 = vsel %vm617_vm1, %v2934_v31, 0.0  ;;  %v2161_v56 = vpop.f32.mrb[31].mxu0 }
 0x965   : > { %v2188_v18 = vsel %vm617_vm1, %v2161_v56, 0.0 }
 0x966   : > { %2192 = vadd.xlane.f32.xlu1 %v2191_v54  ;;  %2189 = vadd.xlane.f32.xlu0 %v2188_v18 }
 0x967   : > { %v2953_v62 = vpop.f32.mrb[32].mxu0 }
 0x968   : > { %v2310_v57 = vsel %vm617_vm1, %v2953_v62, 0.0  ;;  %v2268_v60 = vpop.f32.mrb[33].mxu0 }
 0x969   : > { %v2307_v6 = vsel %vm617_vm1, %v2268_v60, 0.0 }
 0x96a   : > { %2311 = vadd.xlane.f32.xlu1 %v2310_v57  ;;  %2308 = vadd.xlane.f32.xlu0 %v2307_v6 }
 0x96b   : > { %v2956_v59 = vpop.f32.mrb[34].mxu0 }
 0x96c   : > { %v2316_v8 = vsel %vm617_vm1, %v2956_v59, 0.0  ;;  %v2278_v5 = vpop.f32.mrb[35].mxu0  ;;  %v2050_v59 = vld [vmem:[%s4348_s10 + $0x8] sm:$0xff] }
 0x96d   : > { %v2313_v4 = vsel %vm617_vm1, %v2278_v5, 0.0 }
 0x96e   : > { %2317 = vadd.xlane.f32.xlu1 %v2316_v8  ;;  %2314 = vadd.xlane.f32.xlu0 %v2313_v4  ;;  %v2049_v8 = vld [vmem:[%s4348_s10] sm:$0xff] }
 0x96f   : > { %v2959_v36 = vpop.f32.mrb[36].mxu0 }
 0x970   : > { %v2322_v37 = vsel %vm617_vm1, %v2959_v36, 0.0  ;;  %v2288_v11 = vpop.f32.mrb[37].mxu0 }
 0x971   : > { %v2319_v0 = vsel %vm617_vm1, %v2288_v11, 0.0 }
 0x972   : > { %2323 = vadd.xlane.f32.xlu1 %v2322_v37  ;;  %2320 = vadd.xlane.f32.xlu0 %v2319_v0 }
 0x973   : > { %v2962_v2 = vpop.f32.mrb[38].mxu0 }
 0x974   : > { %v2328_v9 = vsel %vm617_vm1, %v2962_v2, 0.0  ;;  %v2298_v12 = vpop.f32.mrb[39].mxu0  ;;  %v2052_v2 = vld [vmem:[%s4348_s10 + $0x18] sm:$0xff] }
 0x975   : > { %v2325_v10 = vsel %vm617_vm1, %v2298_v12, 0.0 }
 0x976   : > { %2329 = vadd.xlane.f32.xlu1 %v2328_v9  ;;  %2326 = vadd.xlane.f32.xlu0 %v2325_v10  ;;  %v2051_v9 = vld [vmem:[%s4348_s10 + $0x10] sm:$0xff] }
 0x987   : > { %2429 = vperm.xlu1 %3071, %v2057_v1  }
 0x98b   : > { %2439 = vperm.xlu1 %3071, %v2059_v15  }
 0x98c   : > { %2434 = vperm.xlu0 %3072, %v2058_v16   ;;  %v2054_v16 = vld [vmem:[%s4348_s10 + $0x28] sm:$0xff] }
 0x98f   : > { %2449 = vperm.xlu1 %3071, %v2061_v17   ;;  %v2053_v17 = vld [vmem:[%s4348_s10 + $0x20] sm:$0xff] }
 0x990   : > { %2444 = vperm.xlu0 %3072, %v2060_v7  }
 0x994   : > { %2454 = vperm.xlu0 %3072, %v2062_v14  }
 0x9e6   : > { %v4235_v35 = vpop.xlane.xlu0 %2174 }
 0x9e7   : > { %v4237_v22 = vpop.xlane.xlu1 %2171  ;;  %v2332_v24 = vmul.f32 %v4235_v35, %v4235_v35 }
 0x9e8   : > { %v2331_v34 = vmul.f32 %v4237_v22, %v4237_v22 }
 0x9eb   : > { %v4239_v21 = vpop.xlane.xlu1 %2180  ;;  %v4241_v42 = vpop.xlane.xlu0 %2177 }
 0x9ec   : > { %v2334_v48 = vmul.f32 %v4239_v21, %v4239_v21  ;;  %v2333_v49 = vmul.f32 %v4241_v42, %v4241_v42 }
 0x9ef   : > { %v4243_v47 = vpop.xlane.xlu1 %2186  ;;  %v4245_v23 = vpop.xlane.xlu0 %2183 }
 0x9f0   : > { %v2336_v53 = vmul.f32 %v4243_v47, %v4243_v47  ;;  %v2335_v26 = vmul.f32 %v4245_v23, %v4245_v23 }
 0x9f3   : > { %v4247_v32 = vpop.xlane.xlu1 %2192  ;;  %v4249_v3 = vpop.xlane.xlu0 %2189 }
 0x9f4   : > { %v2338_v31 = vmul.f32 %v4247_v32, %v4247_v32  ;;  %v2337_v54 = vmul.f32 %v4249_v3, %v4249_v3 }
 0x9f7   : > { %v2312_v43 = vpop.xlane.xlu1 %2311  ;;  %v2309_v44 = vpop.xlane.xlu0 %2308 }
 0x9f8   : > { %v2340_v45 = vsub.f32 %v2312_v43, %v2332_v24  ;;  %v2339_v46 = vsub.f32 %v2309_v44, %v2331_v34  ;;  %v2056_v43 = vld [vmem:[%s4348_s10 + $0x38] sm:$0xff]  ;;  %v2055_v44 = vld [vmem:[%s4348_s10 + $0x30] sm:$0xff] }
 0x9fa   : > { %v2348_v50 = vadd.f32 1e-05, %v2340_v45  ;;  %v2347_v40 = vadd.f32 1e-05, %v2339_v46 }
 0x9fb   : > { %v2318_v38 = vpop.xlane.xlu1 %2317  ;;  %v2315_v41 = vpop.xlane.xlu0 %2314 }
 0x9fc   : > { %3313 = vrsqrt.f32 %v2348_v50  ;;  %v2342_v25 = vsub.f32 %v2318_v38, %v2334_v48  ;;  %v2341_v51 = vsub.f32 %v2315_v41, %v2333_v49  ;;  %v2064_v50 = vld [vmem:[%s4349_s11 + $0x38] sm:$0xff] }
 0x9fd   : > { %3315 = vrsqrt.f32 %v2347_v40  ;;  %v2063_v40 = vld [vmem:[%s4349_s11 + $0x30] sm:$0xff] }
 0x9fe   : > { %v2350_v27 = vadd.f32 1e-05, %v2342_v25  ;;  %v2349_v13 = vadd.f32 1e-05, %v2341_v51 }
 0x9ff   : > { %v2324_v33 = vpop.xlane.xlu1 %2323  ;;  %v2321_v28 = vpop.xlane.xlu0 %2320 }
 0xa00   : > { %3317 = vrsqrt.f32 %v2350_v27  ;;  %v2344_v29 = vsub.f32 %v2324_v33, %v2336_v53  ;;  %v2343_v58 = vsub.f32 %v2321_v28, %v2335_v26  ;;  %v2364_v27 = vsub.f32 %v4099_v52, %v4235_v35 }
 0xa01   : > { %3319 = vrsqrt.f32 %v2349_v13  ;;  %v2363_v13 = vsub.f32 %v4093_v39, %v4237_v22  ;;  %v2365_v39 = vsub.f32 %v4107_v30, %v4241_v42 }
 0xa02   : > { %v2352_v56 = vadd.f32 1e-05, %v2344_v29  ;;  %v2351_v18 = vadd.f32 1e-05, %v2343_v58 }
 0xa03   : > { %v2330_v62 = vpop.xlane.xlu1 %2329  ;;  %v2327_v57 = vpop.xlane.xlu0 %2326 }
 0xa04   : > { %3321 = vrsqrt.f32 %v2352_v56  ;;  %v2346_v60 = vsub.f32 %v2330_v62, %v2338_v31  ;;  %v2345_v6 = vsub.f32 %v2327_v57, %v2337_v54  ;;  %v2366_v54 = vsub.f32 %v4113_v55, %v4239_v21 }
 0xa05   : > { %3323 = vrsqrt.f32 %v2351_v18  ;;  %v2368_v62 = vsub.f32 %v4127_v61, %v4243_v47  ;;  %v2367_v55 = vsub.f32 %v4121_v63, %v4245_v23  ;;  %v2370_v63 = vsub.f32 %v4141_v20, %v4247_v32 }
 0xa06   : > { %v3314_v5 = vpop.eup %3313  ;;  %v2354_v4 = vadd.f32 1e-05, %v2346_v60  ;;  %v2353_v36 = vadd.f32 1e-05, %v2345_v6  ;;  %v2369_v23 = vsub.f32 %v4135_v19, %v4249_v3 }
 0xa07   : > { %v3316_v37 = vpop.eup %3315  ;;  %v2372_v11 = vmul.f32 %v3314_v5, %v2050_v59  ;;  %v2430_v38 = vpop.permute.xlu1 %2429 }
 0xa08   : > { %3325 = vrsqrt.f32 %v2354_v4  ;;  %v2371_v0 = vmul.f32 %v3316_v37, %v2049_v8 }
 0xa09   : > { %3327 = vrsqrt.f32 %v2353_v36  ;;  %2386 = vperm.xlu1 %3071, %v2372_v11  }
 0xa0a   : > { %v3318_v12 = vpop.eup %3317  ;;  %2381 = vperm.xlu0 %3072, %v2371_v0  }
 0xa0b   : > { %v3320_v10 = vpop.eup %3319  ;;  %v2374_v1 = vmul.f32 %v3318_v12, %v2052_v2  ;;  %v2435_v41 = vpop.permute.xlu0 %2434 }
 0xa0c   : > { %v2373_v15 = vmul.f32 %v3320_v10, %v2051_v9  ;;  %v2440_v25 = vpop.permute.xlu1 %2439 }
 0xa0e   : > { %v3322_v7 = vpop.eup %3321  ;;  %2396 = vperm.xlu0 %3072, %v2374_v1   ;;  %2391 = vperm.xlu1 %3071, %v2373_v15  }
 0xa0f   : > { %v3324_v14 = vpop.eup %3323  ;;  %v2376_v24 = vmul.f32 %v3322_v7, %v2054_v16  ;;  %v2445_v51 = vpop.permute.xlu0 %2444 }
 0xa10   : > { %v2375_v34 = vmul.f32 %v3324_v14, %v2053_v17  ;;  %v2450_v53 = vpop.permute.xlu1 %2449 }
 0xa12   : > { %v3326_v45 = vpop.eup %3325  ;;  %2406 = vperm.xlu0 %3072, %v2376_v24   ;;  %2401 = vperm.xlu1 %3071, %v2375_v34  }
 0xa13   : > { %v3328_v46 = vpop.eup %3327  ;;  %v2378_v48 = vmul.f32 %v3326_v45, %v2056_v43  ;;  %v2455_v26 = vpop.permute.xlu0 %2454 }
 0xa14   : > { %v2377_v49 = vmul.f32 %v3328_v46, %v2055_v44 }
 0xa16   : > { %2416 = vperm.xlu0 %3072, %v2378_v48   ;;  %2411 = vperm.xlu1 %3071, %v2377_v49  }
 0xa1a   : > { %2464 = vperm.xlu0 %3072, %v2064_v50   ;;  %2459 = vperm.xlu1 %3071, %v2063_v40  }
 0xa88   : > { %v2387_v33 = vpop.permute.xlu1 %2386 }
 0xa89   : > { %v2420_v28 = vmul.f32 %v2387_v33, %v2364_v27  ;;  %v2382_v29 = vpop.permute.xlu0 %2381 }
 0xa8a   : > { %v2419_v58 = vmul.f32 %v2382_v29, %v2363_v13 }
 0xa8b   : > { %v2468_v31 = vadd.f32 %v2435_v41, %v2420_v28 }
 0xa8c   : > { %v2467_v52 = vadd.f32 %v2430_v38, %v2419_v58 }
 0xa8d   : > { %2476 = vst.msk [vmem:[%s4305_s16 + $0x8] sm:$0xff] %vm617_vm1, %v2468_v31  ;;  %v2392_v35 = vpop.permute.xlu1 %2391  ;;  %v2397_v22 = vpop.permute.xlu0 %2396 }
 0xa8e   : > { %2475 = vst.msk [vmem:[%s4305_s16] sm:$0xff] %vm617_vm1, %v2467_v52  ;;  %v2421_v56 = vmul.f32 %v2392_v35, %v2365_v39  ;;  %v2422_v18 = vmul.f32 %v2397_v22, %v2366_v54 }
 0xa90   : > { %v2469_v21 = vadd.f32 %v2440_v25, %v2421_v56  ;;  %v2470_v57 = vadd.f32 %v2445_v51, %v2422_v18 }
 0xa91   : > { %v2402_v30 = vpop.permute.xlu1 %2401  ;;  %v2407_v42 = vpop.permute.xlu0 %2406 }
 0xa92   : > { %2477 = vst.msk [vmem:[%s4305_s16 + $0x10] sm:$0xff] %vm617_vm1, %v2469_v21  ;;  %2478 = vst.msk [vmem:[%s4305_s16 + $0x18] sm:$0xff] %vm617_vm1, %v2470_v57  ;;  %v2423_v60 = vmul.f32 %v2402_v30, %v2367_v55  ;;  %v2424_v6 = vmul.f32 %v2407_v42, %v2368_v62 }
 0xa94   : > { %v2471_v59 = vadd.f32 %v2450_v53, %v2423_v60  ;;  %v2472_v8 = vadd.f32 %v2455_v26, %v2424_v6 }
 0xa95   : > { %v2412_v61 = vpop.permute.xlu1 %2411  ;;  %v2417_v47 = vpop.permute.xlu0 %2416 }
 0xa96   : > { %2479 = vst.msk [vmem:[%s4305_s16 + $0x20] sm:$0xff] %vm617_vm1, %v2471_v59  ;;  %2480 = vst.msk [vmem:[%s4305_s16 + $0x28] sm:$0xff] %vm617_vm1, %v2472_v8  ;;  %v2425_v5 = vmul.f32 %v2412_v61, %v2369_v23  ;;  %v2426_v4 = vmul.f32 %v2417_v47, %v2370_v63 }
 0xa99   : > { %v2460_v36 = vpop.permute.xlu1 %2459  ;;  %v2465_v37 = vpop.permute.xlu0 %2464 }
 0xa9a   : > { %v2473_v11 = vadd.f32 %v2460_v36, %v2425_v5  ;;  %v2474_v0 = vadd.f32 %v2465_v37, %v2426_v4 }
 0xa9c   : > { %2481 = vst.msk [vmem:[%s4305_s16 + $0x30] sm:$0xff] %vm617_vm1, %v2473_v11  ;;  %2482 = vst.msk [vmem:[%s4305_s16 + $0x38] sm:$0xff] %vm617_vm1, %v2474_v0 }
 0xa9d PF: > { %s24_s25 = sadd.s32 1, %s3351_s25  }
 0xa9e   : > { %p21_p4 = scmp.ge.s32.totalorder %s24_s25, 4  }
 0xaa0   :  { %23 = sbr.rel (!%p21_p4) target bundleno = 1 (0x1), region = 110 }

// kernel: mid_block.4
= control target key start
LH: loop header
LB: loop body
LE: loop exit
PB: predicated region body
PF: predicated region fallthrough
CT: control target
= control target key end

     0   :  { %s4184_s18 = smov 0   ;;  %s4935_s0 = inlined_call_operand.vmem [shape: f32[2,16,64], index: 0, kind: input, shape index: {}]   ;;  %s4936_s1 = inlined_call_operand.vmem [shape: f32[2,16,64], index: 1, kind: input, shape index: {}]   ;;  %s4937_s2 = inlined_call_operand.vmem [shape: bf16[64,192], index: 2, kind: input, shape index: {}]   ;;  %s4938_s3 = inlined_call_operand.vmem [shape: bf16[64,64], index: 3, kind: input, shape index: {}]   ;;  %s4939_s4 = inlined_call_operand.vmem [shape: f32[1,64], index: 4, kind: input, shape index: {}]   ;;  %s4940_s5 = inlined_call_operand.vmem [shape: f32[2,16,64], index: 5, kind: output, shape index: {}]  }
   0x1 LB: > { %s3243_s19 = sadd.s32 4294967295, %s4118_s18   ;;  %p3247_p0 = scmp.ge.s32.totalorder %s4118_s18, 1  ;;  %s4118_s18 = sphi %s4184_s18, %s15_s18  }
   0x2   : > { %p197_p1 = scmp.lt.s32.totalorder %s4118_s18, 3 }
   0x4   : > { %p198_p2 = pnand %p3247_p0, %p197_p1 }
   0x5   : > { %v3968_v0 = vld [vmem:[%s4937_s2 + $0x4] ss:$8 sps:$4 sm:$0xff] (!%p198_p2)   ;;  %p230_p3 = scmp.lt.s32.totalorder (!%p198_p2), %s3243_s19, 1  ;;  %v3970_v1 = vld [vmem:[%s4937_s2] ss:$8 sps:$4 sm:$0xff] (!%p198_p2)   ;;  %v4120_v2 = vmov (!%p198_p2), 0  }
   0x6   : > { %201 = sbr.rel (%p198_p2) target bundleno = 2187 (0x88b), region = 40  ;;  %335 = vmatprep.mubr.bf16.mxu0 (!%p198_p2), %v4120_v2  ;;  %303 = vmatprep.subr.bf16.mxu0 (!%p198_p2), %v3968_v0  ;;  %v3971_v3 = vld [vmem:[%s4937_s2 + $0x14] ss:$8 sps:$4 sm:$0xff] (!%p198_p2)   ;;  %v3973_v4 = vld [vmem:[%s4937_s2 + $0x10] ss:$8 sps:$4 sm:$0xff] (!%p198_p2)   ;;  %vm299_vm0 = vcmask (!%p198_p2), 523264  }
   0x7   : > { %304 = vmatpush1.bf16.msra.mxu0 (!%p198_p2), %v3970_v1  ;;  %v3974_v5 = vld [vmem:[%s4937_s2 + $0x24] ss:$8 sps:$4 sm:$0xff] (!%p198_p2)   ;;  %v3976_v6 = vld [vmem:[%s4937_s2 + $0x20] ss:$8 sps:$4 sm:$0xff] (!%p198_p2)   ;;  %v3977_v7 = vld [vmem:[%s4937_s2 + $0x34] ss:$8 sps:$4 sm:$0xff] (!%p198_p2)  }
   0x8   : > { %305 = vmatprep.subr.bf16.mxu0 (!%p198_p2), %v3971_v3  ;;  %v3979_v8 = vld [vmem:[%s4937_s2 + $0x30] ss:$8 sps:$4 sm:$0xff] (!%p198_p2)   ;;  %v4121_v12 = vmov (!%p198_p2), 0.0   ;;  %vm354_vm1 = vcmask (!%p198_p2), 31744   ;;  %s4122_s15 = smov (!%p198_p2), 64   ;;  %vm440_vm3 = vcmask (!%p198_p2), 130048  }
   0x9   : > { %3462 = vmatprep.subr.bf16.mxu1 (!%p198_p2), %v4121_v12  ;;  %vm4236_vm2 = vmpackc.low (!%p198_p2), %vm354_vm1, %vm354_vm1  ;;  %s4941_s16 = smov (!%p198_p2), 60   ;;  %s4942_s17 = smov (!%p198_p2), 56   ;;  %vm4146_vm4 = vmmov (!%p198_p2), 0   ;;  %vm3047_vm5 = vcmask (!%p198_p2), 64512   ;;  %vm3050_vm6 = vcmask (!%p198_p2), 97280   ;;  %vm3055_vm7 = vcmask (!%p198_p2), 162816  }
   0xa   : > { %s4126_s20 = smov (!%p198_p2), 116   ;;  %s4127_s21 = smov (!%p198_p2), 112   ;;  %3464 = vmatprep.mubr.msk.bf16.mxu1 (!%p198_p2), %vm4146_vm4, %v4121_v12  ;;  %vm3058_vm8 = vcmask (!%p198_p2), 195584   ;;  %vm3061_vm9 = vcmask (!%p198_p2), 228352   ;;  %vm3064_vm10 = vcmask (!%p198_p2), 261120   ;;  %vm3067_vm11 = vcmask (!%p198_p2), 293888  }
   0xb   : > { %306 = vmatpush1.bf16.msra.mxu0 (!%p198_p2), %v3973_v4  ;;  %s4128_s22 = smov (!%p198_p2), 40   ;;  %s4129_s23 = smov (!%p198_p2), 108   ;;  %vm3070_vm12 = vcmask (!%p198_p2), 326656   ;;  %vm3073_vm13 = vcmask (!%p198_p2), 359424   ;;  %vm3076_vm14 = vcmask (!%p198_p2), 392192   ;;  %vm3079_vm15 = vcmask (!%p198_p2), 424960  }
   0xc   : > { %307 = vmatprep.subr.bf16.mxu0 (!%p198_p2), %v3974_v5  ;;  %s4130_s24 = smov (!%p198_p2), 104   ;;  %s4131_s25 = smov (!%p198_p2), 32  }
   0xd   : > { %s4952_s19 = smov (!%p230_p3, %s3243_s19), 1  ;;  %s4132_s26 = smov 100  }
   0xe   : > { %s4207_s30 = sshll.u32 %s4952_s19, 4  ;;  %s4125_s19 = smov 124  }
   0xf   : > { %s234_s12 = scalar_lea.vmem %s4935_s0, %s4207_s30  ;;  %308 = vmatpush1.bf16.msra.mxu0 %v3976_v6  ;;  %s4133_s27 = smov 96  }
  0x10   : > { %v246_v9 = vld [vmem:[%s234_s12] sm:$0xff]  ;;  %v247_v10 = vld [vmem:[%s234_s12 + $0x8] sm:$0xff]  ;;  %309 = vmatprep.subr.bf16.mxu0 %v3977_v7  ;;  %s4134_s28 = smov 24   ;;  %s4135_s29 = smov 92  }
  0x11   : > { %v250_v11 = vpack.c.bf16 %v247_v10, %v246_v9  ;;  %s4136_s6 = smov 88   ;;  %s4137_s7 = smov 16  }
  0x12   : > { %s4138_s8 = smov 84   ;;  %s4139_s9 = smov 80  }
  0x13   : > { %310 = vmatpush1.bf16.msra.mxu0 %v3979_v8  ;;  %s4140_s10 = smov 8   ;;  %s4141_s11 = smov 76  }
  0x14   : > { %s4142_s12 = smov 72   ;;  %s4143_s13 = smov 68  }
  0x15   : > { %s4144_s14 = smov 120  }
  0x16   : > { %3262 = vmatmul.mubr.msk.bf16.vlgmr.msra.gmra.mrb[0].mxu0 %vm299_vm0, %v250_v11 }
  0xe9   : > { %v337_v13 = vpop.f32.mrb[0].mxu0 }
  0xea   : > { %v4224_v14 = vmul.f32 0.5, %v337_v13  ;;  %v339_v15 = vpop.f32.mrb[1].mxu0 }
  0xeb   : > { %v341_v16 = vpop.f32.mrb[2].mxu0 }
  0xec   : > { %v343_v17 = vpop.f32.mrb[3].mxu0  ;;  %3459 = vmatprep.mubr.msk.f32.mxu0 %vm354_vm1, %v4224_v14  ;;  %v4228_v18 = vpack.i.bf16 %v341_v16, %v337_v13  ;;  %v4245_v25 = vmul.f32 0.5, %v341_v16 }
  0xed   : > { %v4230_v19 = vpack.c.bf16 %v343_v17, %v339_v15 }
  0xee   : > { %3814 = vrot.lane.b32.xlu0 %v4228_v18, %s4122_s15  ;;  %s4943_s15 = smov 52  }
  0xef   : > { %3463 = vmatpush3.bf16.msra.mxu1 %v4230_v19 }
 0x160   : > { %v3815_v20 = vpop.permute.xlu0 %3814 }
 0x161   : > { %v3817_v21 = vunpack.i.h.bf16 %v3815_v20  ;;  %v3816_v22 = vunpack.i.l.bf16 %v3815_v20 }
 0x163   : > { %v3675_v24 = vpack.c.bf16 %v3817_v21, %v3816_v22 }
 0x165   : > { %3677 = vmatprep.subr.msk.bf16.mxu0 %vm4236_vm2, %v3675_v24 }
 0x166   : > { %3680 = vmatpush3.bf16.xpose.msk.msra.mxu0 %vm4236_vm2, %v3675_v24 }
 0x167   : > { %3475 = vmatprep.subr.bf16.mxu0 %v4121_v12 }
 0x16d   : > { %3460 = vmatmul.mubr.msk.f32.vlgmr.msra.gmra.mrb[4].mxu0 %vm354_vm1, %v4245_v25 }
 0x16e   : > { %3477 = vmatprep.mubr.msk.bf16.mxu0 %vm4146_vm4, %v4121_v12 }
 0x240   : > { %v3461_v26 = vpop.f32.mrb[4].mxu0 }
 0x241   : > { %v431_v27 = vpop.f32.mrb[5].mxu0  ;;  %v444_v28 = vsel %vm440_vm3, %v3461_v26, -inf }
 0x242   : > { %445 = vmax.xlane.f32.xlu1 %v444_v28  ;;  %v441_v29 = vsel %vm440_vm3, %v431_v27, -inf }
 0x243   : > { %442 = vmax.xlane.f32.xlu0 %v441_v29 }
 0x253   : > { %3819 = vrot.lane.b32.xlu1 %v4228_v18, %s4941_s16  ;;  %s4944_s16 = smov 48  }
 0x257   : > { %3824 = vrot.lane.b32.xlu1 %v4228_v18, %s4942_s17  ;;  %s4148_s17 = smov 44  }
 0x259   : > { %511 = vrot.lane.b32.xlu0 %v4245_v25, %s4125_s19 }
 0x25b   : > { %509 = vrot.lane.b32.xlu1 %v4224_v14, %s4125_s19 }
 0x25d   : > { %834 = vrot.lane.b32.xlu0 %v4245_v25, %s4126_s20 }
 0x261   : > { %993 = vrot.lane.b32.xlu0 %v4224_v14, %s4127_s21 }
 0x265   : > { %3844 = vrot.lane.b32.xlu0 %v4228_v18, %s4128_s22 }
 0x269   : > { %1156 = vrot.lane.b32.xlu0 %v4245_v25, %s4129_s23 }
 0x26d   : > { %1315 = vrot.lane.b32.xlu0 %v4224_v14, %s4130_s24 }
 0x271   : > { %3854 = vrot.lane.b32.xlu0 %v4228_v18, %s4131_s25 }
 0x275   : > { %1478 = vrot.lane.b32.xlu0 %v4245_v25, %s4132_s26 }
 0x279   : > { %1637 = vrot.lane.b32.xlu0 %v4224_v14, %s4133_s27 }
 0x27d   : > { %3864 = vrot.lane.b32.xlu0 %v4228_v18, %s4134_s28 }
 0x281   : > { %1800 = vrot.lane.b32.xlu0 %v4245_v25, %s4135_s29 }
 0x285   : > { %1959 = vrot.lane.b32.xlu0 %v4224_v14, %s4136_s6 }
 0x289   : > { %3874 = vrot.lane.b32.xlu0 %v4228_v18, %s4137_s7 }
 0x28d   : > { %2122 = vrot.lane.b32.xlu0 %v4245_v25, %s4138_s8 }
 0x291   : > { %2281 = vrot.lane.b32.xlu0 %v4224_v14, %s4139_s9 }
 0x295   : > { %3884 = vrot.lane.b32.xlu0 %v4228_v18, %s4140_s10 }
 0x299   : > { %2444 = vrot.lane.b32.xlu0 %v4245_v25, %s4141_s11 }
 0x29d   : > { %2603 = vrot.lane.b32.xlu0 %v4224_v14, %s4142_s12 }
 0x2a1   : > { %2764 = vrot.lane.b32.xlu0 %v4224_v14, %s4143_s13 }
 0x2a5   : > { %785 = vrot.lane.b32.xlu0 %v4230_v19, %s4144_s14 }
 0x2a9   : > { %1268 = vrot.lane.b32.xlu0 %v4230_v19, %s4129_s23 }
 0x2ad   : > { %1590 = vrot.lane.b32.xlu0 %v4230_v19, %s4132_s26 }
 0x2cf   : > { %v446_v30 = vpop.xlane.xlu1 %445 }
 0x2d0   : > { %v448_v31 = vsub.f32 %v3461_v26, %v446_v30  ;;  %v443_v32 = vpop.xlane.xlu0 %442 }
 0x2d1   : > { %v447_v33 = vsub.f32 %v431_v27, %v443_v32 }
 0x2d2   : > { %v451_v34 = vmul.f32 1.442695, %v448_v31 }
 0x2d3   : > { %v449_v35 = vmul.f32 1.442695, %v447_v33  ;;  %v3820_v36 = vpop.permute.xlu1 %3819 }
 0x2d4   : > { %3984 = vpow2.f32 %v451_v34  ;;  %v3822_v37 = vunpack.i.h.bf16 %v3820_v36  ;;  %v3821_v38 = vunpack.i.l.bf16 %v3820_v36  ;;  %v512_v58 = vpop.permute.xlu0 %511 }
 0x2d5   : > { %3986 = vpow2.f32 %v449_v35 }
 0x2d6   : > { %v4300_v39 = vpack.c.bf16 %v3822_v37, %v3821_v38 }
 0x2d7   : > { %v3825_v44 = vpop.permute.xlu1 %3824 }
 0x2d8   : > { %3683 = vmatprep.subr.msk.bf16.mxu1 %vm4236_vm2, %v4300_v39  ;;  %v3827_v52 = vunpack.i.h.bf16 %v3825_v44  ;;  %v3826_v53 = vunpack.i.l.bf16 %v3825_v44  ;;  %v835_v0 = vpop.permute.xlu0 %834 }
 0x2da   : > { %v3687_v59 = vpack.c.bf16 %v3827_v52, %v3826_v53 }
 0x2db   : > { %v510_v45 = vpop.permute.xlu1 %509 }
 0x2dc   : > { %v994_v3 = vpop.permute.xlu0 %993 }
 0x2de   : > { %v3985_v40 = vpop.eup %3984 }
 0x2df   : > { %v456_v41 = vsel %vm440_vm3, %v3985_v40, 0.0  ;;  %v3987_v42 = vpop.eup %3986 }
 0x2e0   : > { %457 = vadd.xlane.f32.xlu1 %v456_v41  ;;  %v453_v43 = vsel %vm440_vm3, %v3987_v42, 0.0  ;;  %v3845_v9 = vpop.permute.xlu0 %3844 }
 0x2e1   : > { %v3847_v17 = vunpack.i.h.bf16 %v3845_v9 }
 0x2e4   : > { %454 = vadd.xlane.f32.xlu1 %v453_v43 }
 0x2f5   : > { %3829 = vrot.lane.b32.xlu1 %v4228_v18, %s4943_s15  ;;  %s4150_s15 = smov 28  }
 0x2f9   : > { %671 = vrot.lane.b32.xlu1 %v4224_v14, %s4144_s14 }
 0x2fd   : > { %673 = vrot.lane.b32.xlu1 %v4245_v25, %s4144_s14  ;;  %s4149_s14 = smov 36  }
 0x301   : > { %3834 = vrot.lane.b32.xlu1 %v4228_v18, %s4944_s16  ;;  %s4153_s16 = smov 4  }
 0x305   : > { %832 = vrot.lane.b32.xlu1 %v4224_v14, %s4126_s20 }
 0x309   : > { %3839 = vrot.lane.b32.xlu1 %v4228_v18, %s4148_s17 }
 0x30d   : > { %995 = vrot.lane.b32.xlu1 %v4245_v25, %s4127_s21 }
 0x311   : > { %1154 = vrot.lane.b32.xlu1 %v4224_v14, %s4129_s23  ;;  %s4151_s23 = smov 20  }
 0x315   : > { %3849 = vrot.lane.b32.xlu1 %v4228_v18, %s4149_s14 }
 0x319   : > { %1317 = vrot.lane.b32.xlu1 %v4245_v25, %s4130_s24 }
 0x31d   : > { %1476 = vrot.lane.b32.xlu1 %v4224_v14, %s4132_s26  ;;  %s4152_s26 = smov 12  }
 0x321   : > { %3859 = vrot.lane.b32.xlu1 %v4228_v18, %s4150_s15 }
 0x325   : > { %1639 = vrot.lane.b32.xlu1 %v4245_v25, %s4133_s27 }
 0x329   : > { %1798 = vrot.lane.b32.xlu1 %v4224_v14, %s4135_s29 }
 0x32d   : > { %3869 = vrot.lane.b32.xlu1 %v4228_v18, %s4151_s23 }
 0x331   : > { %1961 = vrot.lane.b32.xlu1 %v4245_v25, %s4136_s6 }
 0x335   : > { %2120 = vrot.lane.b32.xlu1 %v4224_v14, %s4138_s8 }
 0x339   : > { %3879 = vrot.lane.b32.xlu1 %v4228_v18, %s4152_s26 }
 0x33d   : > { %2283 = vrot.lane.b32.xlu1 %v4245_v25, %s4139_s9 }
 0x341   : > { %2442 = vrot.lane.b32.xlu1 %v4224_v14, %s4141_s11  ;;  %v1157_v14 = vpop.permute.xlu0 %1156 }
 0x345   : > { %3889 = vrot.lane.b32.xlu1 %v4228_v18, %s4153_s16  ;;  %v3846_v18 = vunpack.i.l.bf16 %v3845_v9  ;;  %v1316_v21 = vpop.permute.xlu0 %1315 }
 0x347   : > { %v3711_v22 = vpack.c.bf16 %v3847_v17, %v3846_v18 }
 0x349   : > { %2605 = vrot.lane.b32.xlu1 %v4245_v25, %s4142_s12 }
 0x34d   : > { %2766 = vrot.lane.b32.xlu1 %v4245_v25, %s4143_s13  ;;  %v3855_v25 = vpop.permute.xlu0 %3854 }
 0x34e   : > { %v3857_v32 = vunpack.i.h.bf16 %v3855_v25  ;;  %v3856_v33 = vunpack.i.l.bf16 %v3855_v25 }
 0x350   : > { %v3723_v36 = vpack.c.bf16 %v3857_v32, %v3856_v33 }
 0x351   : > { %624 = vrot.lane.b32.xlu1 %v4230_v19, %s4125_s19  ;;  %v1479_v31 = vpop.permute.xlu0 %1478 }
 0x355   : > { %946 = vrot.lane.b32.xlu1 %v4230_v19, %s4126_s20  ;;  %v1638_v35 = vpop.permute.xlu0 %1637  ;;  %s4947_s20 = smov 48  }
 0x359   : > { %1107 = vrot.lane.b32.xlu1 %v4230_v19, %s4127_s21  ;;  %v3865_v41 = vpop.permute.xlu0 %3864 }
 0x35d   : > { %1429 = vrot.lane.b32.xlu1 %v4230_v19, %s4130_s24  ;;  %v1801_v44 = vpop.permute.xlu0 %1800 }
 0x361   : > { %1751 = vrot.lane.b32.xlu1 %v4230_v19, %s4133_s27 }
 0x36d   : > { %v458_v46 = vpop.xlane.xlu1 %457 }
 0x36e   : > { %3988 = vrcp.f32 %v458_v46  ;;  %v3866_v46 = vunpack.i.l.bf16 %v3865_v41 }
 0x371   : > { %v455_v47 = vpop.xlane.xlu1 %454 }
 0x372   : > { %3990 = vrcp.f32 %v455_v47 }
 0x375   : > { %v3830_v48 = vpop.permute.xlu1 %3829 }
 0x376   : > { %v3832_v61 = vunpack.i.h.bf16 %v3830_v48  ;;  %v3831_v62 = vunpack.i.l.bf16 %v3830_v48 }
 0x378   : > { %v3989_v50 = vpop.eup %3988  ;;  %v3693_v1 = vpack.c.bf16 %v3832_v61, %v3831_v62 }
 0x379   : > { %v672_v49 = vpop.permute.xlu1 %671  ;;  %v462_v56 = vmul.f32 %v3989_v50, %v3985_v40  ;;  %v1960_v50 = vpop.permute.xlu0 %1959 }
 0x37c   : > { %v3991_v51 = vpop.eup %3990 }
 0x37d   : > { %v674_v54 = vpop.permute.xlu1 %673  ;;  %v461_v55 = vmul.f32 %v3991_v51, %v3987_v42 }
 0x37f   : > { %v463_v57 = vpack.c.bf16 %v462_v56, %v461_v55 }
 0x381   : > { %3465 = vmatmul.mubr.msk.bf16.vlgmr.msra.gmra.mrb[0].mxu1 %vm440_vm3, %v463_v57  ;;  %v3835_v60 = vpop.permute.xlu1 %3834 }
 0x382   : > { %3686 = vmatpush3.bf16.xpose.msk.msra.mxu1 %vm4236_vm2, %v4300_v39  ;;  %3472 = vmatprep.mubr.msk.f32.mxu1 %vm354_vm1, %v510_v45  ;;  %v3837_v4 = vunpack.i.h.bf16 %v3835_v60  ;;  %v3836_v5 = vunpack.i.l.bf16 %v3835_v60  ;;  %v3867_v45 = vunpack.i.h.bf16 %v3865_v41 }
 0x383   : > { %3689 = vmatprep.subr.msk.bf16.mxu1 %vm4236_vm2, %v3687_v59 }
 0x384   : > { %v3699_v7 = vpack.c.bf16 %v3837_v4, %v3836_v5  ;;  %v3735_v48 = vpack.c.bf16 %v3867_v45, %v3866_v46 }
 0x385   : > { %v833_v63 = vpop.permute.xlu1 %832 }
 0x389   : > { %v3840_v2 = vpop.permute.xlu1 %3839  ;;  %3473 = vmatmul.mubr.msk.f32.vlgmr.msra.gmra.mrb[4].mxu1 %vm354_vm1, %v512_v58 }
 0x38a   : > { %3692 = vmatpush3.bf16.xpose.msk.msra.mxu1 %vm4236_vm2, %v3687_v59  ;;  %3485 = vmatprep.mubr.msk.f32.mxu1 %vm354_vm1, %v672_v49  ;;  %v3842_v10 = vunpack.i.h.bf16 %v3840_v2  ;;  %v3841_v11 = vunpack.i.l.bf16 %v3840_v2 }
 0x38b   : > { %3695 = vmatprep.subr.msk.bf16.mxu1 %vm4236_vm2, %v3693_v1 }
 0x38c   : > { %v3705_v15 = vpack.c.bf16 %v3842_v10, %v3841_v11 }
 0x38d   : > { %v996_v6 = vpop.permute.xlu1 %995 }
 0x391   : > { %3486 = vmatmul.mubr.msk.f32.vlgmr.msra.gmra.mrb[6].mxu1 %vm354_vm1, %v674_v54  ;;  %v1155_v8 = vpop.permute.xlu1 %1154  ;;  %v3875_v54 = vpop.permute.xlu0 %3874 }
 0x392   : > { %3698 = vmatpush3.bf16.xpose.msk.msra.mxu1 %vm4236_vm2, %v3693_v1  ;;  %3498 = vmatprep.mubr.msk.f32.mxu1 %vm354_vm1, %v833_v63  ;;  %v3877_v57 = vunpack.i.h.bf16 %v3875_v54  ;;  %v3876_v58 = vunpack.i.l.bf16 %v3875_v54 }
 0x393   : > { %3701 = vmatprep.subr.msk.bf16.mxu1 %vm4236_vm2, %v3699_v7 }
 0x394   : > { %v3747_v61 = vpack.c.bf16 %v3877_v57, %v3876_v58 }
 0x395   : > { %v3850_v13 = vpop.permute.xlu1 %3849  ;;  %v2123_v60 = vpop.permute.xlu0 %2122 }
 0x396   : > { %v3852_v26 = vunpack.i.h.bf16 %v3850_v13  ;;  %v3851_v27 = vunpack.i.l.bf16 %v3850_v13 }
 0x398   : > { %v3717_v29 = vpack.c.bf16 %v3852_v26, %v3851_v27 }
 0x399   : > { %3499 = vmatmul.mubr.msk.f32.vlgmr.msra.gmra.mrb[8].mxu1 %vm354_vm1, %v835_v0  ;;  %v1318_v16 = vpop.permute.xlu1 %1317  ;;  %v2282_v63 = vpop.permute.xlu0 %2281 }
 0x39a   : > { %3704 = vmatpush3.bf16.xpose.msk.msra.mxu1 %vm4236_vm2, %v3699_v7  ;;  %3511 = vmatprep.mubr.msk.f32.mxu1 %vm354_vm1, %v994_v3 }
 0x39b   : > { %3707 = vmatprep.subr.msk.bf16.mxu1 %vm4236_vm2, %v3705_v15 }
 0x39d   : > { %v1477_v20 = vpop.permute.xlu1 %1476  ;;  %v3885_v3 = vpop.permute.xlu0 %3884 }
 0x39e   : > { %v3887_v4 = vunpack.i.h.bf16 %v3885_v3  ;;  %v3886_v5 = vunpack.i.l.bf16 %v3885_v3 }
 0x3a1   : > { %3512 = vmatmul.mubr.msk.f32.vlgmr.msra.gmra.mrb[10].mxu1 %vm354_vm1, %v996_v6  ;;  %v3860_v24 = vpop.permute.xlu1 %3859  ;;  %v3759_v6 = vpack.c.bf16 %v3887_v4, %v3886_v5  ;;  %v2445_v7 = vpop.permute.xlu0 %2444 }
 0x3a2   : > { %3710 = vmatpush3.bf16.xpose.msk.msra.mxu1 %vm4236_vm2, %v3705_v15  ;;  %3524 = vmatprep.mubr.msk.f32.mxu1 %vm354_vm1, %v1155_v8  ;;  %v3862_v38 = vunpack.i.h.bf16 %v3860_v24  ;;  %v3861_v39 = vunpack.i.l.bf16 %v3860_v24 }
 0x3a3   : > { %3713 = vmatprep.subr.msk.bf16.mxu1 %vm4236_vm2, %v3711_v22 }
 0x3a4   : > { %v3729_v42 = vpack.c.bf16 %v3862_v38, %v3861_v39 }
 0x3a5   : > { %v1640_v28 = vpop.permute.xlu1 %1639  ;;  %v2604_v10 = vpop.permute.xlu0 %2603 }
 0x3a9   : > { %3525 = vmatmul.mubr.msk.f32.vlgmr.msra.gmra.mrb[12].mxu1 %vm354_vm1, %v1157_v14  ;;  %v1799_v30 = vpop.permute.xlu1 %1798  ;;  %v2765_v13 = vpop.permute.xlu0 %2764 }
 0x3aa   : > { %3716 = vmatpush3.bf16.xpose.msk.msra.mxu1 %vm4236_vm2, %v3711_v22  ;;  %3537 = vmatprep.mubr.msk.f32.mxu1 %vm354_vm1, %v1316_v21 }
 0x3ab   : > { %3719 = vmatprep.subr.msk.bf16.mxu1 %vm4236_vm2, %v3717_v29 }
 0x3ad   : > { %v3870_v34 = vpop.permute.xlu1 %3869 }
 0x3ae   : > { %v3872_v51 = vunpack.i.h.bf16 %v3870_v34  ;;  %v3871_v52 = vunpack.i.l.bf16 %v3870_v34 }
 0x3b0   : > { %v3741_v55 = vpack.c.bf16 %v3872_v51, %v3871_v52 }
 0x3b1   : > { %3538 = vmatmul.mubr.msk.f32.vlgmr.msra.gmra.mrb[14].mxu1 %vm354_vm1, %v1318_v16  ;;  %v1962_v37 = vpop.permute.xlu1 %1961 }
 0x3b2   : > { %3722 = vmatpush3.bf16.xpose.msk.msra.mxu1 %vm4236_vm2, %v3717_v29  ;;  %3550 = vmatprep.mubr.msk.f32.mxu1 %vm354_vm1, %v1477_v20 }
 0x3b3   : > { %3725 = vmatprep.subr.msk.bf16.mxu1 %vm4236_vm2, %v3723_v36 }
 0x3b5   : > { %v2121_v40 = vpop.permute.xlu1 %2120 }
 0x3b9   : > { %3551 = vmatmul.mubr.msk.f32.vlgmr.msra.gmra.mrb[16].mxu1 %vm354_vm1, %v1479_v31  ;;  %v3880_v43 = vpop.permute.xlu1 %3879 }
 0x3ba   : > { %3728 = vmatpush3.bf16.xpose.msk.msra.mxu1 %vm4236_vm2, %v3723_v36  ;;  %3563 = vmatprep.mubr.msk.f32.mxu1 %vm354_vm1, %v1638_v35  ;;  %v3882_v0 = vunpack.i.h.bf16 %v3880_v43  ;;  %v3881_v1 = vunpack.i.l.bf16 %v3880_v43 }
 0x3bb   : > { %3731 = vmatprep.subr.msk.bf16.mxu1 %vm4236_vm2, %v3729_v42 }
 0x3bc   : > { %v3753_v2 = vpack.c.bf16 %v3882_v0, %v3881_v1 }
 0x3bd   : > { %v2284_v47 = vpop.permute.xlu1 %2283 }
 0x3c1   : > { %3564 = vmatmul.mubr.msk.f32.vlgmr.msra.gmra.mrb[18].mxu1 %vm354_vm1, %v1640_v28  ;;  %v2443_v49 = vpop.permute.xlu1 %2442 }
 0x3c2   : > { %3734 = vmatpush3.bf16.xpose.msk.msra.mxu1 %vm4236_vm2, %v3729_v42  ;;  %3576 = vmatprep.mubr.msk.f32.mxu1 %vm354_vm1, %v1799_v30 }
 0x3c3   : > { %3737 = vmatprep.subr.msk.bf16.mxu1 %vm4236_vm2, %v3735_v48 }
 0x3c5   : > { %v3890_v53 = vpop.permute.xlu1 %3889 }
 0x3c6   : > { %v3892_v8 = vunpack.i.h.bf16 %v3890_v53  ;;  %v3891_v9 = vunpack.i.l.bf16 %v3890_v53 }
 0x3c8   : > { %v3765_v11 = vpack.c.bf16 %v3892_v8, %v3891_v9 }
 0x3c9   : > { %3577 = vmatmul.mubr.msk.f32.vlgmr.msra.gmra.mrb[20].mxu1 %vm354_vm1, %v1801_v44  ;;  %v2606_v56 = vpop.permute.xlu1 %2605 }
 0x3ca   : > { %3740 = vmatpush3.bf16.xpose.msk.msra.mxu1 %vm4236_vm2, %v3735_v48  ;;  %3589 = vmatprep.mubr.msk.f32.mxu1 %vm354_vm1, %v1960_v50 }
 0x3cb   : > { %3743 = vmatprep.subr.msk.bf16.mxu1 %vm4236_vm2, %v3741_v55 }
 0x3cd   : > { %v2767_v59 = vpop.permute.xlu1 %2766 }
 0x3d1   : > { %3590 = vmatmul.mubr.msk.f32.vlgmr.msra.gmra.mrb[22].mxu1 %vm354_vm1, %v1962_v37  ;;  %v625_v62 = vpop.permute.xlu1 %624 }
 0x3d2   : > { %3746 = vmatpush3.bf16.xpose.msk.msra.mxu1 %vm4236_vm2, %v3741_v55  ;;  %3602 = vmatprep.mubr.msk.f32.mxu1 %vm354_vm1, %v2121_v40 }
 0x3d3   : > { %3476 = vmatpush3.bf16.msra.mxu0 %v625_v62  ;;  %3749 = vmatprep.subr.msk.bf16.mxu1 %vm4236_vm2, %v3747_v61 }
 0x3d4   : > { %3488 = vmatprep.subr.bf16.mxu0 %v4121_v12 }
 0x3d9   : > { %3603 = vmatmul.mubr.msk.f32.vlgmr.msra.gmra.mrb[24].mxu1 %vm354_vm1, %v2123_v60 }
 0x3da   : > { %3752 = vmatpush3.bf16.xpose.msk.msra.mxu1 %vm4236_vm2, %v3747_v61  ;;  %3615 = vmatprep.mubr.msk.f32.mxu1 %vm354_vm1, %v2282_v63 }
 0x3db   : > { %3755 = vmatprep.subr.msk.bf16.mxu1 %vm4236_vm2, %v3753_v2 }
 0x3e1   : > { %3616 = vmatmul.mubr.msk.f32.vlgmr.msra.gmra.mrb[26].mxu1 %vm354_vm1, %v2284_v47 }
 0x3e2   : > { %3758 = vmatpush3.bf16.xpose.msk.msra.mxu1 %vm4236_vm2, %v3753_v2  ;;  %3628 = vmatprep.mubr.msk.f32.mxu1 %vm354_vm1, %v2443_v49 }
 0x3e3   : > { %3761 = vmatprep.subr.msk.bf16.mxu1 %vm4236_vm2, %v3759_v6 }
 0x3e9   : > { %3629 = vmatmul.mubr.msk.f32.vlgmr.msra.gmra.mrb[28].mxu1 %vm354_vm1, %v2445_v7 }
 0x3ea   : > { %3764 = vmatpush3.bf16.xpose.msk.msra.mxu1 %vm4236_vm2, %v3759_v6  ;;  %3641 = vmatprep.mubr.msk.f32.mxu1 %vm354_vm1, %v2604_v10 }
 0x3eb   : > { %3767 = vmatprep.subr.msk.bf16.mxu1 %vm4236_vm2, %v3765_v11 }
 0x3f1   : > { %3642 = vmatmul.mubr.msk.f32.vlgmr.msra.gmra.mrb[30].mxu1 %vm354_vm1, %v2606_v56 }
 0x3f2   : > { %3770 = vmatpush3.bf16.xpose.msk.msra.mxu1 %vm4236_vm2, %v3765_v11  ;;  %3654 = vmatprep.mubr.msk.f32.mxu1 %vm354_vm1, %v2765_v13  ;;  %v4581_v13 = vpop.permute.xlu1 %946  ;;  %vm3085_vm2 = vcmask 490496  }
 0x3f3   : > { %3663 = vmatprep.subr.bf16.mxu1 %v4121_v12 }
 0x3f9   : > { %3655 = vmatmul.mubr.msk.f32.vlgmr.msra.gmra.mrb[32].mxu1 %vm354_vm1, %v2767_v59 }
 0x3fa   : > { %3671 = vmatprep.mubr.msk.bf16.mxu1 %vm4146_vm4, %v4121_v12 }
 0x454   : > { %v4459_v14 = vpop.f32.mrb[0].mxu1 }
 0x455   : > { %v3466_v15 = vpop.f32.mrb[1].mxu1 }
 0x456   : > { %v4461_v16 = vpop.f32.mrb[2].mxu1 }
 0x457   : > { %v3467_v17 = vpop.f32.mrb[3].mxu1 }
 0x458   : > { %v4585_v17 = vpop.permute.xlu1 %1107 }
 0x45c   : > { %v4463_v18 = vpop.f32.mrb[4].mxu1 }
 0x45d   : > { %v4465_v20 = vpop.f32.mrb[5].mxu1  ;;  %v603_v23 = vsel %vm440_vm3, %v4463_v18, -inf }
 0x45e   : > { %604 = vmax.xlane.f32.xlu1 %v603_v23  ;;  %v600_v21 = vsel %vm440_vm3, %v4465_v20, -inf }
 0x45f   : > { %601 = vmax.xlane.f32.xlu0 %v600_v21  ;;  %v4589_v21 = vpop.permute.xlu0 %785 }
 0x464   : > { %v4471_v22 = vpop.f32.mrb[6].mxu1 }
 0x465   : > { %v4473_v24 = vpop.f32.mrb[7].mxu1  ;;  %v765_v25 = vsel %vm440_vm3, %v4471_v22, -inf }
 0x466   : > { %766 = vmax.xlane.f32.xlu0 %v765_v25  ;;  %v762_v26 = vsel %vm440_vm3, %v4473_v24, -inf }
 0x46a   : > { %763 = vmax.xlane.f32.xlu0 %v762_v26  ;;  %v4593_v26 = vpop.permute.xlu1 %1429 }
 0x46c   : > { %v4479_v27 = vpop.f32.mrb[8].mxu1 }
 0x46d   : > { %v4481_v28 = vpop.f32.mrb[9].mxu1  ;;  %v926_v46 = vsel %vm440_vm3, %v4479_v27, -inf }
 0x46e   : > { %v923_v29 = vsel %vm440_vm3, %v4481_v28, -inf }
 0x46f   : > { %924 = vmax.xlane.f32.xlu1 %v923_v29  ;;  %v4595_v29 = vpop.permute.xlu0 %1268 }
 0x474   : > { %v4485_v30 = vpop.f32.mrb[10].mxu1 }
 0x475   : > { %v4487_v31 = vpop.f32.mrb[11].mxu1  ;;  %v1087_v47 = vsel %vm440_vm3, %v4485_v30, -inf }
 0x476   : > { %v1084_v32 = vsel %vm440_vm3, %v4487_v31, -inf }
 0x477   : > { %1085 = vmax.xlane.f32.xlu1 %v1084_v32  ;;  %v4597_v32 = vpop.permute.xlu1 %1751 }
 0x47c   : > { %v4491_v33 = vpop.f32.mrb[12].mxu1 }
 0x47d   : > { %v4493_v34 = vpop.f32.mrb[13].mxu1  ;;  %v1248_v50 = vsel %vm440_vm3, %v4491_v33, -inf }
 0x47e   : > { %v1245_v35 = vsel %vm440_vm3, %v4493_v34, -inf }
 0x47f   : > { %1246 = vmax.xlane.f32.xlu1 %v1245_v35  ;;  %v4599_v35 = vpop.permute.xlu0 %1590 }
 0x480   : > { %1912 = vrot.lane.b32.xlu0 %v4230_v19, %s4135_s29  ;;  %s4949_s29 = smov 56  }
 0x484   : > { %v4499_v36 = vpop.f32.mrb[14].mxu1 }
 0x485   : > { %v4501_v37 = vpop.f32.mrb[15].mxu1  ;;  %v1409_v51 = vsel %vm440_vm3, %v4499_v36, -inf }
 0x486   : > { %v1406_v38 = vsel %vm440_vm3, %v4501_v37, -inf }
 0x487   : > { %1407 = vmax.xlane.f32.xlu1 %v1406_v38 }
 0x48c   : > { %v4505_v39 = vpop.f32.mrb[16].mxu1 }
 0x48d   : > { %v4507_v40 = vpop.f32.mrb[17].mxu1  ;;  %v1570_v54 = vsel %vm440_vm3, %v4505_v39, -inf }
 0x48e   : > { %v1567_v41 = vsel %vm440_vm3, %v4507_v40, -inf }
 0x48f   : > { %1568 = vmax.xlane.f32.xlu1 %v1567_v41 }
 0x494   : > { %v4511_v42 = vpop.f32.mrb[18].mxu1 }
 0x495   : > { %v4513_v43 = vpop.f32.mrb[19].mxu1  ;;  %v1731_v55 = vsel %vm440_vm3, %v4511_v42, -inf }
 0x496   : > { %v1728_v0 = vsel %vm440_vm3, %v4513_v43, -inf }
 0x49c   : > { %v4515_v44 = vpop.f32.mrb[20].mxu1 }
 0x49d   : > { %v4517_v45 = vpop.f32.mrb[21].mxu1  ;;  %v1892_v58 = vsel %vm440_vm3, %v4515_v44, -inf }
 0x49e   : > { %v1889_v4 = vsel %vm440_vm3, %v4517_v45, -inf }
 0x49f   : > { %927 = vmax.xlane.f32.xlu0 %v926_v46 }
 0x4a0   : > { %2073 = vrot.lane.b32.xlu1 %v4230_v19, %s4136_s6  ;;  %s4950_s6 = smov 60  }
 0x4a3   : > { %1088 = vmax.xlane.f32.xlu0 %v1087_v47 }
 0x4a4   : > { %v4525_v48 = vpop.f32.mrb[22].mxu1 }
 0x4a5   : > { %v4527_v49 = vpop.f32.mrb[23].mxu1  ;;  %v2053_v59 = vsel %vm440_vm3, %v4525_v48, -inf }
 0x4a6   : > { %v2050_v6 = vsel %vm440_vm3, %v4527_v49, -inf }
 0x4a7   : > { %1249 = vmax.xlane.f32.xlu0 %v1248_v50 }
 0x4ab   : > { %1410 = vmax.xlane.f32.xlu0 %v1409_v51 }
 0x4ac   : > { %v4533_v52 = vpop.f32.mrb[24].mxu1 }
 0x4ad   : > { %v4535_v53 = vpop.f32.mrb[25].mxu1  ;;  %v2214_v62 = vsel %vm440_vm3, %v4533_v52, -inf }
 0x4ae   : > { %v2211_v10 = vsel %vm440_vm3, %v4535_v53, -inf }
 0x4af   : > { %1571 = vmax.xlane.f32.xlu0 %v1570_v54 }
 0x4b3   : > { %1732 = vmax.xlane.f32.xlu0 %v1731_v55 }
 0x4b4   : > { %v4541_v56 = vpop.f32.mrb[26].mxu1 }
 0x4b5   : > { %v4543_v57 = vpop.f32.mrb[27].mxu1  ;;  %v2375_v63 = vsel %vm440_vm3, %v4541_v56, -inf }
 0x4b6   : > { %v2372_v11 = vsel %vm440_vm3, %v4543_v57, -inf }
 0x4b7   : > { %1893 = vmax.xlane.f32.xlu0 %v1892_v58 }
 0x4bb   : > { %2054 = vmax.xlane.f32.xlu0 %v2053_v59 }
 0x4bc   : > { %v4549_v60 = vpop.f32.mrb[28].mxu1 }
 0x4bd   : > { %v4551_v61 = vpop.f32.mrb[29].mxu1  ;;  %v2536_v3 = vsel %vm440_vm3, %v4549_v60, -inf }
 0x4be   : > { %v2533_v15 = vsel %vm440_vm3, %v4551_v61, -inf }
 0x4bf   : > { %2215 = vmax.xlane.f32.xlu0 %v2214_v62 }
 0x4c3   : > { %2376 = vmax.xlane.f32.xlu0 %v2375_v63 }
 0x4c4   : > { %v4559_v1 = vpop.f32.mrb[30].mxu1  ;;  %1729 = vmax.xlane.f32.xlu1 %v1728_v0 }
 0x4c5   : > { %v4561_v2 = vpop.f32.mrb[31].mxu1  ;;  %v2697_v5 = vsel %vm440_vm3, %v4559_v1, -inf }
 0x4c6   : > { %v2694_v23 = vsel %vm440_vm3, %v4561_v2, -inf }
 0x4c7   : > { %2537 = vmax.xlane.f32.xlu0 %v2536_v3 }
 0x4c8   : > { %1890 = vmax.xlane.f32.xlu1 %v1889_v4 }
 0x4cb   : > { %2698 = vmax.xlane.f32.xlu0 %v2697_v5 }
 0x4cc   : > { %v4571_v7 = vpop.f32.mrb[32].mxu1  ;;  %2051 = vmax.xlane.f32.xlu1 %v2050_v6 }
 0x4cd   : > { %v4573_v8 = vpop.f32.mrb[33].mxu1  ;;  %v2858_v9 = vsel %vm440_vm3, %v4571_v7, -inf }
 0x4ce   : > { %v2855_v25 = vsel %vm440_vm3, %v4573_v8, -inf }
 0x4cf   : > { %2859 = vmax.xlane.f32.xlu0 %v2858_v9 }
 0x4d0   : > { %2212 = vmax.xlane.f32.xlu1 %v2211_v10 }
 0x4d4   : > { %2373 = vmax.xlane.f32.xlu1 %v2372_v11 }
 0x4d8   : > { %2534 = vmax.xlane.f32.xlu1 %v2533_v15 }
 0x4dc   : > { %2695 = vmax.xlane.f32.xlu1 %v2694_v23 }
 0x4e0   : > { %2856 = vmax.xlane.f32.xlu1 %v2855_v25 }
 0x4eb   : > { %v605_v38 = vpop.xlane.xlu1 %604 }
 0x4ec   : > { %v607_v41 = vsub.f32 %v4463_v18, %v605_v38  ;;  %v602_v46 = vpop.xlane.xlu0 %601 }
 0x4ed   : > { %v606_v47 = vsub.f32 %v4465_v20, %v602_v46 }
 0x4ee   : > { %v610_v50 = vmul.f32 1.442695, %v607_v41 }
 0x4ef   : > { %v608_v51 = vmul.f32 1.442695, %v606_v47 }
 0x4f0   : > { %3992 = vpow2.f32 %v610_v50 }
 0x4f1   : > { %3994 = vpow2.f32 %v608_v51 }
 0x4f3   : > { %v767_v54 = vpop.xlane.xlu0 %766 }
 0x4f4   : > { %v769_v55 = vsub.f32 %v4471_v22, %v767_v54 }
 0x4f6   : > { %v772_v58 = vmul.f32 1.442695, %v769_v55 }
 0x4f7   : > { %v764_v59 = vpop.xlane.xlu0 %763 }
 0x4f8   : > { %3996 = vpow2.f32 %v772_v58  ;;  %v768_v62 = vsub.f32 %v4473_v24, %v764_v59 }
 0x4fa   : > { %v4605_v63 = vpop.eup %3992  ;;  %v770_v0 = vmul.f32 1.442695, %v768_v62 }
 0x4fb   : > { %v4607_v3 = vpop.eup %3994  ;;  %v615_v18 = vsel %vm440_vm3, %v4605_v63, 0.0  ;;  %v4636_v55 = vpop.permute.xlu0 %1912 }
 0x4fc   : > { %3998 = vpow2.f32 %v770_v0  ;;  %v925_v20 = vpop.xlane.xlu1 %924  ;;  %616 = vadd.xlane.f32.xlu0 %v615_v18  ;;  %v612_v4 = vsel %vm440_vm3, %v4607_v3, 0.0 }
 0x4fd   : > { %v929_v22 = vsub.f32 %v4481_v28, %v925_v20  ;;  %613 = vadd.xlane.f32.xlu1 %v612_v4 }
 0x4ff   : > { %v931_v5 = vmul.f32 1.442695, %v929_v22 }
 0x501   : > { %4000 = vpow2.f32 %v931_v5 }
 0x502   : > { %v4614_v24 = vpop.eup %3996 }
 0x503   : > { %v777_v6 = vsel %vm440_vm3, %v4614_v24, 0.0 }
 0x504   : > { %v1086_v9 = vpop.xlane.xlu1 %1085  ;;  %778 = vadd.xlane.f32.xlu0 %v777_v6 }
 0x505   : > { %v1090_v10 = vsub.f32 %v4487_v31, %v1086_v9 }
 0x506   : > { %v4619_v11 = vpop.eup %3998 }
 0x507   : > { %v1092_v15 = vmul.f32 1.442695, %v1090_v10  ;;  %v774_v23 = vsel %vm440_vm3, %v4619_v11, 0.0 }
 0x508   : > { %775 = vadd.xlane.f32.xlu1 %v774_v23 }
 0x509   : > { %4002 = vpow2.f32 %v1092_v15 }
 0x50b   : > { %v4623_v28 = vpop.eup %4000 }
 0x50c   : > { %v935_v25 = vsel %vm440_vm3, %v4623_v28, 0.0  ;;  %v1247_v38 = vpop.xlane.xlu1 %1246 }
 0x50d   : > { %936 = vadd.xlane.f32.xlu1 %v935_v25 }
 0x513   : > { %v4627_v41 = vpop.eup %4002 }
 0x514   : > { %v1408_v46 = vpop.xlane.xlu1 %1407  ;;  %v1096_v31 = vsel %vm440_vm3, %v4627_v41, 0.0 }
 0x515   : > { %v1412_v47 = vsub.f32 %v4501_v37, %v1408_v46  ;;  %1097 = vadd.xlane.f32.xlu1 %v1096_v31  ;;  %v1251_v37 = vsub.f32 %v4493_v34, %v1247_v38 }
 0x517   : > { %v1414_v50 = vmul.f32 1.442695, %v1412_v47  ;;  %v1253_v5 = vmul.f32 1.442695, %v1251_v37 }
 0x519   : > { %4004 = vpow2.f32 %v1414_v50 }
 0x51c   : > { %v1569_v23 = vpop.xlane.xlu1 %1568 }
 0x523   : > { %v4632_v51 = vpop.eup %4004 }
 0x524   : > { %v1418_v54 = vsel %vm440_vm3, %v4632_v51, 0.0 }
 0x525   : > { %1419 = vadd.xlane.f32.xlu1 %v1418_v54 }
 0x52c   : > { %v928_v58 = vpop.xlane.xlu0 %927 }
 0x52d   : > { %v930_v59 = vsub.f32 %v4479_v27, %v928_v58 }
 0x52f   : > { %v933_v62 = vmul.f32 1.442695, %v930_v59 }
 0x530   : > { %v1089_v0 = vpop.xlane.xlu0 %1088 }
 0x531   : > { %4006 = vpow2.f32 %v933_v62  ;;  %v1091_v18 = vsub.f32 %v4485_v30, %v1089_v0 }
 0x533   : > { %v1094_v20 = vmul.f32 1.442695, %v1091_v18 }
 0x534   : > { %v1250_v4 = vpop.xlane.xlu0 %1249 }
 0x535   : > { %4008 = vpow2.f32 %v1094_v20  ;;  %v1252_v22 = vsub.f32 %v4491_v33, %v1250_v4  ;;  %v1573_v33 = vsub.f32 %v4507_v40, %v1569_v23 }
 0x537   : > { %v1255_v6 = vmul.f32 1.442695, %v1252_v22  ;;  %v1575_v54 = vmul.f32 1.442695, %v1573_v33 }
 0x538   : > { %v1411_v9 = vpop.xlane.xlu0 %1410 }
 0x539   : > { %4010 = vpow2.f32 %v1255_v6  ;;  %v1413_v10 = vsub.f32 %v4499_v36, %v1411_v9 }
 0x53a   : > { %4012 = vpow2.f32 %v1253_v5 }
 0x53b   : > { %v4643_v15 = vpop.eup %4006  ;;  %v1416_v27 = vmul.f32 1.442695, %v1413_v10 }
 0x53c   : > { %v1572_v25 = vpop.xlane.xlu0 %1571  ;;  %v938_v30 = vsel %vm440_vm3, %v4643_v15, 0.0 }
 0x53d   : > { %v1574_v34 = vsub.f32 %v4505_v39, %v1572_v25  ;;  %939 = vadd.xlane.f32.xlu0 %v938_v30  ;;  %4014 = vpow2.f32 %v1416_v27 }
 0x53f   : > { %v4648_v38 = vpop.eup %4008  ;;  %v1577_v46 = vmul.f32 1.442695, %v1574_v34 }
 0x540   : > { %v1733_v31 = vpop.xlane.xlu0 %1732  ;;  %v1099_v36 = vsel %vm440_vm3, %v4648_v38, 0.0 }
 0x541   : > { %v1735_v47 = vsub.f32 %v4511_v42, %v1733_v31  ;;  %1100 = vadd.xlane.f32.xlu0 %v1099_v36  ;;  %4016 = vpow2.f32 %v1577_v46 }
 0x543   : > { %v4654_v50 = vpop.eup %4010  ;;  %v1738_v58 = vmul.f32 1.442695, %v1735_v47 }
 0x544   : > { %v1894_v39 = vpop.xlane.xlu0 %1893  ;;  %v1260_v59 = vsel %vm440_vm3, %v4654_v50, 0.0  ;;  %v4658_v62 = vpop.eup %4012 }
 0x545   : > { %4018 = vpow2.f32 %v1738_v58  ;;  %v1896_v40 = vsub.f32 %v4515_v44, %v1894_v39  ;;  %1261 = vadd.xlane.f32.xlu0 %v1260_v59  ;;  %v1257_v42 = vsel %vm440_vm3, %v4658_v62, 0.0  ;;  %v4670_v44 = vpop.permute.xlu1 %2073 }
 0x546   : > { %4020 = vpow2.f32 %v1575_v54 }
 0x547   : > { %v1899_v0 = vmul.f32 1.442695, %v1896_v40  ;;  %v4663_v37 = vpop.eup %4014 }
 0x548   : > { %v2055_v18 = vpop.xlane.xlu0 %2054  ;;  %v1421_v22 = vsel %vm440_vm3, %v4663_v37, 0.0 }
 0x549   : > { %4022 = vpow2.f32 %v1899_v0  ;;  %v2057_v20 = vsub.f32 %v4525_v48, %v2055_v18  ;;  %1258 = vadd.xlane.f32.xlu0 %v1257_v42 }
 0x54b   : > { %v2060_v4 = vmul.f32 1.442695, %v2057_v20  ;;  %v4668_v5 = vpop.eup %4016 }
 0x54c   : > { %v1582_v9 = vsel %vm440_vm3, %v4668_v5, 0.0  ;;  %v2216_v40 = vpop.xlane.xlu0 %2215 }
 0x54d   : > { %4024 = vpow2.f32 %v2060_v4  ;;  %1422 = vadd.xlane.f32.xlu0 %v1421_v22  ;;  %v2218_v20 = vsub.f32 %v4533_v52, %v2216_v40 }
 0x54f   : > { %v4672_v6 = vpop.eup %4018 }
 0x550   : > { %v1743_v10 = vsel %vm440_vm3, %v4672_v6, 0.0  ;;  %v4678_v48 = vpop.eup %4020  ;;  %v2377_v18 = vpop.xlane.xlu0 %2376 }
 0x551   : > { %1583 = vadd.xlane.f32.xlu0 %v1582_v9  ;;  %1744 = vadd.xlane.f32.xlu1 %v1743_v10  ;;  %v1730_v27 = vpop.xlane.xlu1 %1729  ;;  %v1579_v33 = vsel %vm440_vm3, %v4678_v48, 0.0  ;;  %v2221_v9 = vmul.f32 1.442695, %v2218_v20  ;;  %v2379_v10 = vsub.f32 %v4541_v56, %v2377_v18 }
 0x552   : > { %v1734_v23 = vsub.f32 %v4513_v43, %v1730_v27 }
 0x553   : > { %v4681_v25 = vpop.eup %4022 }
 0x554   : > { %v1736_v30 = vmul.f32 1.442695, %v1734_v23  ;;  %v1904_v34 = vsel %vm440_vm3, %v4681_v25, 0.0  ;;  %v2538_v4 = vpop.xlane.xlu0 %2537 }
 0x555   : > { %1905 = vadd.xlane.f32.xlu1 %v1904_v34  ;;  %1580 = vadd.xlane.f32.xlu0 %v1579_v33  ;;  %v1891_v46 = vpop.xlane.xlu1 %1890  ;;  %v2540_v27 = vsub.f32 %v4549_v60, %v2538_v4 }
 0x556   : > { %4026 = vpow2.f32 %v1736_v30  ;;  %v1895_v31 = vsub.f32 %v4517_v45, %v1891_v46  ;;  %v2382_v30 = vmul.f32 1.442695, %v2379_v10 }
 0x557   : > { %v4688_v36 = vpop.eup %4024  ;;  %v2543_v33 = vmul.f32 1.442695, %v2540_v27 }
 0x558   : > { %v1897_v47 = vmul.f32 1.442695, %v1895_v31  ;;  %v2065_v43 = vsel %vm440_vm3, %v4688_v36, 0.0  ;;  %v2699_v23 = vpop.xlane.xlu0 %2698 }
 0x559   : > { %2066 = vadd.xlane.f32.xlu1 %v2065_v43  ;;  %v2052_v45 = vpop.xlane.xlu1 %2051  ;;  %v2701_v46 = vsub.f32 %v4559_v1, %v2699_v23 }
 0x55a   : > { %4028 = vpow2.f32 %v1897_v47  ;;  %v2056_v52 = vsub.f32 %v4527_v49, %v2052_v45 }
 0x55b   : > { %4030 = vpow2.f32 %v2221_v9  ;;  %v2704_v43 = vmul.f32 1.442695, %v2701_v46 }
 0x55c   : > { %4032 = vpow2.f32 %v2382_v30  ;;  %v2860_v31 = vpop.xlane.xlu0 %2859 }
 0x55d   : > { %v2213_v0 = vpop.xlane.xlu1 %2212  ;;  %4034 = vpow2.f32 %v2543_v33  ;;  %v2862_v56 = vsub.f32 %v4571_v7, %v2860_v31 }
 0x55f   : > { %v2865_v20 = vmul.f32 1.442695, %v2862_v56 }
 0x560   : > { %v4692_v54 = vpop.eup %4026 }
 0x561   : > { %v1740_v58 = vsel %vm440_vm3, %v4692_v54, 0.0  ;;  %v2374_v42 = vpop.xlane.xlu1 %2373 }
 0x562   : > { %1741 = vadd.xlane.f32.xlu0 %v1740_v58  ;;  %v2058_v58 = vmul.f32 1.442695, %v2056_v52  ;;  %v2378_v49 = vsub.f32 %v4543_v57, %v2374_v42 }
 0x564   : > { %v4696_v39 = vpop.eup %4028  ;;  %v2380_v7 = vmul.f32 1.442695, %v2378_v49 }
 0x565   : > { %v1901_v59 = vsel %vm440_vm3, %v4696_v39, 0.0  ;;  %v2535_v22 = vpop.xlane.xlu1 %2534  ;;  %v4711_v40 = vpop.eup %4030 }
 0x566   : > { %1902 = vadd.xlane.f32.xlu0 %v1901_v59  ;;  %v2217_v59 = vsub.f32 %v4535_v53, %v2213_v0  ;;  %v2226_v45 = vsel %vm440_vm3, %v4711_v40, 0.0  ;;  %v4716_v4 = vpop.eup %4032  ;;  %v2539_v0 = vsub.f32 %v4551_v61, %v2535_v22 }
 0x567   : > { %v4718_v53 = vpop.eup %4034  ;;  %v2387_v10 = vsel %vm440_vm3, %v4716_v4, 0.0 }
 0x568   : > { %v2219_v1 = vmul.f32 1.442695, %v2217_v59  ;;  %v2548_v57 = vsel %vm440_vm3, %v4718_v53, 0.0  ;;  %v2541_v23 = vmul.f32 1.442695, %v2539_v0 }
 0x569   : > { %v2696_v34 = vpop.xlane.xlu1 %2695 }
 0x56a   : > { %2395 = vrot.lane.b32.xlu1 %v4230_v19, %s4139_s9  ;;  %v2700_v30 = vsub.f32 %v4561_v2, %v2696_v34  ;;  %s239_s9 = scalar_lea.vmem %s4936_s1, %s4207_s30 }
 0x56d   : > { %v2857_v47 = vpop.xlane.xlu1 %2856 }
 0x56e   : > { %v2861_v56 = vsub.f32 %v4573_v8, %v2857_v47 }
 0x570   : > { %v2863_v8 = vmul.f32 1.442695, %v2861_v56 }
 0x57c   : > { %2234 = vrot.lane.b32.xlu0 %v4230_v19, %s4138_s8 }
 0x589   : > { %v617_v60 = vpop.xlane.xlu0 %616 }
 0x58a   : > { %4036 = vrcp.f32 %v617_v60  ;;  %v614_v18 = vpop.xlane.xlu1 %613 }
 0x58b   : > { %4038 = vrcp.f32 %v614_v18 }
 0x58c   : > { %4040 = vpow2.f32 %v2704_v43  ;;  %v2702_v43 = vmul.f32 1.442695, %v2700_v30 }
 0x58d   : > { %4042 = vpow2.f32 %v2058_v58 }
 0x58e   : > { %2227 = vadd.xlane.f32.xlu1 %v2226_v45  ;;  %4044 = vpow2.f32 %v2865_v20 }
 0x58f   : > { %4046 = vpow2.f32 %v2219_v1 }
 0x591   : > { %v779_v9 = vpop.xlane.xlu0 %778 }
 0x592   : > { %2388 = vadd.xlane.f32.xlu1 %v2387_v10  ;;  %4048 = vrcp.f32 %v779_v9 }
 0x593   : > { %4050 = vpow2.f32 %v2380_v7 }
 0x594   : > { %v4037_v27 = vpop.eup %4036 }
 0x595   : > { %v4039_v42 = vpop.eup %4038  ;;  %v621_v33 = vmul.f32 %v4037_v27, %v4605_v63  ;;  %v776_v46 = vpop.xlane.xlu1 %775 }
 0x596   : > { %v4727_v52 = vpop.eup %4040  ;;  %v620_v61 = vmul.f32 %v4039_v42, %v4607_v3  ;;  %4052 = vrcp.f32 %v776_v46  ;;  %2549 = vadd.xlane.f32.xlu1 %v2548_v57 }
 0x597   : > { %v4730_v22 = vpop.eup %4042  ;;  %4054 = vpow2.f32 %v2541_v23  ;;  %v2709_v58 = vsel %vm440_vm3, %v4727_v52, 0.0 }
 0x598   : > { %v622_v31 = vpack.c.bf16 %v621_v33, %v620_v61  ;;  %v4735_v2 = vpop.eup %4044  ;;  %v2062_v63 = vsel %vm440_vm3, %v4730_v22, 0.0  ;;  %4056 = vpow2.f32 %v2702_v43 }
 0x599   : > { %v4740_v3 = vpop.eup %4046  ;;  %v2870_v34 = vsel %vm440_vm3, %v4735_v2, 0.0  ;;  %4058 = vpow2.f32 %v2863_v8 }
 0x59a   : > { %2710 = vadd.xlane.f32.xlu1 %v2709_v58  ;;  %3478 = vmatmul.mubr.msk.bf16.vlgmr.msra.gmra.mrb[8].mxu0 %vm440_vm3, %v622_v31  ;;  %v2223_v59 = vsel %vm440_vm3, %v4740_v3, 0.0  ;;  %v937_v9 = vpop.xlane.xlu1 %936 }
 0x59b   : > { %2063 = vadd.xlane.f32.xlu0 %v2062_v63  ;;  %3489 = vmatpush3.bf16.msra.mxu0 %v4589_v21  ;;  %4060 = vrcp.f32 %v937_v9 }
 0x59c   : > { %3490 = vmatprep.mubr.msk.bf16.mxu0 %vm4146_vm4, %v4121_v12  ;;  %3501 = vmatprep.subr.bf16.mxu0 %v4121_v12  ;;  %v4049_v47 = vpop.eup %4048 }
 0x59d   : > { %v4750_v60 = vpop.eup %4050  ;;  %v783_v21 = vmul.f32 %v4049_v47, %v4614_v24 }
 0x59e   : > { %2871 = vadd.xlane.f32.xlu1 %v2870_v34  ;;  %v2384_v1 = vsel %vm440_vm3, %v4750_v60, 0.0 }
 0x59f   : > { %2224 = vadd.xlane.f32.xlu0 %v2223_v59 }
 0x5a0   : > { %v4053_v18 = vpop.eup %4052 }
 0x5a1   : > { %v782_v20 = vmul.f32 %v4053_v18, %v4619_v11  ;;  %v4756_v49 = vpop.eup %4054 }
 0x5a2   : > { %v2545_v7 = vsel %vm440_vm3, %v4756_v49, 0.0  ;;  %v4764_v24 = vpop.eup %4056  ;;  %v1098_v27 = vpop.xlane.xlu1 %1097 }
 0x5a3   : > { %2385 = vadd.xlane.f32.xlu0 %v2384_v1  ;;  %v784_v45 = vpack.c.bf16 %v783_v21, %v782_v20  ;;  %v2706_v11 = vsel %vm440_vm3, %v4764_v24, 0.0  ;;  %v4769_v0 = vpop.eup %4058 }
 0x5a5   : > { %3491 = vmatmul.mubr.msk.bf16.vlgmr.msra.gmra.mrb[12].mxu0 %vm440_vm3, %v784_v45  ;;  %v4061_v23 = vpop.eup %4060 }
 0x5a6   : > { %3502 = vmatpush3.bf16.msra.mxu0 %v4581_v13  ;;  %3503 = vmatprep.mubr.msk.bf16.mxu0 %vm4146_vm4, %v4121_v12  ;;  %v2867_v13 = vsel %vm440_vm3, %v4769_v0, 0.0  ;;  %v943_v33 = vmul.f32 %v4061_v23, %v4623_v28 }
 0x5a7   : > { %2546 = vadd.xlane.f32.xlu0 %v2545_v7  ;;  %3514 = vmatprep.subr.bf16.mxu0 %v4121_v12 }
 0x5ab   : > { %2707 = vadd.xlane.f32.xlu0 %v2706_v11 }
 0x5af   : > { %2717 = vrot.lane.b32.xlu1 %v4230_v19, %s4142_s12  ;;  %2868 = vadd.xlane.f32.xlu0 %v2867_v13 }
 0x5b3   : > { %2878 = vrot.lane.b32.xlu1 %v4230_v19, %s4143_s13 }
 0x5c5   : > { %2556 = vrot.lane.b32.xlu0 %v4230_v19, %s4141_s11 }
 0x5ca   : > { %v940_v10 = vpop.xlane.xlu0 %939 }
 0x5cb   : > { %4062 = vrcp.f32 %v940_v10 }
 0x5ce   : > { %v1101_v57 = vpop.xlane.xlu0 %1100 }
 0x5cf   : > { %4064 = vrcp.f32 %v1101_v57 }
 0x5d0   : > { %4066 = vrcp.f32 %v1098_v27 }
 0x5d2   : > { %v1262_v42 = vpop.xlane.xlu0 %1261 }
 0x5d5   : > { %v4063_v30 = vpop.eup %4062 }
 0x5d6   : > { %v944_v46 = vmul.f32 %v4063_v30, %v4643_v15  ;;  %v1259_v61 = vpop.xlane.xlu0 %1258  ;;  %v1420_v15 = vpop.xlane.xlu1 %1419 }
 0x5d7   : > { %4068 = vrcp.f32 %v1259_v61 }
 0x5d8   : > { %v945_v31 = vpack.c.bf16 %v944_v46, %v943_v33  ;;  %4070 = vrcp.f32 %v1262_v42 }
 0x5d9   : > { %v4065_v43 = vpop.eup %4064 }
 0x5da   : > { %v1423_v19 = vpop.xlane.xlu0 %1422  ;;  %3504 = vmatmul.mubr.msk.bf16.vlgmr.msra.gmra.mrb[16].mxu0 %vm440_vm3, %v945_v31  ;;  %v4067_v56 = vpop.eup %4066  ;;  %v1105_v58 = vmul.f32 %v4065_v43, %v4648_v38 }
 0x5db   : > { %3515 = vmatpush3.bf16.msra.mxu0 %v4585_v17  ;;  %3516 = vmatprep.mubr.msk.bf16.mxu0 %vm4146_vm4, %v4121_v12  ;;  %v1104_v28 = vmul.f32 %v4067_v56, %v4627_v41  ;;  %4072 = vrcp.f32 %v1423_v19 }
 0x5dc   : > { %3527 = vmatprep.subr.bf16.mxu0 %v4121_v12  ;;  %4074 = vrcp.f32 %v1420_v15 }
 0x5dd   : > { %v1106_v8 = vpack.c.bf16 %v1105_v58, %v1104_v28 }
 0x5de   : > { %v1584_v63 = vpop.xlane.xlu0 %1583  ;;  %v1745_v20 = vpop.xlane.xlu1 %1744 }
 0x5e1   : > { %v4069_v34 = vpop.eup %4068 }
 0x5e2   : > { %3517 = vmatmul.mubr.msk.bf16.vlgmr.msra.gmra.mrb[20].mxu0 %vm440_vm3, %v1106_v8  ;;  %v4071_v47 = vpop.eup %4070  ;;  %v1265_v17 = vmul.f32 %v4069_v34, %v4658_v62  ;;  %v1581_v38 = vpop.xlane.xlu0 %1580 }
 0x5e3   : > { %3528 = vmatpush3.bf16.msra.mxu0 %v4595_v29  ;;  %3529 = vmatprep.mubr.msk.bf16.mxu0 %vm4146_vm4, %v4121_v12  ;;  %v1266_v41 = vmul.f32 %v4071_v47, %v4654_v50  ;;  %4076 = vrcp.f32 %v1581_v38  ;;  %v1906_v11 = vpop.xlane.xlu1 %1905 }
 0x5e4   : > { %3540 = vmatprep.subr.bf16.mxu0 %v4121_v12  ;;  %4078 = vrcp.f32 %v1584_v63 }
 0x5e5   : > { %v1267_v59 = vpack.c.bf16 %v1266_v41, %v1265_v17  ;;  %v4073_v18 = vpop.eup %4072 }
 0x5e6   : > { %v4075_v21 = vpop.eup %4074  ;;  %v1427_v29 = vmul.f32 %v4073_v18, %v4663_v37 }
 0x5e7   : > { %v1426_v62 = vmul.f32 %v4075_v21, %v4632_v51 }
 0x5e9   : > { %v1428_v1 = vpack.c.bf16 %v1427_v29, %v1426_v62 }
 0x5ea   : > { %3530 = vmatmul.mubr.msk.bf16.vlgmr.msra.gmra.mrb[24].mxu0 %vm440_vm3, %v1267_v59 }
 0x5eb   : > { %3541 = vmatpush3.bf16.msra.mxu0 %v4593_v26  ;;  %3542 = vmatprep.mubr.msk.bf16.mxu0 %vm4146_vm4, %v4121_v12 }
 0x5ec   : > { %3553 = vmatprep.subr.bf16.mxu0 %v4121_v12 }
 0x5ed   : > { %v4077_v45 = vpop.eup %4076 }
 0x5ee   : > { %v4079_v7 = vpop.eup %4078  ;;  %v1587_v26 = vmul.f32 %v4077_v45, %v4678_v48 }
 0x5ef   : > { %v1742_v50 = vpop.xlane.xlu0 %1741  ;;  %v1588_v51 = vmul.f32 %v4079_v7, %v4668_v5 }
 0x5f0   : > { %4080 = vrcp.f32 %v1742_v50 }
 0x5f1   : > { %4082 = vrcp.f32 %v1745_v20  ;;  %v1589_v13 = vpack.c.bf16 %v1588_v51, %v1587_v26 }
 0x5f2   : > { %3543 = vmatmul.mubr.msk.bf16.vlgmr.msra.gmra.mrb[28].mxu0 %vm440_vm3, %v1428_v1 }
 0x5f3   : > { %3554 = vmatpush3.bf16.msra.mxu0 %v4599_v35  ;;  %3555 = vmatprep.mubr.msk.bf16.mxu0 %vm4146_vm4, %v4121_v12  ;;  %v1903_v37 = vpop.xlane.xlu0 %1902 }
 0x5f4   : > { %3566 = vmatprep.subr.bf16.mxu0 %v4121_v12  ;;  %4084 = vrcp.f32 %v1903_v37 }
 0x5f5   : > { %4086 = vrcp.f32 %v1906_v11 }
 0x5fa   : > { %v4081_v9 = vpop.eup %4080  ;;  %3556 = vmatmul.mubr.msk.bf16.vlgmr.msra.gmra.mrb[32].mxu0 %vm440_vm3, %v1589_v13 }
 0x5fb   : > { %v4083_v10 = vpop.eup %4082  ;;  %3567 = vmatpush3.bf16.msra.mxu0 %v4597_v32  ;;  %3568 = vmatprep.mubr.msk.bf16.mxu0 %vm4146_vm4, %v4121_v12  ;;  %v1748_v35 = vmul.f32 %v4081_v9, %v4692_v54 }
 0x5fc   : > { %3579 = vmatprep.subr.bf16.mxu0 %v4121_v12  ;;  %v1749_v48 = vmul.f32 %v4083_v10, %v4672_v6  ;;  %v2235_v6 = vpop.permute.xlu0 %2234 }
 0x5fe   : > { %v1750_v5 = vpack.c.bf16 %v1749_v48, %v1748_v35  ;;  %v4085_v27 = vpop.eup %4084 }
 0x5ff   : > { %v4087_v57 = vpop.eup %4086  ;;  %v1909_v32 = vmul.f32 %v4085_v27, %v4696_v39 }
 0x600   : > { %v1910_v54 = vmul.f32 %v4087_v57, %v4681_v25 }
 0x602   : > { %3569 = vmatmul.mubr.msk.bf16.vlgmr.msra.gmra.mrb[36].mxu0 %vm440_vm3, %v1750_v5  ;;  %v1911_v42 = vpack.c.bf16 %v1910_v54, %v1909_v32 }
 0x603   : > { %3580 = vmatpush3.bf16.msra.mxu0 %v4636_v55  ;;  %3581 = vmatprep.mubr.msk.bf16.mxu0 %vm4146_vm4, %v4121_v12  ;;  %v2067_v55 = vpop.xlane.xlu1 %2066 }
 0x604   : > { %3592 = vmatprep.subr.bf16.mxu0 %v4121_v12  ;;  %4088 = vrcp.f32 %v2067_v55 }
 0x607   : > { %v2396_v23 = vpop.permute.xlu1 %2395 }
 0x60a   : > { %3582 = vmatmul.mubr.msk.bf16.vlgmr.msra.gmra.mrb[40].mxu0 %vm440_vm3, %v1911_v42 }
 0x60b   : > { %3593 = vmatpush3.bf16.msra.mxu0 %v4670_v44  ;;  %3594 = vmatprep.mubr.msk.bf16.mxu0 %vm4146_vm4, %v4121_v12 }
 0x60c   : > { %3605 = vmatprep.subr.bf16.mxu0 %v4121_v12 }
 0x60e   : > { %v4089_v46 = vpop.eup %4088 }
 0x60f   : > { %v2071_v44 = vmul.f32 %v4089_v46, %v4688_v36 }
 0x61b   : > { %v2228_v39 = vpop.xlane.xlu1 %2227 }
 0x61f   : > { %v2389_v31 = vpop.xlane.xlu1 %2388 }
 0x623   : > { %v2550_v63 = vpop.xlane.xlu1 %2549 }
 0x627   : > { %v2711_v38 = vpop.xlane.xlu1 %2710 }
 0x628   : > { %v2064_v30 = vpop.xlane.xlu0 %2063 }
 0x629   : > { %4090 = vrcp.f32 %v2064_v30 }
 0x62b   : > { %v2872_v29 = vpop.xlane.xlu1 %2871 }
 0x62c   : > { %v2225_v33 = vpop.xlane.xlu0 %2224 }
 0x62d   : > { %4092 = vrcp.f32 %v2225_v33 }
 0x62e   : > { %4094 = vrcp.f32 %v2228_v39 }
 0x62f   : > { %v2718_v50 = vpop.permute.xlu1 %2717 }
 0x630   : > { %v2386_v25 = vpop.xlane.xlu0 %2385 }
 0x631   : > { %4096 = vrcp.f32 %v2386_v25 }
 0x632   : > { %4098 = vrcp.f32 %v2389_v31 }
 0x633   : > { %v4091_v61 = vpop.eup %4090  ;;  %v2879_v26 = vpop.permute.xlu1 %2878 }
 0x634   : > { %v2070_v43 = vmul.f32 %v4091_v61, %v4730_v22  ;;  %v2547_v19 = vpop.xlane.xlu0 %2546 }
 0x635   : > { %4100 = vrcp.f32 %v2547_v19 }
 0x636   : > { %v2072_v56 = vpack.c.bf16 %v2071_v44, %v2070_v43  ;;  %4102 = vrcp.f32 %v2550_v63 }
 0x637   : > { %v4093_v58 = vpop.eup %4092 }
 0x638   : > { %3595 = vmatmul.mubr.msk.bf16.vlgmr.msra.gmra.mrb[44].mxu0 %vm440_vm3, %v2072_v56  ;;  %v4095_v28 = vpop.eup %4094  ;;  %v2231_v15 = vmul.f32 %v4093_v58, %v4740_v3  ;;  %v2708_v22 = vpop.xlane.xlu0 %2707 }
 0x639   : > { %3606 = vmatpush3.bf16.msra.mxu0 %v2235_v6  ;;  %3607 = vmatprep.mubr.msk.bf16.mxu0 %vm4146_vm4, %v4121_v12  ;;  %v2232_v36 = vmul.f32 %v4095_v28, %v4711_v40  ;;  %4104 = vrcp.f32 %v2708_v22 }
 0x63a   : > { %3618 = vmatprep.subr.bf16.mxu0 %v4121_v12  ;;  %4106 = vrcp.f32 %v2711_v38 }
 0x63b   : > { %v2233_v8 = vpack.c.bf16 %v2232_v36, %v2231_v15  ;;  %v4097_v34 = vpop.eup %4096 }
 0x63c   : > { %v4099_v47 = vpop.eup %4098  ;;  %v2392_v17 = vmul.f32 %v4097_v34, %v4750_v60  ;;  %v2869_v3 = vpop.xlane.xlu0 %2868 }
 0x63d   : > { %v2393_v40 = vmul.f32 %v4099_v47, %v4716_v4  ;;  %4108 = vrcp.f32 %v2869_v3 }
 0x63e   : > { %4110 = vrcp.f32 %v2872_v29 }
 0x63f   : > { %v2394_v41 = vpack.c.bf16 %v2393_v40, %v2392_v17  ;;  %v4101_v59 = vpop.eup %4100 }
 0x640   : > { %3608 = vmatmul.mubr.msk.bf16.vlgmr.msra.gmra.mrb[48].mxu0 %vm440_vm3, %v2233_v8  ;;  %v2557_v18 = vpop.permute.xlu0 %2556  ;;  %v4103_v21 = vpop.eup %4102  ;;  %v2553_v60 = vmul.f32 %v4101_v59, %v4756_v49 }
 0x641   : > { %3619 = vmatpush3.bf16.msra.mxu0 %v2396_v23  ;;  %3620 = vmatprep.mubr.msk.bf16.mxu0 %vm4146_vm4, %v4121_v12  ;;  %v2554_v4 = vmul.f32 %v4103_v21, %v4718_v53 }
 0x642   : > { %3631 = vmatprep.subr.bf16.mxu0 %v4121_v12 }
 0x643   : > { %v2555_v62 = vpack.c.bf16 %v2554_v4, %v2553_v60  ;;  %v4105_v20 = vpop.eup %4104 }
 0x644   : > { %v4107_v1 = vpop.eup %4106  ;;  %v2714_v45 = vmul.f32 %v4105_v20, %v4764_v24 }
 0x645   : > { %v2715_v49 = vmul.f32 %v4107_v1, %v4727_v52 }
 0x647   : > { %v2716_v7 = vpack.c.bf16 %v2715_v49, %v2714_v45  ;;  %v4109_v53 = vpop.eup %4108 }
 0x648   : > { %3621 = vmatmul.mubr.msk.bf16.vlgmr.msra.gmra.mrb[52].mxu0 %vm440_vm3, %v2394_v41  ;;  %v4111_v37 = vpop.eup %4110  ;;  %v2875_v51 = vmul.f32 %v4109_v53, %v4769_v0 }
 0x649   : > { %3632 = vmatpush3.bf16.msra.mxu0 %v2557_v18  ;;  %3633 = vmatprep.mubr.msk.bf16.mxu0 %vm4146_vm4, %v4121_v12  ;;  %v2876_v11 = vmul.f32 %v4111_v37, %v4735_v2 }
 0x64a   : > { %3644 = vmatprep.subr.bf16.mxu0 %v4121_v12 }
 0x64b   : > { %v2877_v13 = vpack.c.bf16 %v2876_v11, %v2875_v51  ;;  %v3980_v51 = vld [vmem:[%s4938_s3] sm:$0xff]  }
 0x64c   : > { %3664 = vmatpush3.bf16.msra.mxu1 %v3980_v51 }
 0x64d   : > { %3665 = vmatprep.subr.bf16.mxu1 %v4121_v12 }
 0x650   : > { %3634 = vmatmul.mubr.msk.bf16.vlgmr.msra.gmra.mrb[56].mxu0 %vm440_vm3, %v2555_v62 }
 0x651   : > { %3645 = vmatpush3.bf16.msra.mxu0 %v2718_v50  ;;  %3646 = vmatprep.mubr.msk.bf16.mxu0 %vm4146_vm4, %v4121_v12 }
 0x652   : > { %3657 = vmatprep.subr.bf16.mxu0 %v4121_v12 }
 0x658   : > { %3647 = vmatmul.mubr.msk.bf16.vlgmr.msra.gmra.mrb[60].mxu0 %vm440_vm3, %v2716_v7 }
 0x659   : > { %3658 = vmatpush3.bf16.msra.mxu0 %v2879_v26  ;;  %3659 = vmatprep.mubr.msk.bf16.mxu0 %vm4146_vm4, %v4121_v12 }
 0x660   : > { %3660 = vmatmul.mubr.msk.bf16.vlgmr.msra.gmra.mrb[64].mxu0 %vm440_vm3, %v2877_v13 }
 0x66d   : > { %v664_v24 = vpop.f32.mrb[8].mxu0 }
 0x66e   : > { %v3479_v9 = vpop.f32.mrb[9].mxu0 }
 0x66f   : > { %v667_v52 = vpop.f32.mrb[10].mxu0 }
 0x670   : > { %v3893_v10 = vpack.i.bf16 %v667_v52, %v664_v24  ;;  %v3480_v35 = vpop.f32.mrb[11].mxu0 }
 0x672   : > { %3894 = vrot.lane.b32.xlu1 %v3893_v10, %s4153_s16  ;;  %v3981_v10 = vld [vmem:[%s4938_s3 + $0x8] sm:$0xff]  }
 0x673   : > { %3666 = vmatpush3.bf16.msra.mxu1 %v3981_v10 }
 0x674   : > { %3667 = vmatprep.subr.bf16.mxu1 %v4121_v12 }
 0x678   : > { %v825_v48 = vpop.f32.mrb[12].mxu0 }
 0x679   : > { %v3492_v5 = vpop.f32.mrb[13].mxu0 }
 0x67a   : > { %v828_v27 = vpop.f32.mrb[14].mxu0  ;;  %v3982_v5 = vld [vmem:[%s4938_s3 + $0x10] sm:$0xff]  }
 0x67b   : > { %v3898_v57 = vpack.i.bf16 %v828_v27, %v825_v48  ;;  %v3493_v32 = vpop.f32.mrb[15].mxu0  ;;  %3668 = vmatpush3.bf16.msra.mxu1 %v3982_v5 }
 0x67c   : > { %3669 = vmatprep.subr.bf16.mxu1 %v4121_v12 }
 0x67d   : > { %3899 = vrot.lane.b32.xlu1 %v3898_v57, %s4140_s10 }
 0x6ad   : > { %v986_v0 = vpop.f32.mrb[16].mxu0 }
 0x6ae   : > { %v3505_v54 = vpop.f32.mrb[17].mxu0 }
 0x6af   : > { %v989_v2 = vpop.f32.mrb[18].mxu0 }
 0x6b0   : > { %v3903_v42 = vpack.i.bf16 %v989_v2, %v986_v0  ;;  %v3506_v55 = vpop.f32.mrb[19].mxu0  ;;  %v3983_v2 = vld [vmem:[%s4938_s3 + $0x18] sm:$0xff]  }
 0x6b1   : > { %3670 = vmatpush3.bf16.msra.mxu1 %v3983_v2 }
 0x6b2   : > { %3904 = vrot.lane.b32.xlu1 %v3903_v42, %s4152_s26 }
 0x6b5   : > { %v1147_v6 = vpop.f32.mrb[20].mxu0 }
 0x6b6   : > { %v3518_v23 = vpop.f32.mrb[21].mxu0 }
 0x6b7   : > { %v1150_v30 = vpop.f32.mrb[22].mxu0 }
 0x6b8   : > { %v3908_v39 = vpack.i.bf16 %v1150_v30, %v1147_v6  ;;  %v3519_v33 = vpop.f32.mrb[23].mxu0 }
 0x6ba   : > { %3909 = vrot.lane.b32.xlu0 %v3908_v39, %s4137_s7 }
 0x6bd   : > { %v1308_v25 = vpop.f32.mrb[24].mxu0 }
 0x6be   : > { %v3531_v46 = vpop.f32.mrb[25].mxu0 }
 0x6bf   : > { %v1311_v61 = vpop.f32.mrb[26].mxu0 }
 0x6c0   : > { %v3913_v44 = vpack.i.bf16 %v1311_v61, %v1308_v25  ;;  %v3532_v31 = vpop.f32.mrb[27].mxu0 }
 0x6c2   : > { %3914 = vrot.lane.b32.xlu1 %v3913_v44, %s4151_s23 }
 0x6c5   : > { %v1469_v43 = vpop.f32.mrb[28].mxu0 }
 0x6c6   : > { %v3544_v19 = vpop.f32.mrb[29].mxu0 }
 0x6c7   : > { %v1472_v56 = vpop.f32.mrb[30].mxu0 }
 0x6c8   : > { %v3918_v58 = vpack.i.bf16 %v1472_v56, %v1469_v43  ;;  %v3545_v28 = vpop.f32.mrb[31].mxu0 }
 0x6ca   : > { %3919 = vrot.lane.b32.xlu0 %v3918_v58, %s4134_s28 }
 0x6cd   : > { %v1630_v15 = vpop.f32.mrb[32].mxu0 }
 0x6ce   : > { %v3557_v36 = vpop.f32.mrb[33].mxu0 }
 0x6cf   : > { %v1633_v63 = vpop.f32.mrb[34].mxu0 }
 0x6d0   : > { %v3923_v22 = vpack.i.bf16 %v1633_v63, %v1630_v15  ;;  %v3558_v8 = vpop.f32.mrb[35].mxu0 }
 0x6d2   : > { %3924 = vrot.lane.b32.xlu1 %v3923_v22, %s4150_s15  ;;  %s244_s15 = scalar_lea.vmem %s4940_s5, %s4207_s30 }
 0x6d5   : > { %v1791_v34 = vpop.f32.mrb[36].mxu0 }
 0x6d6   : > { %v3570_v47 = vpop.f32.mrb[37].mxu0 }
 0x6d7   : > { %v1794_v17 = vpop.f32.mrb[38].mxu0 }
 0x6d8   : > { %v3928_v3 = vpack.i.bf16 %v1794_v17, %v1791_v34  ;;  %v3571_v40 = vpop.f32.mrb[39].mxu0 }
 0x6da   : > { %3929 = vrot.lane.b32.xlu0 %v3928_v3, %s4131_s25  ;;  %s4948_s25 = smov 52  }
 0x6dd   : > { %v1952_v38 = vpop.f32.mrb[40].mxu0 }
 0x6de   : > { %v3583_v41 = vpop.f32.mrb[41].mxu0 }
 0x6df   : > { %v1955_v59 = vpop.f32.mrb[42].mxu0 }
 0x6e0   : > { %v3933_v18 = vpack.i.bf16 %v1955_v59, %v1952_v38  ;;  %v3584_v21 = vpop.f32.mrb[43].mxu0 }
 0x6e2   : > { %3934 = vrot.lane.b32.xlu1 %v3933_v18, %s4149_s14 }
 0x6e4   : > { %v3895_v39 = vpop.permute.xlu1 %3894 }
 0x6e5   : > { %v3896_v31 = vunpack.i.l.bf16 %v3895_v39  ;;  %v3897_v19 = vunpack.i.h.bf16 %v3895_v39 }
 0x6e7   : > { %v3045_v15 = vsel %vm354_vm1, %v4459_v14, %v3896_v31  ;;  %v3046_v8 = vsel %vm354_vm1, %v4461_v16, %v3897_v19  ;;  %vm3082_vm1 = vcmask 457728  }
 0x6ef   : > { %v3900_v33 = vpop.permute.xlu1 %3899 }
 0x6f0   : > { %v3901_v56 = vunpack.i.l.bf16 %v3900_v33  ;;  %v3902_v58 = vunpack.i.h.bf16 %v3900_v33 }
 0x6f2   : > { %v3048_v34 = vsel %vm3047_vm5, %v3045_v15, %v3901_v56  ;;  %v3049_v3 = vsel %vm3047_vm5, %v3046_v8, %v3902_v58  ;;  %v248_v15 = vld [vmem:[%s239_s9] sm:$0xff]  ;;  %v249_v8 = vld [vmem:[%s239_s9 + $0x8] sm:$0xff] }
 0x70b   : > { %v2113_v29 = vpop.f32.mrb[44].mxu0 }
 0x70c   : > { %v3596_v60 = vpop.f32.mrb[45].mxu0 }
 0x70d   : > { %v2116_v4 = vpop.f32.mrb[46].mxu0 }
 0x70e   : > { %v3938_v62 = vpack.i.bf16 %v2116_v4, %v2113_v29  ;;  %v3597_v20 = vpop.f32.mrb[47].mxu0 }
 0x710   : > { %3939 = vrot.lane.b32.xlu0 %v3938_v62, %s4128_s22 }
 0x713   : > { %v2274_v50 = vpop.f32.mrb[48].mxu0 }
 0x714   : > { %v3609_v1 = vpop.f32.mrb[49].mxu0 }
 0x715   : > { %v2277_v45 = vpop.f32.mrb[50].mxu0 }
 0x716   : > { %v3943_v49 = vpack.i.bf16 %v2277_v45, %v2274_v50  ;;  %v3610_v7 = vpop.f32.mrb[51].mxu0 }
 0x718   : > { %3944 = vrot.lane.b32.xlu1 %v3943_v49, %s4148_s17 }
 0x71b   : > { %v2435_v53 = vpop.f32.mrb[52].mxu0 }
 0x71c   : > { %v3622_v26 = vpop.f32.mrb[53].mxu0 }
 0x71d   : > { %v2438_v37 = vpop.f32.mrb[54].mxu0 }
 0x71e   : > { %v3948_v11 = vpack.i.bf16 %v2438_v37, %v2435_v53  ;;  %v3623_v13 = vpop.f32.mrb[55].mxu0 }
 0x720   : > { %3949 = vrot.lane.b32.xlu0 %v3948_v11, %s4947_s20 }
 0x723   : > { %v2596_v24 = vpop.f32.mrb[56].mxu0 }
 0x724   : > { %v3635_v9 = vpop.f32.mrb[57].mxu0  ;;  %v3905_v12 = vpop.permute.xlu1 %3904 }
 0x725   : > { %v2599_v52 = vpop.f32.mrb[58].mxu0  ;;  %v3907_v36 = vunpack.i.h.bf16 %v3905_v12  ;;  %v3906_v63 = vunpack.i.l.bf16 %v3905_v12 }
 0x726   : > { %v3953_v35 = vpack.i.bf16 %v2599_v52, %v2596_v24  ;;  %v3636_v48 = vpop.f32.mrb[59].mxu0 }
 0x727   : > { %v3051_v14 = vsel %vm3050_vm6, %v3048_v34, %v3906_v63  ;;  %v3052_v21 = vsel %vm3050_vm6, %v3049_v3, %v3907_v36 }
 0x728   : > { %3954 = vrot.lane.b32.xlu1 %v3953_v35, %s4948_s25 }
 0x72b   : > { %v2757_v27 = vpop.f32.mrb[60].mxu0 }
 0x72c   : > { %v3648_v57 = vpop.f32.mrb[61].mxu0  ;;  %v3910_v25 = vpop.permute.xlu0 %3909 }
 0x72d   : > { %v2760_v32 = vpop.f32.mrb[62].mxu0  ;;  %v3912_v47 = vunpack.i.h.bf16 %v3910_v25  ;;  %v3911_v17 = vunpack.i.l.bf16 %v3910_v25 }
 0x72e   : > { %v3958_v0 = vpack.i.bf16 %v2760_v32, %v2757_v27  ;;  %v3649_v54 = vpop.f32.mrb[63].mxu0 }
 0x72f   : > { %v3053_v4 = vsel %vm440_vm3, %v3051_v14, %v3911_v17  ;;  %v3054_v62 = vsel %vm440_vm3, %v3052_v21, %v3912_v47 }
 0x730   : > { %3959 = vrot.lane.b32.xlu0 %v3958_v0, %s4949_s29 }
 0x733   : > { %v2918_v42 = vpop.f32.mrb[64].mxu0 }
 0x734   : > { %v3661_v55 = vpop.f32.mrb[65].mxu0  ;;  %v3915_v46 = vpop.permute.xlu1 %3914 }
 0x735   : > { %v2921_v6 = vpop.f32.mrb[66].mxu0  ;;  %v3917_v40 = vunpack.i.h.bf16 %v3915_v46  ;;  %v3916_v38 = vunpack.i.l.bf16 %v3915_v46 }
 0x736   : > { %v3963_v23 = vpack.i.bf16 %v2921_v6, %v2918_v42  ;;  %v3662_v30 = vpop.f32.mrb[67].mxu0 }
 0x737   : > { %v3056_v1 = vsel %vm3055_vm7, %v3053_v4, %v3916_v38  ;;  %v3057_v45 = vsel %vm3055_vm7, %v3054_v62, %v3917_v40 }
 0x738   : > { %3964 = vrot.lane.b32.xlu1 %v3963_v23, %s4950_s6 }
 0x73c   : > { %v3920_v61 = vpop.permute.xlu0 %3919 }
 0x73d   : > { %v3922_v41 = vunpack.i.h.bf16 %v3920_v61  ;;  %v3921_v59 = vunpack.i.l.bf16 %v3920_v61 }
 0x73f   : > { %v3059_v53 = vsel %vm3058_vm8, %v3056_v1, %v3921_v59  ;;  %v3060_v26 = vsel %vm3058_vm8, %v3057_v45, %v3922_v41 }
 0x744   : > { %v3925_v44 = vpop.permute.xlu1 %3924 }
 0x745   : > { %v3927_v29 = vunpack.i.h.bf16 %v3925_v44  ;;  %v3926_v16 = vunpack.i.l.bf16 %v3925_v44 }
 0x747   : > { %v3062_v13 = vsel %vm3061_vm9, %v3059_v53, %v3926_v16  ;;  %v3063_v24 = vsel %vm3061_vm9, %v3060_v26, %v3927_v29 }
 0x74c   : > { %v3930_v43 = vpop.permute.xlu0 %3929 }
 0x74d   : > { %v3932_v20 = vunpack.i.h.bf16 %v3930_v43  ;;  %v3931_v50 = vunpack.i.l.bf16 %v3930_v43 }
 0x74f   : > { %v3065_v35 = vsel %vm3064_vm10, %v3062_v13, %v3931_v50  ;;  %v3066_v48 = vsel %vm3064_vm10, %v3063_v24, %v3932_v20 }
 0x754   : > { %v3935_v28 = vpop.permute.xlu1 %3934 }
 0x755   : > { %v3937_v49 = vunpack.i.h.bf16 %v3935_v28  ;;  %v3936_v7 = vunpack.i.l.bf16 %v3935_v28  ;;  %v3343_v28 = vld [vmem:[%s4939_s4] ss:$0 sm:$0xff] }
 0x757   : > { %v3068_v57 = vsel %vm3067_vm11, %v3065_v35, %v3936_v7  ;;  %v3069_v32 = vsel %vm3067_vm11, %v3066_v48, %v3937_v49 }
 0x782   : > { %v3940_v22 = vpop.permute.xlu0 %3939 }
 0x783   : > { %v3942_v37 = vunpack.i.h.bf16 %v3940_v22  ;;  %v3941_v51 = vunpack.i.l.bf16 %v3940_v22 }
 0x785   : > { %v3071_v2 = vsel %vm3070_vm12, %v3068_v57, %v3941_v51  ;;  %v3072_v42 = vsel %vm3070_vm12, %v3069_v32, %v3942_v37 }
 0x78a   : > { %v3945_v18 = vpop.permute.xlu1 %3944 }
 0x78b   : > { %v3947_v9 = vunpack.i.h.bf16 %v3945_v18  ;;  %v3946_v52 = vunpack.i.l.bf16 %v3945_v18 }
 0x78d   : > { %v3074_v23 = vsel %vm3073_vm13, %v3071_v2, %v3946_v52  ;;  %v3075_v30 = vsel %vm3073_vm13, %v3072_v42, %v3947_v9 }
 0x792   : > { %v3950_v60 = vpop.permute.xlu0 %3949 }
 0x793   : > { %v3952_v5 = vunpack.i.h.bf16 %v3950_v60  ;;  %v3951_v27 = vunpack.i.l.bf16 %v3950_v60 }
 0x795   : > { %v3077_v39 = vsel %vm3076_vm14, %v3074_v23, %v3951_v27  ;;  %v3078_v33 = vsel %vm3076_vm14, %v3075_v30, %v3952_v5 }
 0x79a   : > { %v3955_v11 = vpop.permute.xlu1 %3954 }
 0x79b   : > { %v3957_v0 = vunpack.i.h.bf16 %v3955_v11  ;;  %v3956_v54 = vunpack.i.l.bf16 %v3955_v11 }
 0x79d   : > { %v3080_v25 = vsel %vm3079_vm15, %v3077_v39, %v3956_v54  ;;  %v3081_v46 = vsel %vm3079_vm15, %v3078_v33, %v3957_v0 }
 0x7a2   : > { %v3960_v10 = vpop.permute.xlu0 %3959 }
 0x7a3   : > { %v3962_v55 = vunpack.i.h.bf16 %v3960_v10  ;;  %v3961_v6 = vunpack.i.l.bf16 %v3960_v10 }
 0x7a5   : > { %v3083_v31 = vsel %vm3082_vm1, %v3080_v25, %v3961_v6  ;;  %v3084_v43 = vsel %vm3082_vm1, %v3081_v46, %v3962_v55 }
 0x7aa   : > { %v3965_v12 = vpop.permute.xlu1 %3964 }
 0x7ab   : > { %v3967_v61 = vunpack.i.h.bf16 %v3965_v12  ;;  %v3966_v44 = vunpack.i.l.bf16 %v3965_v12 }
 0x7ad   : > { %v3086_v19 = vsel %vm3085_vm2, %v3083_v31, %v3966_v44  ;;  %v3087_v56 = vsel %vm3085_vm2, %v3084_v43, %v3967_v61 }
 0x7ae   : > { %v3088_v58 = vpack.c.bf16 %v3087_v56, %v3086_v19 }
 0x7b0   : > { %3672 = vmatmul.mubr.msk.bf16.vlgmr.msra.gmra.mrb[36].mxu1 %vm299_vm0, %v3088_v58 }
 0x883   : > { %v3165_v36 = vpop.f32.mrb[36].mxu1 }
 0x884   : > { %v3166_v63 = vadd.f32 %v3343_v28, %v3165_v36  ;;  %v3673_v22 = vpop.f32.mrb[37].mxu1 }
 0x885   : > { %v3168_v34 = vpop.f32.mrb[38].mxu1 }
 0x886   : > { %v3172_v47 = vadd.f32 %v3166_v63, %v248_v15  ;;  %v3169_v17 = vadd.f32 %v3343_v28, %v3168_v34  ;;  %v3674_v3 = vpop.f32.mrb[39].mxu1 }
 0x888   : > { %3174 = vst.msk [vmem:[%s244_s15] sm:$0xff] %vm299_vm0, %v3172_v47  ;;  %v3173_v40 = vadd.f32 %v3169_v17, %v249_v8 }
 0x88a   : > { %3175 = vst.msk [vmem:[%s244_s15 + $0x8] sm:$0xff] %vm299_vm0, %v3173_v40 }
 0x88b PF: > { %s15_s18 = sadd.s32 1, %s4118_s18  }
 0x88c   : > { %p12_p4 = scmp.ge.s32.totalorder %s15_s18, 4  }
 0x88e   :  { %14 = sbr.rel (!%p12_p4) target bundleno = 1 (0x1), region = 73 }

</bundles_post_ra>
